<compile_context>
chip_gen: v7x
topology: tpu7x:2x2x1
jax: 0.10.0
libtpu: 0.0.40
codegen_flags: <defaults>
</compile_context>

<pallas_src>
import numpy as np
import jax
import jax.numpy as jnp
from jax import lax
from jax.experimental import pallas as pl
from jax.experimental.pallas import tpu as pltpu

BN_EPS = 1e-5        # PyTorch BatchNorm1d default eps
NEG_SLOPE = 0.01     # PyTorch LeakyReLU default negative_slope
K = 3                # all convs are kernel_size=3
PHASES = 8           # 2**3 : three stride-2 stages


# ----------------------------------------------------------------------------
# Fused whole-network kernel
# ----------------------------------------------------------------------------
def _g_net_kernel(xin_ref, first_ref, last_ref,
                  we0, ge0, be0, we1, ge1, be1, we2, ge2, be2,
                  wm, gm, bm,
                  wd0, gd0, bd0, wd1, gd1, bd1, wd2, bias_ref,
                  out_ref, asm, sbuf):
    """All activations are kept as lists of phase slabs (R, C) in VMEM, where
    R = B * L/8 is constant through the whole network.  Each conv/deconv level
    is a handful of single MXU matmuls; no selection matmuls, no gathers."""
    R = out_ref.shape[1]
    first_ok = first_ref[...] > 0.5      # (R,1) False on the first row of a batch
    last_ok = last_ref[...] > 0.5        # (R,1) False on the last row of a batch

    # ---- +/-1 row shift within each batch, zero at batch boundaries --------
    # (aligned store + unaligned load through a small VMEM scratch; the stale
    #  row read at the edge is always masked out by first_ok / last_ok)
    def shift_down(v):                   # out[r] = v[r-1]
        c = v.shape[1]
        sbuf[8:8 + R, 0:c] = v
        return jnp.where(first_ok, sbuf[7:7 + R, 0:c], 0.0)

    def shift_up(v):                     # out[r] = v[r+1]
        c = v.shape[1]
        sbuf[0:R, 0:c] = v
        return jnp.where(last_ok, sbuf[1:1 + R, 0:c], 0.0)

    # ---- concat pieces on the lane axis (via scratch), cast to bf16 once,
    #      run ONE MXU matmul --------------------------------------------------
    def matmul(pieces, w_ref):
        off = 0
        for p in pieces:
            c = p.shape[1]
            asm[0:R, off:off + c] = p
            off += c
        lhs = asm[0:R, 0:off].astype(jnp.bfloat16)
        return jnp.dot(lhs, w_ref[...], preferred_element_type=jnp.float32)

    # ---- training-mode BatchNorm1d folded to a single affine + LeakyReLU ----
    def bn_lrelu(ph, g_ref, b_ref):
        inv_n = 1.0 / float(len(ph) * R)
        s1 = sum(jnp.sum(p, axis=0, keepdims=True) for p in ph)
        s2 = sum(jnp.sum(p * p, axis=0, keepdims=True) for p in ph)
        mean = s1 * inv_n
        var = jnp.maximum(s2 * inv_n - mean * mean, 0.0)
        a = g_ref[...] * lax.rsqrt(var + BN_EPS)
        b = b_ref[...] - mean * a
        outs = []
        for p in ph:
            v = p * a + b
            outs.append(jnp.where(v >= 0.0, v, NEG_SLOPE * v))
        return outs

    # ---- Conv1d(k=3, s=2, p=1) on phase slabs:
    #      out phase k = [u_{2k-1} | u_{2k} | u_{2k+1}] @ [W0; W1; W2] --------
    def conv_level(ph_in, w_ref):
        m = len(ph_in)
        outs = []
        for k in range(m // 2):
            prev = shift_down(ph_in[-1]) if k == 0 else ph_in[2 * k - 1]
            outs.append(matmul([prev, ph_in[2 * k], ph_in[2 * k + 1]], w_ref))
        return outs

    # ---- ConvTranspose1d(k=3, s=2, p=1, op=1) on phase slabs:
    #      [phi_j | phi_{j+1}] @ [[V1, V2], [0, V0]] = [psi_{2j} | psi_{2j+1}]
    def deconv_level(ph_in, w_ref):
        m = len(ph_in)
        outs = []
        for j in range(m):
            nxt = ph_in[j + 1] if j + 1 < m else shift_up(ph_in[0])
            y = matmul([ph_in[j], nxt], w_ref)
            half = y.shape[1] // 2
            outs.append(y[:, :half])
            outs.append(y[:, half:])
        return outs

    # ---------------- fused dual encoder (x | y on the lane axis) ------------
    ph = [xin_ref[j] for j in range(PHASES)]               # 8 x (R, 2*indim)
    ph = bn_lrelu(conv_level(ph, we0), ge0, be0)           # 4 x (R, 128)
    ph = bn_lrelu(conv_level(ph, we1), ge1, be1)           # 2 x (R, 64)
    ph = bn_lrelu(conv_level(ph, we2), ge2, be2)           # 1 x (R, 32)

    # bottleneck: z = (encoder_1(x) + encoder_2(y)) / 2  (the two lane halves)
    zf = ph[0]
    h = zf.shape[1] // 2
    z = (zf[:, :h] + zf[:, h:]) * 0.5                      # (R, 16)

    # ---------------- mid conv (k=3, s=1, p=1) -------------------------------
    ph = bn_lrelu([matmul([shift_down(z), z, shift_up(z)], wm)], gm, bm)

    # ---------------- decoder ------------------------------------------------
    ph = bn_lrelu(deconv_level(ph, wd0), gd0, bd0)         # 2 x (R, 32)
    ph = bn_lrelu(deconv_level(ph, wd1), gd1, bd1)         # 4 x (R, 64)
    ph = deconv_level(ph, wd2)                             # 8 x (R, 128)

    bias = bias_ref[...]
    for j in range(PHASES):
        out_ref[j] = ph[j] + bias


# ----------------------------------------------------------------------------
# Parameters: PyTorch-convention init + one-time re-layout for the kernel
# ----------------------------------------------------------------------------
def init_params(key, indim=128, scale=0.05):
    """Deterministic synthetic parameters in PyTorch layout."""
    def conv_p(k_, cout, cin):
        k1, k2 = jax.random.split(k_)
        W = jax.random.normal(k1, (cout, cin, K), jnp.float32) * scale
        b = jax.random.normal(k2, (cout,), jnp.float32) * scale
        return W, b, jnp.ones((cout,), jnp.float32), jnp.zeros((cout,), jnp.float32)

    def deconv_p(k_, cin, cout):
        k1, k2 = jax.random.split(k_)
        W = jax.random.normal(k1, (cin, cout, K), jnp.float32) * scale  # (Cin,Cout,K)
        b = jax.random.normal(k2, (cout,), jnp.float32) * scale
        return W, b, jnp.ones((cout,), jnp.float32), jnp.zeros((cout,), jnp.float32)

    ks = jax.random.split(key, 10)
    enc1 = [conv_p(ks[0], 64, indim), conv_p(ks[1], 32, 64), conv_p(ks[2], 16, 32)]
    enc2 = [conv_p(ks[3], 64, indim), conv_p(ks[4], 32, 64), conv_p(ks[5], 16, 32)]
    mid = conv_p(ks[6], 16, 16)
    dec = [deconv_p(ks[7], 16, 32), deconv_p(ks[8], 32, 64), deconv_p(ks[9], 64, indim)]
    return dict(enc1=enc1, enc2=enc2, mid=mid, dec=dec)


def pack_params(params):
    """One-time re-layout into what the fused kernel consumes (all bf16 weights,
    taps stacked on the reduction axis, encoders fused block-diagonally).
    Conv biases followed by training-mode BN are dropped (exactly cancelled by
    the batch-mean subtraction); only the final deconv bias is kept."""
    f32 = jnp.float32

    def conv_taps_T(W):                      # (Cout, Cin, K) -> K x (Cin, Cout)
        return [W[:, :, t].T for t in range(K)]

    def fused_conv_w(Wa, Wb):                # two encoders, block-diagonal per tap
        Cout, Cin, _ = Wa.shape
        Z = jnp.zeros((Cin, Cout), f32)
        blocks = []
        for At, Bt in zip(conv_taps_T(Wa), conv_taps_T(Wb)):
            top = jnp.concatenate([At, Z], axis=1)
            bot = jnp.concatenate([Z, Bt], axis=1)
            blocks.append(jnp.concatenate([top, bot], axis=0))     # (2Cin, 2Cout)
        return jnp.concatenate(blocks, axis=0).astype(jnp.bfloat16)  # (6Cin, 2Cout)

    def conv_w(W):                            # mid conv: (3Cin, Cout)
        return jnp.concatenate(conv_taps_T(W), axis=0).astype(jnp.bfloat16)

    def deconv_w(W):                          # (Cin, Cout, K) -> [[V1,V2],[0,V0]]
        V0, V1, V2 = W[:, :, 0], W[:, :, 1], W[:, :, 2]
        Z = jnp.zeros_like(V0)
        top = jnp.concatenate([V1, V2], axis=1)
        bot = jnp.concatenate([Z, V0], axis=1)
        return jnp.concatenate([top, bot], axis=0).astype(jnp.bfloat16)  # (2Cin,2Cout)

    def vec(v):
        return v.reshape(1, -1).astype(f32)

    flat = []
    for lvl in range(3):
        W1, _, g1, b1 = params["enc1"][lvl]
        W2, _, g2, b2 = params["enc2"][lvl]
        flat += [fused_conv_w(W1, W2),
                 vec(jnp.concatenate([g1, g2])),
                 vec(jnp.concatenate([b1, b2]))]
    Wm, _, gm, bm = params["mid"]
    flat += [conv_w(Wm), vec(gm), vec(bm)]
    for lvl in range(3):
        W, b, g, be = params["dec"][lvl]
        if lvl < 2:
            flat += [deconv_w(W), vec(g), vec(be)]
        else:
            flat += [deconv_w(W), vec(b)]
    return tuple(flat)


# ----------------------------------------------------------------------------
# Forward: single pallas_call for the whole network
# ----------------------------------------------------------------------------
def g_net_forward(packed, x, y):
    """x, y: (B, indim, L) NCW with L divisible by 8 -> (B, indim, L)."""
    B, C, L = x.shape
    assert x.shape == y.shape
    assert L % PHASES == 0, "spatial length must be divisible by 8 (3 stride-2 stages)"
    L3 = L // PHASES
    R = B * L3

    # one-time NCW -> 8 phase-decomposed channel-last slabs; x|y fused on lanes
    def to_phases(v):
        v = jnp.transpose(v, (0, 2, 1)).reshape(B, L3, PHASES, C)
        return jnp.transpose(v, (2, 0, 1, 3)).reshape(PHASES, R, C)

    xin = jnp.concatenate([to_phases(x), to_phases(y)], axis=-1)    # (8, R, 2C) f32

    # batch-boundary validity masks for the +/-1 row shifts (compile-time)
    m = np.arange(R) % L3
    first_ok = jnp.asarray((m != 0).astype(np.float32).reshape(R, 1))
    last_ok = jnp.asarray((m != L3 - 1).astype(np.float32).reshape(R, 1))

    args = (xin, first_ok, last_ok) + tuple(packed)

    # cost hint: one MXU matmul per output phase per level
    n_mm = (4, 2, 1, 1, 1, 2, 4)
    w_mats = [a for a in packed if a.dtype == jnp.bfloat16]
    flops = int(2 * R * sum(n * int(w.shape[0]) * int(w.shape[1])
                            for n, w in zip(n_mm, w_mats)))
    transcendentals = 128 + 64 + 32 + 16 + 32 + 64                  # BN rsqrt lanes
    bytes_accessed = int(sum(int(a.size) * a.dtype.itemsize for a in args)
                         + PHASES * R * C * 4)

    vmem_spec = pl.BlockSpec(memory_space=pltpu.MemorySpace.VMEM)
    asm_lanes = max(3 * 2 * C, 128)        # widest matmul LHS (encoder level 0)
    shift_lanes = max(2 * C, 128)          # widest shifted slab (fused input phase)

    out = pl.pallas_call(
        _g_net_kernel,
        out_shape=jax.ShapeDtypeStruct((PHASES, R, C), jnp.float32),
        in_specs=[vmem_spec] * len(args),
        out_specs=vmem_spec,
        scratch_shapes=[
            pltpu.VMEM((R + 8, asm_lanes), jnp.float32),    # lane-assembly buffer
            pltpu.VMEM((R + 8, shift_lanes), jnp.float32),  # row-shift buffer
        ],
        compiler_params=pltpu.CompilerParams(vmem_limit_bytes=64 * 1024 * 1024),
        cost_estimate=pl.CostEstimate(flops=flops, transcendentals=transcendentals,
                                      bytes_accessed=bytes_accessed),
    )(*args)

    # phase slabs -> NCW once at the output boundary
    o = out.reshape(PHASES, B, L3, C).transpose(1, 2, 0, 3).reshape(B, L, C)
    return jnp.transpose(o, (0, 2, 1))


if __name__ == "__main__":
    INDIM = 128    # module default
    B, L = 4, 128  # bottleneck rows = B*L/8 = 64 (keeps vregs / MXU passes filled)

    key = jax.random.PRNGKey(0)
    kp, kx, ky = jax.random.split(key, 3)
    params = init_params(kp, indim=INDIM)
    packed = pack_params(params)
    x = jax.random.normal(kx, (B, INDIM, L), jnp.float32)
    y = jax.random.normal(ky, (B, INDIM, L), jnp.float32)

    fwd = jax.jit(g_net_forward)
    out = jax.block_until_ready(fwd(packed, x, y))
    assert out.shape == (B, INDIM, L), out.shape
    assert bool(jnp.all(jnp.isfinite(out)))
    print("KERNEL_OK")
</pallas_src>

<mosaic_0001>
module attributes {stable_mosaic.version = 11 : i64} {
  func.func @_g_net_kernel(%arg0: memref<8x64x256xf32, #tpu.memory_space<vmem>>, %arg1: memref<64x1xf32, #tpu.memory_space<vmem>>, %arg2: memref<64x1xf32, #tpu.memory_space<vmem>>, %arg3: memref<768x128xbf16, #tpu.memory_space<vmem>>, %arg4: memref<1x128xf32, #tpu.memory_space<vmem>>, %arg5: memref<1x128xf32, #tpu.memory_space<vmem>>, %arg6: memref<384x64xbf16, #tpu.memory_space<vmem>>, %arg7: memref<1x64xf32, #tpu.memory_space<vmem>>, %arg8: memref<1x64xf32, #tpu.memory_space<vmem>>, %arg9: memref<192x32xbf16, #tpu.memory_space<vmem>>, %arg10: memref<1x32xf32, #tpu.memory_space<vmem>>, %arg11: memref<1x32xf32, #tpu.memory_space<vmem>>, %arg12: memref<48x16xbf16, #tpu.memory_space<vmem>>, %arg13: memref<1x16xf32, #tpu.memory_space<vmem>>, %arg14: memref<1x16xf32, #tpu.memory_space<vmem>>, %arg15: memref<32x64xbf16, #tpu.memory_space<vmem>>, %arg16: memref<1x32xf32, #tpu.memory_space<vmem>>, %arg17: memref<1x32xf32, #tpu.memory_space<vmem>>, %arg18: memref<64x128xbf16, #tpu.memory_space<vmem>>, %arg19: memref<1x64xf32, #tpu.memory_space<vmem>>, %arg20: memref<1x64xf32, #tpu.memory_space<vmem>>, %arg21: memref<128x256xbf16, #tpu.memory_space<vmem>>, %arg22: memref<1x128xf32, #tpu.memory_space<vmem>>, %arg23: memref<8x64x128xf32, #tpu.memory_space<vmem>>, %arg24: memref<72x768xf32, #tpu.memory_space<vmem>>, %arg25: memref<72x256xf32, #tpu.memory_space<vmem>>) attributes {dimension_semantics = [], scalar_prefetch = 0 : i64, scratch_operands = 2 : i64, tpu.core_type = #tpu.core_type<tc>} {
    %c0 = arith.constant 0 : index
    %c0_0 = arith.constant 0 : index
    %0 = vector.load %arg1[%c0, %c0_0] : memref<64x1xf32, #tpu.memory_space<vmem>>, vector<64x1xf32>
    %cst = arith.constant 5.000000e-01 : f32
    %1 = vector.broadcast %cst : f32 to vector<64x1xf32>
    %2 = arith.cmpf ogt, %0, %1 : vector<64x1xf32>
    %c0_1 = arith.constant 0 : index
    %c0_2 = arith.constant 0 : index
    %3 = vector.load %arg2[%c0_1, %c0_2] : memref<64x1xf32, #tpu.memory_space<vmem>>, vector<64x1xf32>
    %cst_3 = arith.constant 5.000000e-01 : f32
    %4 = vector.broadcast %cst_3 : f32 to vector<64x1xf32>
    %5 = arith.cmpf ogt, %3, %4 : vector<64x1xf32>
    %c0_4 = arith.constant 0 : index
    %c0_5 = arith.constant 0 : index
    %c0_6 = arith.constant 0 : index
    %6 = vector.load %arg0[%c0_4, %c0_5, %c0_6] : memref<8x64x256xf32, #tpu.memory_space<vmem>>, vector<1x64x256xf32>
    %7 = vector.shape_cast %6 : vector<1x64x256xf32> to vector<64x256xf32>
    %c1 = arith.constant 1 : index
    %c0_7 = arith.constant 0 : index
    %c0_8 = arith.constant 0 : index
    %8 = vector.load %arg0[%c1, %c0_7, %c0_8] : memref<8x64x256xf32, #tpu.memory_space<vmem>>, vector<1x64x256xf32>
    %9 = vector.shape_cast %8 : vector<1x64x256xf32> to vector<64x256xf32>
    %c2 = arith.constant 2 : index
    %c0_9 = arith.constant 0 : index
    %c0_10 = arith.constant 0 : index
    %10 = vector.load %arg0[%c2, %c0_9, %c0_10] : memref<8x64x256xf32, #tpu.memory_space<vmem>>, vector<1x64x256xf32>
    %11 = vector.shape_cast %10 : vector<1x64x256xf32> to vector<64x256xf32>
    %c3 = arith.constant 3 : index
    %c0_11 = arith.constant 0 : index
    %c0_12 = arith.constant 0 : index
    %12 = vector.load %arg0[%c3, %c0_11, %c0_12] : memref<8x64x256xf32, #tpu.memory_space<vmem>>, vector<1x64x256xf32>
    %13 = vector.shape_cast %12 : vector<1x64x256xf32> to vector<64x256xf32>
    %c4 = arith.constant 4 : index
    %c0_13 = arith.constant 0 : index
    %c0_14 = arith.constant 0 : index
    %14 = vector.load %arg0[%c4, %c0_13, %c0_14] : memref<8x64x256xf32, #tpu.memory_space<vmem>>, vector<1x64x256xf32>
    %15 = vector.shape_cast %14 : vector<1x64x256xf32> to vector<64x256xf32>
    %c5 = arith.constant 5 : index
    %c0_15 = arith.constant 0 : index
    %c0_16 = arith.constant 0 : index
    %16 = vector.load %arg0[%c5, %c0_15, %c0_16] : memref<8x64x256xf32, #tpu.memory_space<vmem>>, vector<1x64x256xf32>
    %17 = vector.shape_cast %16 : vector<1x64x256xf32> to vector<64x256xf32>
    %c6 = arith.constant 6 : index
    %c0_17 = arith.constant 0 : index
    %c0_18 = arith.constant 0 : index
    %18 = vector.load %arg0[%c6, %c0_17, %c0_18] : memref<8x64x256xf32, #tpu.memory_space<vmem>>, vector<1x64x256xf32>
    %19 = vector.shape_cast %18 : vector<1x64x256xf32> to vector<64x256xf32>
    %c7 = arith.constant 7 : index
    %c0_19 = arith.constant 0 : index
    %c0_20 = arith.constant 0 : index
    %20 = vector.load %arg0[%c7, %c0_19, %c0_20] : memref<8x64x256xf32, #tpu.memory_space<vmem>>, vector<1x64x256xf32>
    %21 = vector.shape_cast %20 : vector<1x64x256xf32> to vector<64x256xf32>
    %c8 = arith.constant 8 : index
    %c0_21 = arith.constant 0 : index
    %22 = vector.load %arg25[%c8, %c0_21] : memref<72x256xf32, #tpu.memory_space<vmem>>, vector<64x256xf32>
    tpu.vector_store %arg25[%c8, %c0_21], %21 {strides = array<i32>} : memref<72x256xf32, #tpu.memory_space<vmem>>, vector<64x256xf32>,
    %c7_22 = arith.constant 7 : index
    %c0_23 = arith.constant 0 : index
    %23 = vector.load %arg25[%c7_22, %c0_23] : memref<72x256xf32, #tpu.memory_space<vmem>>, vector<64x256xf32>
    %cst_24 = arith.constant 0.000000e+00 : f32
    %24 = vector.shape_cast %2 : vector<64x1xi1> to vector<64x1xi1>
    %25 = vector.broadcast %24 : vector<64x1xi1> to vector<64x256xi1>
    %26 = vector.broadcast %cst_24 : f32 to vector<64x256xf32>
    %27 = arith.select %25, %23, %26 : vector<64x256xi1>, vector<64x256xf32>
    %c0_25 = arith.constant 0 : index
    %c0_26 = arith.constant 0 : index
    %28 = vector.load %arg24[%c0_25, %c0_26] : memref<72x768xf32, #tpu.memory_space<vmem>>, vector<64x256xf32>
    tpu.vector_store %arg24[%c0_25, %c0_26], %27 {strides = array<i32>} : memref<72x768xf32, #tpu.memory_space<vmem>>, vector<64x256xf32>,
    %c0_27 = arith.constant 0 : index
    %c256 = arith.constant 256 : index
    %29 = vector.load %arg24[%c0_27, %c256] : memref<72x768xf32, #tpu.memory_space<vmem>>, vector<64x256xf32>
    tpu.vector_store %arg24[%c0_27, %c256], %7 {strides = array<i32>} : memref<72x768xf32, #tpu.memory_space<vmem>>, vector<64x256xf32>,
    %c0_28 = arith.constant 0 : index
    %c512 = arith.constant 512 : index
    %30 = vector.load %arg24[%c0_28, %c512] : memref<72x768xf32, #tpu.memory_space<vmem>>, vector<64x256xf32>
    tpu.vector_store %arg24[%c0_28, %c512], %9 {strides = array<i32>} : memref<72x768xf32, #tpu.memory_space<vmem>>, vector<64x256xf32>,
    %c0_29 = arith.constant 0 : index
    %c0_30 = arith.constant 0 : index
    %31 = vector.load %arg24[%c0_29, %c0_30] : memref<72x768xf32, #tpu.memory_space<vmem>>, vector<64x768xf32>
    %32 = arith.truncf %31 : vector<64x768xf32> to vector<64x768xbf16>
    %c0_31 = arith.constant 0 : index
    %c0_32 = arith.constant 0 : index
    %33 = vector.load %arg3[%c0_31, %c0_32] : memref<768x128xbf16, #tpu.memory_space<vmem>>, vector<768x128xbf16>
    %cst_33 = arith.constant dense<0.000000e+00> : vector<64x128xf32>
    %34 = tpu.matmul %32, %33, %cst_33 {dimension_numbers = #tpu.dot_dimension_numbers<[1], [0], [0], [1], [0, 0, 1, 1], [], []>} : vector<64x768xbf16>, vector<768x128xbf16>, vector<64x128xf32> -> vector<64x128xf32>
    %c0_34 = arith.constant 0 : index
    %c0_35 = arith.constant 0 : index
    %35 = vector.load %arg24[%c0_34, %c0_35] : memref<72x768xf32, #tpu.memory_space<vmem>>, vector<64x256xf32>
    tpu.vector_store %arg24[%c0_34, %c0_35], %9 {strides = array<i32>} : memref<72x768xf32, #tpu.memory_space<vmem>>, vector<64x256xf32>,
    %c0_36 = arith.constant 0 : index
    %c256_37 = arith.constant 256 : index
    %36 = vector.load %arg24[%c0_36, %c256_37] : memref<72x768xf32, #tpu.memory_space<vmem>>, vector<64x256xf32>
    tpu.vector_store %arg24[%c0_36, %c256_37], %11 {strides = array<i32>} : memref<72x768xf32, #tpu.memory_space<vmem>>, vector<64x256xf32>,
    %c0_38 = arith.constant 0 : index
    %c512_39 = arith.constant 512 : index
    %37 = vector.load %arg24[%c0_38, %c512_39] : memref<72x768xf32, #tpu.memory_space<vmem>>, vector<64x256xf32>
    tpu.vector_store %arg24[%c0_38, %c512_39], %13 {strides = array<i32>} : memref<72x768xf32, #tpu.memory_space<vmem>>, vector<64x256xf32>,
    %c0_40 = arith.constant 0 : index
    %c0_41 = arith.constant 0 : index
    %38 = vector.load %arg24[%c0_40, %c0_41] : memref<72x768xf32, #tpu.memory_space<vmem>>, vector<64x768xf32>
    %39 = arith.truncf %38 : vector<64x768xf32> to vector<64x768xbf16>
    %c0_42 = arith.constant 0 : index
    %c0_43 = arith.constant 0 : index
    %40 = vector.load %arg3[%c0_42, %c0_43] : memref<768x128xbf16, #tpu.memory_space<vmem>>, vector<768x128xbf16>
    %cst_44 = arith.constant dense<0.000000e+00> : vector<64x128xf32>
    %41 = tpu.matmul %39, %40, %cst_44 {dimension_numbers = #tpu.dot_dimension_numbers<[1], [0], [0], [1], [0, 0, 1, 1], [], []>} : vector<64x768xbf16>, vector<768x128xbf16>, vector<64x128xf32> -> vector<64x128xf32>
    %c0_45 = arith.constant 0 : index
    %c0_46 = arith.constant 0 : index
    %42 = vector.load %arg24[%c0_45, %c0_46] : memref<72x768xf32, #tpu.memory_space<vmem>>, vector<64x256xf32>
    tpu.vector_store %arg24[%c0_45, %c0_46], %13 {strides = array<i32>} : memref<72x768xf32, #tpu.memory_space<vmem>>, vector<64x256xf32>,
    %c0_47 = arith.constant 0 : index
    %c256_48 = arith.constant 256 : index
    %43 = vector.load %arg24[%c0_47, %c256_48] : memref<72x768xf32, #tpu.memory_space<vmem>>, vector<64x256xf32>
    tpu.vector_store %arg24[%c0_47, %c256_48], %15 {strides = array<i32>} : memref<72x768xf32, #tpu.memory_space<vmem>>, vector<64x256xf32>,
    %c0_49 = arith.constant 0 : index
    %c512_50 = arith.constant 512 : index
    %44 = vector.load %arg24[%c0_49, %c512_50] : memref<72x768xf32, #tpu.memory_space<vmem>>, vector<64x256xf32>
    tpu.vector_store %arg24[%c0_49, %c512_50], %17 {strides = array<i32>} : memref<72x768xf32, #tpu.memory_space<vmem>>, vector<64x256xf32>,
    %c0_51 = arith.constant 0 : index
    %c0_52 = arith.constant 0 : index
    %45 = vector.load %arg24[%c0_51, %c0_52] : memref<72x768xf32, #tpu.memory_space<vmem>>, vector<64x768xf32>
    %46 = arith.truncf %45 : vector<64x768xf32> to vector<64x768xbf16>
    %c0_53 = arith.constant 0 : index
    %c0_54 = arith.constant 0 : index
    %47 = vector.load %arg3[%c0_53, %c0_54] : memref<768x128xbf16, #tpu.memory_space<vmem>>, vector<768x128xbf16>
    %cst_55 = arith.constant dense<0.000000e+00> : vector<64x128xf32>
    %48 = tpu.matmul %46, %47, %cst_55 {dimension_numbers = #tpu.dot_dimension_numbers<[1], [0], [0], [1], [0, 0, 1, 1], [], []>} : vector<64x768xbf16>, vector<768x128xbf16>, vector<64x128xf32> -> vector<64x128xf32>
    %c0_56 = arith.constant 0 : index
    %c0_57 = arith.constant 0 : index
    %49 = vector.load %arg24[%c0_56, %c0_57] : memref<72x768xf32, #tpu.memory_space<vmem>>, vector<64x256xf32>
    tpu.vector_store %arg24[%c0_56, %c0_57], %17 {strides = array<i32>} : memref<72x768xf32, #tpu.memory_space<vmem>>, vector<64x256xf32>,
    %c0_58 = arith.constant 0 : index
    %c256_59 = arith.constant 256 : index
    %50 = vector.load %arg24[%c0_58, %c256_59] : memref<72x768xf32, #tpu.memory_space<vmem>>, vector<64x256xf32>
    tpu.vector_store %arg24[%c0_58, %c256_59], %19 {strides = array<i32>} : memref<72x768xf32, #tpu.memory_space<vmem>>, vector<64x256xf32>,
    %c0_60 = arith.constant 0 : index
    %c512_61 = arith.constant 512 : index
    %51 = vector.load %arg24[%c0_60, %c512_61] : memref<72x768xf32, #tpu.memory_space<vmem>>, vector<64x256xf32>
    tpu.vector_store %arg24[%c0_60, %c512_61], %21 {strides = array<i32>} : memref<72x768xf32, #tpu.memory_space<vmem>>, vector<64x256xf32>,
    %c0_62 = arith.constant 0 : index
    %c0_63 = arith.constant 0 : index
    %52 = vector.load %arg24[%c0_62, %c0_63] : memref<72x768xf32, #tpu.memory_space<vmem>>, vector<64x768xf32>
    %53 = arith.truncf %52 : vector<64x768xf32> to vector<64x768xbf16>
    %c0_64 = arith.constant 0 : index
    %c0_65 = arith.constant 0 : index
    %54 = vector.load %arg3[%c0_64, %c0_65] : memref<768x128xbf16, #tpu.memory_space<vmem>>, vector<768x128xbf16>
    %cst_66 = arith.constant dense<0.000000e+00> : vector<64x128xf32>
    %55 = tpu.matmul %53, %54, %cst_66 {dimension_numbers = #tpu.dot_dimension_numbers<[1], [0], [0], [1], [0, 0, 1, 1], [], []>} : vector<64x768xbf16>, vector<768x128xbf16>, vector<64x128xf32> -> vector<64x128xf32>
    %cst_67 = arith.constant dense<0.000000e+00> : vector<128xf32>
    %56 = vector.multi_reduction <add>, %34, %cst_67 [0] : vector<64x128xf32> to vector<128xf32>
    %57 = vector.shape_cast %56 : vector<128xf32> to vector<1x128xf32>
    %cst_68 = arith.constant 0.000000e+00 : f32
    %58 = vector.broadcast %cst_68 : f32 to vector<1x128xf32>
    %59 = arith.addf %58, %57 : vector<1x128xf32>
    %cst_69 = arith.constant dense<0.000000e+00> : vector<128xf32>
    %60 = vector.multi_reduction <add>, %41, %cst_69 [0] : vector<64x128xf32> to vector<128xf32>
    %61 = vector.shape_cast %60 : vector<128xf32> to vector<1x128xf32>
    %62 = arith.addf %59, %61 : vector<1x128xf32>
    %cst_70 = arith.constant dense<0.000000e+00> : vector<128xf32>
    %63 = vector.multi_reduction <add>, %48, %cst_70 [0] : vector<64x128xf32> to vector<128xf32>
    %64 = vector.shape_cast %63 : vector<128xf32> to vector<1x128xf32>
    %65 = arith.addf %62, %64 : vector<1x128xf32>
    %cst_71 = arith.constant dense<0.000000e+00> : vector<128xf32>
    %66 = vector.multi_reduction <add>, %55, %cst_71 [0] : vector<64x128xf32> to vector<128xf32>
    %67 = vector.shape_cast %66 : vector<128xf32> to vector<1x128xf32>
    %68 = arith.addf %65, %67 : vector<1x128xf32>
    %69 = arith.mulf %34, %34 : vector<64x128xf32>
    %cst_72 = arith.constant dense<0.000000e+00> : vector<128xf32>
    %70 = vector.multi_reduction <add>, %69, %cst_72 [0] : vector<64x128xf32> to vector<128xf32>
    %71 = vector.shape_cast %70 : vector<128xf32> to vector<1x128xf32>
    %cst_73 = arith.constant 0.000000e+00 : f32
    %72 = vector.broadcast %cst_73 : f32 to vector<1x128xf32>
    %73 = arith.addf %72, %71 : vector<1x128xf32>
    %74 = arith.mulf %41, %41 : vector<64x128xf32>
    %cst_74 = arith.constant dense<0.000000e+00> : vector<128xf32>
    %75 = vector.multi_reduction <add>, %74, %cst_74 [0] : vector<64x128xf32> to vector<128xf32>
    %76 = vector.shape_cast %75 : vector<128xf32> to vector<1x128xf32>
    %77 = arith.addf %73, %76 : vector<1x128xf32>
    %78 = arith.mulf %48, %48 : vector<64x128xf32>
    %cst_75 = arith.constant dense<0.000000e+00> : vector<128xf32>
    %79 = vector.multi_reduction <add>, %78, %cst_75 [0] : vector<64x128xf32> to vector<128xf32>
    %80 = vector.shape_cast %79 : vector<128xf32> to vector<1x128xf32>
    %81 = arith.addf %77, %80 : vector<1x128xf32>
    %82 = arith.mulf %55, %55 : vector<64x128xf32>
    %cst_76 = arith.constant dense<0.000000e+00> : vector<128xf32>
    %83 = vector.multi_reduction <add>, %82, %cst_76 [0] : vector<64x128xf32> to vector<128xf32>
    %84 = vector.shape_cast %83 : vector<128xf32> to vector<1x128xf32>
    %85 = arith.addf %81, %84 : vector<1x128xf32>
    %cst_77 = arith.constant 3.906250e-03 : f32
    %86 = vector.broadcast %cst_77 : f32 to vector<1x128xf32>
    %87 = arith.mulf %68, %86 : vector<1x128xf32>
    %cst_78 = arith.constant 3.906250e-03 : f32
    %88 = vector.broadcast %cst_78 : f32 to vector<1x128xf32>
    %89 = arith.mulf %85, %88 : vector<1x128xf32>
    %90 = arith.mulf %87, %87 : vector<1x128xf32>
    %91 = arith.subf %89, %90 : vector<1x128xf32>
    %cst_79 = arith.constant 0.000000e+00 : f32
    %92 = vector.broadcast %cst_79 : f32 to vector<1x128xf32>
    %93 = arith.maximumf %91, %92 : vector<1x128xf32>
    %c0_80 = arith.constant 0 : index
    %c0_81 = arith.constant 0 : index
    %94 = vector.load %arg4[%c0_80, %c0_81] : memref<1x128xf32, #tpu.memory_space<vmem>>, vector<1x128xf32>
    %cst_82 = arith.constant 9.99999974E-6 : f32
    %95 = vector.broadcast %cst_82 : f32 to vector<1x128xf32>
    %96 = arith.addf %93, %95 : vector<1x128xf32>
    %97 = math.rsqrt %96 : vector<1x128xf32>
    %98 = arith.mulf %94, %97 : vector<1x128xf32>
    %c0_83 = arith.constant 0 : index
    %c0_84 = arith.constant 0 : index
    %99 = vector.load %arg5[%c0_83, %c0_84] : memref<1x128xf32, #tpu.memory_space<vmem>>, vector<1x128xf32>
    %100 = arith.mulf %87, %98 : vector<1x128xf32>
    %101 = arith.subf %99, %100 : vector<1x128xf32>
    %102 = vector.broadcast %98 : vector<1x128xf32> to vector<64x128xf32>
    %103 = arith.mulf %34, %102 : vector<64x128xf32>
    %104 = vector.broadcast %101 : vector<1x128xf32> to vector<64x128xf32>
    %105 = arith.addf %103, %104 : vector<64x128xf32>
    %cst_85 = arith.constant 0.000000e+00 : f32
    %106 = vector.broadcast %cst_85 : f32 to vector<64x128xf32>
    %107 = arith.cmpf oge, %105, %106 : vector<64x128xf32>
    %cst_86 = arith.constant 0.00999999977 : f32
    %108 = vector.broadcast %cst_86 : f32 to vector<64x128xf32>
    %109 = arith.mulf %108, %105 : vector<64x128xf32>
    %110 = arith.select %107, %105, %109 : vector<64x128xi1>, vector<64x128xf32>
    %111 = vector.broadcast %98 : vector<1x128xf32> to vector<64x128xf32>
    %112 = arith.mulf %41, %111 : vector<64x128xf32>
    %113 = vector.broadcast %101 : vector<1x128xf32> to vector<64x128xf32>
    %114 = arith.addf %112, %113 : vector<64x128xf32>
    %cst_87 = arith.constant 0.000000e+00 : f32
    %115 = vector.broadcast %cst_87 : f32 to vector<64x128xf32>
    %116 = arith.cmpf oge, %114, %115 : vector<64x128xf32>
    %cst_88 = arith.constant 0.00999999977 : f32
    %117 = vector.broadcast %cst_88 : f32 to vector<64x128xf32>
    %118 = arith.mulf %117, %114 : vector<64x128xf32>
    %119 = arith.select %116, %114, %118 : vector<64x128xi1>, vector<64x128xf32>
    %120 = vector.broadcast %98 : vector<1x128xf32> to vector<64x128xf32>
    %121 = arith.mulf %48, %120 : vector<64x128xf32>
    %122 = vector.broadcast %101 : vector<1x128xf32> to vector<64x128xf32>
    %123 = arith.addf %121, %122 : vector<64x128xf32>
    %cst_89 = arith.constant 0.000000e+00 : f32
    %124 = vector.broadcast %cst_89 : f32 to vector<64x128xf32>
    %125 = arith.cmpf oge, %123, %124 : vector<64x128xf32>
    %cst_90 = arith.constant 0.00999999977 : f32
    %126 = vector.broadcast %cst_90 : f32 to vector<64x128xf32>
    %127 = arith.mulf %126, %123 : vector<64x128xf32>
    %128 = arith.select %125, %123, %127 : vector<64x128xi1>, vector<64x128xf32>
    %129 = vector.broadcast %98 : vector<1x128xf32> to vector<64x128xf32>
    %130 = arith.mulf %55, %129 : vector<64x128xf32>
    %131 = vector.broadcast %101 : vector<1x128xf32> to vector<64x128xf32>
    %132 = arith.addf %130, %131 : vector<64x128xf32>
    %cst_91 = arith.constant 0.000000e+00 : f32
    %133 = vector.broadcast %cst_91 : f32 to vector<64x128xf32>
    %134 = arith.cmpf oge, %132, %133 : vector<64x128xf32>
    %cst_92 = arith.constant 0.00999999977 : f32
    %135 = vector.broadcast %cst_92 : f32 to vector<64x128xf32>
    %136 = arith.mulf %135, %132 : vector<64x128xf32>
    %137 = arith.select %134, %132, %136 : vector<64x128xi1>, vector<64x128xf32>
    %c8_93 = arith.constant 8 : index
    %c0_94 = arith.constant 0 : index
    %138 = vector.load %arg25[%c8_93, %c0_94] : memref<72x256xf32, #tpu.memory_space<vmem>>, vector<64x128xf32>
    tpu.vector_store %arg25[%c8_93, %c0_94], %137 {strides = array<i32>} : memref<72x256xf32, #tpu.memory_space<vmem>>, vector<64x128xf32>,
    %c7_95 = arith.constant 7 : index
    %c0_96 = arith.constant 0 : index
    %139 = vector.load %arg25[%c7_95, %c0_96] : memref<72x256xf32, #tpu.memory_space<vmem>>, vector<64x128xf32>
    %cst_97 = arith.constant 0.000000e+00 : f32
    %140 = vector.shape_cast %2 : vector<64x1xi1> to vector<64x1xi1>
    %141 = vector.broadcast %140 : vector<64x1xi1> to vector<64x128xi1>
    %142 = vector.broadcast %cst_97 : f32 to vector<64x128xf32>
    %143 = arith.select %141, %139, %142 : vector<64x128xi1>, vector<64x128xf32>
    %c0_98 = arith.constant 0 : index
    %c0_99 = arith.constant 0 : index
    %144 = vector.load %arg24[%c0_98, %c0_99] : memref<72x768xf32, #tpu.memory_space<vmem>>, vector<64x128xf32>
    tpu.vector_store %arg24[%c0_98, %c0_99], %143 {strides = array<i32>} : memref<72x768xf32, #tpu.memory_space<vmem>>, vector<64x128xf32>,
    %c0_100 = arith.constant 0 : index
    %c128 = arith.constant 128 : index
    %145 = vector.load %arg24[%c0_100, %c128] : memref<72x768xf32, #tpu.memory_space<vmem>>, vector<64x128xf32>
    tpu.vector_store %arg24[%c0_100, %c128], %110 {strides = array<i32>} : memref<72x768xf32, #tpu.memory_space<vmem>>, vector<64x128xf32>,
    %c0_101 = arith.constant 0 : index
    %c256_102 = arith.constant 256 : index
    %146 = vector.load %arg24[%c0_101, %c256_102] : memref<72x768xf32, #tpu.memory_space<vmem>>, vector<64x128xf32>
    tpu.vector_store %arg24[%c0_101, %c256_102], %119 {strides = array<i32>} : memref<72x768xf32, #tpu.memory_space<vmem>>, vector<64x128xf32>,
    %c0_103 = arith.constant 0 : index
    %c0_104 = arith.constant 0 : index
    %147 = vector.load %arg24[%c0_103, %c0_104] : memref<72x768xf32, #tpu.memory_space<vmem>>, vector<64x384xf32>
    %148 = arith.truncf %147 : vector<64x384xf32> to vector<64x384xbf16>
    %c0_105 = arith.constant 0 : index
    %c0_106 = arith.constant 0 : index
    %149 = vector.load %arg6[%c0_105, %c0_106] : memref<384x64xbf16, #tpu.memory_space<vmem>>, vector<384x64xbf16>
    %cst_107 = arith.constant dense<0.000000e+00> : vector<64x64xf32>
    %150 = tpu.matmul %148, %149, %cst_107 {dimension_numbers = #tpu.dot_dimension_numbers<[1], [0], [0], [1], [0, 0, 1, 1], [], []>} : vector<64x384xbf16>, vector<384x64xbf16>, vector<64x64xf32> -> vector<64x64xf32>
    %c0_108 = arith.constant 0 : index
    %c0_109 = arith.constant 0 : index
    %151 = vector.load %arg24[%c0_108, %c0_109] : memref<72x768xf32, #tpu.memory_space<vmem>>, vector<64x128xf32>
    tpu.vector_store %arg24[%c0_108, %c0_109], %119 {strides = array<i32>} : memref<72x768xf32, #tpu.memory_space<vmem>>, vector<64x128xf32>,
    %c0_110 = arith.constant 0 : index
    %c128_111 = arith.constant 128 : index
    %152 = vector.load %arg24[%c0_110, %c128_111] : memref<72x768xf32, #tpu.memory_space<vmem>>, vector<64x128xf32>
    tpu.vector_store %arg24[%c0_110, %c128_111], %128 {strides = array<i32>} : memref<72x768xf32, #tpu.memory_space<vmem>>, vector<64x128xf32>,
    %c0_112 = arith.constant 0 : index
    %c256_113 = arith.constant 256 : index
    %153 = vector.load %arg24[%c0_112, %c256_113] : memref<72x768xf32, #tpu.memory_space<vmem>>, vector<64x128xf32>
    tpu.vector_store %arg24[%c0_112, %c256_113], %137 {strides = array<i32>} : memref<72x768xf32, #tpu.memory_space<vmem>>, vector<64x128xf32>,
    %c0_114 = arith.constant 0 : index
    %c0_115 = arith.constant 0 : index
    %154 = vector.load %arg24[%c0_114, %c0_115] : memref<72x768xf32, #tpu.memory_space<vmem>>, vector<64x384xf32>
    %155 = arith.truncf %154 : vector<64x384xf32> to vector<64x384xbf16>
    %c0_116 = arith.constant 0 : index
    %c0_117 = arith.constant 0 : index
    %156 = vector.load %arg6[%c0_116, %c0_117] : memref<384x64xbf16, #tpu.memory_space<vmem>>, vector<384x64xbf16>
    %cst_118 = arith.constant dense<0.000000e+00> : vector<64x64xf32>
    %157 = tpu.matmul %155, %156, %cst_118 {dimension_numbers = #tpu.dot_dimension_numbers<[1], [0], [0], [1], [0, 0, 1, 1], [], []>} : vector<64x384xbf16>, vector<384x64xbf16>, vector<64x64xf32> -> vector<64x64xf32>
    %cst_119 = arith.constant dense<0.000000e+00> : vector<64xf32>
    %158 = vector.multi_reduction <add>, %150, %cst_119 [0] : vector<64x64xf32> to vector<64xf32>
    %159 = vector.shape_cast %158 : vector<64xf32> to vector<1x64xf32>
    %cst_120 = arith.constant 0.000000e+00 : f32
    %160 = vector.broadcast %cst_120 : f32 to vector<1x64xf32>
    %161 = arith.addf %160, %159 : vector<1x64xf32>
    %cst_121 = arith.constant dense<0.000000e+00> : vector<64xf32>
    %162 = vector.multi_reduction <add>, %157, %cst_121 [0] : vector<64x64xf32> to vector<64xf32>
    %163 = vector.shape_cast %162 : vector<64xf32> to vector<1x64xf32>
    %164 = arith.addf %161, %163 : vector<1x64xf32>
    %165 = arith.mulf %150, %150 : vector<64x64xf32>
    %cst_122 = arith.constant dense<0.000000e+00> : vector<64xf32>
    %166 = vector.multi_reduction <add>, %165, %cst_122 [0] : vector<64x64xf32> to vector<64xf32>
    %167 = vector.shape_cast %166 : vector<64xf32> to vector<1x64xf32>
    %cst_123 = arith.constant 0.000000e+00 : f32
    %168 = vector.broadcast %cst_123 : f32 to vector<1x64xf32>
    %169 = arith.addf %168, %167 : vector<1x64xf32>
    %170 = arith.mulf %157, %157 : vector<64x64xf32>
    %cst_124 = arith.constant dense<0.000000e+00> : vector<64xf32>
    %171 = vector.multi_reduction <add>, %170, %cst_124 [0] : vector<64x64xf32> to vector<64xf32>
    %172 = vector.shape_cast %171 : vector<64xf32> to vector<1x64xf32>
    %173 = arith.addf %169, %172 : vector<1x64xf32>
    %cst_125 = arith.constant 7.812500e-03 : f32
    %174 = vector.broadcast %cst_125 : f32 to vector<1x64xf32>
    %175 = arith.mulf %164, %174 : vector<1x64xf32>
    %cst_126 = arith.constant 7.812500e-03 : f32
    %176 = vector.broadcast %cst_126 : f32 to vector<1x64xf32>
    %177 = arith.mulf %173, %176 : vector<1x64xf32>
    %178 = arith.mulf %175, %175 : vector<1x64xf32>
    %179 = arith.subf %177, %178 : vector<1x64xf32>
    %cst_127 = arith.constant 0.000000e+00 : f32
    %180 = vector.broadcast %cst_127 : f32 to vector<1x64xf32>
    %181 = arith.maximumf %179, %180 : vector<1x64xf32>
    %c0_128 = arith.constant 0 : index
    %c0_129 = arith.constant 0 : index
    %182 = vector.load %arg7[%c0_128, %c0_129] : memref<1x64xf32, #tpu.memory_space<vmem>>, vector<1x64xf32>
    %cst_130 = arith.constant 9.99999974E-6 : f32
    %183 = vector.broadcast %cst_130 : f32 to vector<1x64xf32>
    %184 = arith.addf %181, %183 : vector<1x64xf32>
    %185 = math.rsqrt %184 : vector<1x64xf32>
    %186 = arith.mulf %182, %185 : vector<1x64xf32>
    %c0_131 = arith.constant 0 : index
    %c0_132 = arith.constant 0 : index
    %187 = vector.load %arg8[%c0_131, %c0_132] : memref<1x64xf32, #tpu.memory_space<vmem>>, vector<1x64xf32>
    %188 = arith.mulf %175, %186 : vector<1x64xf32>
    %189 = arith.subf %187, %188 : vector<1x64xf32>
    %190 = vector.broadcast %186 : vector<1x64xf32> to vector<64x64xf32>
    %191 = arith.mulf %150, %190 : vector<64x64xf32>
    %192 = vector.broadcast %189 : vector<1x64xf32> to vector<64x64xf32>
    %193 = arith.addf %191, %192 : vector<64x64xf32>
    %cst_133 = arith.constant 0.000000e+00 : f32
    %194 = vector.broadcast %cst_133 : f32 to vector<64x64xf32>
    %195 = arith.cmpf oge, %193, %194 : vector<64x64xf32>
    %cst_134 = arith.constant 0.00999999977 : f32
    %196 = vector.broadcast %cst_134 : f32 to vector<64x64xf32>
    %197 = arith.mulf %196, %193 : vector<64x64xf32>
    %198 = arith.select %195, %193, %197 : vector<64x64xi1>, vector<64x64xf32>
    %199 = vector.broadcast %186 : vector<1x64xf32> to vector<64x64xf32>
    %200 = arith.mulf %157, %199 : vector<64x64xf32>
    %201 = vector.broadcast %189 : vector<1x64xf32> to vector<64x64xf32>
    %202 = arith.addf %200, %201 : vector<64x64xf32>
    %cst_135 = arith.constant 0.000000e+00 : f32
    %203 = vector.broadcast %cst_135 : f32 to vector<64x64xf32>
    %204 = arith.cmpf oge, %202, %203 : vector<64x64xf32>
    %cst_136 = arith.constant 0.00999999977 : f32
    %205 = vector.broadcast %cst_136 : f32 to vector<64x64xf32>
    %206 = arith.mulf %205, %202 : vector<64x64xf32>
    %207 = arith.select %204, %202, %206 : vector<64x64xi1>, vector<64x64xf32>
    %c8_137 = arith.constant 8 : index
    %c0_138 = arith.constant 0 : index
    %208 = vector.load %arg25[%c8_137, %c0_138] : memref<72x256xf32, #tpu.memory_space<vmem>>, vector<64x64xf32>
    tpu.vector_store %arg25[%c8_137, %c0_138], %207 {strides = array<i32>} : memref<72x256xf32, #tpu.memory_space<vmem>>, vector<64x64xf32>,
    %c7_139 = arith.constant 7 : index
    %c0_140 = arith.constant 0 : index
    %209 = vector.load %arg25[%c7_139, %c0_140] : memref<72x256xf32, #tpu.memory_space<vmem>>, vector<64x64xf32>
    %cst_141 = arith.constant 0.000000e+00 : f32
    %210 = vector.shape_cast %2 : vector<64x1xi1> to vector<64x1xi1>
    %211 = vector.broadcast %210 : vector<64x1xi1> to vector<64x64xi1>
    %212 = vector.broadcast %cst_141 : f32 to vector<64x64xf32>
    %213 = arith.select %211, %209, %212 : vector<64x64xi1>, vector<64x64xf32>
    %c0_142 = arith.constant 0 : index
    %c0_143 = arith.constant 0 : index
    %214 = vector.load %arg24[%c0_142, %c0_143] : memref<72x768xf32, #tpu.memory_space<vmem>>, vector<64x64xf32>
    tpu.vector_store %arg24[%c0_142, %c0_143], %213 {strides = array<i32>} : memref<72x768xf32, #tpu.memory_space<vmem>>, vector<64x64xf32>,
    %c0_144 = arith.constant 0 : index
    %c64 = arith.constant 64 : index
    %215 = vector.load %arg24[%c0_144, %c64] : memref<72x768xf32, #tpu.memory_space<vmem>>, vector<64x64xf32>
    tpu.vector_store %arg24[%c0_144, %c64], %198 {strides = array<i32>} : memref<72x768xf32, #tpu.memory_space<vmem>>, vector<64x64xf32>,
    %c0_145 = arith.constant 0 : index
    %c128_146 = arith.constant 128 : index
    %216 = vector.load %arg24[%c0_145, %c128_146] : memref<72x768xf32, #tpu.memory_space<vmem>>, vector<64x64xf32>
    tpu.vector_store %arg24[%c0_145, %c128_146], %207 {strides = array<i32>} : memref<72x768xf32, #tpu.memory_space<vmem>>, vector<64x64xf32>,
    %c0_147 = arith.constant 0 : index
    %c0_148 = arith.constant 0 : index
    %217 = vector.load %arg24[%c0_147, %c0_148] : memref<72x768xf32, #tpu.memory_space<vmem>>, vector<64x192xf32>
    %218 = arith.truncf %217 : vector<64x192xf32> to vector<64x192xbf16>
    %c0_149 = arith.constant 0 : index
    %c0_150 = arith.constant 0 : index
    %219 = vector.load %arg9[%c0_149, %c0_150] : memref<192x32xbf16, #tpu.memory_space<vmem>>, vector<192x32xbf16>
    %cst_151 = arith.constant dense<0.000000e+00> : vector<64x32xf32>
    %220 = tpu.matmul %218, %219, %cst_151 {dimension_numbers = #tpu.dot_dimension_numbers<[1], [0], [0], [1], [0, 0, 1, 1], [], []>} : vector<64x192xbf16>, vector<192x32xbf16>, vector<64x32xf32> -> vector<64x32xf32>
    %cst_152 = arith.constant dense<0.000000e+00> : vector<32xf32>
    %221 = vector.multi_reduction <add>, %220, %cst_152 [0] : vector<64x32xf32> to vector<32xf32>
    %222 = vector.shape_cast %221 : vector<32xf32> to vector<1x32xf32>
    %cst_153 = arith.constant 0.000000e+00 : f32
    %223 = vector.broadcast %cst_153 : f32 to vector<1x32xf32>
    %224 = arith.addf %223, %222 : vector<1x32xf32>
    %225 = arith.mulf %220, %220 : vector<64x32xf32>
    %cst_154 = arith.constant dense<0.000000e+00> : vector<32xf32>
    %226 = vector.multi_reduction <add>, %225, %cst_154 [0] : vector<64x32xf32> to vector<32xf32>
    %227 = vector.shape_cast %226 : vector<32xf32> to vector<1x32xf32>
    %cst_155 = arith.constant 0.000000e+00 : f32
    %228 = vector.broadcast %cst_155 : f32 to vector<1x32xf32>
    %229 = arith.addf %228, %227 : vector<1x32xf32>
    %cst_156 = arith.constant 1.562500e-02 : f32
    %230 = vector.broadcast %cst_156 : f32 to vector<1x32xf32>
    %231 = arith.mulf %224, %230 : vector<1x32xf32>
    %cst_157 = arith.constant 1.562500e-02 : f32
    %232 = vector.broadcast %cst_157 : f32 to vector<1x32xf32>
    %233 = arith.mulf %229, %232 : vector<1x32xf32>
    %234 = arith.mulf %231, %231 : vector<1x32xf32>
    %235 = arith.subf %233, %234 : vector<1x32xf32>
    %cst_158 = arith.constant 0.000000e+00 : f32
    %236 = vector.broadcast %cst_158 : f32 to vector<1x32xf32>
    %237 = arith.maximumf %235, %236 : vector<1x32xf32>
    %c0_159 = arith.constant 0 : index
    %c0_160 = arith.constant 0 : index
    %238 = vector.load %arg10[%c0_159, %c0_160] : memref<1x32xf32, #tpu.memory_space<vmem>>, vector<1x32xf32>
    %cst_161 = arith.constant 9.99999974E-6 : f32
    %239 = vector.broadcast %cst_161 : f32 to vector<1x32xf32>
    %240 = arith.addf %237, %239 : vector<1x32xf32>
    %241 = math.rsqrt %240 : vector<1x32xf32>
    %242 = arith.mulf %238, %241 : vector<1x32xf32>
    %c0_162 = arith.constant 0 : index
    %c0_163 = arith.constant 0 : index
    %243 = vector.load %arg11[%c0_162, %c0_163] : memref<1x32xf32, #tpu.memory_space<vmem>>, vector<1x32xf32>
    %244 = arith.mulf %231, %242 : vector<1x32xf32>
    %245 = arith.subf %243, %244 : vector<1x32xf32>
    %246 = vector.broadcast %242 : vector<1x32xf32> to vector<64x32xf32>
    %247 = arith.mulf %220, %246 : vector<64x32xf32>
    %248 = vector.broadcast %245 : vector<1x32xf32> to vector<64x32xf32>
    %249 = arith.addf %247, %248 : vector<64x32xf32>
    %cst_164 = arith.constant 0.000000e+00 : f32
    %250 = vector.broadcast %cst_164 : f32 to vector<64x32xf32>
    %251 = arith.cmpf oge, %249, %250 : vector<64x32xf32>
    %cst_165 = arith.constant 0.00999999977 : f32
    %252 = vector.broadcast %cst_165 : f32 to vector<64x32xf32>
    %253 = arith.mulf %252, %249 : vector<64x32xf32>
    %254 = arith.select %251, %249, %253 : vector<64x32xi1>, vector<64x32xf32>
    %255 = vector.extract_strided_slice %254 {offsets = [0, 0], sizes = [64, 16], strides = [1, 1]} : vector<64x32xf32> to vector<64x16xf32>
    %256 = vector.extract_strided_slice %254 {offsets = [0, 16], sizes = [64, 16], strides = [1, 1]} : vector<64x32xf32> to vector<64x16xf32>
    %257 = arith.addf %255, %256 : vector<64x16xf32>
    %cst_166 = arith.constant 5.000000e-01 : f32
    %258 = vector.broadcast %cst_166 : f32 to vector<64x16xf32>
    %259 = arith.mulf %257, %258 : vector<64x16xf32>
    %c8_167 = arith.constant 8 : index
    %c0_168 = arith.constant 0 : index
    %260 = vector.load %arg25[%c8_167, %c0_168] : memref<72x256xf32, #tpu.memory_space<vmem>>, vector<64x16xf32>
    tpu.vector_store %arg25[%c8_167, %c0_168], %259 {strides = array<i32>} : memref<72x256xf32, #tpu.memory_space<vmem>>, vector<64x16xf32>,
    %c7_169 = arith.constant 7 : index
    %c0_170 = arith.constant 0 : index
    %261 = vector.load %arg25[%c7_169, %c0_170] : memref<72x256xf32, #tpu.memory_space<vmem>>, vector<64x16xf32>
    %cst_171 = arith.constant 0.000000e+00 : f32
    %262 = vector.shape_cast %2 : vector<64x1xi1> to vector<64x1xi1>
    %263 = vector.broadcast %262 : vector<64x1xi1> to vector<64x16xi1>
    %264 = vector.broadcast %cst_171 : f32 to vector<64x16xf32>
    %265 = arith.select %263, %261, %264 : vector<64x16xi1>, vector<64x16xf32>
    %c0_172 = arith.constant 0 : index
    %c0_173 = arith.constant 0 : index
    %266 = vector.load %arg25[%c0_172, %c0_173] : memref<72x256xf32, #tpu.memory_space<vmem>>, vector<64x16xf32>
    tpu.vector_store %arg25[%c0_172, %c0_173], %259 {strides = array<i32>} : memref<72x256xf32, #tpu.memory_space<vmem>>, vector<64x16xf32>,
    %c1_174 = arith.constant 1 : index
    %c0_175 = arith.constant 0 : index
    %267 = vector.load %arg25[%c1_174, %c0_175] : memref<72x256xf32, #tpu.memory_space<vmem>>, vector<64x16xf32>
    %cst_176 = arith.constant 0.000000e+00 : f32
    %268 = vector.shape_cast %5 : vector<64x1xi1> to vector<64x1xi1>
    %269 = vector.broadcast %268 : vector<64x1xi1> to vector<64x16xi1>
    %270 = vector.broadcast %cst_176 : f32 to vector<64x16xf32>
    %271 = arith.select %269, %267, %270 : vector<64x16xi1>, vector<64x16xf32>
    %c0_177 = arith.constant 0 : index
    %c0_178 = arith.constant 0 : index
    %272 = vector.load %arg24[%c0_177, %c0_178] : memref<72x768xf32, #tpu.memory_space<vmem>>, vector<64x16xf32>
    tpu.vector_store %arg24[%c0_177, %c0_178], %265 {strides = array<i32>} : memref<72x768xf32, #tpu.memory_space<vmem>>, vector<64x16xf32>,
    %c0_179 = arith.constant 0 : index
    %c16 = arith.constant 16 : index
    %273 = vector.load %arg24[%c0_179, %c16] : memref<72x768xf32, #tpu.memory_space<vmem>>, vector<64x16xf32>
    tpu.vector_store %arg24[%c0_179, %c16], %259 {strides = array<i32>} : memref<72x768xf32, #tpu.memory_space<vmem>>, vector<64x16xf32>,
    %c0_180 = arith.constant 0 : index
    %c32 = arith.constant 32 : index
    %274 = vector.load %arg24[%c0_180, %c32] : memref<72x768xf32, #tpu.memory_space<vmem>>, vector<64x16xf32>
    tpu.vector_store %arg24[%c0_180, %c32], %271 {strides = array<i32>} : memref<72x768xf32, #tpu.memory_space<vmem>>, vector<64x16xf32>,
    %c0_181 = arith.constant 0 : index
    %c0_182 = arith.constant 0 : index
    %275 = vector.load %arg24[%c0_181, %c0_182] : memref<72x768xf32, #tpu.memory_space<vmem>>, vector<64x48xf32>
    %276 = arith.truncf %275 : vector<64x48xf32> to vector<64x48xbf16>
    %c0_183 = arith.constant 0 : index
    %c0_184 = arith.constant 0 : index
    %277 = vector.load %arg12[%c0_183, %c0_184] : memref<48x16xbf16, #tpu.memory_space<vmem>>, vector<48x16xbf16>
    %cst_185 = arith.constant dense<0.000000e+00> : vector<64x16xf32>
    %278 = tpu.matmul %276, %277, %cst_185 {dimension_numbers = #tpu.dot_dimension_numbers<[1], [0], [0], [1], [0, 0, 1, 1], [], []>} : vector<64x48xbf16>, vector<48x16xbf16>, vector<64x16xf32> -> vector<64x16xf32>
    %cst_186 = arith.constant dense<0.000000e+00> : vector<16xf32>
    %279 = vector.multi_reduction <add>, %278, %cst_186 [0] : vector<64x16xf32> to vector<16xf32>
    %280 = vector.shape_cast %279 : vector<16xf32> to vector<1x16xf32>
    %cst_187 = arith.constant 0.000000e+00 : f32
    %281 = vector.broadcast %cst_187 : f32 to vector<1x16xf32>
    %282 = arith.addf %281, %280 : vector<1x16xf32>
    %283 = arith.mulf %278, %278 : vector<64x16xf32>
    %cst_188 = arith.constant dense<0.000000e+00> : vector<16xf32>
    %284 = vector.multi_reduction <add>, %283, %cst_188 [0] : vector<64x16xf32> to vector<16xf32>
    %285 = vector.shape_cast %284 : vector<16xf32> to vector<1x16xf32>
    %cst_189 = arith.constant 0.000000e+00 : f32
    %286 = vector.broadcast %cst_189 : f32 to vector<1x16xf32>
    %287 = arith.addf %286, %285 : vector<1x16xf32>
    %cst_190 = arith.constant 1.562500e-02 : f32
    %288 = vector.broadcast %cst_190 : f32 to vector<1x16xf32>
    %289 = arith.mulf %282, %288 : vector<1x16xf32>
    %cst_191 = arith.constant 1.562500e-02 : f32
    %290 = vector.broadcast %cst_191 : f32 to vector<1x16xf32>
    %291 = arith.mulf %287, %290 : vector<1x16xf32>
    %292 = arith.mulf %289, %289 : vector<1x16xf32>
    %293 = arith.subf %291, %292 : vector<1x16xf32>
    %cst_192 = arith.constant 0.000000e+00 : f32
    %294 = vector.broadcast %cst_192 : f32 to vector<1x16xf32>
    %295 = arith.maximumf %293, %294 : vector<1x16xf32>
    %c0_193 = arith.constant 0 : index
    %c0_194 = arith.constant 0 : index
    %296 = vector.load %arg13[%c0_193, %c0_194] : memref<1x16xf32, #tpu.memory_space<vmem>>, vector<1x16xf32>
    %cst_195 = arith.constant 9.99999974E-6 : f32
    %297 = vector.broadcast %cst_195 : f32 to vector<1x16xf32>
    %298 = arith.addf %295, %297 : vector<1x16xf32>
    %299 = math.rsqrt %298 : vector<1x16xf32>
    %300 = arith.mulf %296, %299 : vector<1x16xf32>
    %c0_196 = arith.constant 0 : index
    %c0_197 = arith.constant 0 : index
    %301 = vector.load %arg14[%c0_196, %c0_197] : memref<1x16xf32, #tpu.memory_space<vmem>>, vector<1x16xf32>
    %302 = arith.mulf %289, %300 : vector<1x16xf32>
    %303 = arith.subf %301, %302 : vector<1x16xf32>
    %304 = vector.broadcast %300 : vector<1x16xf32> to vector<64x16xf32>
    %305 = arith.mulf %278, %304 : vector<64x16xf32>
    %306 = vector.broadcast %303 : vector<1x16xf32> to vector<64x16xf32>
    %307 = arith.addf %305, %306 : vector<64x16xf32>
    %cst_198 = arith.constant 0.000000e+00 : f32
    %308 = vector.broadcast %cst_198 : f32 to vector<64x16xf32>
    %309 = arith.cmpf oge, %307, %308 : vector<64x16xf32>
    %cst_199 = arith.constant 0.00999999977 : f32
    %310 = vector.broadcast %cst_199 : f32 to vector<64x16xf32>
    %311 = arith.mulf %310, %307 : vector<64x16xf32>
    %312 = arith.select %309, %307, %311 : vector<64x16xi1>, vector<64x16xf32>
    %c0_200 = arith.constant 0 : index
    %c0_201 = arith.constant 0 : index
    %313 = vector.load %arg25[%c0_200, %c0_201] : memref<72x256xf32, #tpu.memory_space<vmem>>, vector<64x16xf32>
    tpu.vector_store %arg25[%c0_200, %c0_201], %312 {strides = array<i32>} : memref<72x256xf32, #tpu.memory_space<vmem>>, vector<64x16xf32>,
    %c1_202 = arith.constant 1 : index
    %c0_203 = arith.constant 0 : index
    %314 = vector.load %arg25[%c1_202, %c0_203] : memref<72x256xf32, #tpu.memory_space<vmem>>, vector<64x16xf32>
    %cst_204 = arith.constant 0.000000e+00 : f32
    %315 = vector.shape_cast %5 : vector<64x1xi1> to vector<64x1xi1>
    %316 = vector.broadcast %315 : vector<64x1xi1> to vector<64x16xi1>
    %317 = vector.broadcast %cst_204 : f32 to vector<64x16xf32>
    %318 = arith.select %316, %314, %317 : vector<64x16xi1>, vector<64x16xf32>
    %c0_205 = arith.constant 0 : index
    %c0_206 = arith.constant 0 : index
    %319 = vector.load %arg24[%c0_205, %c0_206] : memref<72x768xf32, #tpu.memory_space<vmem>>, vector<64x16xf32>
    tpu.vector_store %arg24[%c0_205, %c0_206], %312 {strides = array<i32>} : memref<72x768xf32, #tpu.memory_space<vmem>>, vector<64x16xf32>,
    %c0_207 = arith.constant 0 : index
    %c16_208 = arith.constant 16 : index
    %320 = vector.load %arg24[%c0_207, %c16_208] : memref<72x768xf32, #tpu.memory_space<vmem>>, vector<64x16xf32>
    tpu.vector_store %arg24[%c0_207, %c16_208], %318 {strides = array<i32>} : memref<72x768xf32, #tpu.memory_space<vmem>>, vector<64x16xf32>,
    %c0_209 = arith.constant 0 : index
    %c0_210 = arith.constant 0 : index
    %321 = vector.load %arg24[%c0_209, %c0_210] : memref<72x768xf32, #tpu.memory_space<vmem>>, vector<64x32xf32>
    %322 = arith.truncf %321 : vector<64x32xf32> to vector<64x32xbf16>
    %c0_211 = arith.constant 0 : index
    %c0_212 = arith.constant 0 : index
    %323 = vector.load %arg15[%c0_211, %c0_212] : memref<32x64xbf16, #tpu.memory_space<vmem>>, vector<32x64xbf16>
    %cst_213 = arith.constant dense<0.000000e+00> : vector<64x64xf32>
    %324 = tpu.matmul %322, %323, %cst_213 {dimension_numbers = #tpu.dot_dimension_numbers<[1], [0], [0], [1], [0, 0, 1, 1], [], []>} : vector<64x32xbf16>, vector<32x64xbf16>, vector<64x64xf32> -> vector<64x64xf32>
    %325 = vector.extract_strided_slice %324 {offsets = [0, 0], sizes = [64, 32], strides = [1, 1]} : vector<64x64xf32> to vector<64x32xf32>
    %326 = vector.extract_strided_slice %324 {offsets = [0, 32], sizes = [64, 32], strides = [1, 1]} : vector<64x64xf32> to vector<64x32xf32>
    %cst_214 = arith.constant dense<0.000000e+00> : vector<32xf32>
    %327 = vector.multi_reduction <add>, %325, %cst_214 [0] : vector<64x32xf32> to vector<32xf32>
    %328 = vector.shape_cast %327 : vector<32xf32> to vector<1x32xf32>
    %cst_215 = arith.constant 0.000000e+00 : f32
    %329 = vector.broadcast %cst_215 : f32 to vector<1x32xf32>
    %330 = arith.addf %329, %328 : vector<1x32xf32>
    %cst_216 = arith.constant dense<0.000000e+00> : vector<32xf32>
    %331 = vector.multi_reduction <add>, %326, %cst_216 [0] : vector<64x32xf32> to vector<32xf32>
    %332 = vector.shape_cast %331 : vector<32xf32> to vector<1x32xf32>
    %333 = arith.addf %330, %332 : vector<1x32xf32>
    %334 = arith.mulf %325, %325 : vector<64x32xf32>
    %cst_217 = arith.constant dense<0.000000e+00> : vector<32xf32>
    %335 = vector.multi_reduction <add>, %334, %cst_217 [0] : vector<64x32xf32> to vector<32xf32>
    %336 = vector.shape_cast %335 : vector<32xf32> to vector<1x32xf32>
    %cst_218 = arith.constant 0.000000e+00 : f32
    %337 = vector.broadcast %cst_218 : f32 to vector<1x32xf32>
    %338 = arith.addf %337, %336 : vector<1x32xf32>
    %339 = arith.mulf %326, %326 : vector<64x32xf32>
    %cst_219 = arith.constant dense<0.000000e+00> : vector<32xf32>
    %340 = vector.multi_reduction <add>, %339, %cst_219 [0] : vector<64x32xf32> to vector<32xf32>
    %341 = vector.shape_cast %340 : vector<32xf32> to vector<1x32xf32>
    %342 = arith.addf %338, %341 : vector<1x32xf32>
    %cst_220 = arith.constant 7.812500e-03 : f32
    %343 = vector.broadcast %cst_220 : f32 to vector<1x32xf32>
    %344 = arith.mulf %333, %343 : vector<1x32xf32>
    %cst_221 = arith.constant 7.812500e-03 : f32
    %345 = vector.broadcast %cst_221 : f32 to vector<1x32xf32>
    %346 = arith.mulf %342, %345 : vector<1x32xf32>
    %347 = arith.mulf %344, %344 : vector<1x32xf32>
    %348 = arith.subf %346, %347 : vector<1x32xf32>
    %cst_222 = arith.constant 0.000000e+00 : f32
    %349 = vector.broadcast %cst_222 : f32 to vector<1x32xf32>
    %350 = arith.maximumf %348, %349 : vector<1x32xf32>
    %c0_223 = arith.constant 0 : index
    %c0_224 = arith.constant 0 : index
    %351 = vector.load %arg16[%c0_223, %c0_224] : memref<1x32xf32, #tpu.memory_space<vmem>>, vector<1x32xf32>
    %cst_225 = arith.constant 9.99999974E-6 : f32
    %352 = vector.broadcast %cst_225 : f32 to vector<1x32xf32>
    %353 = arith.addf %350, %352 : vector<1x32xf32>
    %354 = math.rsqrt %353 : vector<1x32xf32>
    %355 = arith.mulf %351, %354 : vector<1x32xf32>
    %c0_226 = arith.constant 0 : index
    %c0_227 = arith.constant 0 : index
    %356 = vector.load %arg17[%c0_226, %c0_227] : memref<1x32xf32, #tpu.memory_space<vmem>>, vector<1x32xf32>
    %357 = arith.mulf %344, %355 : vector<1x32xf32>
    %358 = arith.subf %356, %357 : vector<1x32xf32>
    %359 = vector.broadcast %355 : vector<1x32xf32> to vector<64x32xf32>
    %360 = arith.mulf %325, %359 : vector<64x32xf32>
    %361 = vector.broadcast %358 : vector<1x32xf32> to vector<64x32xf32>
    %362 = arith.addf %360, %361 : vector<64x32xf32>
    %cst_228 = arith.constant 0.000000e+00 : f32
    %363 = vector.broadcast %cst_228 : f32 to vector<64x32xf32>
    %364 = arith.cmpf oge, %362, %363 : vector<64x32xf32>
    %cst_229 = arith.constant 0.00999999977 : f32
    %365 = vector.broadcast %cst_229 : f32 to vector<64x32xf32>
    %366 = arith.mulf %365, %362 : vector<64x32xf32>
    %367 = arith.select %364, %362, %366 : vector<64x32xi1>, vector<64x32xf32>
    %368 = vector.broadcast %355 : vector<1x32xf32> to vector<64x32xf32>
    %369 = arith.mulf %326, %368 : vector<64x32xf32>
    %370 = vector.broadcast %358 : vector<1x32xf32> to vector<64x32xf32>
    %371 = arith.addf %369, %370 : vector<64x32xf32>
    %cst_230 = arith.constant 0.000000e+00 : f32
    %372 = vector.broadcast %cst_230 : f32 to vector<64x32xf32>
    %373 = arith.cmpf oge, %371, %372 : vector<64x32xf32>
    %cst_231 = arith.constant 0.00999999977 : f32
    %374 = vector.broadcast %cst_231 : f32 to vector<64x32xf32>
    %375 = arith.mulf %374, %371 : vector<64x32xf32>
    %376 = arith.select %373, %371, %375 : vector<64x32xi1>, vector<64x32xf32>
    %c0_232 = arith.constant 0 : index
    %c0_233 = arith.constant 0 : index
    %377 = vector.load %arg24[%c0_232, %c0_233] : memref<72x768xf32, #tpu.memory_space<vmem>>, vector<64x32xf32>
    tpu.vector_store %arg24[%c0_232, %c0_233], %367 {strides = array<i32>} : memref<72x768xf32, #tpu.memory_space<vmem>>, vector<64x32xf32>,
    %c0_234 = arith.constant 0 : index
    %c32_235 = arith.constant 32 : index
    %378 = vector.load %arg24[%c0_234, %c32_235] : memref<72x768xf32, #tpu.memory_space<vmem>>, vector<64x32xf32>
    tpu.vector_store %arg24[%c0_234, %c32_235], %376 {strides = array<i32>} : memref<72x768xf32, #tpu.memory_space<vmem>>, vector<64x32xf32>,
    %c0_236 = arith.constant 0 : index
    %c0_237 = arith.constant 0 : index
    %379 = vector.load %arg24[%c0_236, %c0_237] : memref<72x768xf32, #tpu.memory_space<vmem>>, vector<64x64xf32>
    %380 = arith.truncf %379 : vector<64x64xf32> to vector<64x64xbf16>
    %c0_238 = arith.constant 0 : index
    %c0_239 = arith.constant 0 : index
    %381 = vector.load %arg18[%c0_238, %c0_239] : memref<64x128xbf16, #tpu.memory_space<vmem>>, vector<64x128xbf16>
    %cst_240 = arith.constant dense<0.000000e+00> : vector<64x128xf32>
    %382 = tpu.matmul %380, %381, %cst_240 {dimension_numbers = #tpu.dot_dimension_numbers<[1], [0], [0], [1], [0, 0, 1, 1], [], []>} : vector<64x64xbf16>, vector<64x128xbf16>, vector<64x128xf32> -> vector<64x128xf32>
    %383 = vector.extract_strided_slice %382 {offsets = [0, 0], sizes = [64, 64], strides = [1, 1]} : vector<64x128xf32> to vector<64x64xf32>
    %384 = vector.extract_strided_slice %382 {offsets = [0, 64], sizes = [64, 64], strides = [1, 1]} : vector<64x128xf32> to vector<64x64xf32>
    %c0_241 = arith.constant 0 : index
    %c0_242 = arith.constant 0 : index
    %385 = vector.load %arg25[%c0_241, %c0_242] : memref<72x256xf32, #tpu.memory_space<vmem>>, vector<64x32xf32>
    tpu.vector_store %arg25[%c0_241, %c0_242], %367 {strides = array<i32>} : memref<72x256xf32, #tpu.memory_space<vmem>>, vector<64x32xf32>,
    %c1_243 = arith.constant 1 : index
    %c0_244 = arith.constant 0 : index
    %386 = vector.load %arg25[%c1_243, %c0_244] : memref<72x256xf32, #tpu.memory_space<vmem>>, vector<64x32xf32>
    %cst_245 = arith.constant 0.000000e+00 : f32
    %387 = vector.shape_cast %5 : vector<64x1xi1> to vector<64x1xi1>
    %388 = vector.broadcast %387 : vector<64x1xi1> to vector<64x32xi1>
    %389 = vector.broadcast %cst_245 : f32 to vector<64x32xf32>
    %390 = arith.select %388, %386, %389 : vector<64x32xi1>, vector<64x32xf32>
    %c0_246 = arith.constant 0 : index
    %c0_247 = arith.constant 0 : index
    %391 = vector.load %arg24[%c0_246, %c0_247] : memref<72x768xf32, #tpu.memory_space<vmem>>, vector<64x32xf32>
    tpu.vector_store %arg24[%c0_246, %c0_247], %376 {strides = array<i32>} : memref<72x768xf32, #tpu.memory_space<vmem>>, vector<64x32xf32>,
    %c0_248 = arith.constant 0 : index
    %c32_249 = arith.constant 32 : index
    %392 = vector.load %arg24[%c0_248, %c32_249] : memref<72x768xf32, #tpu.memory_space<vmem>>, vector<64x32xf32>
    tpu.vector_store %arg24[%c0_248, %c32_249], %390 {strides = array<i32>} : memref<72x768xf32, #tpu.memory_space<vmem>>, vector<64x32xf32>,
    %c0_250 = arith.constant 0 : index
    %c0_251 = arith.constant 0 : index
    %393 = vector.load %arg24[%c0_250, %c0_251] : memref<72x768xf32, #tpu.memory_space<vmem>>, vector<64x64xf32>
    %394 = arith.truncf %393 : vector<64x64xf32> to vector<64x64xbf16>
    %c0_252 = arith.constant 0 : index
    %c0_253 = arith.constant 0 : index
    %395 = vector.load %arg18[%c0_252, %c0_253] : memref<64x128xbf16, #tpu.memory_space<vmem>>, vector<64x128xbf16>
    %cst_254 = arith.constant dense<0.000000e+00> : vector<64x128xf32>
    %396 = tpu.matmul %394, %395, %cst_254 {dimension_numbers = #tpu.dot_dimension_numbers<[1], [0], [0], [1], [0, 0, 1, 1], [], []>} : vector<64x64xbf16>, vector<64x128xbf16>, vector<64x128xf32> -> vector<64x128xf32>
    %397 = vector.extract_strided_slice %396 {offsets = [0, 0], sizes = [64, 64], strides = [1, 1]} : vector<64x128xf32> to vector<64x64xf32>
    %398 = vector.extract_strided_slice %396 {offsets = [0, 64], sizes = [64, 64], strides = [1, 1]} : vector<64x128xf32> to vector<64x64xf32>
    %cst_255 = arith.constant dense<0.000000e+00> : vector<64xf32>
    %399 = vector.multi_reduction <add>, %383, %cst_255 [0] : vector<64x64xf32> to vector<64xf32>
    %400 = vector.shape_cast %399 : vector<64xf32> to vector<1x64xf32>
    %cst_256 = arith.constant 0.000000e+00 : f32
    %401 = vector.broadcast %cst_256 : f32 to vector<1x64xf32>
    %402 = arith.addf %401, %400 : vector<1x64xf32>
    %cst_257 = arith.constant dense<0.000000e+00> : vector<64xf32>
    %403 = vector.multi_reduction <add>, %384, %cst_257 [0] : vector<64x64xf32> to vector<64xf32>
    %404 = vector.shape_cast %403 : vector<64xf32> to vector<1x64xf32>
    %405 = arith.addf %402, %404 : vector<1x64xf32>
    %cst_258 = arith.constant dense<0.000000e+00> : vector<64xf32>
    %406 = vector.multi_reduction <add>, %397, %cst_258 [0] : vector<64x64xf32> to vector<64xf32>
    %407 = vector.shape_cast %406 : vector<64xf32> to vector<1x64xf32>
    %408 = arith.addf %405, %407 : vector<1x64xf32>
    %cst_259 = arith.constant dense<0.000000e+00> : vector<64xf32>
    %409 = vector.multi_reduction <add>, %398, %cst_259 [0] : vector<64x64xf32> to vector<64xf32>
    %410 = vector.shape_cast %409 : vector<64xf32> to vector<1x64xf32>
    %411 = arith.addf %408, %410 : vector<1x64xf32>
    %412 = arith.mulf %383, %383 : vector<64x64xf32>
    %cst_260 = arith.constant dense<0.000000e+00> : vector<64xf32>
    %413 = vector.multi_reduction <add>, %412, %cst_260 [0] : vector<64x64xf32> to vector<64xf32>
    %414 = vector.shape_cast %413 : vector<64xf32> to vector<1x64xf32>
    %cst_261 = arith.constant 0.000000e+00 : f32
    %415 = vector.broadcast %cst_261 : f32 to vector<1x64xf32>
    %416 = arith.addf %415, %414 : vector<1x64xf32>
    %417 = arith.mulf %384, %384 : vector<64x64xf32>
    %cst_262 = arith.constant dense<0.000000e+00> : vector<64xf32>
    %418 = vector.multi_reduction <add>, %417, %cst_262 [0] : vector<64x64xf32> to vector<64xf32>
    %419 = vector.shape_cast %418 : vector<64xf32> to vector<1x64xf32>
    %420 = arith.addf %416, %419 : vector<1x64xf32>
    %421 = arith.mulf %397, %397 : vector<64x64xf32>
    %cst_263 = arith.constant dense<0.000000e+00> : vector<64xf32>
    %422 = vector.multi_reduction <add>, %421, %cst_263 [0] : vector<64x64xf32> to vector<64xf32>
    %423 = vector.shape_cast %422 : vector<64xf32> to vector<1x64xf32>
    %424 = arith.addf %420, %423 : vector<1x64xf32>
    %425 = arith.mulf %398, %398 : vector<64x64xf32>
    %cst_264 = arith.constant dense<0.000000e+00> : vector<64xf32>
    %426 = vector.multi_reduction <add>, %425, %cst_264 [0] : vector<64x64xf32> to vector<64xf32>
    %427 = vector.shape_cast %426 : vector<64xf32> to vector<1x64xf32>
    %428 = arith.addf %424, %427 : vector<1x64xf32>
    %cst_265 = arith.constant 3.906250e-03 : f32
    %429 = vector.broadcast %cst_265 : f32 to vector<1x64xf32>
    %430 = arith.mulf %411, %429 : vector<1x64xf32>
    %cst_266 = arith.constant 3.906250e-03 : f32
    %431 = vector.broadcast %cst_266 : f32 to vector<1x64xf32>
    %432 = arith.mulf %428, %431 : vector<1x64xf32>
    %433 = arith.mulf %430, %430 : vector<1x64xf32>
    %434 = arith.subf %432, %433 : vector<1x64xf32>
    %cst_267 = arith.constant 0.000000e+00 : f32
    %435 = vector.broadcast %cst_267 : f32 to vector<1x64xf32>
    %436 = arith.maximumf %434, %435 : vector<1x64xf32>
    %c0_268 = arith.constant 0 : index
    %c0_269 = arith.constant 0 : index
    %437 = vector.load %arg19[%c0_268, %c0_269] : memref<1x64xf32, #tpu.memory_space<vmem>>, vector<1x64xf32>
    %cst_270 = arith.constant 9.99999974E-6 : f32
    %438 = vector.broadcast %cst_270 : f32 to vector<1x64xf32>
    %439 = arith.addf %436, %438 : vector<1x64xf32>
    %440 = math.rsqrt %439 : vector<1x64xf32>
    %441 = arith.mulf %437, %440 : vector<1x64xf32>
    %c0_271 = arith.constant 0 : index
    %c0_272 = arith.constant 0 : index
    %442 = vector.load %arg20[%c0_271, %c0_272] : memref<1x64xf32, #tpu.memory_space<vmem>>, vector<1x64xf32>
    %443 = arith.mulf %430, %441 : vector<1x64xf32>
    %444 = arith.subf %442, %443 : vector<1x64xf32>
    %445 = vector.broadcast %441 : vector<1x64xf32> to vector<64x64xf32>
    %446 = arith.mulf %383, %445 : vector<64x64xf32>
    %447 = vector.broadcast %444 : vector<1x64xf32> to vector<64x64xf32>
    %448 = arith.addf %446, %447 : vector<64x64xf32>
    %cst_273 = arith.constant 0.000000e+00 : f32
    %449 = vector.broadcast %cst_273 : f32 to vector<64x64xf32>
    %450 = arith.cmpf oge, %448, %449 : vector<64x64xf32>
    %cst_274 = arith.constant 0.00999999977 : f32
    %451 = vector.broadcast %cst_274 : f32 to vector<64x64xf32>
    %452 = arith.mulf %451, %448 : vector<64x64xf32>
    %453 = arith.select %450, %448, %452 : vector<64x64xi1>, vector<64x64xf32>
    %454 = vector.broadcast %441 : vector<1x64xf32> to vector<64x64xf32>
    %455 = arith.mulf %384, %454 : vector<64x64xf32>
    %456 = vector.broadcast %444 : vector<1x64xf32> to vector<64x64xf32>
    %457 = arith.addf %455, %456 : vector<64x64xf32>
    %cst_275 = arith.constant 0.000000e+00 : f32
    %458 = vector.broadcast %cst_275 : f32 to vector<64x64xf32>
    %459 = arith.cmpf oge, %457, %458 : vector<64x64xf32>
    %cst_276 = arith.constant 0.00999999977 : f32
    %460 = vector.broadcast %cst_276 : f32 to vector<64x64xf32>
    %461 = arith.mulf %460, %457 : vector<64x64xf32>
    %462 = arith.select %459, %457, %461 : vector<64x64xi1>, vector<64x64xf32>
    %463 = vector.broadcast %441 : vector<1x64xf32> to vector<64x64xf32>
    %464 = arith.mulf %397, %463 : vector<64x64xf32>
    %465 = vector.broadcast %444 : vector<1x64xf32> to vector<64x64xf32>
    %466 = arith.addf %464, %465 : vector<64x64xf32>
    %cst_277 = arith.constant 0.000000e+00 : f32
    %467 = vector.broadcast %cst_277 : f32 to vector<64x64xf32>
    %468 = arith.cmpf oge, %466, %467 : vector<64x64xf32>
    %cst_278 = arith.constant 0.00999999977 : f32
    %469 = vector.broadcast %cst_278 : f32 to vector<64x64xf32>
    %470 = arith.mulf %469, %466 : vector<64x64xf32>
    %471 = arith.select %468, %466, %470 : vector<64x64xi1>, vector<64x64xf32>
    %472 = vector.broadcast %441 : vector<1x64xf32> to vector<64x64xf32>
    %473 = arith.mulf %398, %472 : vector<64x64xf32>
    %474 = vector.broadcast %444 : vector<1x64xf32> to vector<64x64xf32>
    %475 = arith.addf %473, %474 : vector<64x64xf32>
    %cst_279 = arith.constant 0.000000e+00 : f32
    %476 = vector.broadcast %cst_279 : f32 to vector<64x64xf32>
    %477 = arith.cmpf oge, %475, %476 : vector<64x64xf32>
    %cst_280 = arith.constant 0.00999999977 : f32
    %478 = vector.broadcast %cst_280 : f32 to vector<64x64xf32>
    %479 = arith.mulf %478, %475 : vector<64x64xf32>
    %480 = arith.select %477, %475, %479 : vector<64x64xi1>, vector<64x64xf32>
    %c0_281 = arith.constant 0 : index
    %c0_282 = arith.constant 0 : index
    %481 = vector.load %arg24[%c0_281, %c0_282] : memref<72x768xf32, #tpu.memory_space<vmem>>, vector<64x64xf32>
    tpu.vector_store %arg24[%c0_281, %c0_282], %453 {strides = array<i32>} : memref<72x768xf32, #tpu.memory_space<vmem>>, vector<64x64xf32>,
    %c0_283 = arith.constant 0 : index
    %c64_284 = arith.constant 64 : index
    %482 = vector.load %arg24[%c0_283, %c64_284] : memref<72x768xf32, #tpu.memory_space<vmem>>, vector<64x64xf32>
    tpu.vector_store %arg24[%c0_283, %c64_284], %462 {strides = array<i32>} : memref<72x768xf32, #tpu.memory_space<vmem>>, vector<64x64xf32>,
    %c0_285 = arith.constant 0 : index
    %c0_286 = arith.constant 0 : index
    %483 = vector.load %arg24[%c0_285, %c0_286] : memref<72x768xf32, #tpu.memory_space<vmem>>, vector<64x128xf32>
    %484 = arith.truncf %483 : vector<64x128xf32> to vector<64x128xbf16>
    %c0_287 = arith.constant 0 : index
    %c0_288 = arith.constant 0 : index
    %485 = vector.load %arg21[%c0_287, %c0_288] : memref<128x256xbf16, #tpu.memory_space<vmem>>, vector<128x256xbf16>
    %cst_289 = arith.constant dense<0.000000e+00> : vector<64x256xf32>
    %486 = tpu.matmul %484, %485, %cst_289 {dimension_numbers = #tpu.dot_dimension_numbers<[1], [0], [0], [1], [0, 0, 1, 1], [], []>} : vector<64x128xbf16>, vector<128x256xbf16>, vector<64x256xf32> -> vector<64x256xf32>
    %487 = vector.extract_strided_slice %486 {offsets = [0, 0], sizes = [64, 128], strides = [1, 1]} : vector<64x256xf32> to vector<64x128xf32>
    %488 = vector.extract_strided_slice %486 {offsets = [0, 128], sizes = [64, 128], strides = [1, 1]} : vector<64x256xf32> to vector<64x128xf32>
    %c0_290 = arith.constant 0 : index
    %c0_291 = arith.constant 0 : index
    %489 = vector.load %arg24[%c0_290, %c0_291] : memref<72x768xf32, #tpu.memory_space<vmem>>, vector<64x64xf32>
    tpu.vector_store %arg24[%c0_290, %c0_291], %462 {strides = array<i32>} : memref<72x768xf32, #tpu.memory_space<vmem>>, vector<64x64xf32>,
    %c0_292 = arith.constant 0 : index
    %c64_293 = arith.constant 64 : index
    %490 = vector.load %arg24[%c0_292, %c64_293] : memref<72x768xf32, #tpu.memory_space<vmem>>, vector<64x64xf32>
    tpu.vector_store %arg24[%c0_292, %c64_293], %471 {strides = array<i32>} : memref<72x768xf32, #tpu.memory_space<vmem>>, vector<64x64xf32>,
    %c0_294 = arith.constant 0 : index
    %c0_295 = arith.constant 0 : index
    %491 = vector.load %arg24[%c0_294, %c0_295] : memref<72x768xf32, #tpu.memory_space<vmem>>, vector<64x128xf32>
    %492 = arith.truncf %491 : vector<64x128xf32> to vector<64x128xbf16>
    %c0_296 = arith.constant 0 : index
    %c0_297 = arith.constant 0 : index
    %493 = vector.load %arg21[%c0_296, %c0_297] : memref<128x256xbf16, #tpu.memory_space<vmem>>, vector<128x256xbf16>
    %cst_298 = arith.constant dense<0.000000e+00> : vector<64x256xf32>
    %494 = tpu.matmul %492, %493, %cst_298 {dimension_numbers = #tpu.dot_dimension_numbers<[1], [0], [0], [1], [0, 0, 1, 1], [], []>} : vector<64x128xbf16>, vector<128x256xbf16>, vector<64x256xf32> -> vector<64x256xf32>
    %495 = vector.extract_strided_slice %494 {offsets = [0, 0], sizes = [64, 128], strides = [1, 1]} : vector<64x256xf32> to vector<64x128xf32>
    %496 = vector.extract_strided_slice %494 {offsets = [0, 128], sizes = [64, 128], strides = [1, 1]} : vector<64x256xf32> to vector<64x128xf32>
    %c0_299 = arith.constant 0 : index
    %c0_300 = arith.constant 0 : index
    %497 = vector.load %arg24[%c0_299, %c0_300] : memref<72x768xf32, #tpu.memory_space<vmem>>, vector<64x64xf32>
    tpu.vector_store %arg24[%c0_299, %c0_300], %471 {strides = array<i32>} : memref<72x768xf32, #tpu.memory_space<vmem>>, vector<64x64xf32>,
    %c0_301 = arith.constant 0 : index
    %c64_302 = arith.constant 64 : index
    %498 = vector.load %arg24[%c0_301, %c64_302] : memref<72x768xf32, #tpu.memory_space<vmem>>, vector<64x64xf32>
    tpu.vector_store %arg24[%c0_301, %c64_302], %480 {strides = array<i32>} : memref<72x768xf32, #tpu.memory_space<vmem>>, vector<64x64xf32>,
    %c0_303 = arith.constant 0 : index
    %c0_304 = arith.constant 0 : index
    %499 = vector.load %arg24[%c0_303, %c0_304] : memref<72x768xf32, #tpu.memory_space<vmem>>, vector<64x128xf32>
    %500 = arith.truncf %499 : vector<64x128xf32> to vector<64x128xbf16>
    %c0_305 = arith.constant 0 : index
    %c0_306 = arith.constant 0 : index
    %501 = vector.load %arg21[%c0_305, %c0_306] : memref<128x256xbf16, #tpu.memory_space<vmem>>, vector<128x256xbf16>
    %cst_307 = arith.constant dense<0.000000e+00> : vector<64x256xf32>
    %502 = tpu.matmul %500, %501, %cst_307 {dimension_numbers = #tpu.dot_dimension_numbers<[1], [0], [0], [1], [0, 0, 1, 1], [], []>} : vector<64x128xbf16>, vector<128x256xbf16>, vector<64x256xf32> -> vector<64x256xf32>
    %503 = vector.extract_strided_slice %502 {offsets = [0, 0], sizes = [64, 128], strides = [1, 1]} : vector<64x256xf32> to vector<64x128xf32>
    %504 = vector.extract_strided_slice %502 {offsets = [0, 128], sizes = [64, 128], strides = [1, 1]} : vector<64x256xf32> to vector<64x128xf32>
    %c0_308 = arith.constant 0 : index
    %c0_309 = arith.constant 0 : index
    %505 = vector.load %arg25[%c0_308, %c0_309] : memref<72x256xf32, #tpu.memory_space<vmem>>, vector<64x64xf32>
    tpu.vector_store %arg25[%c0_308, %c0_309], %453 {strides = array<i32>} : memref<72x256xf32, #tpu.memory_space<vmem>>, vector<64x64xf32>,
    %c1_310 = arith.constant 1 : index
    %c0_311 = arith.constant 0 : index
    %506 = vector.load %arg25[%c1_310, %c0_311] : memref<72x256xf32, #tpu.memory_space<vmem>>, vector<64x64xf32>
    %cst_312 = arith.constant 0.000000e+00 : f32
    %507 = vector.shape_cast %5 : vector<64x1xi1> to vector<64x1xi1>
    %508 = vector.broadcast %507 : vector<64x1xi1> to vector<64x64xi1>
    %509 = vector.broadcast %cst_312 : f32 to vector<64x64xf32>
    %510 = arith.select %508, %506, %509 : vector<64x64xi1>, vector<64x64xf32>
    %c0_313 = arith.constant 0 : index
    %c0_314 = arith.constant 0 : index
    %511 = vector.load %arg24[%c0_313, %c0_314] : memref<72x768xf32, #tpu.memory_space<vmem>>, vector<64x64xf32>
    tpu.vector_store %arg24[%c0_313, %c0_314], %480 {strides = array<i32>} : memref<72x768xf32, #tpu.memory_space<vmem>>, vector<64x64xf32>,
    %c0_315 = arith.constant 0 : index
    %c64_316 = arith.constant 64 : index
    %512 = vector.load %arg24[%c0_315, %c64_316] : memref<72x768xf32, #tpu.memory_space<vmem>>, vector<64x64xf32>
    tpu.vector_store %arg24[%c0_315, %c64_316], %510 {strides = array<i32>} : memref<72x768xf32, #tpu.memory_space<vmem>>, vector<64x64xf32>,
    %c0_317 = arith.constant 0 : index
    %c0_318 = arith.constant 0 : index
    %513 = vector.load %arg24[%c0_317, %c0_318] : memref<72x768xf32, #tpu.memory_space<vmem>>, vector<64x128xf32>
    %514 = arith.truncf %513 : vector<64x128xf32> to vector<64x128xbf16>
    %c0_319 = arith.constant 0 : index
    %c0_320 = arith.constant 0 : index
    %515 = vector.load %arg21[%c0_319, %c0_320] : memref<128x256xbf16, #tpu.memory_space<vmem>>, vector<128x256xbf16>
    %cst_321 = arith.constant dense<0.000000e+00> : vector<64x256xf32>
    %516 = tpu.matmul %514, %515, %cst_321 {dimension_numbers = #tpu.dot_dimension_numbers<[1], [0], [0], [1], [0, 0, 1, 1], [], []>} : vector<64x128xbf16>, vector<128x256xbf16>, vector<64x256xf32> -> vector<64x256xf32>
    %517 = vector.extract_strided_slice %516 {offsets = [0, 0], sizes = [64, 128], strides = [1, 1]} : vector<64x256xf32> to vector<64x128xf32>
    %518 = vector.extract_strided_slice %516 {offsets = [0, 128], sizes = [64, 128], strides = [1, 1]} : vector<64x256xf32> to vector<64x128xf32>
    %c0_322 = arith.constant 0 : index
    %c0_323 = arith.constant 0 : index
    %519 = vector.load %arg22[%c0_322, %c0_323] : memref<1x128xf32, #tpu.memory_space<vmem>>, vector<1x128xf32>
    %520 = vector.broadcast %519 : vector<1x128xf32> to vector<64x128xf32>
    %521 = arith.addf %487, %520 : vector<64x128xf32>
    %c0_324 = arith.constant 0 : index
    %c0_325 = arith.constant 0 : index
    %c0_326 = arith.constant 0 : index
    %522 = vector.load %arg23[%c0_324, %c0_325, %c0_326] : memref<8x64x128xf32, #tpu.memory_space<vmem>>, vector<1x64x128xf32>
    %523 = vector.shape_cast %522 : vector<1x64x128xf32> to vector<64x128xf32>
    %524 = vector.shape_cast %521 : vector<64x128xf32> to vector<1x64x128xf32>
    tpu.vector_store %arg23[%c0_324, %c0_325, %c0_326], %524 {strides = array<i32>} : memref<8x64x128xf32, #tpu.memory_space<vmem>>, vector<1x64x128xf32>,
    %525 = vector.broadcast %519 : vector<1x128xf32> to vector<64x128xf32>
    %526 = arith.addf %488, %525 : vector<64x128xf32>
    %c1_327 = arith.constant 1 : index
    %c0_328 = arith.constant 0 : index
    %c0_329 = arith.constant 0 : index
    %527 = vector.load %arg23[%c1_327, %c0_328, %c0_329] : memref<8x64x128xf32, #tpu.memory_space<vmem>>, vector<1x64x128xf32>
    %528 = vector.shape_cast %527 : vector<1x64x128xf32> to vector<64x128xf32>
    %529 = vector.shape_cast %526 : vector<64x128xf32> to vector<1x64x128xf32>
    tpu.vector_store %arg23[%c1_327, %c0_328, %c0_329], %529 {strides = array<i32>} : memref<8x64x128xf32, #tpu.memory_space<vmem>>, vector<1x64x128xf32>,
    %530 = vector.broadcast %519 : vector<1x128xf32> to vector<64x128xf32>
    %531 = arith.addf %495, %530 : vector<64x128xf32>
    %c2_330 = arith.constant 2 : index
    %c0_331 = arith.constant 0 : index
    %c0_332 = arith.constant 0 : index
    %532 = vector.load %arg23[%c2_330, %c0_331, %c0_332] : memref<8x64x128xf32, #tpu.memory_space<vmem>>, vector<1x64x128xf32>
    %533 = vector.shape_cast %532 : vector<1x64x128xf32> to vector<64x128xf32>
    %534 = vector.shape_cast %531 : vector<64x128xf32> to vector<1x64x128xf32>
    tpu.vector_store %arg23[%c2_330, %c0_331, %c0_332], %534 {strides = array<i32>} : memref<8x64x128xf32, #tpu.memory_space<vmem>>, vector<1x64x128xf32>,
    %535 = vector.broadcast %519 : vector<1x128xf32> to vector<64x128xf32>
    %536 = arith.addf %496, %535 : vector<64x128xf32>
    %c3_333 = arith.constant 3 : index
    %c0_334 = arith.constant 0 : index
    %c0_335 = arith.constant 0 : index
    %537 = vector.load %arg23[%c3_333, %c0_334, %c0_335] : memref<8x64x128xf32, #tpu.memory_space<vmem>>, vector<1x64x128xf32>
    %538 = vector.shape_cast %537 : vector<1x64x128xf32> to vector<64x128xf32>
    %539 = vector.shape_cast %536 : vector<64x128xf32> to vector<1x64x128xf32>
    tpu.vector_store %arg23[%c3_333, %c0_334, %c0_335], %539 {strides = array<i32>} : memref<8x64x128xf32, #tpu.memory_space<vmem>>, vector<1x64x128xf32>,
    %540 = vector.broadcast %519 : vector<1x128xf32> to vector<64x128xf32>
    %541 = arith.addf %503, %540 : vector<64x128xf32>
    %c4_336 = arith.constant 4 : index
    %c0_337 = arith.constant 0 : index
    %c0_338 = arith.constant 0 : index
    %542 = vector.load %arg23[%c4_336, %c0_337, %c0_338] : memref<8x64x128xf32, #tpu.memory_space<vmem>>, vector<1x64x128xf32>
    %543 = vector.shape_cast %542 : vector<1x64x128xf32> to vector<64x128xf32>
    %544 = vector.shape_cast %541 : vector<64x128xf32> to vector<1x64x128xf32>
    tpu.vector_store %arg23[%c4_336, %c0_337, %c0_338], %544 {strides = array<i32>} : memref<8x64x128xf32, #tpu.memory_space<vmem>>, vector<1x64x128xf32>,
    %545 = vector.broadcast %519 : vector<1x128xf32> to vector<64x128xf32>
    %546 = arith.addf %504, %545 : vector<64x128xf32>
    %c5_339 = arith.constant 5 : index
    %c0_340 = arith.constant 0 : index
    %c0_341 = arith.constant 0 : index
    %547 = vector.load %arg23[%c5_339, %c0_340, %c0_341] : memref<8x64x128xf32, #tpu.memory_space<vmem>>, vector<1x64x128xf32>
    %548 = vector.shape_cast %547 : vector<1x64x128xf32> to vector<64x128xf32>
    %549 = vector.shape_cast %546 : vector<64x128xf32> to vector<1x64x128xf32>
    tpu.vector_store %arg23[%c5_339, %c0_340, %c0_341], %549 {strides = array<i32>} : memref<8x64x128xf32, #tpu.memory_space<vmem>>, vector<1x64x128xf32>,
    %550 = vector.broadcast %519 : vector<1x128xf32> to vector<64x128xf32>
    %551 = arith.addf %517, %550 : vector<64x128xf32>
    %c6_342 = arith.constant 6 : index
    %c0_343 = arith.constant 0 : index
    %c0_344 = arith.constant 0 : index
    %552 = vector.load %arg23[%c6_342, %c0_343, %c0_344] : memref<8x64x128xf32, #tpu.memory_space<vmem>>, vector<1x64x128xf32>
    %553 = vector.shape_cast %552 : vector<1x64x128xf32> to vector<64x128xf32>
    %554 = vector.shape_cast %551 : vector<64x128xf32> to vector<1x64x128xf32>
    tpu.vector_store %arg23[%c6_342, %c0_343, %c0_344], %554 {strides = array<i32>} : memref<8x64x128xf32, #tpu.memory_space<vmem>>, vector<1x64x128xf32>,
    %555 = vector.broadcast %519 : vector<1x128xf32> to vector<64x128xf32>
    %556 = arith.addf %518, %555 : vector<64x128xf32>
    %c7_345 = arith.constant 7 : index
    %c0_346 = arith.constant 0 : index
    %c0_347 = arith.constant 0 : index
    %557 = vector.load %arg23[%c7_345, %c0_346, %c0_347] : memref<8x64x128xf32, #tpu.memory_space<vmem>>, vector<1x64x128xf32>
    %558 = vector.shape_cast %557 : vector<1x64x128xf32> to vector<64x128xf32>
    %559 = vector.shape_cast %556 : vector<64x128xf32> to vector<1x64x128xf32>
    tpu.vector_store %arg23[%c7_345, %c0_346, %c0_347], %559 {strides = array<i32>} : memref<8x64x128xf32, #tpu.memory_space<vmem>>, vector<1x64x128xf32>,
    return
  }
}

</mosaic_0001>

<bundles_post_ra>
// kernel: g_net_forward.1
= control target key start
LH: loop header
LB: loop body
LE: loop exit
PB: predicated region body
PF: predicated region fallthrough
CT: control target
= control target key end

     0   :  { %s13231_s0 = inlined_call_operand.hbm [shape: f32[8,64,256], index: 0, kind: input, shape index: {}]   ;;  %s13232_s1 = inlined_call_operand.hbm [shape: f32[64,1], index: 1, kind: input, shape index: {}]   ;;  %s13233_s2 = inlined_call_operand.hbm [shape: f32[64,1], index: 2, kind: input, shape index: {}]   ;;  %s13234_s3 = inlined_call_operand.hbm [shape: bf16[768,128], index: 3, kind: input, shape index: {}]   ;;  %s13235_s4 = inlined_call_operand.hbm [shape: f32[1,128], index: 4, kind: input, shape index: {}]   ;;  %s13236_s5 = inlined_call_operand.hbm [shape: f32[1,128], index: 5, kind: input, shape index: {}]   ;;  %s13237_s6 = inlined_call_operand.hbm [shape: bf16[384,64], index: 6, kind: input, shape index: {}]   ;;  %s13238_s7 = inlined_call_operand.hbm [shape: f32[1,64], index: 7, kind: input, shape index: {}]   ;;  %s13239_s8 = inlined_call_operand.hbm [shape: f32[1,64], index: 8, kind: input, shape index: {}]   ;;  %s13240_s9 = inlined_call_operand.hbm [shape: bf16[192,32], index: 9, kind: input, shape index: {}]   ;;  %s13241_s10 = inlined_call_operand.hbm [shape: f32[1,32], index: 10, kind: input, shape index: {}]   ;;  %s13242_s11 = inlined_call_operand.hbm [shape: f32[1,32], index: 11, kind: input, shape index: {}]   ;;  %s13243_s12 = inlined_call_operand.hbm [shape: bf16[48,16], index: 12, kind: input, shape index: {}]   ;;  %s13244_s13 = inlined_call_operand.hbm [shape: f32[1,16], index: 13, kind: input, shape index: {}]   ;;  %s13245_s14 = inlined_call_operand.hbm [shape: f32[1,16], index: 14, kind: input, shape index: {}]   ;;  %s13246_s15 = inlined_call_operand.hbm [shape: bf16[32,64], index: 15, kind: input, shape index: {}]   ;;  %s13247_s16 = inlined_call_operand.hbm [shape: f32[1,32], index: 16, kind: input, shape index: {}]   ;;  %s13248_s17 = inlined_call_operand.hbm [shape: f32[1,32], index: 17, kind: input, shape index: {}]   ;;  %s13249_s18 = inlined_call_operand.hbm [shape: bf16[64,128], index: 18, kind: input, shape index: {}]   ;;  %s13250_s19 = inlined_call_operand.hbm [shape: f32[1,64], index: 19, kind: input, shape index: {}]   ;;  %s13251_s20 = inlined_call_operand.hbm [shape: f32[1,64], index: 20, kind: input, shape index: {}]   ;;  %s13252_s21 = inlined_call_operand.hbm [shape: bf16[128,256], index: 21, kind: input, shape index: {}]   ;;  %s13253_s22 = inlined_call_operand.hbm [shape: f32[1,128], index: 22, kind: input, shape index: {}]   ;;  %s13254_s23 = inlined_call_operand.hbm [shape: f32[8,64,128], index: 23, kind: output, shape index: {}]  }
   0x1   :  { %13319 = sst [smem:[#allocation68_spill]] %s13231_s0 }
   0x2   :  { %13320 = sst [smem:[#allocation69_spill]] %s13232_s1 }
   0x3   :  { %13321 = sst [smem:[#allocation70_spill]] %s13233_s2 }
   0x4   :  { %13322 = sst [smem:[#allocation71_spill]] %s13234_s3 }
   0x5   :  { %13323 = sst [smem:[#allocation72_spill]] %s13235_s4 }
   0x6   :  { %13324 = sst [smem:[#allocation73_spill]] %s13236_s5 }
   0x7   :  { %13325 = sst [smem:[#allocation74_spill]] %s13237_s6 }
   0x8   :  { %13326 = sst [smem:[#allocation75_spill]] %s13238_s7 }
   0x9   :  { %13327 = sst [smem:[#allocation76_spill]] %s13251_s20 }
   0xa   :  { %13328 = sst [smem:[#allocation77_spill]] %s13253_s22 }
   0xb   :  { %13329 = sst [smem:[#allocation78_spill]] %s13254_s23 }
   0xc   :  { %28 = vsyncpa [#allocation5], 0 }
   0xd   :  { %29 = vsyncpa [#allocation8], 0 }
   0xe   :  { %30 = vsyncpa [#allocation11], 0 }
   0xf   :  { %31 = vsyncpa [#allocation14], 0 }
  0x10   :  { %32 = vsyncpa [#allocation17], 0 }
  0x11   :  { %33 = vsyncpa [#allocation20], 0 }
  0x12   :  { %34 = vsyncpa [#allocation23], 0 }
  0x13   :  { %35 = vsyncpa [#allocation26], 0 }
  0x14   :  { %36 = vsyncpa [#allocation29], 0 }
  0x15   :  { %37 = vsyncpa [#allocation32], 0 }
  0x16   :  { %38 = vsyncpa [#allocation35], 0 }
  0x17   :  { %39 = vsyncpa [#allocation38], 0 }
  0x18   :  { %40 = vsyncpa [#allocation6], 0  ;;  %s10196_s4 = smov [#allocation7]   ;;  %s13330_s5 = sld [smem:[#allocation69_spill]] }
  0x19   :  { %s58_s30 = sshll.u32 %s10196_s4, 4  ;;  %s59_s30 = int_to_ptr.vmem [resolvable:$true] %s58_s30 }
  0x1e   :  { %s9642_s1 = scalar_lea.hbm %s13330_s5, 1024 }
  0x1f   :  { %p9643_p0 = scmp.ne.s32.totalorder %s13330_s5, %s9642_s1  ;;  %p9646_p1 = scmp.lt.u32.totalorder %s9642_s1, %s13330_s5 }
  0x21   :  { %p9648_p2 = pnand %p9646_p1, %p9643_p0 }
  0x23   :  { %9651 = shalt.err (!%p9648_p2)
}
  0x24   :  { %s9652_s7 = scalar_lea.vmem %s59_s30, 1024  ;;  %p9657_p4 = scmp.lt.s32.totalorder %s59_s30, %s59_s30 }
  0x25   :  { %p9653_p3 = scmp.ne.s32.totalorder %s59_s30, %s9652_s7  ;;  %p9658_p5 = scmp.lt.s32.totalorder %s9652_s7, %s9652_s7 }
  0x27   :  { %p9659_p6 = por %p9658_p5, %p9657_p4 }
  0x29   :  { %p9660_p7 = pnand %p9659_p6, %p9653_p3 }
  0x2b   :  { %9663 = shalt.err (!%p9660_p7)
}
  0x2c   :  { %s13265_s28 = smov 128   ;;  %s13267_s29 = smov 8  }
  0x2d   :  { %64 = dma.hbm_to_vmem [thread:$0]  %s13330_s5, 1024, %s59_s30, [#allocation8], %s13265_s28, %s13265_s28, %s13267_s29  }
  0x2e   :  { %s10199_s4 = smov [#allocation10]   ;;  %s13331_s26 = sld [smem:[#allocation71_spill]] }
  0x2f   :  { %s82_s24 = sshll.u32 %s10199_s4, 4  ;;  %s83_s24 = int_to_ptr.vmem [resolvable:$true] %s82_s24 }
  0x34   :  { %s9664_s2 = scalar_lea.hbm %s13331_s26, 6144 }
  0x35   :  { %p9665_p8 = scmp.ne.s32.totalorder %s13331_s26, %s9664_s2  ;;  %p9668_p9 = scmp.lt.u32.totalorder %s9664_s2, %s13331_s26 }
  0x37   :  { %p9670_p10 = pnand %p9668_p9, %p9665_p8 }
  0x39   :  { %9673 = shalt.err (!%p9670_p10)
}
  0x3a   :  { %s9674_s22 = scalar_lea.vmem %s83_s24, 6144  ;;  %p9679_p12 = scmp.lt.s32.totalorder %s83_s24, %s83_s24 }
  0x3b   :  { %p9675_p11 = scmp.ne.s32.totalorder %s83_s24, %s9674_s22  ;;  %p9680_p13 = scmp.lt.s32.totalorder %s9674_s22, %s9674_s22 }
  0x3d   :  { %p9681_p0 = por %p9680_p13, %p9679_p12 }
  0x3f   :  { %p9682_p1 = pnand %p9681_p0, %p9675_p11 }
  0x41   :  { %9685 = shalt.err (!%p9682_p1)
}
  0x42   :  { %s10200_s30 = smov 64   ;;  %s10201_s5 = smov 4  }
  0x43   :  { %88 = dma.hbm_to_vmem [thread:$0]  %s13331_s26, 6144, %s83_s24, [#allocation11], %s10200_s30, %s10200_s30, %s10201_s5  }
  0x44   :  { %s10202_s23 = smov [#allocation13]   ;;  %s10203_s25 = smov [#allocation16]  }
  0x45   :  { %s105_s4 = sshll.u32 %s10202_s23, 4  ;;  %s127_s1 = sshll.u32 %s10203_s25, 4  ;;  %s106_s4 = int_to_ptr.vmem [resolvable:$true] %s105_s4  ;;  %s128_s1 = int_to_ptr.vmem [resolvable:$true] %s127_s1 }
  0x46   :  { %s13332_s6 = sld [smem:[#allocation73_spill]] }
  0x4c   :  { %s9686_s27 = scalar_lea.hbm %s13332_s6, 16 }
  0x4d   :  { %p9687_p2 = scmp.ne.s32.totalorder %s13332_s6, %s9686_s27  ;;  %p9690_p3 = scmp.lt.u32.totalorder %s9686_s27, %s13332_s6 }
  0x4f   :  { %p9692_p4 = pnand %p9690_p3, %p9687_p2 }
  0x51   :  { %9695 = shalt.err (!%p9692_p4)
}
  0x52   :  { %s9696_s24 = scalar_lea.vmem %s106_s4, 16  ;;  %s9700_s26 = scalar_lea.vmem %s106_s4, 32 }
  0x53   :  { %p9697_p5 = scmp.ne.s32.totalorder %s106_s4, %s9696_s24  ;;  %p9701_p6 = scmp.lt.s32.totalorder %s106_s4, %s106_s4 }
  0x54   :  { %p9702_p7 = scmp.lt.s32.totalorder %s9700_s26, %s9696_s24 }
  0x56   :  { %p9703_p8 = por %p9702_p7, %p9701_p6 }
  0x58   :  { %p9704_p9 = pnand %p9703_p8, %p9697_p5 }
  0x5a   :  { %9707 = shalt.err (!%p9704_p9)
}
  0x5b   :  { %108 = dma.hbm_to_vmem [thread:$0]  %s13332_s6, 16, %s106_s4, [#allocation14]  }
  0x5c   :  { %s13333_s25 = sld [smem:[#allocation75_spill]] }
  0x62   :  { %s9708_s2 = scalar_lea.hbm %s13333_s25, 16 }
  0x63   :  { %p9709_p10 = scmp.ne.s32.totalorder %s13333_s25, %s9708_s2  ;;  %p9712_p11 = scmp.lt.u32.totalorder %s9708_s2, %s13333_s25 }
  0x65   :  { %p9714_p12 = pnand %p9712_p11, %p9709_p10 }
  0x67   :  { %9717 = shalt.err (!%p9714_p12)
}
  0x68   :  { %s9718_s7 = scalar_lea.vmem %s128_s1, 16  ;;  %s9722_s24 = scalar_lea.vmem %s128_s1, 32 }
  0x69   :  { %p9719_p13 = scmp.ne.s32.totalorder %s128_s1, %s9718_s7  ;;  %p9723_p0 = scmp.lt.s32.totalorder %s128_s1, %s128_s1 }
  0x6a   :  { %p9724_p1 = scmp.lt.s32.totalorder %s9722_s24, %s9718_s7 }
  0x6c   :  { %p9725_p2 = por %p9724_p1, %p9723_p0 }
  0x6e   :  { %p9726_p3 = pnand %p9725_p2, %p9719_p13 }
  0x70   :  { %9729 = shalt.err (!%p9726_p3)
}
  0x71   :  { %130 = dma.hbm_to_vmem [thread:$0]  %s13333_s25, 16, %s128_s1, [#allocation17]  }
  0x72   :  { %s10204_s26 = smov [#allocation19]   ;;  %s10205_s0 = smov [#allocation22]  }
  0x73   :  { %s146_s3 = sshll.u32 %s10204_s26, 4  ;;  %s169_s28 = sshll.u32 %s10205_s0, 4  ;;  %s147_s3 = int_to_ptr.vmem [resolvable:$true] %s146_s3  ;;  %s170_s28 = int_to_ptr.vmem [resolvable:$true] %s169_s28 }
  0x74   :  { %s9730_s20 = scalar_lea.hbm %s13240_s9, 1536 }
  0x75   :  { %p9731_p4 = scmp.ne.s32.totalorder %s13240_s9, %s9730_s20  ;;  %p9734_p5 = scmp.lt.u32.totalorder %s9730_s20, %s13240_s9 }
  0x77   :  { %p9736_p6 = pnand %p9734_p5, %p9731_p4 }
  0x79   :  { %9739 = shalt.err (!%p9736_p6)
}
  0x7a   :  { %s9740_s1 = scalar_lea.vmem %s147_s3, 1536  ;;  %p9745_p8 = scmp.lt.s32.totalorder %s147_s3, %s147_s3 }
  0x7b   :  { %p9741_p7 = scmp.ne.s32.totalorder %s147_s3, %s9740_s1  ;;  %p9746_p9 = scmp.lt.s32.totalorder %s9740_s1, %s9740_s1 }
  0x7d   :  { %p9747_p10 = por %p9746_p9, %p9745_p8 }
  0x7f   :  { %p9748_p11 = pnand %p9747_p10, %p9741_p7 }
  0x81   :  { %9751 = shalt.err (!%p9748_p11)
}
  0x82   :  { %152 = dma.hbm_to_vmem [thread:$0]  %s13240_s9, 1536, %s147_s3, [#allocation20], %s10200_s30, %s10200_s30, %s10201_s5  }
  0x83   :  { %s9752_s26 = scalar_lea.hbm %s13242_s11, 16 }
  0x84   :  { %p9753_p12 = scmp.ne.s32.totalorder %s13242_s11, %s9752_s26  ;;  %p9756_p13 = scmp.lt.u32.totalorder %s9752_s26, %s13242_s11 }
  0x86   :  { %p9758_p0 = pnand %p9756_p13, %p9753_p12 }
  0x88   :  { %9761 = shalt.err (!%p9758_p0)
}
  0x89   :  { %s9762_s29 = scalar_lea.vmem %s170_s28, 16  ;;  %s9766_s22 = scalar_lea.vmem %s170_s28, 32 }
  0x8a   :  { %p9763_p1 = scmp.ne.s32.totalorder %s170_s28, %s9762_s29  ;;  %p9767_p2 = scmp.lt.s32.totalorder %s170_s28, %s170_s28 }
  0x8b   :  { %p9768_p3 = scmp.lt.s32.totalorder %s9766_s22, %s9762_s29 }
  0x8d   :  { %p9769_p4 = por %p9768_p3, %p9767_p2 }
  0x8f   :  { %p9770_p5 = pnand %p9769_p4, %p9763_p1 }
  0x91   :  { %9773 = shalt.err (!%p9770_p5)
}
  0x92   :  { %172 = dma.hbm_to_vmem [thread:$0]  %s13242_s11, 16, %s170_s28, [#allocation23]  }
  0x93   :  { %s10206_s27 = smov [#allocation25]   ;;  %s10207_s1 = smov [#allocation28]  }
  0x94   :  { %s191_s7 = sshll.u32 %s10206_s27, 4  ;;  %s210_s25 = sshll.u32 %s10207_s1, 4  ;;  %s192_s7 = int_to_ptr.vmem [resolvable:$true] %s191_s7  ;;  %s10431_s25 = int_to_ptr.vmem [resolvable:$true] %s210_s25 }
  0x95   :  { %s9774_s6 = scalar_lea.hbm %s13244_s13, 16 }
  0x96   :  { %p9775_p6 = scmp.ne.s32.totalorder %s13244_s13, %s9774_s6  ;;  %p9778_p7 = scmp.lt.u32.totalorder %s9774_s6, %s13244_s13 }
  0x98   :  { %p9780_p8 = pnand %p9778_p7, %p9775_p6 }
  0x9a   :  { %9783 = shalt.err (!%p9780_p8)
}
  0x9b   :  { %s9784_s11 = scalar_lea.vmem %s192_s7, 16  ;;  %s9788_s28 = scalar_lea.vmem %s192_s7, 32 }
  0x9c   :  { %p9785_p9 = scmp.ne.s32.totalorder %s192_s7, %s9784_s11  ;;  %p9789_p10 = scmp.lt.s32.totalorder %s192_s7, %s192_s7 }
  0x9d   :  { %p9790_p11 = scmp.lt.s32.totalorder %s9788_s28, %s9784_s11 }
  0x9f   :  { %p9791_p12 = por %p9790_p11, %p9789_p10 }
  0xa1   :  { %p9792_p13 = pnand %p9791_p12, %p9785_p9 }
  0xa3   :  { %9795 = shalt.err (!%p9792_p13)
}
  0xa4   :  { %194 = dma.hbm_to_vmem [thread:$0]  %s13244_s13, 16, %s192_s7, [#allocation26]  }
  0xa5   :  { %s9796_s3 = scalar_lea.hbm %s13246_s15, 256 }
  0xa6   :  { %p9797_p0 = scmp.ne.s32.totalorder %s13246_s15, %s9796_s3  ;;  %p9800_p1 = scmp.lt.u32.totalorder %s9796_s3, %s13246_s15 }
  0xa8   :  { %p9802_p2 = pnand %p9800_p1, %p9797_p0 }
  0xaa   :  { %9805 = shalt.err (!%p9802_p2)
}
  0xab   :  { %s9806_s6 = scalar_lea.vmem %s10431_s25, 256  ;;  %p9811_p4 = scmp.lt.s32.totalorder %s10431_s25, %s10431_s25 }
  0xac   :  { %p9807_p3 = scmp.ne.s32.totalorder %s10431_s25, %s9806_s6  ;;  %p9812_p5 = scmp.lt.s32.totalorder %s9806_s6, %s9806_s6 }
  0xae   :  { %p9813_p6 = por %p9812_p5, %p9811_p4 }
  0xb0   :  { %p9814_p7 = pnand %p9813_p6, %p9807_p3 }
  0xb2   :  { %9817 = shalt.err (!%p9814_p7)
}
  0xb3   :  { %216 = dma.hbm_to_vmem [thread:$0]  %s13246_s15, 256, %s10431_s25, [#allocation29], %s10200_s30, %s10200_s30, %s10201_s5  }
  0xb4   :  { %s10208_s26 = smov [#allocation31]   ;;  %s10209_s23 = smov [#allocation34]  }
  0xb5   :  { %s233_s0 = sshll.u32 %s10208_s26, 4  ;;  %s255_s2 = sshll.u32 %s10209_s23, 4  ;;  %s234_s0 = int_to_ptr.vmem [resolvable:$true] %s233_s0  ;;  %s256_s2 = int_to_ptr.vmem [resolvable:$true] %s255_s2 }
  0xb6   :  { %s9818_s20 = scalar_lea.hbm %s13248_s17, 16 }
  0xb7   :  { %p9819_p8 = scmp.ne.s32.totalorder %s13248_s17, %s9818_s20  ;;  %p9822_p9 = scmp.lt.u32.totalorder %s9818_s20, %s13248_s17 }
  0xb9   :  { %p9824_p10 = pnand %p9822_p9, %p9819_p8 }
  0xbb   :  { %9827 = shalt.err (!%p9824_p10)
}
  0xbc   :  { %s9828_s15 = scalar_lea.vmem %s234_s0, 16  ;;  %s9832_s25 = scalar_lea.vmem %s234_s0, 32 }
  0xbd   :  { %p9829_p11 = scmp.ne.s32.totalorder %s234_s0, %s9828_s15  ;;  %p9833_p12 = scmp.lt.s32.totalorder %s234_s0, %s234_s0 }
  0xbe   :  { %p9834_p13 = scmp.lt.s32.totalorder %s9832_s25, %s9828_s15 }
  0xc0   :  { %p9835_p0 = por %p9834_p13, %p9833_p12 }
  0xc2   :  { %p9836_p1 = pnand %p9835_p0, %p9829_p11 }
  0xc4   :  { %9839 = shalt.err (!%p9836_p1)
}
  0xc5   :  { %236 = dma.hbm_to_vmem [thread:$0]  %s13248_s17, 16, %s234_s0, [#allocation32]  }
  0xc6   :  { %s9840_s6 = scalar_lea.hbm %s13250_s19, 16 }
  0xc7   :  { %p9841_p2 = scmp.ne.s32.totalorder %s13250_s19, %s9840_s6  ;;  %p9844_p3 = scmp.lt.u32.totalorder %s9840_s6, %s13250_s19 }
  0xc9   :  { %p9846_p4 = pnand %p9844_p3, %p9841_p2 }
  0xcb   :  { %9849 = shalt.err (!%p9846_p4)
}
  0xcc   :  { %s9850_s11 = scalar_lea.vmem %s256_s2, 16  ;;  %s9854_s28 = scalar_lea.vmem %s256_s2, 32 }
  0xcd   :  { %p9851_p5 = scmp.ne.s32.totalorder %s256_s2, %s9850_s11  ;;  %p9855_p6 = scmp.lt.s32.totalorder %s256_s2, %s256_s2 }
  0xce   :  { %p9856_p7 = scmp.lt.s32.totalorder %s9854_s28, %s9850_s11 }
  0xd0   :  { %p9857_p8 = por %p9856_p7, %p9855_p6 }
  0xd2   :  { %p9858_p9 = pnand %p9857_p8, %p9851_p5 }
  0xd4   :  { %9861 = shalt.err (!%p9858_p9)
}
  0xd5   :  { %258 = dma.hbm_to_vmem [thread:$0]  %s13250_s19, 16, %s256_s2, [#allocation35]  }
  0xd6   :  { %s10210_s20 = smov [#allocation37]   ;;  %s10211_s22 = smov [#allocation4]  }
  0xd7   :  { %s274_s29 = sshll.u32 %s10210_s20, 4  ;;  %s46_s9 = sshll.u32 %s10211_s22, 4  ;;  %s275_s29 = int_to_ptr.vmem [resolvable:$true] %s274_s29  ;;  %s10489_s9 = int_to_ptr.vmem [resolvable:$true] %s46_s9 }
  0xd8   :  { %s9862_s25 = scalar_lea.hbm %s13252_s21, 2048 }
  0xd9   :  { %p9863_p10 = scmp.ne.s32.totalorder %s13252_s21, %s9862_s25  ;;  %p9866_p11 = scmp.lt.u32.totalorder %s9862_s25, %s13252_s21 }
  0xdb   :  { %p9868_p12 = pnand %p9866_p11, %p9863_p10 }
  0xdd   :  { %9871 = shalt.err (!%p9868_p12)
}
  0xde   :  { %s9872_s19 = scalar_lea.vmem %s275_s29, 2048  ;;  %p9877_p0 = scmp.lt.s32.totalorder %s275_s29, %s275_s29 }
  0xdf   :  { %p9873_p13 = scmp.ne.s32.totalorder %s275_s29, %s9872_s19  ;;  %p9878_p1 = scmp.lt.s32.totalorder %s9872_s19, %s9872_s19 }
  0xe1   :  { %p9879_p2 = por %p9878_p1, %p9877_p0 }
  0xe3   :  { %p9880_p3 = pnand %p9879_p2, %p9873_p13 }
  0xe5   :  { %9883 = shalt.err (!%p9880_p3)
}
  0xe6   :  { %s13334_s2 = smov 8   ;;  %s13335_s6 = smov 128  }
  0xe7   :  { %280 = dma.hbm_to_vmem [thread:$0]  %s13252_s21, 2048, %s275_s29, [#allocation38], %s13335_s6, %s13335_s6, %s13334_s2  }
  0xe8   :  { %s13336_s11 = sld [smem:[#allocation68_spill]] }
  0xee   :  { %s9884_s28 = scalar_lea.hbm %s13336_s11, 16384 }
  0xef   :  { %p9885_p4 = scmp.ne.s32.totalorder %s13336_s11, %s9884_s28  ;;  %p9888_p5 = scmp.lt.u32.totalorder %s9884_s28, %s13336_s11 }
  0xf1   :  { %p9890_p6 = pnand %p9888_p5, %p9885_p4 }
  0xf3   :  { %9893 = shalt.err (!%p9890_p6)
}
  0xf4   :  { %s9894_s3 = scalar_lea.vmem %s10489_s9, 16384  ;;  %p9899_p8 = scmp.lt.s32.totalorder %s10489_s9, %s10489_s9 }
  0xf5   :  { %p9895_p7 = scmp.ne.s32.totalorder %s10489_s9, %s9894_s3  ;;  %p9900_p9 = scmp.lt.s32.totalorder %s9894_s3, %s9894_s3 }
  0xf7   :  { %p9901_p10 = por %p9900_p9, %p9899_p8 }
  0xf9   :  { %p9902_p11 = pnand %p9901_p10, %p9895_p7 }
  0xfb   :  { %9905 = shalt.err (!%p9902_p11)
}
  0xfc   :  { %s10212_s21 = smov 256   ;;  %s10213_s29 = smov 16  }
  0xfd   :  { %52 = dma.hbm_to_vmem [thread:$0]  %s13336_s11, 16384, %s10489_s9, [#allocation5], %s10212_s21, %s10212_s21, %s10213_s29  }
  0xfe   :  { %s10214_s27 = smov [#allocation9]   ;;  %s10215_s24 = smov [#allocation12]  }
  0xff   :  { %s70_s1 = sshll.u32 %s10214_s27, 4  ;;  %s95_s4 = sshll.u32 %s10215_s24, 4  ;;  %s71_s1 = int_to_ptr.vmem [resolvable:$true] %s70_s1  ;;  %s96_s4 = int_to_ptr.vmem [resolvable:$true] %s95_s4 }
 0x100   :  { %s13337_s7 = sld [smem:[#allocation70_spill]] }
 0x106   :  { %s9906_s26 = scalar_lea.hbm %s13337_s7, 1024 }
 0x107   :  { %p9907_p12 = scmp.ne.s32.totalorder %s13337_s7, %s9906_s26  ;;  %p9910_p13 = scmp.lt.u32.totalorder %s9906_s26, %s13337_s7 }
 0x109   :  { %p9912_p0 = pnand %p9910_p13, %p9907_p12 }
 0x10b   :  { %9915 = shalt.err (!%p9912_p0)
}
 0x10c   :  { %s9916_s9 = scalar_lea.vmem %s71_s1, 1024  ;;  %p9921_p2 = scmp.lt.s32.totalorder %s71_s1, %s71_s1 }
 0x10d   :  { %p9917_p1 = scmp.ne.s32.totalorder %s71_s1, %s9916_s9  ;;  %p9922_p3 = scmp.lt.s32.totalorder %s9916_s9, %s9916_s9 }
 0x10f   :  { %p9923_p4 = por %p9922_p3, %p9921_p2 }
 0x111   :  { %p9924_p5 = pnand %p9923_p4, %p9917_p1 }
 0x113   :  { %9927 = shalt.err (!%p9924_p5)
}
 0x114   :  { %76 = dma.hbm_to_vmem [thread:$0]  %s13337_s7, 1024, %s71_s1, [#allocation8], %s13335_s6, %s13335_s6, %s13334_s2  }
 0x115   :  { %s13338_s21 = sld [smem:[#allocation72_spill]] }
 0x11b   :  { %s9928_s15 = scalar_lea.hbm %s13338_s21, 16 }
 0x11c   :  { %p9929_p6 = scmp.ne.s32.totalorder %s13338_s21, %s9928_s15  ;;  %p9932_p7 = scmp.lt.u32.totalorder %s9928_s15, %s13338_s21 }
 0x11e   :  { %p9934_p8 = pnand %p9932_p7, %p9929_p6 }
 0x120   :  { %9937 = shalt.err (!%p9934_p8)
}
 0x121   :  { %s9938_s13 = scalar_lea.vmem %s96_s4, 16  ;;  %s9942_s26 = scalar_lea.vmem %s96_s4, 32 }
 0x122   :  { %p9939_p9 = scmp.ne.s32.totalorder %s96_s4, %s9938_s13  ;;  %p9943_p10 = scmp.lt.s32.totalorder %s96_s4, %s96_s4 }
 0x123   :  { %p9944_p11 = scmp.lt.s32.totalorder %s9942_s26, %s9938_s13 }
 0x125   :  { %p9945_p12 = por %p9944_p11, %p9943_p10 }
 0x127   :  { %p9946_p13 = pnand %p9945_p12, %p9939_p9 }
 0x129   :  { %9949 = shalt.err (!%p9946_p13)
}
 0x12a   :  { %98 = dma.hbm_to_vmem [thread:$0]  %s13338_s21, 16, %s96_s4, [#allocation11]  }
 0x12b   :  { %s10216_s23 = smov [#allocation15]   ;;  %s10217_s17 = smov [#allocation18]  }
 0x12c   :  { %s114_s28 = sshll.u32 %s10216_s23, 4  ;;  %s137_s0 = sshll.u32 %s10217_s17, 4  ;;  %s115_s28 = int_to_ptr.vmem [resolvable:$true] %s114_s28  ;;  %s138_s0 = int_to_ptr.vmem [resolvable:$true] %s137_s0 }
 0x12d   :  { %s13339_s20 = sld [smem:[#allocation74_spill]] }
 0x133   :  { %s9950_s22 = scalar_lea.hbm %s13339_s20, 3072 }
 0x134   :  { %p9951_p0 = scmp.ne.s32.totalorder %s13339_s20, %s9950_s22  ;;  %p9954_p1 = scmp.lt.u32.totalorder %s9950_s22, %s13339_s20 }
 0x136   :  { %p9956_p2 = pnand %p9954_p1, %p9951_p0 }
 0x138   :  { %9959 = shalt.err (!%p9956_p2)
}
 0x139   :  { %s9960_s4 = scalar_lea.vmem %s115_s28, 3072  ;;  %p9965_p4 = scmp.lt.s32.totalorder %s115_s28, %s115_s28 }
 0x13a   :  { %p9961_p3 = scmp.ne.s32.totalorder %s115_s28, %s9960_s4  ;;  %p9966_p5 = scmp.lt.s32.totalorder %s9960_s4, %s9960_s4 }
 0x13c   :  { %p9967_p6 = por %p9966_p5, %p9965_p4 }
 0x13e   :  { %p9968_p7 = pnand %p9967_p6, %p9961_p3 }
 0x140   :  { %9971 = shalt.err (!%p9968_p7)
}
 0x141   :  { %120 = dma.hbm_to_vmem [thread:$0]  %s13339_s20, 3072, %s115_s28, [#allocation14], %s10200_s30, %s10200_s30, %s10201_s5  }
 0x142   :  { %s9972_s26 = scalar_lea.hbm %s13239_s8, 16 }
 0x143   :  { %p9973_p8 = scmp.ne.s32.totalorder %s13239_s8, %s9972_s26  ;;  %p9976_p9 = scmp.lt.u32.totalorder %s9972_s26, %s13239_s8 }
 0x145   :  { %p9978_p10 = pnand %p9976_p9, %p9973_p8 }
 0x147   :  { %9981 = shalt.err (!%p9978_p10)
}
 0x148   :  { %s9982_s9 = scalar_lea.vmem %s138_s0, 16  ;;  %s9986_s11 = scalar_lea.vmem %s138_s0, 32 }
 0x149   :  { %p9983_p11 = scmp.ne.s32.totalorder %s138_s0, %s9982_s9  ;;  %p9987_p12 = scmp.lt.s32.totalorder %s138_s0, %s138_s0 }
 0x14a   :  { %p9988_p13 = scmp.lt.s32.totalorder %s9986_s11, %s9982_s9 }
 0x14c   :  { %p9989_p0 = por %p9988_p13, %p9987_p12 }
 0x14e   :  { %p9990_p1 = pnand %p9989_p0, %p9983_p11 }
 0x150   :  { %9993 = shalt.err (!%p9990_p1)
}
 0x151   :  { %140 = dma.hbm_to_vmem [thread:$0]  %s13239_s8, 16, %s138_s0, [#allocation17]  }
 0x152   :  { %s10218_s22 = smov [#allocation21]   ;;  %s10219_s15 = smov [#allocation24]  }
 0x153   :  { %s159_s3 = sshll.u32 %s10218_s22, 4  ;;  %s178_s25 = sshll.u32 %s10219_s15, 4  ;;  %s160_s3 = int_to_ptr.vmem [resolvable:$true] %s159_s3  ;;  %s10578_s25 = int_to_ptr.vmem [resolvable:$true] %s178_s25 }
 0x154   :  { %s9994_s21 = scalar_lea.hbm %s13241_s10, 16 }
 0x155   :  { %p9995_p2 = scmp.ne.s32.totalorder %s13241_s10, %s9994_s21  ;;  %p9998_p3 = scmp.lt.u32.totalorder %s9994_s21, %s13241_s10 }
 0x157   :  { %p10000_p4 = pnand %p9998_p3, %p9995_p2 }
 0x159   :  { %10003 = shalt.err (!%p10000_p4)
}
 0x15a   :  { %s10004_s8 = scalar_lea.vmem %s160_s3, 16  ;;  %s10008_s0 = scalar_lea.vmem %s160_s3, 32 }
 0x15b   :  { %p10005_p5 = scmp.ne.s32.totalorder %s160_s3, %s10004_s8  ;;  %p10009_p6 = scmp.lt.s32.totalorder %s160_s3, %s160_s3 }
 0x15c   :  { %p10010_p7 = scmp.lt.s32.totalorder %s10008_s0, %s10004_s8 }
 0x15e   :  { %p10011_p8 = por %p10010_p7, %p10009_p6 }
 0x160   :  { %p10012_p9 = pnand %p10011_p8, %p10005_p5 }
 0x162   :  { %10015 = shalt.err (!%p10012_p9)
}
 0x163   :  { %162 = dma.hbm_to_vmem [thread:$0]  %s13241_s10, 16, %s160_s3, [#allocation20]  }
 0x164   :  { %s10016_s9 = scalar_lea.hbm %s13243_s12, 384 }
 0x165   :  { %p10017_p10 = scmp.ne.s32.totalorder %s13243_s12, %s10016_s9  ;;  %p10020_p11 = scmp.lt.u32.totalorder %s10016_s9, %s13243_s12 }
 0x167   :  { %p10022_p12 = pnand %p10020_p11, %p10017_p10 }
 0x169   :  { %10025 = shalt.err (!%p10022_p12)
}
 0x16a   :  { %s10026_s15 = scalar_lea.vmem %s10578_s25, 384  ;;  %p10031_p0 = scmp.lt.s32.totalorder %s10578_s25, %s10578_s25 }
 0x16b   :  { %p10027_p13 = scmp.ne.s32.totalorder %s10578_s25, %s10026_s15  ;;  %p10032_p1 = scmp.lt.s32.totalorder %s10026_s15, %s10026_s15 }
 0x16d   :  { %p10033_p2 = por %p10032_p1, %p10031_p0 }
 0x16f   :  { %p10034_p3 = pnand %p10033_p2, %p10027_p13 }
 0x171   :  { %10037 = shalt.err (!%p10034_p3)
}
 0x172   :  { %184 = dma.hbm_to_vmem [thread:$0]  %s13243_s12, 384, %s10578_s25, [#allocation23], %s10200_s30, %s10200_s30, %s10201_s5  }
 0x173   :  { %s10220_s27 = smov [#allocation27]   ;;  %s10221_s21 = smov [#allocation30]  }
 0x174   :  { %s201_s4 = sshll.u32 %s10220_s27, 4  ;;  %s223_s24 = sshll.u32 %s10221_s21, 4  ;;  %s202_s4 = int_to_ptr.vmem [resolvable:$true] %s201_s4  ;;  %s224_s24 = int_to_ptr.vmem [resolvable:$true] %s223_s24 }
 0x175   :  { %s10038_s26 = scalar_lea.hbm %s13245_s14, 16 }
 0x176   :  { %p10039_p4 = scmp.ne.s32.totalorder %s13245_s14, %s10038_s26  ;;  %p10042_p5 = scmp.lt.u32.totalorder %s10038_s26, %s13245_s14 }
 0x178   :  { %p10044_p6 = pnand %p10042_p5, %p10039_p4 }
 0x17a   :  { %10047 = shalt.err (!%p10044_p6)
}
 0x17b   :  { %s10048_s12 = scalar_lea.vmem %s202_s4, 16  ;;  %s10052_s25 = scalar_lea.vmem %s202_s4, 32 }
 0x17c   :  { %p10049_p7 = scmp.ne.s32.totalorder %s202_s4, %s10048_s12  ;;  %p10053_p8 = scmp.lt.s32.totalorder %s202_s4, %s202_s4 }
 0x17d   :  { %p10054_p9 = scmp.lt.s32.totalorder %s10052_s25, %s10048_s12 }
 0x17f   :  { %p10055_p10 = por %p10054_p9, %p10053_p8 }
 0x181   :  { %p10056_p11 = pnand %p10055_p10, %p10049_p7 }
 0x183   :  { %10059 = shalt.err (!%p10056_p11)
}
 0x184   :  { %204 = dma.hbm_to_vmem [thread:$0]  %s13245_s14, 16, %s202_s4, [#allocation26]  }
 0x185   :  { %s10060_s28 = scalar_lea.hbm %s13247_s16, 16 }
 0x186   :  { %p10061_p12 = scmp.ne.s32.totalorder %s13247_s16, %s10060_s28  ;;  %p10064_p13 = scmp.lt.u32.totalorder %s10060_s28, %s13247_s16 }
 0x188   :  { %p10066_p0 = pnand %p10064_p13, %p10061_p12 }
 0x18a   :  { %10069 = shalt.err (!%p10066_p0)
}
 0x18b   :  { %s10070_s3 = scalar_lea.vmem %s224_s24, 16  ;;  %s10074_s27 = scalar_lea.vmem %s224_s24, 32 }
 0x18c   :  { %p10071_p1 = scmp.ne.s32.totalorder %s224_s24, %s10070_s3  ;;  %p10075_p2 = scmp.lt.s32.totalorder %s224_s24, %s224_s24 }
 0x18d   :  { %p10076_p3 = scmp.lt.s32.totalorder %s10074_s27, %s10070_s3 }
 0x18f   :  { %p10077_p4 = por %p10076_p3, %p10075_p2 }
 0x191   :  { %p10078_p5 = pnand %p10077_p4, %p10071_p1 }
 0x193   :  { %10081 = shalt.err (!%p10078_p5)
}
 0x194   :  { %226 = dma.hbm_to_vmem [thread:$0]  %s13247_s16, 16, %s224_s24, [#allocation29]  }
 0x195   :  { %s10222_s21 = smov [#allocation33]   ;;  %s10223_s13 = smov [#allocation36]  }
 0x196   :  { %s242_s19 = sshll.u32 %s10222_s21, 4  ;;  %s265_s26 = sshll.u32 %s10223_s13, 4  ;;  %s243_s19 = int_to_ptr.vmem [resolvable:$true] %s242_s19  ;;  %s266_s26 = int_to_ptr.vmem [resolvable:$true] %s265_s26 }
 0x197   :  { %s10082_s1 = scalar_lea.hbm %s13249_s18, 512 }
 0x198   :  { %p10083_p6 = scmp.ne.s32.totalorder %s13249_s18, %s10082_s1  ;;  %p10086_p7 = scmp.lt.u32.totalorder %s10082_s1, %s13249_s18 }
 0x19a   :  { %p10088_p8 = pnand %p10086_p7, %p10083_p6 }
 0x19c   :  { %10091 = shalt.err (!%p10088_p8)
}
 0x19d   :  { %s10092_s16 = scalar_lea.vmem %s243_s19, 512  ;;  %p10097_p10 = scmp.lt.s32.totalorder %s243_s19, %s243_s19 }
 0x19e   :  { %p10093_p9 = scmp.ne.s32.totalorder %s243_s19, %s10092_s16  ;;  %p10098_p11 = scmp.lt.s32.totalorder %s10092_s16, %s10092_s16 }
 0x1a0   :  { %p10099_p12 = por %p10098_p11, %p10097_p10 }
 0x1a2   :  { %p10100_p13 = pnand %p10099_p12, %p10093_p9 }
 0x1a4   :  { %10103 = shalt.err (!%p10100_p13)
}
 0x1a5   :  { %248 = dma.hbm_to_vmem [thread:$0]  %s13249_s18, 512, %s243_s19, [#allocation32], %s10200_s30, %s10200_s30, %s10201_s5  }
 0x1a6   :  { %s13340_s28 = sld [smem:[#allocation76_spill]] }
 0x1ac   :  { %s10104_s20 = scalar_lea.hbm %s13340_s28, 16 }
 0x1ad   :  { %p10105_p0 = scmp.ne.s32.totalorder %s13340_s28, %s10104_s20  ;;  %p10108_p1 = scmp.lt.u32.totalorder %s10104_s20, %s13340_s28 }
 0x1af   :  { %p10110_p2 = pnand %p10108_p1, %p10105_p0 }
 0x1b1   :  { %10113 = shalt.err (!%p10110_p2)
}
 0x1b2   :  { %s10114_s27 = scalar_lea.vmem %s266_s26, 16  ;;  %s10118_s14 = scalar_lea.vmem %s266_s26, 32 }
 0x1b3   :  { %p10115_p3 = scmp.ne.s32.totalorder %s266_s26, %s10114_s27  ;;  %p10119_p4 = scmp.lt.s32.totalorder %s266_s26, %s266_s26 }
 0x1b4   :  { %p10120_p5 = scmp.lt.s32.totalorder %s10118_s14, %s10114_s27 }
 0x1b6   :  { %p10121_p6 = por %p10120_p5, %p10119_p4 }
 0x1b8   :  { %p10122_p7 = pnand %p10121_p6, %p10115_p3 }
 0x1ba   :  { %10125 = shalt.err (!%p10122_p7)
}
 0x1bb   :  { %268 = dma.hbm_to_vmem [thread:$0]  %s13340_s28, 16, %s266_s26, [#allocation35]  }
 0x1bc   :  { %s10224_s4 = smov [#allocation39]   ;;  %s13341_s8 = sld [smem:[#allocation77_spill]] }
 0x1bd   :  { %s287_s21 = sshll.u32 %s10224_s4, 4  ;;  %s288_s21 = int_to_ptr.vmem [resolvable:$true] %s287_s21 }
 0x1c2   :  { %s10126_s0 = scalar_lea.hbm %s13341_s8, 16 }
 0x1c3   :  { %p10127_p8 = scmp.ne.s32.totalorder %s13341_s8, %s10126_s0  ;;  %p10130_p9 = scmp.lt.u32.totalorder %s10126_s0, %s13341_s8 }
 0x1c5   :  { %p10132_p10 = pnand %p10130_p9, %p10127_p8 }
 0x1c7   :  { %10135 = shalt.err (!%p10132_p10)
}
 0x1c8   :  { %s10136_s23 = scalar_lea.vmem %s288_s21, 16  ;;  %s10140_s26 = scalar_lea.vmem %s288_s21, 32 }
 0x1c9   :  { %p10137_p11 = scmp.ne.s32.totalorder %s288_s21, %s10136_s23  ;;  %p10141_p12 = scmp.lt.s32.totalorder %s288_s21, %s288_s21 }
 0x1ca   :  { %p10142_p13 = scmp.lt.s32.totalorder %s10140_s26, %s10136_s23 }
 0x1cc   :  { %p10143_p0 = por %p10142_p13, %p10141_p12 }
 0x1ce   :  { %p10144_p1 = pnand %p10143_p0, %p10137_p11 }
 0x1d0   :  { %10147 = shalt.err (!%p10144_p1)
}
 0x1d1   :  { %290 = dma.hbm_to_vmem [thread:$0]  %s13341_s8, 16, %s288_s21, [#allocation38]  }
 0x1d2   :  { %10170 = dma.done.wait [#allocation5], 16384  }
 0x1d3   :  { %10171 = vsyncadd [#allocation5], 4294950912 }
 0x1d4   :  { %10172 = dma.done.wait [#allocation8], 2048  }
 0x1d5   :  { %10173 = vsyncadd [#allocation8], 4294965248 }
 0x1d6   :  { %10174 = dma.done.wait [#allocation11], 6160  }
 0x1d7   :  { %10175 = vsyncadd [#allocation11], 4294961136 }
 0x1d8   :  { %10176 = dma.done.wait [#allocation14], 3088  }
 0x1d9   :  { %10177 = vsyncadd [#allocation14], 4294964208 }
 0x1da   :  { %10178 = dma.done.wait [#allocation17], 32  }
 0x1db   :  { %10179 = vsyncadd [#allocation17], 4294967264 }
 0x1dc   :  { %10180 = dma.done.wait [#allocation20], 1552  }
 0x1dd   :  { %10181 = vsyncadd [#allocation20], 4294965744 }
 0x1de   :  { %10182 = dma.done.wait [#allocation23], 400  }
 0x1df   :  { %10183 = vsyncadd [#allocation23], 4294966896 }
 0x1e0   :  { %10184 = dma.done.wait [#allocation26], 32  }
 0x1e1   :  { %10185 = vsyncadd [#allocation26], 4294967264 }
 0x1e2   :  { %10186 = dma.done.wait [#allocation29], 272  }
 0x1e3   :  { %10187 = vsyncadd [#allocation29], 4294967024 }
 0x1e4   :  { %10188 = dma.done.wait [#allocation32], 528  }
 0x1e5   :  { %10189 = vsyncadd [#allocation32], 4294966768 }
 0x1e6   :  { %10190 = dma.done.wait [#allocation35], 32  }
 0x1e7   :  { %10191 = vsyncadd [#allocation35], 4294967264 }
 0x1e8   :  { %10192 = dma.done.wait [#allocation38], 2064  }
 0x1e9   :  { %10193 = vsyncadd [#allocation38], 4294965232  ;;  %v13270_v0 = vmov 0   ;;  %v363_v1 = vld [vmem:[#allocation7 + $0x10] sm:$0xff]  ;;  %v361_v2 = vld [vmem:[#allocation7] sm:$0xff]  ;;  %vm13300_vm8 = vcmask 1040384  }
 0x1ea   :  { %9288 = vset.pattern.permute.xlu1 %v13270_v0  ;;  %9287 = vset.pattern.permute.xlu0 %v13270_v0  ;;  %v364_v3 = vld [vmem:[#allocation7 + $0x18] sm:$0xff]  ;;  %vm371_vm0 = vcmp.gt.f32.partialorder %v363_v1, 0.5  ;;  %vm369_vm1 = vcmp.gt.f32.partialorder %v361_v2, 0.5  ;;  %v362_v4 = vld [vmem:[#allocation7 + $0x8] sm:$0xff]  ;;  %v365_v8 = vld [vmem:[#allocation7 + $0x20] sm:$0xff]  ;;  %s10226_s17 = smov 112  }
 0x1eb   :  { %vm372_vm2 = vcmp.gt.f32.partialorder %v364_v3, 0.5  ;;  %v366_v5 = vld [vmem:[#allocation7 + $0x28] sm:$0xff]  ;;  %v564_v6 = vsel %vm371_vm0, 1, %v13270_v0  ;;  %v562_v7 = vsel %vm369_vm1, 1, %v13270_v0  ;;  %vm370_vm3 = vcmp.gt.f32.partialorder %v362_v4, 0.5  ;;  %v368_v9 = vld [vmem:[#allocation7 + $0x38] sm:$0xff] }
 0x1ec   :  { %577 = vperm.xlu1 %9288, %v564_v6   ;;  %571 = vperm.xlu0 %9287, %v562_v7   ;;  %v565_v10 = vsel %vm372_vm2, 1, %v13270_v0  ;;  %v563_v11 = vsel %vm370_vm3, 1, %v13270_v0  ;;  %vm374_vm4 = vcmp.gt.f32.partialorder %v366_v5, 0.5  ;;  %v367_v12 = vld [vmem:[#allocation7 + $0x30] sm:$0xff]  ;;  %vm373_vm5 = vcmp.gt.f32.partialorder %v365_v8, 0.5  ;;  %v9289_v13 = vld [vmem:[#allocation10 + $0x40] sm:$0xff]  }
 0x1ed   :  { %vm376_vm6 = vcmp.gt.f32.partialorder %v368_v9, 0.5  ;;  %v9290_v14 = vld [vmem:[#allocation10 + $0xc0] sm:$0xff]   ;;  %v567_v15 = vsel %vm374_vm4, 1, %v13270_v0  ;;  %v566_v17 = vsel %vm373_vm5, 1, %v13270_v0  ;;  %8518 = vmatprep.subr.bf16.mxu0 %v9289_v13  ;;  %vm375_vm7 = vcmp.gt.f32.partialorder %v367_v12, 0.5  ;;  %v9293_v19 = vld [vmem:[#allocation10 + $0x48] sm:$0xff]  }
 0x1ee   :  { %v9291_v16 = vld [vmem:[#allocation10] sm:$0xff]   ;;  %8558 = vmatprep.subr.bf16.mxu1 %v9290_v14  ;;  %v9294_v20 = vld [vmem:[#allocation10 + $0xc8] sm:$0xff]   ;;  %v569_v21 = vsel %vm376_vm6, 1, %v13270_v0  ;;  %v568_v23 = vsel %vm375_vm7, 1, %v13270_v0  ;;  %v9297_v25 = vld [vmem:[#allocation10 + $0x50] sm:$0xff]   ;;  %s10227_s9 = smov 32  }
 0x1ef   :  { %v9292_v18 = vld [vmem:[#allocation10 + $0x80] sm:$0xff]   ;;  %8519 = vmatpush3.bf16.msra.mxu0 %v9291_v16  ;;  %v9295_v22 = vld [vmem:[#allocation10 + $0x8] sm:$0xff]   ;;  %v9298_v26 = vld [vmem:[#allocation10 + $0xd0] sm:$0xff]  }
 0x1f0   :  { %580 = vperm.xlu1 %9288, %v565_v10   ;;  %574 = vperm.xlu0 %9287, %v563_v11   ;;  %v9296_v24 = vld [vmem:[#allocation10 + $0x88] sm:$0xff]   ;;  %v9299_v27 = vld [vmem:[#allocation10 + $0x10] sm:$0xff]   ;;  %v9301_v29 = vld [vmem:[#allocation10 + $0x58] sm:$0xff]  }
 0x1f1   :  { %8559 = vmatpush3.bf16.msra.mxu1 %v9292_v18  ;;  %8520 = vmatprep.subr.bf16.mxu0 %v9293_v19  ;;  %v9300_v28 = vld [vmem:[#allocation10 + $0x90] sm:$0xff]   ;;  %v9302_v30 = vld [vmem:[#allocation10 + $0xd8] sm:$0xff]   ;;  %v10690_v35 = vld [vmem:[#allocation4 + $0x3a0] sm:$0xff] }
 0x1f2   :  { %8560 = vmatprep.subr.bf16.mxu1 %v9294_v20  ;;  %v9303_v31 = vld [vmem:[#allocation10 + $0x18] sm:$0xff]   ;;  %v10686_v33 = vld [vmem:[#allocation4 + $0x390] sm:$0xff]  ;;  %v10692_v36 = vld [vmem:[#allocation4 + $0x3a8] sm:$0xff]  ;;  %2820 = vst [vmem:[#allocation2 + $0x80] sm:$0xff] %v10690_v35 }
 0x1f3   :  { %8521 = vmatpush3.bf16.msra.mxu0 %v9295_v22  ;;  %v9304_v32 = vld [vmem:[#allocation10 + $0x98] sm:$0xff]   ;;  %v10695_v37 = vld [vmem:[#allocation4 + $0x380] sm:$0xff]  ;;  %2818 = vst [vmem:[#allocation2 + $0x50] sm:$0xff] %v10686_v33  ;;  %533 = vst [vmem:[#allocation3 + $0x38] sm:$0xff] %v10692_v36 }
 0x1f4   :  { %586 = vperm.xlu1 %9288, %v567_v15   ;;  %583 = vperm.xlu0 %9287, %v566_v17   ;;  %v10688_v34 = vld [vmem:[#allocation4 + $0x398] sm:$0xff]  ;;  %v10699_v38 = vld [vmem:[#allocation4 + $0x388] sm:$0xff]  ;;  %2816 = vst [vmem:[#allocation2 + $0x20] sm:$0xff] %v10695_v37  ;;  %v9305_v39 = vld [vmem:[#allocation10 + $0x60] sm:$0xff]  }
 0x1f5   :  { %8561 = vmatpush3.bf16.msra.mxu1 %v9296_v24  ;;  %8522 = vmatprep.subr.bf16.mxu0 %v9297_v25  ;;  %531 = vst [vmem:[#allocation3 + $0x28] sm:$0xff] %v10688_v34  ;;  %529 = vst [vmem:[#allocation3 + $0x18] sm:$0xff] %v10699_v38  ;;  %v9306_v40 = vld [vmem:[#allocation10 + $0xe0] sm:$0xff]   ;;  %v10704_v43 = vld [vmem:[#allocation4 + $0x3b0] sm:$0xff] }
 0x1f6   :  { %8562 = vmatprep.subr.bf16.mxu1 %v9298_v26  ;;  %v9307_v41 = vld [vmem:[#allocation10 + $0x20] sm:$0xff]   ;;  %v10706_v44 = vld [vmem:[#allocation4 + $0x3b8] sm:$0xff]  ;;  %2822 = vst [vmem:[#allocation2 + $0xb0] sm:$0xff] %v10704_v43  ;;  %v9309_v45 = vld [vmem:[#allocation10 + $0x68] sm:$0xff]  }
 0x1f7   :  { %8523 = vmatpush3.bf16.msra.mxu0 %v9299_v27  ;;  %v9308_v42 = vld [vmem:[#allocation10 + $0xa0] sm:$0xff]   ;;  %535 = vst [vmem:[#allocation3 + $0x48] sm:$0xff] %v10706_v44  ;;  %v9310_v46 = vld [vmem:[#allocation10 + $0xe8] sm:$0xff]   ;;  %v10714_v51 = vld [vmem:[#allocation4 + $0x3d0] sm:$0xff] }
 0x1f8   :  { %592 = vperm.xlu1 %9288, %v569_v21   ;;  %589 = vperm.xlu0 %9287, %v568_v23   ;;  %v9311_v47 = vld [vmem:[#allocation10 + $0x28] sm:$0xff]   ;;  %v10710_v49 = vld [vmem:[#allocation4 + $0x3c0] sm:$0xff]  ;;  %v10716_v52 = vld [vmem:[#allocation4 + $0x3d8] sm:$0xff]  ;;  %2826 = vst [vmem:[#allocation2 + $0x110] sm:$0xff] %v10714_v51 }
 0x1f9   :  { %8563 = vmatpush3.bf16.msra.mxu1 %v9300_v28  ;;  %8524 = vmatprep.subr.bf16.mxu0 %v9301_v29  ;;  %v9312_v48 = vld [vmem:[#allocation10 + $0xa8] sm:$0xff]   ;;  %2824 = vst [vmem:[#allocation2 + $0xe0] sm:$0xff] %v10710_v49  ;;  %539 = vst [vmem:[#allocation3 + $0x68] sm:$0xff] %v10716_v52  ;;  %v9313_v53 = vld [vmem:[#allocation10 + $0x70] sm:$0xff]  }
 0x1fa   :  { %8564 = vmatprep.subr.bf16.mxu1 %v9302_v30  ;;  %v10712_v50 = vld [vmem:[#allocation4 + $0x3c8] sm:$0xff]  ;;  %v9314_v54 = vld [vmem:[#allocation10 + $0xf0] sm:$0xff]   ;;  %v10722_v57 = vld [vmem:[#allocation4 + $0x3e0] sm:$0xff] }
 0x1fb   :  { %8525 = vmatpush3.bf16.msra.mxu0 %v9303_v31  ;;  %537 = vst [vmem:[#allocation3 + $0x58] sm:$0xff] %v10712_v50  ;;  %v9315_v55 = vld [vmem:[#allocation10 + $0x30] sm:$0xff]   ;;  %v10724_v58 = vld [vmem:[#allocation4 + $0x3e8] sm:$0xff]  ;;  %v527_v60 = vld [vmem:[#allocation4 + $0x3f8] sm:$0xff] }
 0x1fc   :  { %8526 = vmatprep.subr.bf16.mxu0 %v9305_v39  ;;  %v9316_v56 = vld [vmem:[#allocation10 + $0xb0] sm:$0xff]   ;;  %2828 = vst [vmem:[#allocation2 + $0x140] sm:$0xff] %v10722_v57  ;;  %541 = vst [vmem:[#allocation3 + $0x78] sm:$0xff] %v10724_v58  ;;  %v9317_v61 = vld [vmem:[#allocation10 + $0x78] sm:$0xff]  }
 0x1fd   :  { %8565 = vmatpush3.bf16.msra.mxu1 %v9304_v32  ;;  %v526_v59 = vld [vmem:[#allocation4 + $0x3f0] sm:$0xff]  ;;  %543 = vst [vmem:[#allocation3 + $0x88] sm:$0xff] %v527_v60  ;;  %v9318_v62 = vld [vmem:[#allocation10 + $0xf8] sm:$0xff]   ;;  %v394_v2 = vld [vmem:[#allocation4 + $0x8] sm:$0xff] }
 0x1fe   :  { %8566 = vmatprep.subr.bf16.mxu1 %v9306_v40  ;;  %542 = vst [vmem:[#allocation3 + $0x80] sm:$0xff] %v526_v59  ;;  %v9319_v63 = vld [vmem:[#allocation10 + $0x38] sm:$0xff]   ;;  %v428_v4 = vld [vmem:[#allocation4 + $0x108] sm:$0xff]  ;;  %v393_v7 = vld [vmem:[#allocation4] sm:$0xff] }
 0x1ff   :  { %8527 = vmatpush3.bf16.msra.mxu0 %v9307_v41  ;;  %v9320_v1 = vld [vmem:[#allocation10 + $0xb8] sm:$0xff]   ;;  %1403 = vst [vmem:[#allocation2 + $0x18] sm:$0xff] %v428_v4  ;;  %v395_v8 = vld [vmem:[#allocation4 + $0x10] sm:$0xff]  ;;  %v461_v10 = vld [vmem:[#allocation4 + $0x200] sm:$0xff] }
 0x200   :  { %8528 = vmatprep.subr.bf16.mxu0 %v9309_v45  ;;  %v396_v3 = vld [vmem:[#allocation4 + $0x18] sm:$0xff]  ;;  %v785_v9 = vpack.c.bf16 %v395_v8, %v393_v7  ;;  %v463_v11 = vld [vmem:[#allocation4 + $0x210] sm:$0xff]  ;;  %2101 = vst [vmem:[#allocation2 + $0x10] sm:$0xff] %v461_v10  ;;  %v9321_v12 = vld [vmem:[#allocation10 + $0x140] sm:$0xff]  }
 0x201   :  { %8567 = vmatpush3.bf16.msra.mxu1 %v9308_v42  ;;  %v430_v5 = vld [vmem:[#allocation4 + $0x118] sm:$0xff]  ;;  %v786_v6 = vpack.c.bf16 %v396_v3, %v394_v2  ;;  %2103 = vst [vmem:[#allocation2 + $0x40] sm:$0xff] %v463_v11  ;;  %v9322_v13 = vld [vmem:[#allocation10 + $0x40] sm:$0xff]   ;;  %v10730_v15 = vld [vmem:[#allocation4 + $0x190] sm:$0xff] }
 0x202   :  { %8568 = vmatprep.subr.bf16.mxu1 %v9310_v46  ;;  %1405 = vst [vmem:[#allocation2 + $0x48] sm:$0xff] %v430_v5  ;;  %v10728_v14 = vld [vmem:[#allocation4 + $0x180] sm:$0xff]  ;;  %2087 = vst [vmem:[#allocation2 + $0x30] sm:$0xff] %v10730_v15  ;;  %v9326_v17 = vld [vmem:[#allocation10 + $0x48] sm:$0xff]  }
 0x203   :  { %8529 = vmatpush3.bf16.msra.mxu0 %v9311_v47  ;;  %1288 = vmatprep.mubr.bf16.mxu1 %v786_v6  ;;  %2085 = vst [vmem:[#allocation2] sm:$0xff] %v10728_v14  ;;  %v9324_v16 = vld [vmem:[#allocation10] sm:$0xff]   ;;  %v9328_v18 = vld [vmem:[#allocation10 + $0x8] sm:$0xff]   ;;  %v400_v20 = vld [vmem:[#allocation4 + $0x38] sm:$0xff]  ;;  %v1486_v45 = vpack.c.bf16 %v10730_v15, %v10728_v14  ;;  %v13348_v15 = vmov 0 }
 0x204   :  { %8530 = vmatprep.subr.bf16.mxu0 %v9313_v53  ;;  %v398_v19 = vld [vmem:[#allocation4 + $0x28] sm:$0xff]  ;;  %v397_v22 = vld [vmem:[#allocation4 + $0x20] sm:$0xff]  ;;  %v399_v23 = vld [vmem:[#allocation4 + $0x30] sm:$0xff] }
 0x205   :  { %8569 = vmatpush3.bf16.msra.mxu1 %v9312_v48  ;;  %v792_v21 = vpack.c.bf16 %v400_v20, %v398_v19  ;;  %v431_v24 = vld [vmem:[#allocation4 + $0x120] sm:$0xff]  ;;  %v433_v25 = vld [vmem:[#allocation4 + $0x130] sm:$0xff]  ;;  %v791_v26 = vpack.c.bf16 %v399_v23, %v397_v22  ;;  %v9334_v29 = vld [vmem:[#allocation10 + $0x58] sm:$0xff]  }
 0x206   :  { %8570 = vmatprep.subr.bf16.mxu1 %v9314_v54  ;;  %1406 = vst [vmem:[#allocation2 + $0x70] sm:$0xff] %v431_v24  ;;  %1408 = vst [vmem:[#allocation2 + $0xa0] sm:$0xff] %v433_v25  ;;  %v9330_v27 = vld [vmem:[#allocation10 + $0x50] sm:$0xff]   ;;  %v9336_v30 = vld [vmem:[#allocation10 + $0x18] sm:$0xff]  }
 0x207   :  { %8531 = vmatpush3.bf16.msra.mxu0 %v9315_v55  ;;  %v9332_v28 = vld [vmem:[#allocation10 + $0x10] sm:$0xff]   ;;  %v402_v31 = vld [vmem:[#allocation4 + $0x48] sm:$0xff]  ;;  %v404_v32 = vld [vmem:[#allocation4 + $0x58] sm:$0xff] }
 0x208   :  { %8532 = vmatprep.subr.bf16.mxu0 %v9317_v61  ;;  %v798_v39 = vpack.c.bf16 %v404_v32, %v402_v31  ;;  %v401_v40 = vld [vmem:[#allocation4 + $0x40] sm:$0xff]  ;;  %v403_v41 = vld [vmem:[#allocation4 + $0x50] sm:$0xff]  ;;  %v411_v48 = vld [vmem:[#allocation4 + $0x88] sm:$0xff] }
 0x209   :  { %8571 = vmatpush3.bf16.msra.mxu1 %v9316_v56  ;;  %v797_v42 = vpack.c.bf16 %v403_v41, %v401_v40  ;;  %v9338_v46 = vld [vmem:[#allocation10 + $0x60] sm:$0xff]   ;;  %v9342_v53 = vld [vmem:[#allocation10 + $0x68] sm:$0xff]   ;;  %v413_v54 = vld [vmem:[#allocation4 + $0x98] sm:$0xff] }
 0x20a   :  { %8572 = vmatprep.subr.bf16.mxu1 %v9318_v62  ;;  %v9340_v47 = vld [vmem:[#allocation10 + $0x20] sm:$0xff]   ;;  %v9344_v55 = vld [vmem:[#allocation10 + $0x28] sm:$0xff]   ;;  %v408_v59 = vld [vmem:[#allocation4 + $0x78] sm:$0xff] }
 0x20b   :  { %8533 = vmatpush3.bf16.msra.mxu0 %v9319_v63  ;;  %v406_v56 = vld [vmem:[#allocation4 + $0x68] sm:$0xff]  ;;  %v405_v61 = vld [vmem:[#allocation4 + $0x60] sm:$0xff]  ;;  %v407_v62 = vld [vmem:[#allocation4 + $0x70] sm:$0xff]  ;;  %v10736_v63 = vpack.c.bf16 %v413_v54, %v411_v48 }
 0x20c   :  { %8598 = vmatprep.subr.bf16.mxu0 %v9321_v12  ;;  %v804_v60 = vpack.c.bf16 %v408_v59, %v406_v56  ;;  %v9346_v2 = vld [vmem:[#allocation10 + $0x70] sm:$0xff]   ;;  %v410_v3 = vld [vmem:[#allocation4 + $0x80] sm:$0xff]  ;;  %v415_v6 = vld [vmem:[#allocation4 + $0xa8] sm:$0xff] }
 0x20d   :  { %8573 = vmatpush3.bf16.msra.mxu1 %v9320_v1  ;;  %v803_v1 = vpack.c.bf16 %v407_v62, %v405_v61  ;;  %v412_v4 = vld [vmem:[#allocation4 + $0x90] sm:$0xff]  ;;  %v9350_v7 = vld [vmem:[#allocation10 + $0x78] sm:$0xff]   ;;  %v9354_v12 = vld [vmem:[#allocation10 + $0x140] sm:$0xff]  }
 0x20e   :  { %8638 = vmatprep.subr.bf16.mxu1 %v9322_v13  ;;  %v9348_v5 = vld [vmem:[#allocation10 + $0x30] sm:$0xff]   ;;  %v417_v8 = vld [vmem:[#allocation4 + $0xb8] sm:$0xff]  ;;  %v10739_v10 = vpack.c.bf16 %v412_v4, %v410_v3  ;;  %v414_v13 = vld [vmem:[#allocation4 + $0xa0] sm:$0xff]  ;;  %v622_v3 = vrot.slane %v10695_v37, 7 }
 0x20f   :  { %v10741_v11 = vpack.c.bf16 %v417_v8, %v415_v6  ;;  %v421_v19 = vld [vmem:[#allocation4 + $0xd8] sm:$0xff]  ;;  %v9358_v20 = vld [vmem:[#allocation10 + $0x148] sm:$0xff]   ;;  %v418_v24 = vld [vmem:[#allocation4 + $0xc0] sm:$0xff] }
 0x210   :  { %1289 = vmatmul.mubr.bf16.vlgmr.msra.gmra.mrb[0].mxu1 %v785_v9  ;;  %v9352_v9 = vld [vmem:[#allocation10 + $0x38] sm:$0xff]   ;;  %v420_v25 = vld [vmem:[#allocation4 + $0xd0] sm:$0xff]  ;;  %v422_v40 = vld [vmem:[#allocation4 + $0xe0] sm:$0xff] }
 0x211   :  { %8639 = vmatpush3.bf16.msra.mxu1 %v9324_v16  ;;  %1296 = vmatprep.mubr.bf16.mxu1 %v792_v21  ;;  %v416_v16 = vld [vmem:[#allocation4 + $0xb0] sm:$0xff]  ;;  %v9360_v21 = vld [vmem:[#allocation10 + $0x108] sm:$0xff]   ;;  %v10751_v31 = vpack.c.bf16 %v420_v25, %v418_v24  ;;  %v9368_v32 = vld [vmem:[#allocation10 + $0x118] sm:$0xff]  }
 0x212   :  { %8640 = vmatprep.subr.bf16.mxu1 %v9326_v17  ;;  %v419_v17 = vld [vmem:[#allocation4 + $0xc8] sm:$0xff]  ;;  %v10745_v22 = vpack.c.bf16 %v416_v16, %v414_v13  ;;  %v424_v41 = vld [vmem:[#allocation4 + $0xf0] sm:$0xff]  ;;  %v9372_v48 = vld [vmem:[#allocation10 + $0x120] sm:$0xff]  }
 0x213   :  { %v10747_v23 = vpack.c.bf16 %v421_v19, %v419_v17  ;;  %v9374_v54 = vld [vmem:[#allocation10 + $0x168] sm:$0xff]   ;;  %v544_v59 = vld [vmem:[#allocation3] sm:$0x80]  ;;  %v545_v62 = vld [vmem:[#allocation3 + $0x8] sm:$0x80] }
 0x214   :  { %v9376_v56 = vld [vmem:[#allocation10 + $0x128] sm:$0xff]   ;;  %v9378_v61 = vld [vmem:[#allocation10 + $0x170] sm:$0xff]   ;;  %v9382_v6 = vld [vmem:[#allocation10 + $0x178] sm:$0xff]  }
 0x215   :  { %8641 = vmatpush3.bf16.msra.mxu1 %v9328_v18  ;;  %v9356_v18 = vld [vmem:[#allocation10 + $0x100] sm:$0xff]   ;;  %v449_v4 = vld [vmem:[#allocation4 + $0x1a8] sm:$0xff]  ;;  %v451_v8 = vld [vmem:[#allocation4 + $0x1b8] sm:$0xff] }
 0x216   :  { %8642 = vmatprep.subr.bf16.mxu1 %v9330_v27  ;;  %v423_v27 = vld [vmem:[#allocation4 + $0xe8] sm:$0xff]  ;;  %v9384_v13 = vld [vmem:[#allocation10 + $0x138] sm:$0xff]  }
 0x217   :  { %v455_v14 = vld [vmem:[#allocation4 + $0x1d8] sm:$0xff] }
 0x218   :  { %1297 = vmatmul.mubr.bf16.gmra.mrb[4].mxu1 %v791_v26  ;;  %v9362_v26 = vld [vmem:[#allocation10 + $0x150] sm:$0xff]  }
 0x219   :  { %8643 = vmatpush3.bf16.msra.mxu1 %v9332_v28  ;;  %1304 = vmatprep.mubr.bf16.mxu1 %v798_v39  ;;  %v9364_v28 = vld [vmem:[#allocation10 + $0x110] sm:$0xff]  }
 0x21a   :  { %8644 = vmatprep.subr.bf16.mxu1 %v9334_v29  ;;  %v425_v29 = vld [vmem:[#allocation4 + $0xf8] sm:$0xff] }
 0x21b   :  { %v10753_v39 = vpack.c.bf16 %v425_v29, %v423_v27  ;;  %v9386_v27 = vld [vmem:[#allocation10 + $0xc0] sm:$0xff]   ;;  %v450_v29 = vld [vmem:[#allocation4 + $0x1b0] sm:$0xff] }
 0x21d   :  { %8645 = vmatpush3.bf16.msra.mxu1 %v9336_v30  ;;  %v9366_v30 = vld [vmem:[#allocation10 + $0x158] sm:$0xff]  }
 0x21e   :  { %8646 = vmatprep.subr.bf16.mxu1 %v9338_v46  ;;  %v9370_v46 = vld [vmem:[#allocation10 + $0x160] sm:$0xff]  }
 0x220   :  { %1305 = vmatmul.mubr.bf16.gmra.mrb[8].mxu1 %v797_v42  ;;  %v445_v42 = vld [vmem:[#allocation4 + $0x188] sm:$0xff] }
 0x221   :  { %8647 = vmatpush3.bf16.msra.mxu1 %v9340_v47  ;;  %1312 = vmatprep.mubr.bf16.mxu1 %v804_v60  ;;  %v447_v47 = vld [vmem:[#allocation4 + $0x198] sm:$0xff]  ;;  %v627_v60 = vrot.slane %v10686_v33, 7  ;;  %v637_v33 = vrot.slane %v10706_v44, 7  ;;  %v641_v44 = vrot.slane %v10712_v50, 7  ;;  %v9323_v50 = vld [vmem:[#allocation10 + $0x100] sm:$0xff]  }
 0x222   :  { %8648 = vmatprep.subr.bf16.mxu1 %v9342_v53  ;;  %v10757_v53 = vpack.c.bf16 %v424_v41, %v422_v40  ;;  %v453_v40 = vld [vmem:[#allocation4 + $0x1c8] sm:$0xff] }
 0x225   :  { %8649 = vmatpush3.bf16.msra.mxu1 %v9344_v55  ;;  %v10759_v55 = vpack.c.bf16 %v447_v47, %v445_v42 }
 0x226   :  { %8650 = vmatprep.subr.bf16.mxu1 %v9346_v2  ;;  %v9380_v2 = vld [vmem:[#allocation10 + $0x130] sm:$0xff]  }
 0x228   :  { %1313 = vmatmul.mubr.bf16.gmra.mrb[12].mxu1 %v803_v1  ;;  %v633_v1 = vrot.slane %v10692_v36, 7  ;;  %v631_v36 = vrot.slane %v10690_v35, 7  ;;  %v645_v35 = vrot.slane %v10716_v52, 7  ;;  %v9337_v52 = vld [vmem:[#allocation10 + $0x160] sm:$0xff]  }
 0x229   :  { %1922 = vmatprep.mubr.bf16.mxu1 %v10736_v63  ;;  %8651 = vmatpush3.bf16.msra.mxu1 %v9348_v5  ;;  %v621_v5 = vrot.slane %v544_v59, 7 }
 0x22a   :  { %8652 = vmatprep.subr.bf16.mxu1 %v9350_v7  ;;  %v629_v7 = vrot.slane %v10688_v34, 7  ;;  %v632_v47 = vsel %vm13300_vm8, %v627_v60, %v631_v36 }
 0x22b   :  { %v623_v34 = vsel %vm13300_vm8, %v621_v5, %v622_v3  ;;  %v561_v5 = vld [vmem:[#allocation3 + $0x88] sm:$0x7f] }
 0x22c   :  { %v634_v37 = vsel %vm13300_vm8, %v629_v7, %v633_v1 }
 0x22d   :  { %8653 = vmatpush3.bf16.msra.mxu1 %v9352_v9  ;;  %v624_v9 = vrot.slane %v545_v62, 7  ;;  %v642_v62 = vsel %vm13300_vm8, %v637_v33, %v641_v44 }
 0x22e   :  { %8718 = vmatprep.subr.bf16.mxu1 %v9354_v12  ;;  %v625_v12 = vrot.slane %v10699_v38, 7  ;;  %v635_v38 = vrot.slane %v10704_v43, 7  ;;  %v13356_v43 = vmov 0 }
 0x230   :  { %1923 = vmatmul.mubr.bf16.vlgmr.msra.gmra.mrb[16].mxu1 %v10739_v10  ;;  %v626_v19 = vsel %vm13300_vm8, %v624_v9, %v625_v12  ;;  %v630_v24 = vsel %vm13300_vm8, %v625_v12, %v629_v7  ;;  %v643_v7 = vrot.slane %v10714_v51, 7  ;;  %v649_v9 = vrot.slane %v10724_v58, 7  ;;  %v9331_v12 = vld [vmem:[#allocation10 + $0x110] sm:$0xff]  }
 0x231   :  { %1930 = vmatprep.mubr.bf16.mxu1 %v10741_v11  ;;  %8719 = vmatpush3.bf16.msra.mxu1 %v9356_v18  ;;  %v10777_v18 = vpack.c.bf16 %v451_v8, %v449_v4  ;;  %v639_v4 = vrot.slane %v10710_v49, 7  ;;  %v560_v8 = vld [vmem:[#allocation3 + $0x80] sm:$0x7f]  ;;  %v647_v58 = vrot.slane %v10722_v57, 7 }
 0x232   :  { %8720 = vmatprep.subr.bf16.mxu1 %v9358_v20  ;;  %v638_v20 = vsel %vm13300_vm8, %v633_v1, %v637_v33  ;;  %v452_v33 = vld [vmem:[#allocation4 + $0x1c0] sm:$0xff]  ;;  %v9394_v51 = vld [vmem:[#allocation10 + $0xd0] sm:$0xff]   ;;  %v650_v57 = vsel %vm13300_vm8, %v645_v35, %v649_v9 }
 0x233   :  { %v9613_v1 = vpack.c.bf16 %v638_v20, %v634_v37  ;;  %v454_v37 = vld [vmem:[#allocation4 + $0x1d0] sm:$0xff]  ;;  %v457_v20 = vld [vmem:[#allocation4 + $0x1e8] sm:$0xff] }
 0x235   :  { %8721 = vmatpush3.bf16.msra.mxu1 %v9360_v21  ;;  %v628_v21 = vsel %vm13300_vm8, %v622_v3, %v627_v60  ;;  %v13351_v60 = vmov 0  ;;  %v10835_v3 = vpack.c.bf16 %v455_v14, %v453_v40  ;;  %v456_v40 = vld [vmem:[#allocation4 + $0x1e0] sm:$0xff]  ;;  %v458_v14 = vld [vmem:[#allocation4 + $0x1f0] sm:$0xff] }
 0x236   :  { %8722 = vmatprep.subr.bf16.mxu1 %v9362_v26 }
 0x238   :  { %1931 = vmatmul.mubr.bf16.gmra.mrb[20].mxu1 %v10745_v22 }
 0x239   :  { %1938 = vmatprep.mubr.bf16.mxu1 %v10747_v23  ;;  %8723 = vmatpush3.bf16.msra.mxu1 %v9364_v28  ;;  %v448_v28 = vld [vmem:[#allocation4 + $0x1a0] sm:$0xff] }
 0x23a   :  { %8724 = vmatprep.subr.bf16.mxu1 %v9366_v30  ;;  %v9388_v30 = vld [vmem:[#allocation10 + $0x80] sm:$0xff]   ;;  %v10818_v59 = vpack.c.bf16 %v450_v29, %v448_v28  ;;  %v10854_v28 = vpack.c.bf16 %v454_v37, %v452_v33  ;;  %v9349_v33 = vld [vmem:[#allocation10 + $0x178] sm:$0xff]  }
 0x23d   :  { %8725 = vmatpush3.bf16.msra.mxu1 %v9368_v32  ;;  %v9325_v32 = vld [vmem:[#allocation10 + $0x148] sm:$0xff]  }
 0x23e   :  { %8726 = vmatprep.subr.bf16.mxu1 %v9370_v46  ;;  %v9390_v46 = vld [vmem:[#allocation10 + $0xc8] sm:$0xff]  }
 0x240   :  { %1939 = vmatmul.mubr.bf16.gmra.mrb[24].mxu1 %v10751_v31 }
 0x241   :  { %1946 = vmatprep.mubr.bf16.mxu1 %v10753_v39  ;;  %8727 = vmatpush3.bf16.msra.mxu1 %v9372_v48  ;;  %v636_v48 = vsel %vm13300_vm8, %v631_v36, %v635_v38 }
 0x242   :  { %8728 = vmatprep.subr.bf16.mxu1 %v9374_v54  ;;  %v9610_v54 = vpack.c.bf16 %v628_v21, %v623_v34  ;;  %v9333_v34 = vld [vmem:[#allocation10 + $0x158] sm:$0xff]  }
 0x243   :  { %v459_v21 = vld [vmem:[#allocation4 + $0x1f8] sm:$0xff] }
 0x245   :  { %8729 = vmatpush3.bf16.msra.mxu1 %v9376_v56  ;;  %v9327_v56 = vld [vmem:[#allocation10 + $0x108] sm:$0xff]  }
 0x246   :  { %8730 = vmatprep.subr.bf16.mxu1 %v9378_v61  ;;  %v646_v61 = vsel %vm13300_vm8, %v641_v44, %v645_v35  ;;  %v644_v44 = vsel %vm13300_vm8, %v639_v4, %v643_v7  ;;  %v9339_v35 = vld [vmem:[#allocation10 + $0x120] sm:$0xff]  }
 0x248   :  { %1947 = vmatmul.mubr.bf16.gmra.mrb[28].mxu1 %v10757_v53 }
 0x249   :  { %2052 = vmatprep.mubr.bf16.mxu1 %v10759_v55  ;;  %8731 = vmatpush3.bf16.msra.mxu1 %v9380_v2  ;;  %v9392_v2 = vld [vmem:[#allocation10 + $0x88] sm:$0xff]  }
 0x24a   :  { %8732 = vmatprep.subr.bf16.mxu1 %v9382_v6  ;;  %v9329_v6 = vld [vmem:[#allocation10 + $0x150] sm:$0xff]  }
 0x24d   :  { %8733 = vmatpush3.bf16.msra.mxu1 %v9384_v13  ;;  %v653_v13 = vrot.slane %v561_v5, 7 }
 0x24e   :  { %8798 = vmatprep.subr.bf16.mxu1 %v9386_v27  ;;  %v9616_v27 = vpack.c.bf16 %v636_v48, %v632_v47  ;;  %v9341_v47 = vld [vmem:[#allocation10 + $0x168] sm:$0xff]  }
 0x24f   :  { %v654_v29 = vsel %vm13300_vm8, %v649_v9, %v653_v13  ;;  %v462_v48 = vld [vmem:[#allocation4 + $0x208] sm:$0xff]  ;;  %v9347_v9 = vld [vmem:[#allocation10 + $0x130] sm:$0xff]  }
 0x250   :  { %2053 = vmatmul.mubr.bf16.vlgmr.msra.gmra.mrb[32].mxu1 %v1486_v45  ;;  %v9607_v45 = vpack.c.bf16 %v630_v24, %v626_v19  ;;  %v651_v19 = vrot.slane %v560_v8, 7  ;;  %v640_v24 = vsel %vm13300_vm8, %v635_v38, %v639_v4  ;;  %v9619_v38 = vpack.c.bf16 %v646_v61, %v642_v62  ;;  %v9345_v8 = vld [vmem:[#allocation10 + $0x170] sm:$0xff]   ;;  %v9406_v13 = vld [vmem:[#allocation10 + $0xe8] sm:$0xff]  }
 0x251   :  { %2060 = vmatprep.mubr.bf16.mxu1 %v10777_v18  ;;  %8799 = vmatpush3.bf16.msra.mxu1 %v9388_v30  ;;  %v9396_v30 = vld [vmem:[#allocation10 + $0x90] sm:$0xff]   ;;  %v648_v61 = vsel %vm13300_vm8, %v643_v7, %v647_v58  ;;  %v9622_v62 = vpack.c.bf16 %v644_v44, %v640_v24  ;;  %v13359_v4 = vmov 0  ;;  %v9625_v5 = vpack.c.bf16 %v654_v29, %v650_v57  ;;  %v9353_v44 = vld [vmem:[#allocation10 + $0xc0] sm:$0xff]   ;;  %v10899_v29 = vld [vmem:[#allocation2 + $0x48] sm:$0xff] }
 0x252   :  { %8800 = vmatprep.subr.bf16.mxu1 %v9390_v46  ;;  %v9400_v46 = vld [vmem:[#allocation10 + $0x98] sm:$0xff]   ;;  %v9412_v24 = vld [vmem:[#allocation10 + $0xb0] sm:$0xff]  }
 0x253   :  { %v9363_v57 = vld [vmem:[#allocation10 + $0x90] sm:$0xff]  }
 0x255   :  { %8801 = vmatpush3.bf16.msra.mxu1 %v9392_v2  ;;  %v10879_v2 = vpack.c.bf16 %v458_v14, %v456_v40  ;;  %v2141_v14 = vld [vmem:[#allocation2 + $0x40] sm:$0xff] }
 0x256   :  { %8802 = vmatprep.subr.bf16.mxu1 %v9394_v51  ;;  %v9351_v51 = vld [vmem:[#allocation10 + $0x138] sm:$0xff]  }
 0x258   :  { %2061 = vmatmul.mubr.bf16.gmra.mrb[36].mxu1 %v10818_v59 }
 0x259   :  { %2068 = vmatprep.mubr.bf16.mxu1 %v10835_v3  ;;  %8803 = vmatpush3.bf16.msra.mxu1 %v9396_v30  ;;  %v10901_v30 = vld [vmem:[#allocation4 + $0x308] sm:$0xff] }
 0x260   :  { %2069 = vmatmul.mubr.bf16.gmra.mrb[40].mxu1 %v10854_v28 }
 0x26b   :  { %v10770_v16 = vpop.permute.xlu1 %577  ;;  %v10772_v17 = vpop.permute.xlu0 %571 }
 0x26c   :  { %13342 = vst [vmem:[#allocation54_spill] sm:$0xff] %v10770_v16  ;;  %13343 = vst [vmem:[#allocation55_spill] sm:$0xff] %v10772_v17  ;;  %vm13297_vm9 = vcmp.eq.s32.totalorder %v10770_v16, 1  ;;  %vm13299_vm10 = vcmp.eq.s32.totalorder %v10772_v17, 1 }
 0x26f   :  { %v10787_v25 = vpop.permute.xlu1 %580  ;;  %v10789_v26 = vpop.permute.xlu0 %574 }
 0x270   :  { %13344 = vst [vmem:[#allocation56_spill] sm:$0xff] %v10787_v25  ;;  %13345 = vst [vmem:[#allocation57_spill] sm:$0xff] %v10789_v26  ;;  %vm13296_vm11 = vcmp.eq.s32.totalorder %v10787_v25, 1  ;;  %vm13298_vm12 = vcmp.eq.s32.totalorder %v10789_v26, 1  ;;  %v9498_v26 = vld [vmem:[#allocation15 + $0xb8] sm:$0xff]  }
 0x271   :  { %vm10805_vm13 = vmpackc.low %vm13298_vm12, %vm13299_vm10 }
 0x272   :  { %v13349_v15 = vsel %vm10805_vm13, 4294967295, %v13348_v15  ;;  %9608 = vmatprep.mubr.msk.bf16.mxu0 %vm10805_vm13, %v9607_v45  ;;  %vm10829_vm0 = vmpackc.low %vm13296_vm11, %vm13297_vm9  ;;  %v9398_v45 = vld [vmem:[#allocation10 + $0xd8] sm:$0xff]  }
 0x273   :  { %v10797_v41 = vpop.permute.xlu1 %586  ;;  %v10799_v42 = vpop.permute.xlu0 %583  ;;  %13350 = vst [vmem:[#allocation60_spill] sm:$0xff] %v13349_v15  ;;  %9611 = vmatmul.mubr.msk.bf16.vlgmr.msra.gmra.mrb[0].mxu0 %vm10805_vm13, %v9610_v54  ;;  %v13352_v60 = vsel %vm10829_vm0, 4294967295, %v13351_v60  ;;  %8804 = vmatprep.subr.bf16.mxu1 %v9398_v45  ;;  %v464_v54 = vld [vmem:[#allocation4 + $0x218] sm:$0xff] }
 0x274   :  { %13346 = vst [vmem:[#allocation58_spill] sm:$0xff] %v10797_v41  ;;  %13347 = vst [vmem:[#allocation59_spill] sm:$0xff] %v10799_v42  ;;  %vm13294_vm14 = vcmp.eq.s32.totalorder %v10797_v41, 1  ;;  %vm13295_vm15 = vcmp.eq.s32.totalorder %v10799_v42, 1  ;;  %8599 = vmatpush3.bf16.msra.mxu0 %v9323_v50  ;;  %9614 = vmatprep.mubr.msk.bf16.mxu0 %vm10829_vm0, %v9613_v1  ;;  %v9335_v50 = vld [vmem:[#allocation10 + $0x118] sm:$0xff]   ;;  %v9343_v1 = vld [vmem:[#allocation10 + $0x128] sm:$0xff]   ;;  %v2184_v7 = vpack.c.bf16 %v464_v54, %v462_v48 }
 0x275   :  { %13353 = vst [vmem:[#allocation61_spill] sm:$0xff] %v13352_v60  ;;  %8600 = vmatprep.subr.bf16.mxu0 %v9325_v32  ;;  %vm10865_vm3 = vmpackc.low %vm13294_vm14, %vm13295_vm15  ;;  %v10871_v32 = vpack.c.bf16 %v459_v21, %v457_v20  ;;  %8805 = vmatpush3.bf16.msra.mxu1 %v9400_v46  ;;  %v9357_v20 = vld [vmem:[#allocation10 + $0xc8] sm:$0xff]   ;;  %v9365_v45 = vld [vmem:[#allocation10 + $0xd8] sm:$0xff]  }
 0x276   :  { %v13357_v43 = vsel %vm10865_vm3, 4294967295, %v13356_v43  ;;  %v9359_v21 = vld [vmem:[#allocation10 + $0x88] sm:$0xff]   ;;  %v9418_v48 = vld [vmem:[#allocation10 + $0x40] sm:$0xff]  }
 0x277   :  { %v10841_v36 = vpop.permute.xlu1 %592  ;;  %v10844_v49 = vpop.permute.xlu0 %589  ;;  %13358 = vst [vmem:[#allocation64_spill] sm:$0xff] %v13357_v43  ;;  %2076 = vmatprep.mubr.bf16.mxu1 %v10871_v32 }
 0x278   :  { %13354 = vst [vmem:[#allocation62_spill] sm:$0xff] %v10841_v36  ;;  %8601 = vmatpush3.bf16.msra.mxu0 %v9327_v56  ;;  %13355 = vst [vmem:[#allocation63_spill] sm:$0xff] %v10844_v49  ;;  %vm13293_vm1 = vcmp.eq.s32.totalorder %v10841_v36, 1  ;;  %vm13292_vm2 = vcmp.eq.s32.totalorder %v10844_v49, 1  ;;  %v652_v56 = vsel %vm13300_vm8, %v647_v58, %v651_v19  ;;  %2077 = vmatmul.mubr.bf16.gmra.mrb[44].mxu1 %v10879_v2  ;;  %v9410_v58 = vld [vmem:[#allocation10 + $0xf0] sm:$0xff]   ;;  %v9355_v19 = vld [vmem:[#allocation10 + $0x80] sm:$0xff]  }
 0x279   :  { %8602 = vmatprep.subr.bf16.mxu0 %v9329_v6  ;;  %vm10885_vm4 = vmpackc.low %vm13293_vm1, %vm13292_vm2  ;;  %v9402_v6 = vld [vmem:[#allocation10 + $0xe0] sm:$0xff]   ;;  %2686 = vmatprep.mubr.bf16.mxu1 %v2184_v7  ;;  %v9628_v37 = vpack.c.bf16 %v652_v56, %v648_v61  ;;  %v9422_v7 = vld [vmem:[#allocation10 + $0x48] sm:$0xff]  }
 0x27a   :  { %v13360_v4 = vsel %vm10885_vm4, 4294967295, %v13359_v4  ;;  %8806 = vmatprep.subr.bf16.mxu1 %v9402_v6  ;;  %v9369_v56 = vld [vmem:[#allocation10 + $0xe0] sm:$0xff]  }
 0x27b   :  { %9617 = vmatmul.mubr.msk.bf16.gmra.mrb[4].mxu0 %vm10829_vm0, %v9616_v27  ;;  %13361 = vst [vmem:[#allocation65_spill] sm:$0xff] %v13360_v4  ;;  %v9361_v27 = vld [vmem:[#allocation10 + $0xd0] sm:$0xff]   ;;  %v465_v61 = vld [vmem:[#allocation4 + $0x220] sm:$0xff] }
 0x27c   :  { %8603 = vmatpush3.bf16.msra.mxu0 %v9331_v12  ;;  %9620 = vmatprep.mubr.msk.bf16.mxu0 %vm10865_vm3, %v9619_v38  ;;  %v9404_v12 = vld [vmem:[#allocation10 + $0xa0] sm:$0xff]   ;;  %v9416_v38 = vld [vmem:[#allocation10 + $0xb8] sm:$0xff]  }
 0x27d   :  { %8604 = vmatprep.subr.bf16.mxu0 %v9333_v34  ;;  %8807 = vmatpush3.bf16.msra.mxu1 %v9404_v12  ;;  %v9408_v34 = vld [vmem:[#allocation10 + $0xa8] sm:$0xff]   ;;  %v9371_v6 = vld [vmem:[#allocation10 + $0xa0] sm:$0xff]  }
 0x27e   :  { %8808 = vmatprep.subr.bf16.mxu1 %v9406_v13  ;;  %v10911_v12 = vld [vmem:[#allocation4 + $0x328] sm:$0xff] }
 0x27f   :  { %v9375_v13 = vld [vmem:[#allocation10 + $0xa8] sm:$0xff]  }
 0x280   :  { %8605 = vmatpush3.bf16.msra.mxu0 %v9335_v50  ;;  %v10897_v50 = vld [vmem:[#allocation2 + $0x18] sm:$0xff] }
 0x281   :  { %8606 = vmatprep.subr.bf16.mxu0 %v9337_v52  ;;  %8809 = vmatpush3.bf16.msra.mxu1 %v9408_v34  ;;  %v10903_v52 = vld [vmem:[#allocation4 + $0x318] sm:$0xff]  ;;  %2801 = vst [vmem:[#allocation2 + $0x18] sm:$0xff] %v10901_v30 }
 0x282   :  { %8810 = vmatprep.subr.bf16.mxu1 %v9410_v58  ;;  %2803 = vst [vmem:[#allocation2 + $0x48] sm:$0xff] %v10903_v52  ;;  %v2883_v40 = vpack.c.bf16 %v10903_v52, %v10901_v30  ;;  %v469_v58 = vld [vmem:[#allocation4 + $0x240] sm:$0xff] }
 0x283   :  { %9623 = vmatmul.mubr.msk.bf16.gmra.mrb[8].mxu0 %vm10865_vm3, %v9622_v62  ;;  %v467_v62 = vld [vmem:[#allocation4 + $0x230] sm:$0xff] }
 0x284   :  { %8607 = vmatpush3.bf16.msra.mxu0 %v9339_v35  ;;  %9626 = vmatprep.mubr.msk.bf16.mxu0 %vm10885_vm4, %v9625_v5  ;;  %v466_v35 = vld [vmem:[#allocation4 + $0x228] sm:$0xff] }
 0x285   :  { %8608 = vmatprep.subr.bf16.mxu0 %v9341_v47  ;;  %8811 = vmatpush3.bf16.msra.mxu1 %v9412_v24  ;;  %v9367_v47 = vld [vmem:[#allocation10 + $0x98] sm:$0xff]   ;;  %v470_v5 = vld [vmem:[#allocation4 + $0x248] sm:$0xff]  ;;  %v9428_v24 = vld [vmem:[#allocation10 + $0x10] sm:$0xff]  }
 0x288   :  { %8609 = vmatpush3.bf16.msra.mxu0 %v9343_v1  ;;  %v9420_v1 = vld [vmem:[#allocation10] sm:$0xff]  }
 0x289   :  { %8610 = vmatprep.subr.bf16.mxu0 %v9345_v8  ;;  %v472_v8 = vld [vmem:[#allocation4 + $0x258] sm:$0xff] }
 0x28b   :  { %9629 = vmatmul.mubr.msk.bf16.gmra.mrb[12].mxu0 %vm10885_vm4, %v9628_v37  ;;  %v2196_v37 = vpack.c.bf16 %v472_v8, %v470_v5  ;;  %v475_v5 = vld [vmem:[#allocation4 + $0x270] sm:$0xff] }
 0x28c   :  { %8611 = vmatpush3.bf16.msra.mxu0 %v9347_v9  ;;  %1353 = vmatprep.mubr.bf16.mxu0 %v10736_v63  ;;  %v9414_v63 = vld [vmem:[#allocation10 + $0xf8] sm:$0xff]   ;;  %v9424_v9 = vld [vmem:[#allocation10 + $0x8] sm:$0xff]  }
 0x28d   :  { %8612 = vmatprep.subr.bf16.mxu0 %v9349_v33  ;;  %8812 = vmatprep.subr.bf16.mxu1 %v9414_v63  ;;  %v2189_v33 = vpack.c.bf16 %v467_v62, %v465_v61  ;;  %v9430_v63 = vld [vmem:[#allocation10 + $0x58] sm:$0xff]   ;;  %v479_v61 = vld [vmem:[#allocation4 + $0x288] sm:$0xff] }
 0x28e   :  { %8813 = vmatpush3.bf16.msra.mxu1 %v9416_v38  ;;  %v429_v38 = vld [vmem:[#allocation4 + $0x110] sm:$0xff]  ;;  %v481_v62 = vld [vmem:[#allocation4 + $0x298] sm:$0xff] }
 0x28f   :  { %8878 = vmatprep.subr.bf16.mxu1 %v9418_v48 }
 0x290   :  { %8613 = vmatpush3.bf16.msra.mxu0 %v9351_v51  ;;  %v9377_v51 = vld [vmem:[#allocation10 + $0xf0] sm:$0xff]  }
 0x291   :  { %8678 = vmatprep.subr.bf16.mxu0 %v9353_v44  ;;  %v9426_v44 = vld [vmem:[#allocation10 + $0x50] sm:$0xff]  }
 0x293   :  { %1354 = vmatmul.mubr.bf16.vlgmr.msra.gmra.mrb[16].mxu0 %v10739_v10  ;;  %v468_v10 = vld [vmem:[#allocation4 + $0x238] sm:$0xff] }
 0x294   :  { %8679 = vmatpush3.bf16.msra.mxu0 %v9355_v19  ;;  %1361 = vmatprep.mubr.bf16.mxu0 %v10741_v11  ;;  %v2135_v11 = vld [vmem:[#allocation2 + $0x10] sm:$0xff]  ;;  %v2190_v54 = vpack.c.bf16 %v468_v10, %v466_v35  ;;  %v9432_v35 = vld [vmem:[#allocation10 + $0x18] sm:$0xff]   ;;  %v10921_v10 = vld [vmem:[#allocation4 + $0x348] sm:$0xff] }
 0x295   :  { %8680 = vmatprep.subr.bf16.mxu0 %v9357_v20  ;;  %v2183_v46 = vpack.c.bf16 %v2141_v14, %v2135_v11  ;;  %v471_v19 = vld [vmem:[#allocation4 + $0x250] sm:$0xff]  ;;  %v10923_v11 = vld [vmem:[#allocation4 + $0x358] sm:$0xff] }
 0x296   :  { %v9379_v20 = vld [vmem:[#allocation10 + $0xb0] sm:$0xff]   ;;  %v2195_v14 = vpack.c.bf16 %v471_v19, %v469_v58  ;;  %v10930_v58 = vpack.c.bf16 %v481_v62, %v479_v61  ;;  %v442_v61 = vld [vmem:[#allocation4 + $0x178] sm:$0xff] }
 0x297   :  { %2687 = vmatmul.mubr.bf16.vlgmr.msra.gmra.mrb[48].mxu1 %v2183_v46  ;;  %v434_v46 = vld [vmem:[#allocation4 + $0x138] sm:$0xff]  ;;  %v1448_v19 = vld [vmem:[#allocation2 + $0x70] sm:$0xff] }
 0x298   :  { %8681 = vmatpush3.bf16.msra.mxu0 %v9359_v21  ;;  %2694 = vmatprep.mubr.bf16.mxu1 %v2190_v54  ;;  %v474_v21 = vld [vmem:[#allocation4 + $0x268] sm:$0xff]  ;;  %v473_v54 = vld [vmem:[#allocation4 + $0x260] sm:$0xff]  ;;  %v9399_v62 = vld [vmem:[#allocation10 + $0x18] sm:$0xff]  }
 0x299   :  { %8682 = vmatprep.subr.bf16.mxu0 %v9361_v27  ;;  %8879 = vmatpush3.bf16.msra.mxu1 %v9420_v1  ;;  %v476_v27 = vld [vmem:[#allocation4 + $0x278] sm:$0xff]  ;;  %v9387_v1 = vld [vmem:[#allocation10] sm:$0xff]  }
 0x29a   :  { %8880 = vmatprep.subr.bf16.mxu1 %v9422_v7  ;;  %v2202_v48 = vpack.c.bf16 %v476_v27, %v474_v21  ;;  %v9389_v7 = vld [vmem:[#allocation10 + $0x48] sm:$0xff]   ;;  %v10932_v21 = vld [vmem:[#allocation4 + $0x378] sm:$0xff] }
 0x29b   :  { %1362 = vmatmul.mubr.bf16.gmra.mrb[20].mxu0 %v10745_v22  ;;  %v9373_v22 = vld [vmem:[#allocation10 + $0xe8] sm:$0xff]  }
 0x29c   :  { %8683 = vmatpush3.bf16.msra.mxu0 %v9363_v57  ;;  %1369 = vmatprep.mubr.bf16.mxu0 %v10747_v23  ;;  %v10913_v23 = vld [vmem:[#allocation4 + $0x338] sm:$0xff] }
 0x29d   :  { %8684 = vmatprep.subr.bf16.mxu0 %v9365_v45  ;;  %v2889_v34 = vpack.c.bf16 %v10913_v23, %v10911_v12  ;;  %8881 = vmatpush3.bf16.msra.mxu1 %v9424_v9  ;;  %v9381_v57 = vld [vmem:[#allocation10 + $0xf8] sm:$0xff]   ;;  %v432_v45 = vld [vmem:[#allocation4 + $0x128] sm:$0xff]  ;;  %v507_v23 = vld [vmem:[#allocation4 + $0x360] sm:$0xff] }
 0x29e   :  { %8882 = vmatprep.subr.bf16.mxu1 %v9426_v44  ;;  %v1491_v8 = vpack.c.bf16 %v434_v46, %v432_v45  ;;  %v9438_v9 = vld [vmem:[#allocation10 + $0x68] sm:$0xff]   ;;  %v485_v46 = vld [vmem:[#allocation4 + $0x2b8] sm:$0xff] }
 0x29f   :  { %2695 = vmatmul.mubr.bf16.gmra.mrb[52].mxu1 %v2189_v33  ;;  %v2201_v33 = vpack.c.bf16 %v475_v5, %v473_v54  ;;  %v10928_v44 = vld [vmem:[#allocation4 + $0x368] sm:$0xff]  ;;  %v9446_v54 = vld [vmem:[#allocation10 + $0x78] sm:$0xff]   ;;  %v9401_v5 = vld [vmem:[#allocation10 + $0x60] sm:$0xff]  }
 0x2a0   :  { %8685 = vmatpush3.bf16.msra.mxu0 %v9367_v47  ;;  %2702 = vmatprep.mubr.bf16.mxu1 %v2196_v37  ;;  %v9383_v47 = vld [vmem:[#allocation10 + $0xb8] sm:$0xff]   ;;  %v2901_v27 = vpack.c.bf16 %v10932_v21, %v10928_v44  ;;  %v483_v45 = vld [vmem:[#allocation4 + $0x2a8] sm:$0xff] }
 0x2a1   :  { %8686 = vmatprep.subr.bf16.mxu0 %v9369_v56  ;;  %8883 = vmatpush3.bf16.msra.mxu1 %v9428_v24  ;;  %v9434_v56 = vld [vmem:[#allocation10 + $0x60] sm:$0xff]   ;;  %v438_v37 = vld [vmem:[#allocation4 + $0x158] sm:$0xff]  ;;  %v9393_v24 = vld [vmem:[#allocation10 + $0x50] sm:$0xff]  }
 0x2a2   :  { %8884 = vmatprep.subr.bf16.mxu1 %v9430_v63 }
 0x2a3   :  { %1370 = vmatmul.mubr.bf16.gmra.mrb[24].mxu0 %v10751_v31  ;;  %v1485_v31 = vpack.c.bf16 %v10899_v29, %v10897_v50  ;;  %v2895_v50 = vpack.c.bf16 %v10923_v11, %v10921_v10  ;;  %v9385_v29 = vld [vmem:[#allocation10 + $0x40] sm:$0xff]  }
 0x2a4   :  { %8687 = vmatpush3.bf16.msra.mxu0 %v9371_v6  ;;  %1377 = vmatprep.mubr.bf16.mxu0 %v10753_v39  ;;  %v427_v39 = vld [vmem:[#allocation4 + $0x100] sm:$0xff] }
 0x2a5   :  { %8688 = vmatprep.subr.bf16.mxu0 %v9373_v22  ;;  %8885 = vmatpush3.bf16.msra.mxu1 %v9432_v35  ;;  %v1484_v6 = vpack.c.bf16 %v429_v38, %v427_v39  ;;  %v9391_v22 = vld [vmem:[#allocation10 + $0x8] sm:$0xff]   ;;  %v478_v39 = vld [vmem:[#allocation4 + $0x280] sm:$0xff]  ;;  %v480_v38 = vld [vmem:[#allocation4 + $0x290] sm:$0xff] }
 0x2a6   :  { %8886 = vmatprep.subr.bf16.mxu1 %v9434_v56  ;;  %v440_v56 = vld [vmem:[#allocation4 + $0x168] sm:$0xff] }
 0x2a7   :  { %2703 = vmatmul.mubr.bf16.gmra.mrb[56].mxu1 %v2195_v14  ;;  %v9444_v14 = vld [vmem:[#allocation10 + $0x30] sm:$0xff]  }
 0x2a8   :  { %8689 = vmatpush3.bf16.msra.mxu0 %v9375_v13  ;;  %2710 = vmatprep.mubr.bf16.mxu1 %v2202_v48  ;;  %v436_v13 = vld [vmem:[#allocation4 + $0x148] sm:$0xff]  ;;  %v435_v48 = vld [vmem:[#allocation4 + $0x140] sm:$0xff] }
 0x2a9   :  { %8690 = vmatprep.subr.bf16.mxu0 %v9377_v51  ;;  %v9440_v51 = vld [vmem:[#allocation10 + $0x28] sm:$0xff]   ;;  %v1497_v35 = vpack.c.bf16 %v438_v37, %v436_v13  ;;  %v1503_v13 = vpack.c.bf16 %v442_v61, %v440_v56  ;;  %v9452_v37 = vld [vmem:[#allocation10 + $0x100] sm:$0xff]   ;;  %v493_v61 = vld [vmem:[#allocation4 + $0x2f8] sm:$0xff] }
 0x2aa   :  { %v491_v56 = vld [vmem:[#allocation4 + $0x2e8] sm:$0xff] }
 0x2ab   :  { %1378 = vmatmul.mubr.bf16.gmra.mrb[28].mxu0 %v10757_v53  ;;  %v9436_v53 = vld [vmem:[#allocation10 + $0x20] sm:$0xff]  }
 0x2ac   :  { %8691 = vmatpush3.bf16.msra.mxu0 %v9379_v20  ;;  %1987 = vmatprep.mubr.bf16.mxu0 %v1485_v31  ;;  %v1454_v20 = vld [vmem:[#allocation2 + $0xa0] sm:$0xff]  ;;  %v9442_v31 = vld [vmem:[#allocation10 + $0x70] sm:$0xff]  }
 0x2ad   :  { %8692 = vmatprep.subr.bf16.mxu0 %v9381_v57  ;;  %8887 = vmatpush3.bf16.msra.mxu1 %v9436_v53  ;;  %v1490_v63 = vpack.c.bf16 %v1454_v20, %v1448_v19  ;;  %v9395_v57 = vld [vmem:[#allocation10 + $0x10] sm:$0xff]   ;;  %v9450_v53 = vld [vmem:[#allocation10 + $0x140] sm:$0xff]   ;;  %v489_v19 = vld [vmem:[#allocation4 + $0x2d8] sm:$0xff] }
 0x2ae   :  { %8888 = vmatprep.subr.bf16.mxu1 %v9438_v9  ;;  %v9403_v9 = vld [vmem:[#allocation10 + $0x20] sm:$0xff]   ;;  %v9405_v20 = vld [vmem:[#allocation10 + $0x68] sm:$0xff]  }
 0x2af   :  { %2711 = vmatmul.mubr.bf16.gmra.mrb[60].mxu1 %v2201_v33  ;;  %v484_v33 = vld [vmem:[#allocation4 + $0x2b0] sm:$0xff] }
 0x2b0   :  { %8693 = vmatpush3.bf16.msra.mxu0 %v9383_v47  ;;  %3320 = vmatprep.mubr.bf16.mxu1 %v10930_v58  ;;  %v9397_v47 = vld [vmem:[#allocation10 + $0x58] sm:$0xff]  }
 0x2b1   :  { %8758 = vmatprep.subr.bf16.mxu0 %v9385_v29  ;;  %8889 = vmatpush3.bf16.msra.mxu1 %v9440_v51  ;;  %v437_v29 = vld [vmem:[#allocation4 + $0x150] sm:$0xff]  ;;  %v487_v51 = vld [vmem:[#allocation4 + $0x2c8] sm:$0xff] }
 0x2b2   :  { %8890 = vmatprep.subr.bf16.mxu1 %v9442_v31  ;;  %v441_v31 = vld [vmem:[#allocation4 + $0x170] sm:$0xff] }
 0x2b3   :  { %1988 = vmatmul.mubr.bf16.vlgmr.msra.gmra.mrb[32].mxu0 %v1484_v6  ;;  %v10937_v6 = vpack.c.bf16 %v480_v38, %v478_v39  ;;  %v9456_v39 = vld [vmem:[#allocation10 + $0x108] sm:$0xff]   ;;  %v9409_v38 = vld [vmem:[#allocation10 + $0x70] sm:$0xff]  }
 0x2b4   :  { %8759 = vmatpush3.bf16.msra.mxu0 %v9387_v1  ;;  %1995 = vmatprep.mubr.bf16.mxu0 %v1491_v8  ;;  %v9448_v1 = vld [vmem:[#allocation10 + $0x38] sm:$0xff]   ;;  %v1496_v8 = vpack.c.bf16 %v437_v29, %v435_v48  ;;  %v486_v48 = vld [vmem:[#allocation4 + $0x2c0] sm:$0xff]  ;;  %v488_v29 = vld [vmem:[#allocation4 + $0x2d0] sm:$0xff] }
 0x2b5   :  { %8760 = vmatprep.subr.bf16.mxu0 %v9389_v7  ;;  %8891 = vmatpush3.bf16.msra.mxu1 %v9444_v14  ;;  %v10939_v7 = vpack.c.bf16 %v485_v46, %v483_v45  ;;  %v9458_v14 = vld [vmem:[#allocation10 + $0x150] sm:$0xff]   ;;  %v10945_v45 = vpack.c.bf16 %v489_v19, %v487_v51  ;;  %v9419_v19 = vld [vmem:[#allocation10 + $0x100] sm:$0xff]  }
 0x2b6   :  { %8892 = vmatprep.subr.bf16.mxu1 %v9446_v54  ;;  %v9460_v54 = vld [vmem:[#allocation10 + $0x110] sm:$0xff]  }
 0x2b8   :  { %8761 = vmatpush3.bf16.msra.mxu0 %v9391_v22  ;;  %v482_v22 = vld [vmem:[#allocation4 + $0x2a0] sm:$0xff] }
 0x2b9   :  { %8762 = vmatprep.subr.bf16.mxu0 %v9393_v24  ;;  %8893 = vmatpush3.bf16.msra.mxu1 %v9448_v1  ;;  %v439_v24 = vld [vmem:[#allocation4 + $0x160] sm:$0xff]  ;;  %v9415_v1 = vld [vmem:[#allocation10 + $0x38] sm:$0xff]  }
 0x2ba   :  { %8958 = vmatprep.subr.bf16.mxu1 %v9450_v53  ;;  %v1502_v46 = vpack.c.bf16 %v441_v31, %v439_v24  ;;  %v9462_v53 = vld [vmem:[#allocation10 + $0x158] sm:$0xff]   ;;  %v492_v24 = vld [vmem:[#allocation4 + $0x2f0] sm:$0xff]  ;;  %v9468_v31 = vld [vmem:[#allocation10 + $0x120] sm:$0xff]  }
 0x2bb   :  { %1996 = vmatmul.mubr.bf16.gmra.mrb[36].mxu0 %v1490_v63  ;;  %v9454_v63 = vld [vmem:[#allocation10 + $0x148] sm:$0xff]  }
 0x2bc   :  { %8763 = vmatpush3.bf16.msra.mxu0 %v9395_v57  ;;  %2003 = vmatprep.mubr.bf16.mxu0 %v1497_v35  ;;  %v9407_v57 = vld [vmem:[#allocation10 + $0x28] sm:$0xff]   ;;  %v10943_v35 = vpack.c.bf16 %v484_v33, %v482_v22  ;;  %v9417_v22 = vld [vmem:[#allocation10 + $0x140] sm:$0xff]   ;;  %v10950_v33 = vpack.c.bf16 %v488_v29, %v486_v48 }
 0x2bd   :  { %8764 = vmatprep.subr.bf16.mxu0 %v9397_v47  ;;  %3321 = vmatmul.mubr.bf16.vlgmr.msra.gmra.mrb[64].mxu1 %v10937_v6  ;;  %v9411_v47 = vld [vmem:[#allocation10 + $0x30] sm:$0xff]   ;;  %v9591_v48 = vld [vmem:[#allocation3 + $0x18] sm:$0xff] }
 0x2be   :  { %8959 = vmatpush3.bf16.msra.mxu1 %v9452_v37  ;;  %3328 = vmatprep.mubr.bf16.mxu1 %v10939_v7  ;;  %v10952_v37 = vpack.c.bf16 %v493_v61, %v491_v56  ;;  %v9476_v56 = vld [vmem:[#allocation10 + $0x130] sm:$0xff]   ;;  %v9429_v61 = vld [vmem:[#allocation10 + $0x158] sm:$0xff]  }
 0x2bf   :  { %8960 = vmatprep.subr.bf16.mxu1 %v9454_v63  ;;  %v9421_v63 = vld [vmem:[#allocation10 + $0x148] sm:$0xff]  }
 0x2c0   :  { %8765 = vmatpush3.bf16.msra.mxu0 %v9399_v62  ;;  %v9413_v62 = vld [vmem:[#allocation10 + $0x78] sm:$0xff]  }
 0x2c1   :  { %8766 = vmatprep.subr.bf16.mxu0 %v9401_v5  ;;  %v2133_v5 = vld [vmem:[#allocation2] sm:$0xff] }
 0x2c2   :  { %8961 = vmatpush3.bf16.msra.mxu1 %v9456_v39  ;;  %v9472_v39 = vld [vmem:[#allocation10 + $0x128] sm:$0xff]  }
 0x2c3   :  { %2004 = vmatmul.mubr.bf16.gmra.mrb[40].mxu0 %v1496_v8  ;;  %8962 = vmatprep.subr.bf16.mxu1 %v9458_v14  ;;  %v2139_v8 = vld [vmem:[#allocation2 + $0x30] sm:$0xff] }
 0x2c4   :  { %8767 = vmatpush3.bf16.msra.mxu0 %v9403_v9  ;;  %2011 = vmatprep.mubr.bf16.mxu0 %v1503_v13  ;;  %v9464_v9 = vld [vmem:[#allocation10 + $0x118] sm:$0xff]   ;;  %v9466_v13 = vld [vmem:[#allocation10 + $0x160] sm:$0xff]   ;;  %v2181_v51 = vpack.c.bf16 %v2139_v8, %v2133_v5 }
 0x2c5   :  { %8768 = vmatprep.subr.bf16.mxu0 %v9405_v20  ;;  %3329 = vmatmul.mubr.bf16.gmra.mrb[68].mxu1 %v10943_v35  ;;  %v490_v20 = vld [vmem:[#allocation4 + $0x2e0] sm:$0xff]  ;;  %v9480_v5 = vld [vmem:[#allocation10 + $0x138] sm:$0xff]  }
 0x2c6   :  { %8963 = vmatpush3.bf16.msra.mxu1 %v9460_v54  ;;  %3336 = vmatprep.mubr.bf16.mxu1 %v10945_v45  ;;  %v10957_v14 = vpack.c.bf16 %v492_v24, %v490_v20  ;;  %v9427_v54 = vld [vmem:[#allocation10 + $0x110] sm:$0xff]   ;;  %v9593_v8 = vld [vmem:[#allocation2 + $0x20] sm:$0xff]  ;;  %v9437_v20 = vld [vmem:[#allocation10 + $0x168] sm:$0xff]  }
 0x2c7   :  { %8964 = vmatprep.subr.bf16.mxu1 %v9462_v53  ;;  %v9592_v53 = vld [vmem:[#allocation2 + $0x50] sm:$0xff]  ;;  %v9596_v24 = vld [vmem:[#allocation2 + $0x80] sm:$0xff] }
 0x2c8   :  { %8769 = vmatpush3.bf16.msra.mxu0 %v9407_v57  ;;  %v9423_v57 = vld [vmem:[#allocation10 + $0x108] sm:$0xff]  }
 0x2c9   :  { %8770 = vmatprep.subr.bf16.mxu0 %v9409_v38  ;;  %v9425_v38 = vld [vmem:[#allocation10 + $0x150] sm:$0xff]  }
 0x2ca   :  { %8965 = vmatpush3.bf16.msra.mxu1 %v9464_v9  ;;  %v2884_v9 = vpack.c.bf16 %v9592_v53, %v9593_v8  ;;  %v9603_v53 = vld [vmem:[#allocation3 + $0x88] sm:$0xff] }
 0x2cb   :  { %2012 = vmatmul.mubr.bf16.gmra.mrb[44].mxu0 %v1502_v46  ;;  %8966 = vmatprep.subr.bf16.mxu1 %v9466_v13  ;;  %v9474_v46 = vld [vmem:[#allocation10 + $0x170] sm:$0xff]   ;;  %v9594_v13 = vld [vmem:[#allocation3 + $0x38] sm:$0xff] }
 0x2cc   :  { %8771 = vmatpush3.bf16.msra.mxu0 %v9411_v47  ;;  %2621 = vmatprep.mubr.bf16.mxu0 %v10759_v55  ;;  %v9470_v55 = vld [vmem:[#allocation10 + $0x168] sm:$0xff]   ;;  %v9590_v47 = vld [vmem:[#allocation3 + $0x28] sm:$0xff] }
 0x2cd   :  { %8772 = vmatprep.subr.bf16.mxu0 %v9413_v62  ;;  %3337 = vmatmul.mubr.bf16.gmra.mrb[72].mxu1 %v10950_v33  ;;  %v2885_v29 = vpack.c.bf16 %v9590_v47, %v9591_v48  ;;  %v9478_v62 = vld [vmem:[#allocation10 + $0x178] sm:$0xff]  }
 0x2ce   :  { %8967 = vmatpush3.bf16.msra.mxu1 %v9468_v31  ;;  %3344 = vmatprep.mubr.bf16.mxu1 %v10952_v37  ;;  %v9597_v31 = vld [vmem:[#allocation2 + $0xb0] sm:$0xff]  ;;  %v9447_v47 = vld [vmem:[#allocation10 + $0x138] sm:$0xff]  }
 0x2cf   :  { %8968 = vmatprep.subr.bf16.mxu1 %v9470_v55  ;;  %v9443_v55 = vld [vmem:[#allocation10 + $0x130] sm:$0xff]  }
 0x2d0   :  { %8773 = vmatpush3.bf16.msra.mxu0 %v9415_v1  ;;  %v9433_v1 = vld [vmem:[#allocation10 + $0x160] sm:$0xff]  }
 0x2d1   :  { %8838 = vmatprep.subr.bf16.mxu0 %v9417_v22  ;;  %v9435_v22 = vld [vmem:[#allocation10 + $0x120] sm:$0xff]  }
 0x2d2   :  { %8969 = vmatpush3.bf16.msra.mxu1 %v9472_v39  ;;  %v9599_v39 = vld [vmem:[#allocation3 + $0x68] sm:$0xff] }
 0x2d3   :  { %2622 = vmatmul.mubr.bf16.vlgmr.msra.gmra.mrb[48].mxu0 %v2181_v51  ;;  %8970 = vmatprep.subr.bf16.mxu1 %v9474_v46  ;;  %v9595_v51 = vld [vmem:[#allocation3 + $0x48] sm:$0xff] }
 0x2d4   :  { %8839 = vmatpush3.bf16.msra.mxu0 %v9419_v19  ;;  %2629 = vmatprep.mubr.bf16.mxu0 %v10777_v18  ;;  %v9431_v18 = vld [vmem:[#allocation10 + $0x118] sm:$0xff]   ;;  %v2891_v19 = vpack.c.bf16 %v9595_v51, %v9594_v13  ;;  %v9604_v13 = vld [vmem:[#allocation2 + $0x140] sm:$0xff]  ;;  %v9605_v51 = vld [vmem:[#allocation3 + $0x80] sm:$0xff] }
 0x2d5   :  { %8840 = vmatprep.subr.bf16.mxu0 %v9421_v63  ;;  %3345 = vmatmul.mubr.bf16.gmra.mrb[76].mxu1 %v10957_v14  ;;  %v2890_v63 = vpack.c.bf16 %v9597_v31, %v9596_v24  ;;  %v9445_v46 = vld [vmem:[#allocation10 + $0x178] sm:$0xff]  }
 0x2d6   :  { %8971 = vmatpush3.bf16.msra.mxu1 %v9476_v56  ;;  %3450 = vmatprep.mubr.bf16.mxu1 %v2885_v29  ;;  %v9600_v56 = vld [vmem:[#allocation2 + $0xe0] sm:$0xff]  ;;  %v9463_v31 = vld [vmem:[#allocation10 + $0x98] sm:$0xff]  }
 0x2d7   :  { %8972 = vmatprep.subr.bf16.mxu1 %v9478_v62 }
 0x2d8   :  { %8841 = vmatpush3.bf16.msra.mxu0 %v9423_v57  ;;  %v9598_v57 = vld [vmem:[#allocation3 + $0x58] sm:$0xff] }
 0x2d9   :  { %8842 = vmatprep.subr.bf16.mxu0 %v9425_v38  ;;  %v2897_v38 = vpack.c.bf16 %v9599_v39, %v9598_v57  ;;  %v9467_v39 = vld [vmem:[#allocation10 + $0xa0] sm:$0xff]  }
 0x2da   :  { %8973 = vmatpush3.bf16.msra.mxu1 %v9480_v5  ;;  %v9602_v5 = vld [vmem:[#allocation3 + $0x78] sm:$0xff] }
 0x2db   :  { %2630 = vmatmul.mubr.bf16.gmra.mrb[52].mxu0 %v10818_v59  ;;  %v9439_v59 = vld [vmem:[#allocation10 + $0x128] sm:$0xff]   ;;  %v2903_v8 = vpack.c.bf16 %v9603_v53, %v9602_v5 }
 0x2dc   :  { %8843 = vmatpush3.bf16.msra.mxu0 %v9427_v54  ;;  %2637 = vmatprep.mubr.bf16.mxu0 %v10835_v3  ;;  %v9441_v3 = vld [vmem:[#allocation10 + $0x170] sm:$0xff]  }
 0x2dd   :  { %8844 = vmatprep.subr.bf16.mxu0 %v9429_v61  ;;  %3451 = vmatmul.mubr.bf16.vlgmr.msra.gmra.mrb[80].mxu1 %v2884_v9  ;;  %v9601_v61 = vld [vmem:[#allocation2 + $0x110] sm:$0xff] }
 0x2de   :  { %3458 = vmatprep.mubr.bf16.mxu1 %v2891_v19  ;;  %v2902_v19 = vpack.c.bf16 %v9605_v51, %v9604_v13  ;;  %v505_v13 = vld [vmem:[#allocation4 + $0x350] sm:$0xff] }
 0x2e0   :  { %8845 = vmatpush3.bf16.msra.mxu0 %v9431_v18  ;;  %v2896_v18 = vpack.c.bf16 %v9601_v61, %v9600_v56 }
 0x2e1   :  { %8846 = vmatprep.subr.bf16.mxu0 %v9433_v1  ;;  %v9451_v1 = vld [vmem:[#allocation10 + $0x80] sm:$0xff]  }
 0x2e3   :  { %2638 = vmatmul.mubr.bf16.gmra.mrb[56].mxu0 %v10854_v28  ;;  %v8574_v48 = vpop.f32.mrb[0].mxu1  ;;  %v9449_v28 = vld [vmem:[#allocation10 + $0xc0] sm:$0xff]  }
 0x2e4   :  { %8847 = vmatpush3.bf16.msra.mxu0 %v9435_v22  ;;  %2645 = vmatprep.mubr.bf16.mxu0 %v10871_v32  ;;  %v8575_v29 = vpop.f32.mrb[1].mxu1  ;;  %v9455_v22 = vld [vmem:[#allocation10 + $0x88] sm:$0xff]  }
 0x2e5   :  { %8848 = vmatprep.subr.bf16.mxu0 %v9437_v20  ;;  %3459 = vmatmul.mubr.bf16.gmra.mrb[84].mxu1 %v2890_v63  ;;  %v10966_v32 = vadd.f32 %v8575_v29, %v8574_v48  ;;  %v8577_v54 = vpop.f32.mrb[2].mxu1  ;;  %v9459_v20 = vld [vmem:[#allocation10 + $0x90] sm:$0xff]  }
 0x2e6   :  { %3466 = vmatprep.mubr.bf16.mxu1 %v2897_v38  ;;  %v8578_v62 = vpop.f32.mrb[3].mxu1  ;;  %v9469_v38 = vld [vmem:[#allocation10 + $0xe8] sm:$0xff]  }
 0x2e7   :  { %v10968_v9 = vadd.f32 %v8578_v62, %v8577_v54  ;;  %v9477_v54 = vld [vmem:[#allocation10 + $0xf8] sm:$0xff]   ;;  %v497_v62 = vld [vmem:[#allocation4 + $0x310] sm:$0xff] }
 0x2e8   :  { %8849 = vmatpush3.bf16.msra.mxu0 %v9439_v59  ;;  %v9461_v59 = vld [vmem:[#allocation10 + $0xd8] sm:$0xff]  }
 0x2e9   :  { %8850 = vmatprep.subr.bf16.mxu0 %v9441_v3 }
 0x2eb   :  { %2646 = vmatmul.mubr.bf16.gmra.mrb[60].mxu0 %v10879_v2  ;;  %v9453_v2 = vld [vmem:[#allocation10 + $0xc8] sm:$0xff]   ;;  %v8580_v3 = vpop.f32.mrb[4].mxu1 }
 0x2ec   :  { %8851 = vmatpush3.bf16.msra.mxu0 %v9443_v55  ;;  %2751 = vmatprep.mubr.bf16.mxu0 %v10930_v58  ;;  %v9457_v58 = vld [vmem:[#allocation10 + $0xd0] sm:$0xff]   ;;  %v8581_v24 = vpop.f32.mrb[5].mxu1 }
 0x2ed   :  { %8852 = vmatprep.subr.bf16.mxu0 %v9445_v46  ;;  %3467 = vmatmul.mubr.bf16.gmra.mrb[88].mxu1 %v2896_v18  ;;  %v10972_v63 = vadd.f32 %v8581_v24, %v8580_v3  ;;  %v8583_v55 = vpop.f32.mrb[6].mxu1  ;;  %v9471_v46 = vld [vmem:[#allocation10 + $0xa8] sm:$0xff]   ;;  %v495_v18 = vld [vmem:[#allocation4 + $0x300] sm:$0xff] }
 0x2ee   :  { %3474 = vmatprep.mubr.bf16.mxu1 %v2903_v8  ;;  %v8584_v57 = vpop.f32.mrb[7].mxu1 }
 0x2f0   :  { %8853 = vmatpush3.bf16.msra.mxu0 %v9447_v47  ;;  %v9473_v47 = vld [vmem:[#allocation10 + $0xf0] sm:$0xff]  }
 0x2f1   :  { %8918 = vmatprep.subr.bf16.mxu0 %v9449_v28  ;;  %v9475_v28 = vld [vmem:[#allocation10 + $0xb0] sm:$0xff]  }
 0x2f3   :  { %2752 = vmatmul.mubr.bf16.vlgmr.msra.gmra.mrb[64].mxu0 %v10937_v6  ;;  %v9465_v6 = vld [vmem:[#allocation10 + $0xe0] sm:$0xff]  }
 0x2f4   :  { %8919 = vmatpush3.bf16.msra.mxu0 %v9451_v1  ;;  %2759 = vmatprep.mubr.bf16.mxu0 %v10939_v7  ;;  %v10976_v7 = vadd.f32 %v8584_v57, %v8583_v55 }
 0x2f5   :  { %8920 = vmatprep.subr.bf16.mxu0 %v9453_v2  ;;  %3475 = vmatmul.mubr.bf16.gmra.mrb[92].mxu1 %v2902_v19 }
 0x2f8   :  { %8921 = vmatpush3.bf16.msra.mxu0 %v9455_v22  ;;  %v499_v22 = vld [vmem:[#allocation4 + $0x320] sm:$0xff] }
 0x2f9   :  { %8922 = vmatprep.subr.bf16.mxu0 %v9457_v58  ;;  %v501_v58 = vld [vmem:[#allocation4 + $0x330] sm:$0xff] }
 0x2fa   :  { %v2888_v30 = vpack.c.bf16 %v501_v58, %v499_v22 }
 0x2fb   :  { %2760 = vmatmul.mubr.bf16.gmra.mrb[68].mxu0 %v10943_v35  ;;  %v8586_v35 = vpop.f32.mrb[8].mxu1 }
 0x2fc   :  { %8923 = vmatpush3.bf16.msra.mxu0 %v9459_v20  ;;  %2767 = vmatprep.mubr.bf16.mxu0 %v10945_v45  ;;  %v8587_v48 = vpop.f32.mrb[9].mxu1 }
 0x2fd   :  { %8924 = vmatprep.subr.bf16.mxu0 %v9461_v59  ;;  %v10980_v29 = vadd.f32 %v8587_v48, %v8586_v35  ;;  %v8589_v45 = vpop.f32.mrb[10].mxu1 }
 0x2fe   :  { %v8590_v56 = vpop.f32.mrb[11].mxu1 }
 0x2ff   :  { %v10982_v61 = vadd.f32 %v8590_v56, %v8589_v45  ;;  %v8592_v1 = vpop.f32.mrb[12].mxu1 }
 0x300   :  { %8925 = vmatpush3.bf16.msra.mxu0 %v9463_v31  ;;  %v8593_v5 = vpop.f32.mrb[13].mxu1 }
 0x301   :  { %8926 = vmatprep.subr.bf16.mxu0 %v9465_v6  ;;  %v10988_v53 = vadd.f32 %v8593_v5, %v8592_v1  ;;  %v8595_v8 = vpop.f32.mrb[14].mxu1 }
 0x302   :  { %v8596_v2 = vpop.f32.mrb[15].mxu1 }
 0x303   :  { %2768 = vmatmul.mubr.bf16.gmra.mrb[72].mxu0 %v10950_v33  ;;  %v9479_v33 = vld [vmem:[#allocation10 + $0xb8] sm:$0xff]   ;;  %v8654_v52 = vpop.f32.mrb[16].mxu1 }
 0x304   :  { %8927 = vmatpush3.bf16.msra.mxu0 %v9467_v39  ;;  %2775 = vmatprep.mubr.bf16.mxu0 %v10952_v37  ;;  %v2882_v37 = vpack.c.bf16 %v497_v62, %v495_v18  ;;  %v8655_v51 = vpop.f32.mrb[17].mxu1 }
 0x305   :  { %8928 = vmatprep.subr.bf16.mxu0 %v9469_v38  ;;  %v10998_v19 = vadd.f32 %v8655_v51, %v8654_v52  ;;  %v8657_v20 = vpop.f32.mrb[18].mxu1 }
 0x306   :  { %v8658_v59 = vpop.f32.mrb[19].mxu1 }
 0x307   :  { %v11000_v24 = vadd.f32 %v8658_v59, %v8657_v20 }
 0x308   :  { %8929 = vmatpush3.bf16.msra.mxu0 %v9471_v46 }
 0x309   :  { %8930 = vmatprep.subr.bf16.mxu0 %v9473_v47 }
 0x30b   :  { %2776 = vmatmul.mubr.bf16.gmra.mrb[76].mxu0 %v10957_v14  ;;  %v10993_v14 = vadd.f32 %v8596_v2, %v8595_v8  ;;  %v8660_v12 = vpop.f32.mrb[20].mxu1 }
 0x30c   :  { %8931 = vmatpush3.bf16.msra.mxu0 %v9475_v28  ;;  %3385 = vmatprep.mubr.bf16.mxu0 %v2883_v40  ;;  %v503_v40 = vld [vmem:[#allocation4 + $0x340] sm:$0xff]  ;;  %v8661_v31 = vpop.f32.mrb[21].mxu1 }
 0x30d   :  { %8932 = vmatprep.subr.bf16.mxu0 %v9477_v54  ;;  %v2894_v3 = vpack.c.bf16 %v505_v13, %v503_v40  ;;  %v11005_v55 = vadd.f32 %v8661_v31, %v8660_v12  ;;  %v8663_v10 = vpop.f32.mrb[22].mxu1 }
 0x30e   :  { %v8664_v11 = vpop.f32.mrb[23].mxu1 }
 0x30f   :  { %v11007_v6 = vadd.f32 %v8664_v11, %v8663_v10 }
 0x310   :  { %8933 = vmatpush3.bf16.msra.mxu0 %v9479_v33 }
 0x313   :  { %3386 = vmatmul.mubr.bf16.vlgmr.msra.gmra.mrb[80].mxu0 %v2882_v37  ;;  %v8666_v57 = vpop.f32.mrb[24].mxu1 }
 0x314   :  { %3393 = vmatprep.mubr.bf16.mxu0 %v2889_v34  ;;  %v509_v34 = vld [vmem:[#allocation4 + $0x370] sm:$0xff]  ;;  %v8667_v39 = vpop.f32.mrb[25].mxu1 }
 0x315   :  { %v11009_v38 = vadd.f32 %v8667_v39, %v8666_v57  ;;  %v8669_v46 = vpop.f32.mrb[26].mxu1 }
 0x316   :  { %v8670_v47 = vpop.f32.mrb[27].mxu1 }
 0x317   :  { %v11011_v35 = vadd.f32 %v8670_v47, %v8669_v46 }
 0x31b   :  { %3394 = vmatmul.mubr.bf16.gmra.mrb[84].mxu0 %v2888_v30  ;;  %v8672_v48 = vpop.f32.mrb[28].mxu1 }
 0x31c   :  { %3401 = vmatprep.mubr.bf16.mxu0 %v2895_v50  ;;  %v2900_v50 = vpack.c.bf16 %v509_v34, %v507_v23  ;;  %v8673_v44 = vpop.f32.mrb[29].mxu1 }
 0x31d   :  { %v11013_v21 = vadd.f32 %v8673_v44, %v8672_v48 }
 0x323   :  { %3402 = vmatmul.mubr.bf16.gmra.mrb[88].mxu0 %v2894_v3 }
 0x324   :  { %3409 = vmatprep.mubr.bf16.mxu0 %v2901_v27  ;;  %v8675_v27 = vpop.f32.mrb[30].mxu1 }
 0x325   :  { %v8676_v28 = vpop.f32.mrb[31].mxu1 }
 0x326   :  { %v11015_v45 = vadd.f32 %v8676_v28, %v8675_v27  ;;  %v8734_v54 = vpop.f32.mrb[32].mxu1 }
 0x327   :  { %v8735_v56 = vpop.f32.mrb[33].mxu1 }
 0x328   :  { %v11017_v18 = vadd.f32 %v8735_v56, %v8734_v54  ;;  %v8737_v62 = vpop.f32.mrb[34].mxu1 }
 0x329   :  { %v8738_v33 = vpop.f32.mrb[35].mxu1 }
 0x32a   :  { %v11019_v37 = vadd.f32 %v8738_v33, %v8737_v62 }
 0x32b   :  { %3410 = vmatmul.mubr.bf16.gmra.mrb[92].mxu0 %v2900_v50  ;;  %v8740_v52 = vpop.f32.mrb[36].mxu1 }
 0x32c   :  { %v8741_v40 = vpop.f32.mrb[37].mxu1 }
 0x32d   :  { %v11023_v51 = vadd.f32 %v8741_v40, %v8740_v52  ;;  %v8743_v20 = vpop.f32.mrb[38].mxu1 }
 0x32e   :  { %v8744_v59 = vpop.f32.mrb[39].mxu1 }
 0x32f   :  { %v11025_v12 = vadd.f32 %v8744_v59, %v8743_v20 }
 0x346   :  { %v8534_v1 = vpop.f32.mrb[0].mxu0 }
 0x347   :  { %v8535_v5 = vpop.f32.mrb[1].mxu0 }
 0x348   :  { %v8536_v8 = vadd.f32 %v8535_v5, %v8534_v1  ;;  %v8537_v2 = vpop.f32.mrb[2].mxu0 }
 0x349   :  { %v8538_v22 = vpop.f32.mrb[3].mxu0 }
 0x34a   :  { %v1291_v58 = vadd.f32 %v10966_v32, %v8536_v8  ;;  %v8539_v30 = vadd.f32 %v8538_v22, %v8537_v2  ;;  %v8746_v32 = vpop.f32.mrb[40].mxu1 }
 0x34b   :  { %v8747_v57 = vpop.f32.mrb[41].mxu1 }
 0x34c   :  { %v1294_v13 = vadd.f32 %v10968_v9, %v8539_v30  ;;  %v11029_v46 = vadd.f32 %v8747_v57, %v8746_v32  ;;  %v8749_v9 = vpop.f32.mrb[42].mxu1 }
 0x34d   :  { %v8750_v47 = vpop.f32.mrb[43].mxu1 }
 0x34e   :  { %v8540_v3 = vpop.f32.mrb[4].mxu0  ;;  %v11031_v44 = vadd.f32 %v8750_v47, %v8749_v9 }
 0x34f   :  { %v8541_v23 = vpop.f32.mrb[5].mxu0 }
 0x350   :  { %v8542_v34 = vadd.f32 %v8541_v23, %v8540_v3  ;;  %v8543_v31 = vpop.f32.mrb[6].mxu0 }
 0x351   :  { %v8544_v10 = vpop.f32.mrb[7].mxu0 }
 0x352   :  { %v1299_v11 = vadd.f32 %v10972_v63, %v8542_v34  ;;  %v8545_v50 = vadd.f32 %v8544_v10, %v8543_v31  ;;  %v8752_v63 = vpop.f32.mrb[44].mxu1 }
 0x353   :  { %v8753_v1 = vpop.f32.mrb[45].mxu1 }
 0x354   :  { %v1302_v39 = vadd.f32 %v10976_v7, %v8545_v50  ;;  %v11035_v8 = vadd.f32 %v8753_v1, %v8752_v63  ;;  %v8755_v7 = vpop.f32.mrb[46].mxu1 }
 0x355   :  { %v8756_v2 = vpop.f32.mrb[47].mxu1 }
 0x356   :  { %v8546_v48 = vpop.f32.mrb[8].mxu0  ;;  %v11037_v30 = vadd.f32 %v8756_v2, %v8755_v7 }
 0x357   :  { %v8547_v27 = vpop.f32.mrb[9].mxu0 }
 0x358   :  { %v8548_v28 = vadd.f32 %v8547_v27, %v8546_v48  ;;  %v8549_v54 = vpop.f32.mrb[10].mxu0 }
 0x359   :  { %v8550_v56 = vpop.f32.mrb[11].mxu0 }
 0x35a   :  { %v1307_v62 = vadd.f32 %v10980_v29, %v8548_v28  ;;  %v8551_v33 = vadd.f32 %v8550_v56, %v8549_v54 }
 0x35c   :  { %v1310_v5 = vadd.f32 %v10982_v61, %v8551_v33 }
 0x35e   :  { %v8552_v22 = vpop.f32.mrb[12].mxu0 }
 0x35f   :  { %v8553_v52 = vpop.f32.mrb[13].mxu0 }
 0x360   :  { %v8554_v40 = vadd.f32 %v8553_v52, %v8552_v22  ;;  %v8555_v20 = vpop.f32.mrb[14].mxu0 }
 0x361   :  { %v8556_v59 = vpop.f32.mrb[15].mxu0 }
 0x362   :  { %v1315_v3 = vadd.f32 %v10988_v53, %v8554_v40  ;;  %v8557_v23 = vadd.f32 %v8556_v59, %v8555_v20 }
 0x364   :  { %v1318_v29 = vadd.f32 %v10993_v14, %v8557_v23 }
 0x366   :  { %v8614_v34 = vpop.f32.mrb[16].mxu0 }
 0x367   :  { %v8615_v31 = vpop.f32.mrb[17].mxu0 }
 0x368   :  { %v8616_v10 = vadd.f32 %v8615_v31, %v8614_v34  ;;  %v8617_v61 = vpop.f32.mrb[18].mxu0 }
 0x369   :  { %v8618_v50 = vpop.f32.mrb[19].mxu0 }
 0x36a   :  { %v11041_v32 = vadd.f32 %v8616_v10, %v1291_v58  ;;  %v8619_v57 = vadd.f32 %v8618_v50, %v8617_v61  ;;  %v8814_v33 = vpop.f32.mrb[48].mxu1 }
 0x36b   :  { %v8815_v63 = vpop.f32.mrb[49].mxu1 }
 0x36c   :  { %v11043_v9 = vadd.f32 %v8619_v57, %v1294_v13  ;;  %v3539_v47 = vmul.f32 %v11041_v32, %v11041_v32  ;;  %v11053_v7 = vadd.f32 %v8815_v63, %v8814_v33  ;;  %v8817_v2 = vpop.f32.mrb[50].mxu1 }
 0x36d   :  { %v8818_v22 = vpop.f32.mrb[51].mxu1 }
 0x36e   :  { %v3483_v48 = vadd.f32 %v11043_v9, %v11041_v32  ;;  %v3540_v53 = vmul.f32 %v11043_v9, %v11043_v9  ;;  %v8620_v14 = vpop.f32.mrb[20].mxu0  ;;  %v11057_v40 = vadd.f32 %v8818_v22, %v8817_v2 }
 0x36f   :  { %v8621_v27 = vpop.f32.mrb[21].mxu0 }
 0x370   :  { %v3547_v28 = vadd.f32 %v3540_v53, %v3539_v47  ;;  %v8622_v54 = vadd.f32 %v8621_v27, %v8620_v14  ;;  %v8623_v56 = vpop.f32.mrb[22].mxu0 }
 0x371   :  { %v8624_v58 = vpop.f32.mrb[23].mxu0 }
 0x372   :  { %v11051_v1 = vadd.f32 %v8622_v54, %v1299_v11  ;;  %v8625_v13 = vadd.f32 %v8624_v58, %v8623_v56  ;;  %v8820_v31 = vpop.f32.mrb[52].mxu1 }
 0x373   :  { %v8821_v61 = vpop.f32.mrb[53].mxu1 }
 0x374   :  { %v11055_v52 = vadd.f32 %v8625_v13, %v1302_v39  ;;  %v11061_v57 = vadd.f32 %v8821_v61, %v8820_v31  ;;  %v8823_v47 = vpop.f32.mrb[54].mxu1 }
 0x375   :  { %v8824_v53 = vpop.f32.mrb[55].mxu1 }
 0x376   :  { %v8626_v20 = vpop.f32.mrb[24].mxu0  ;;  %v11065_v39 = vadd.f32 %v8824_v53, %v8823_v47 }
 0x377   :  { %v8627_v59 = vpop.f32.mrb[25].mxu0 }
 0x378   :  { %v8628_v23 = vadd.f32 %v8627_v59, %v8626_v20  ;;  %v8629_v34 = vpop.f32.mrb[26].mxu0 }
 0x379   :  { %v8630_v10 = vpop.f32.mrb[27].mxu0 }
 0x37a   :  { %v11059_v50 = vadd.f32 %v8628_v23, %v1307_v62  ;;  %v8631_v11 = vadd.f32 %v8630_v10, %v8629_v34  ;;  %v8826_v63 = vpop.f32.mrb[56].mxu1 }
 0x37b   :  { %v8827_v62 = vpop.f32.mrb[57].mxu1 }
 0x37c   :  { %v11063_v14 = vadd.f32 %v8631_v11, %v1310_v5  ;;  %v11069_v22 = vadd.f32 %v8827_v62, %v8826_v63  ;;  %v8829_v20 = vpop.f32.mrb[58].mxu1  ;;  %v3541_v11 = vmul.f32 %v11051_v1, %v11051_v1 }
 0x37d   :  { %v8830_v23 = vpop.f32.mrb[59].mxu1 }
 0x37e   :  { %v8632_v27 = vpop.f32.mrb[28].mxu0  ;;  %v11073_v5 = vadd.f32 %v8830_v23, %v8829_v20  ;;  %v3548_v62 = vadd.f32 %v3547_v28, %v3541_v11  ;;  %v3542_v20 = vmul.f32 %v11055_v52, %v11055_v52 }
 0x37f   :  { %v8633_v54 = vpop.f32.mrb[29].mxu0 }
 0x380   :  { %v8634_v56 = vadd.f32 %v8633_v54, %v8632_v27  ;;  %v8635_v33 = vpop.f32.mrb[30].mxu0  ;;  %v3549_v11 = vadd.f32 %v3548_v62, %v3542_v20 }
 0x381   :  { %v8636_v58 = vpop.f32.mrb[31].mxu0 }
 0x382   :  { %v11067_v13 = vadd.f32 %v8634_v56, %v1315_v3  ;;  %v8637_v2 = vadd.f32 %v8636_v58, %v8635_v33  ;;  %v8832_v3 = vpop.f32.mrb[60].mxu1  ;;  %v3484_v56 = vadd.f32 %v3483_v48, %v11051_v1 }
 0x383   :  { %v8833_v54 = vpop.f32.mrb[61].mxu1 }
 0x384   :  { %v11071_v59 = vadd.f32 %v8637_v2, %v1318_v29  ;;  %v11079_v29 = vadd.f32 %v8833_v54, %v8832_v3  ;;  %v8835_v33 = vpop.f32.mrb[62].mxu1  ;;  %v3485_v48 = vadd.f32 %v3484_v56, %v11055_v52  ;;  %v3544_v56 = vmul.f32 %v11063_v14, %v11063_v14 }
 0x385   :  { %v8836_v2 = vpop.f32.mrb[63].mxu1  ;;  %v3545_v62 = vmul.f32 %v11067_v13, %v11067_v13 }
 0x386   :  { %v8694_v34 = vpop.f32.mrb[32].mxu0  ;;  %v11087_v23 = vadd.f32 %v8836_v2, %v8835_v33 }
 0x387   :  { %v8695_v31 = vpop.f32.mrb[33].mxu0 }
 0x388   :  { %v8696_v10 = vadd.f32 %v8695_v31, %v8694_v34  ;;  %v8697_v61 = vpop.f32.mrb[34].mxu0  ;;  %v3543_v31 = vmul.f32 %v11059_v50, %v11059_v50 }
 0x389   :  { %v8698_v47 = vpop.f32.mrb[35].mxu0 }
 0x38a   :  { %v1990_v53 = vadd.f32 %v8696_v10, %v10998_v19  ;;  %v8699_v27 = vadd.f32 %v8698_v47, %v8697_v61  ;;  %v3550_v54 = vadd.f32 %v3549_v11, %v3543_v31 }
 0x38c   :  { %v11082_v58 = vadd.f32 %v11017_v18, %v1990_v53  ;;  %v1993_v63 = vadd.f32 %v8699_v27, %v11000_v24 }
 0x38e   :  { %v11090_v19 = vadd.f32 %v11019_v37, %v1993_v63  ;;  %v8700_v34 = vpop.f32.mrb[36].mxu0  ;;  %v3561_v24 = vmul.f32 %v11082_v58, %v11082_v58  ;;  %v3486_v37 = vadd.f32 %v3485_v48, %v11059_v50 }
 0x38f   :  { %v8701_v18 = vpop.f32.mrb[37].mxu0 }
 0x390   :  { %v3497_v28 = vadd.f32 %v11090_v19, %v11082_v58  ;;  %v3562_v10 = vmul.f32 %v11090_v19, %v11090_v19  ;;  %v8703_v61 = vpop.f32.mrb[38].mxu0  ;;  %v8702_v47 = vadd.f32 %v8701_v18, %v8700_v34  ;;  %v8894_v2 = vpop.f32.mrb[64].mxu1  ;;  %v3487_v0 = vadd.f32 %v3486_v37, %v11063_v14 }
 0x391   :  { %v8704_v3 = vpop.f32.mrb[39].mxu0  ;;  %v8895_v34 = vpop.f32.mrb[65].mxu1 }
 0x392   :  { %v3569_v53 = vadd.f32 %v3562_v10, %v3561_v24  ;;  %v8705_v27 = vadd.f32 %v8704_v3, %v8703_v61  ;;  %v1998_v33 = vadd.f32 %v8702_v47, %v11005_v55  ;;  %v11115_v18 = vadd.f32 %v8895_v34, %v8894_v2  ;;  %v8897_v24 = vpop.f32.mrb[66].mxu1 }
 0x393   :  { %v3551_v55 = vadd.f32 %v3550_v54, %v3544_v56  ;;  %v8898_v37 = vpop.f32.mrb[67].mxu1  ;;  %v3546_v54 = vmul.f32 %v11071_v59, %v11071_v59 }
 0x394   :  { %v2001_v63 = vadd.f32 %v8705_v27, %v11007_v6  ;;  %v11110_v20 = vadd.f32 %v11023_v51, %v1998_v33  ;;  %v3488_v6 = vadd.f32 %v3487_v0, %v11067_v13  ;;  %v11123_v3 = vadd.f32 %v8898_v37, %v8897_v24 }
 0x395   :  { %v3552_v27 = vadd.f32 %v3551_v55, %v3545_v62 }
 0x396   :  { %v11113_v48 = vadd.f32 %v11025_v12, %v2001_v63  ;;  %v8706_v31 = vpop.f32.mrb[40].mxu0  ;;  %v3498_v10 = vadd.f32 %v3497_v28, %v11110_v20  ;;  %v3563_v61 = vmul.f32 %v11110_v20, %v11110_v20  ;;  %v3489_v2 = vadd.f32 %v3488_v6, %v11071_v59 }
 0x397   :  { %v8707_v11 = vpop.f32.mrb[41].mxu0  ;;  %v3553_v62 = vadd.f32 %v3552_v27, %v3546_v54 }
 0x398   :  { %v3564_v51 = vmul.f32 %v11113_v48, %v11113_v48  ;;  %v8708_v47 = vadd.f32 %v8707_v11, %v8706_v31  ;;  %v8709_v12 = vpop.f32.mrb[42].mxu0  ;;  %v3570_v56 = vadd.f32 %v3569_v53, %v3563_v61  ;;  %v3499_v0 = vadd.f32 %v3498_v10, %v11113_v48  ;;  %v8900_v24 = vpop.f32.mrb[68].mxu1 }
 0x399   :  { %v8710_v28 = vpop.f32.mrb[43].mxu0  ;;  %v8901_v55 = vpop.f32.mrb[69].mxu1  ;;  %v3490_v37 = vrot.slane %v3489_v2, 4 }
 0x39a   :  { %v2006_v33 = vadd.f32 %v8708_v47, %v11009_v38  ;;  %v8711_v63 = vadd.f32 %v8710_v28, %v8709_v12  ;;  %v3571_v34 = vadd.f32 %v3570_v56, %v3564_v51  ;;  %v11140_v61 = vadd.f32 %v8901_v55, %v8900_v24  ;;  %v8903_v6 = vpop.f32.mrb[70].mxu1 }
 0x39b   :  { %v8904_v51 = vpop.f32.mrb[71].mxu1  ;;  %v3554_v56 = vrot.slane %v3553_v62, 4  ;;  %v3491_v24 = vadd.f32 %v3490_v37, %v3489_v2 }
 0x39c   :  { %v11131_v49 = vadd.f32 %v11029_v46, %v2006_v33  ;;  %v2009_v31 = vadd.f32 %v8711_v63, %v11011_v35  ;;  %v11145_v28 = vadd.f32 %v8904_v51, %v8903_v6 }
 0x39d   :  { %v3492_v37 = vrot.slane %v3491_v24, 2 }
 0x39e   :  { %v3500_v11 = vadd.f32 %v3499_v0, %v11131_v49  ;;  %v3565_v53 = vmul.f32 %v11131_v49, %v11131_v49  ;;  %v11138_v10 = vadd.f32 %v11031_v44, %v2009_v31  ;;  %v8712_v38 = vpop.f32.mrb[44].mxu0  ;;  %v9481_v31 = vld [vmem:[#allocation15 + $0x80] sm:$0xff]  }
 0x39f   :  { %v8713_v46 = vpop.f32.mrb[45].mxu0  ;;  %9131 = vmatprep.subr.bf16.mxu1 %v9481_v31 }
 0x3a0   :  { %v3572_v47 = vadd.f32 %v3571_v34, %v3565_v53  ;;  %v3501_v35 = vadd.f32 %v3500_v11, %v11138_v10  ;;  %v3566_v12 = vmul.f32 %v11138_v10, %v11138_v10  ;;  %v8714_v27 = vadd.f32 %v8713_v46, %v8712_v38  ;;  %v8715_v54 = vpop.f32.mrb[46].mxu0  ;;  %v8906_v11 = vpop.f32.mrb[72].mxu1  ;;  %9132 = vmatpush3.bf16.msra.mxu1 %v9481_v31 }
 0x3a1   :  { %v8716_v0 = vpop.f32.mrb[47].mxu0  ;;  %v3555_v53 = vadd.f32 %v3554_v56, %v3553_v62  ;;  %v8907_v38 = vpop.f32.mrb[73].mxu1 }
 0x3a2   :  { %v3573_v44 = vadd.f32 %v3572_v47, %v3566_v12  ;;  %v2014_v33 = vadd.f32 %v8714_v27, %v11013_v21  ;;  %v8717_v63 = vadd.f32 %v8716_v0, %v8715_v54  ;;  %v11158_v2 = vadd.f32 %v8907_v38, %v8906_v11 }
 0x3a3   :  { %v3556_v56 = vrot.slane %v3555_v53, 2  ;;  %v3493_v11 = vadd.f32 %v3492_v37, %v3491_v24 }
 0x3a4   :  { %v11149_v55 = vadd.f32 %v11035_v8, %v2014_v33  ;;  %v2017_v34 = vadd.f32 %v8717_v63, %v11015_v45  ;;  %v8909_v8 = vpop.f32.mrb[74].mxu1 }
 0x3a5   :  { %v8910_v45 = vpop.f32.mrb[75].mxu1  ;;  %v3557_v36 = vadd.f32 %v3556_v56, %v3555_v53 }
 0x3a6   :  { %v3502_v46 = vadd.f32 %v3501_v35, %v11149_v55  ;;  %v3567_v6 = vmul.f32 %v11149_v55, %v11149_v55  ;;  %v11156_v21 = vadd.f32 %v11037_v30, %v2017_v34  ;;  %v8774_v51 = vpop.f32.mrb[48].mxu0  ;;  %v11163_v33 = vadd.f32 %v8910_v45, %v8909_v8 }
 0x3a7   :  { %v8775_v47 = vpop.f32.mrb[49].mxu0 }
 0x3a8   :  { %v3574_v12 = vadd.f32 %v3573_v44, %v3567_v6  ;;  %v3503_v62 = vadd.f32 %v3502_v46, %v11156_v21  ;;  %v3568_v27 = vmul.f32 %v11156_v21, %v11156_v21  ;;  %v8776_v35 = vadd.f32 %v8775_v47, %v8774_v51  ;;  %v8777_v54 = vpop.f32.mrb[50].mxu0  ;;  %v8912_v6 = vpop.f32.mrb[76].mxu1 }
 0x3a9   :  { %v8778_v0 = vpop.f32.mrb[51].mxu0  ;;  %v8913_v51 = vpop.f32.mrb[77].mxu1 }
 0x3aa   :  { %v3504_v30 = vrot.slane %v3503_v62, 4  ;;  %v3575_v63 = vadd.f32 %v3574_v12, %v3568_v27  ;;  %v11166_v31 = vadd.f32 %v11053_v7, %v8776_v35  ;;  %v8779_v34 = vadd.f32 %v8778_v0, %v8777_v54  ;;  %v8915_v45 = vpop.f32.mrb[78].mxu1 }
 0x3ab   :  { %v11171_v8 = vadd.f32 %v8913_v51, %v8912_v6  ;;  %v3494_v12 = vrot.slane %v3493_v11, 1  ;;  %v8916_v7 = vpop.f32.mrb[79].mxu1 }
 0x3ac   :  { %v3505_v38 = vadd.f32 %v3504_v30, %v3503_v62  ;;  %v3576_v44 = vrot.slane %v3575_v63, 4  ;;  %v11169_v46 = vadd.f32 %v11057_v40, %v8779_v34  ;;  %v11173_v62 = vadd.f32 %v8916_v7, %v8915_v45 }
 0x3ad   :  { %v3558_v40 = vrot.slane %v3557_v36, 1  ;;  %v3495_v34 = vadd.f32 %v3494_v12, %v3493_v11 }
 0x3ae   :  { %v3506_v47 = vrot.slane %v3505_v38, 2  ;;  %v3577_v41 = vadd.f32 %v3576_v44, %v3575_v63  ;;  %v8780_v42 = vpop.f32.mrb[52].mxu0 }
 0x3af   :  { %v8781_v27 = vpop.f32.mrb[53].mxu0 }
 0x3b0   :  { %v3507_v35 = vadd.f32 %v3506_v47, %v3505_v38  ;;  %v3578_v54 = vrot.slane %v3577_v41, 2  ;;  %v8782_v24 = vadd.f32 %v8781_v27, %v8780_v42  ;;  %v8783_v37 = vpop.f32.mrb[54].mxu0  ;;  %v8974_v38 = vpop.f32.mrb[80].mxu1  ;;  %v3559_v42 = vadd.f32 %v3558_v40, %v3557_v36 }
 0x3b1   :  { %v8784_v0 = vpop.f32.mrb[55].mxu0  ;;  %v8975_v47 = vpop.f32.mrb[81].mxu1 }
 0x3b2   :  { %v3508_v30 = vrot.slane %v3507_v35, 1  ;;  %v3579_v53 = vadd.f32 %v3578_v54, %v3577_v41  ;;  %v11176_v56 = vadd.f32 %v11061_v57, %v8782_v24  ;;  %v8785_v63 = vadd.f32 %v8784_v0, %v8783_v37  ;;  %v8977_v41 = vpop.f32.mrb[82].mxu1  ;;  %v9484_v0 = vld [vmem:[#allocation15 + $0x40] sm:$0xff]  }
 0x3b3   :  { %v11183_v25 = vadd.f32 %v8975_v47, %v8974_v38  ;;  %v8978_v57 = vpop.f32.mrb[83].mxu1  ;;  %8998 = vmatprep.subr.bf16.mxu0 %v9484_v0  ;;  %v9491_v0 = vld [vmem:[#allocation15 + $0x10] sm:$0xff]  }
 0x3b4   :  { %v3509_v44 = vadd.f32 %v3508_v30, %v3507_v35  ;;  %v3580_v6 = vrot.slane %v3579_v53, 1  ;;  %v11179_v51 = vadd.f32 %v11065_v39, %v8785_v63  ;;  %v11187_v12 = vadd.f32 %v8978_v57, %v8977_v41  ;;  %v9482_v39 = vld [vmem:[#allocation15 + $0x88] sm:$0xff]   ;;  %v9485_v30 = vld [vmem:[#allocation15] sm:$0xff]  }
 0x3b5   :  { %9133 = vmatprep.subr.bf16.mxu1 %v9482_v39  ;;  %8999 = vmatpush3.bf16.msra.mxu0 %v9485_v30 }
 0x3b6   :  { %v3581_v27 = vadd.f32 %v3580_v6, %v3579_v53  ;;  %v8786_v45 = vpop.f32.mrb[56].mxu0  ;;  %v11181_v7 = vadd.f32 %v3509_v44, %v3495_v34  ;;  %9134 = vmatpush3.bf16.msra.mxu1 %v9482_v39  ;;  %v9483_v44 = vld [vmem:[#allocation15 + $0x90] sm:$0xff]   ;;  %v9487_v6 = vld [vmem:[#allocation15 + $0x48] sm:$0xff]  }
 0x3b7   :  { %v8787_v54 = vpop.f32.mrb[57].mxu0  ;;  %9135 = vmatprep.subr.bf16.mxu1 %v9483_v44  ;;  %9000 = vmatprep.subr.bf16.mxu0 %v9487_v6 }
 0x3b8   :  { %v8788_v24 = vadd.f32 %v8787_v54, %v8786_v45  ;;  %v8789_v37 = vpop.f32.mrb[58].mxu0  ;;  %v11185_v11 = vadd.f32 %v3581_v27, %v3559_v42  ;;  %v8980_v63 = vpop.f32.mrb[84].mxu1  ;;  %v9488_v27 = vld [vmem:[#allocation15 + $0x8] sm:$0xff]  }
 0x3b9   :  { %v8790_v35 = vpop.f32.mrb[59].mxu0  ;;  %v8981_v34 = vpop.f32.mrb[85].mxu1  ;;  %9001 = vmatpush3.bf16.msra.mxu0 %v9488_v27  ;;  %v9494_v27 = vld [vmem:[#allocation15 + $0x18] sm:$0xff]  }
 0x3ba   :  { %v11190_v36 = vadd.f32 %v11069_v22, %v8788_v24  ;;  %v8791_v40 = vadd.f32 %v8790_v35, %v8789_v37  ;;  %v11195_v47 = vadd.f32 %v8981_v34, %v8980_v63  ;;  %v8983_v42 = vpop.f32.mrb[86].mxu1  ;;  %9136 = vmatpush3.bf16.msra.mxu1 %v9483_v44  ;;  %v9486_v24 = vld [vmem:[#allocation15 + $0x98] sm:$0xff]   ;;  %v9490_v37 = vld [vmem:[#allocation15 + $0x50] sm:$0xff]   ;;  %v9489_v34 = vld [vmem:[#allocation15 + $0xa0] sm:$0xff]  }
 0x3bb   :  { %v8984_v45 = vpop.f32.mrb[87].mxu1  ;;  %9137 = vmatprep.subr.bf16.mxu1 %v9486_v24  ;;  %9002 = vmatprep.subr.bf16.mxu0 %v9490_v37  ;;  %v9493_v44 = vld [vmem:[#allocation15 + $0x58] sm:$0xff]  }
 0x3bc   :  { %v11193_v53 = vadd.f32 %v11073_v5, %v8791_v40  ;;  %v11197_v57 = vadd.f32 %v8984_v45, %v8983_v42 }
 0x3bd   :  { %9003 = vmatpush3.bf16.msra.mxu0 %v9491_v0  ;;  %v9497_v0 = vld [vmem:[#allocation15 + $0x20] sm:$0xff]  }
 0x3be   :  { %v8792_v38 = vpop.f32.mrb[60].mxu0  ;;  %9138 = vmatpush3.bf16.msra.mxu1 %v9486_v24  ;;  %9004 = vmatprep.subr.bf16.mxu0 %v9493_v44  ;;  %v9496_v24 = vld [vmem:[#allocation15 + $0x60] sm:$0xff]  }
 0x3bf   :  { %v8793_v22 = vpop.f32.mrb[61].mxu0  ;;  %9139 = vmatprep.subr.bf16.mxu1 %v9489_v34 }
 0x3c0   :  { %v8794_v41 = vadd.f32 %v8793_v22, %v8792_v38  ;;  %v8795_v54 = vpop.f32.mrb[62].mxu0  ;;  %v8986_v30 = vpop.f32.mrb[88].mxu1 }
 0x3c1   :  { %v8796_v5 = vpop.f32.mrb[63].mxu0  ;;  %v8987_v63 = vpop.f32.mrb[89].mxu1  ;;  %9005 = vmatpush3.bf16.msra.mxu0 %v9494_v27 }
 0x3c2   :  { %v11200_v39 = vadd.f32 %v11079_v29, %v8794_v41  ;;  %v8797_v35 = vadd.f32 %v8796_v5, %v8795_v54  ;;  %v11205_v38 = vadd.f32 %v8987_v63, %v8986_v30  ;;  %v8989_v42 = vpop.f32.mrb[90].mxu1  ;;  %9140 = vmatpush3.bf16.msra.mxu1 %v9489_v34  ;;  %v9492_v5 = vld [vmem:[#allocation15 + $0xa8] sm:$0xff]   ;;  %9006 = vmatprep.subr.bf16.mxu0 %v9496_v24 }
 0x3c3   :  { %v8990_v22 = vpop.f32.mrb[91].mxu1  ;;  %9141 = vmatprep.subr.bf16.mxu1 %v9492_v5  ;;  %v9499_v34 = vld [vmem:[#allocation15 + $0x68] sm:$0xff]  }
 0x3c4   :  { %v11203_v40 = vadd.f32 %v11087_v23, %v8797_v35  ;;  %v11207_v54 = vadd.f32 %v8990_v22, %v8989_v42 }
 0x3c5   :  { %9007 = vmatpush3.bf16.msra.mxu0 %v9497_v0 }
 0x3c6   :  { %v8854_v6 = vpop.f32.mrb[64].mxu0  ;;  %9142 = vmatpush3.bf16.msra.mxu1 %v9492_v5  ;;  %9008 = vmatprep.subr.bf16.mxu0 %v9499_v34 }
 0x3c7   :  { %v8855_v29 = vpop.f32.mrb[65].mxu0 }
 0x3c8   :  { %v8856_v45 = vadd.f32 %v8855_v29, %v8854_v6  ;;  %v8857_v41 = vpop.f32.mrb[66].mxu0  ;;  %v8992_v63 = vpop.f32.mrb[92].mxu1  ;;  %v9495_v6 = vld [vmem:[#allocation15 + $0xb0] sm:$0xff]  }
 0x3c9   :  { %v8858_v23 = vpop.f32.mrb[67].mxu0  ;;  %v8993_v44 = vpop.f32.mrb[93].mxu1  ;;  %9143 = vmatprep.subr.bf16.mxu1 %v9495_v6 }
 0x3ca   :  { %v11210_v37 = vadd.f32 %v8856_v45, %v11166_v31  ;;  %v8859_v35 = vadd.f32 %v8858_v23, %v8857_v41  ;;  %v11221_v22 = vadd.f32 %v8993_v44, %v8992_v63  ;;  %v9500_v45 = vld [vmem:[#allocation15 + $0x28] sm:$0xff]   ;;  %9144 = vmatpush3.bf16.msra.mxu1 %v9495_v6 }
 0x3cb   :  { %9009 = vmatpush3.bf16.msra.mxu0 %v9500_v45  ;;  %9145 = vmatprep.subr.bf16.mxu1 %v9498_v26 }
 0x3cc   :  { %v11213_v30 = vadd.f32 %v8859_v35, %v11169_v46  ;;  %v3583_v42 = vmul.f32 %v11210_v37, %v11210_v37  ;;  %v8995_v46 = vpop.f32.mrb[94].mxu1 }
 0x3cd   :  { %v8996_v23 = vpop.f32.mrb[95].mxu1 }
 0x3ce   :  { %v3511_v31 = vadd.f32 %v11213_v30, %v11210_v37  ;;  %v3584_v27 = vmul.f32 %v11213_v30, %v11213_v30  ;;  %v8860_v29 = vpop.f32.mrb[68].mxu0  ;;  %v11223_v0 = vadd.f32 %v8996_v23, %v8995_v46  ;;  %9146 = vmatpush3.bf16.msra.mxu1 %v9498_v26  ;;  %v11237_v23 = vld [vmem:[#allocation15 + $0x80] sm:$0xff]  }
 0x3cf   :  { %v8861_v41 = vpop.f32.mrb[69].mxu0  ;;  %9155 = vmatprep.subr.bf16.mxu1 %v11237_v23 }
 0x3d0   :  { %v3591_v5 = vadd.f32 %v3584_v27, %v3583_v42  ;;  %v8862_v24 = vadd.f32 %v8861_v41, %v8860_v29  ;;  %v8863_v35 = vpop.f32.mrb[70].mxu0 }
 0x3d1   :  { %v8864_v16 = vpop.f32.mrb[71].mxu0 }
 0x3d2   :  { %v11226_v17 = vadd.f32 %v8862_v24, %v11176_v56  ;;  %v8865_v63 = vadd.f32 %v8864_v16, %v8863_v35  ;;  %v9502_v56 = vld [vmem:[#allocation15 + $0x70] sm:$0xff]  }
 0x3d3   :  { %v9503_v16 = vld [vmem:[#allocation15 + $0x30] sm:$0xff]   ;;  %9010 = vmatprep.subr.bf16.mxu0 %v9502_v56 }
 0x3d4   :  { %v3512_v44 = vadd.f32 %v3511_v31, %v11226_v17  ;;  %v3585_v4 = vmul.f32 %v11226_v17, %v11226_v17  ;;  %v11232_v34 = vadd.f32 %v8865_v63, %v11179_v51  ;;  %9011 = vmatpush3.bf16.msra.mxu0 %v9503_v16  ;;  %v9505_v51 = vld [vmem:[#allocation15 + $0x78] sm:$0xff]  }
 0x3d5   :  { %9012 = vmatprep.subr.bf16.mxu0 %v9505_v51 }
 0x3d6   :  { %v3592_v42 = vadd.f32 %v3591_v5, %v3585_v4  ;;  %v3513_v6 = vadd.f32 %v3512_v44, %v11232_v34  ;;  %v3586_v27 = vmul.f32 %v11232_v34, %v11232_v34  ;;  %v8866_v29 = vpop.f32.mrb[72].mxu0  ;;  %v9506_v5 = vld [vmem:[#allocation15 + $0x38] sm:$0xff]  }
 0x3d7   :  { %v8867_v46 = vpop.f32.mrb[73].mxu0 }
 0x3d8   :  { %v3593_v45 = vadd.f32 %v3592_v42, %v3586_v27  ;;  %v8868_v41 = vadd.f32 %v8867_v46, %v8866_v29  ;;  %v8869_v31 = vpop.f32.mrb[74].mxu0  ;;  %9013 = vmatpush3.bf16.msra.mxu0 %v9506_v5  ;;  %v9508_v46 = vld [vmem:[#allocation15 + $0x40] sm:$0xff]  }
 0x3d9   :  { %v8870_v24 = vpop.f32.mrb[75].mxu0  ;;  %9050 = vmatprep.subr.bf16.mxu0 %v9508_v46 }
 0x3da   :  { %v11240_v26 = vadd.f32 %v8868_v41, %v11190_v36  ;;  %v8871_v4 = vadd.f32 %v8870_v24, %v8869_v31 }
 0x3dc   :  { %v3514_v35 = vadd.f32 %v3513_v6, %v11240_v26  ;;  %v3587_v63 = vmul.f32 %v11240_v26, %v11240_v26  ;;  %v11247_v44 = vadd.f32 %v8871_v4, %v11193_v53 }
 0x3de   :  { %v3594_v42 = vadd.f32 %v3593_v45, %v3587_v63  ;;  %v3515_v27 = vadd.f32 %v3514_v35, %v11247_v44  ;;  %v3588_v36 = vmul.f32 %v11247_v44, %v11247_v44  ;;  %v8872_v29 = vpop.f32.mrb[76].mxu0 }
 0x3df   :  { %v8873_v56 = vpop.f32.mrb[77].mxu0 }
 0x3e0   :  { %v3595_v16 = vadd.f32 %v3594_v42, %v3588_v36  ;;  %v8874_v41 = vadd.f32 %v8873_v56, %v8872_v29  ;;  %v8875_v6 = vpop.f32.mrb[78].mxu0 }
 0x3e1   :  { %v8876_v31 = vpop.f32.mrb[79].mxu0 }
 0x3e2   :  { %v11253_v24 = vadd.f32 %v8874_v41, %v11200_v39  ;;  %v8877_v53 = vadd.f32 %v8876_v31, %v8875_v6 }
 0x3e4   :  { %v3516_v4 = vadd.f32 %v3515_v27, %v11253_v24  ;;  %v3589_v45 = vmul.f32 %v11253_v24, %v11253_v24  ;;  %v11259_v51 = vadd.f32 %v8877_v53, %v11203_v40 }
 0x3e6   :  { %v3596_v5 = vadd.f32 %v3595_v16, %v3589_v45  ;;  %v3517_v35 = vadd.f32 %v3516_v4, %v11259_v51  ;;  %v3590_v63 = vmul.f32 %v11259_v51, %v11259_v51  ;;  %v8934_v42 = vpop.f32.mrb[80].mxu0 }
 0x3e7   :  { %v8935_v36 = vpop.f32.mrb[81].mxu0 }
 0x3e8   :  { %v3518_v29 = vrot.slane %v3517_v35, 4  ;;  %v3597_v39 = vadd.f32 %v3596_v5, %v3590_v63  ;;  %v8936_v56 = vadd.f32 %v8935_v36, %v8934_v42  ;;  %v8937_v46 = vpop.f32.mrb[82].mxu0 }
 0x3e9   :  { %v8938_v41 = vpop.f32.mrb[83].mxu0 }
 0x3ea   :  { %v3519_v27 = vadd.f32 %v3518_v29, %v3517_v35  ;;  %v3598_v6 = vrot.slane %v3597_v39, 4  ;;  %v3388_v31 = vadd.f32 %v8936_v56, %v11115_v18  ;;  %v8939_v43 = vadd.f32 %v8938_v41, %v8937_v46 }
 0x3ec   :  { %v3520_v40 = vrot.slane %v3519_v27, 2  ;;  %v3599_v53 = vadd.f32 %v3598_v6, %v3597_v39  ;;  %v11266_v16 = vadd.f32 %v11183_v25, %v3388_v31  ;;  %v3391_v4 = vadd.f32 %v8939_v43, %v11123_v3 }
 0x3ee   :  { %v3521_v45 = vadd.f32 %v3520_v40, %v3519_v27  ;;  %v3600_v60 = vrot.slane %v3599_v53, 2  ;;  %v11270_v15 = vadd.f32 %v11187_v12, %v3391_v4  ;;  %v8940_v5 = vpop.f32.mrb[84].mxu0  ;;  %v3605_v35 = vmul.f32 %v11266_v16, %v11266_v16 }
 0x3ef   :  { %v8941_v63 = vpop.f32.mrb[85].mxu0 }
 0x3f0   :  { %v3522_v42 = vrot.slane %v3521_v45, 1  ;;  %v3601_v18 = vadd.f32 %v3600_v60, %v3599_v53  ;;  %v3525_v36 = vadd.f32 %v11270_v15, %v11266_v16  ;;  %v3606_v25 = vmul.f32 %v11270_v15, %v11270_v15  ;;  %v8943_v29 = vpop.f32.mrb[86].mxu0 }
 0x3f1   :  { %v8942_v43 = vadd.f32 %v8941_v63, %v8940_v5  ;;  %v8944_v3 = vpop.f32.mrb[87].mxu0 }
 0x3f2   :  { %v3523_v39 = vadd.f32 %v3522_v42, %v3521_v45  ;;  %v3602_v56 = vrot.slane %v3601_v18, 1  ;;  %v3613_v12 = vadd.f32 %v3606_v25, %v3605_v35  ;;  %v8945_v46 = vadd.f32 %v8944_v3, %v8943_v29 }
 0x3f3   :  { %v3396_v41 = vadd.f32 %v8942_v43, %v11140_v61 }
 0x3f4   :  { %v3524_v27 = vadd.f32 %v3523_v39, %v11181_v7  ;;  %v3603_v6 = vadd.f32 %v3602_v56, %v3601_v18  ;;  %v3399_v60 = vadd.f32 %v8945_v46, %v11145_v28 }
 0x3f5   :  { %v11282_v31 = vadd.f32 %v11195_v47, %v3396_v41 }
 0x3f6   :  { %v3604_v40 = vadd.f32 %v3603_v6, %v11185_v11  ;;  %v11286_v53 = vadd.f32 %v11197_v57, %v3399_v60  ;;  %v8946_v4 = vpop.f32.mrb[88].mxu0 }
 0x3f7   :  { %v3526_v45 = vadd.f32 %v3525_v36, %v11282_v31  ;;  %v3607_v5 = vmul.f32 %v11282_v31, %v11282_v31  ;;  %v8947_v61 = vpop.f32.mrb[89].mxu0 }
 0x3f8   :  { %v3608_v7 = vmul.f32 %v11286_v53, %v11286_v53  ;;  %v8948_v35 = vadd.f32 %v8947_v61, %v8946_v4  ;;  %v8949_v28 = vpop.f32.mrb[90].mxu0 }
 0x3f9   :  { %v3614_v63 = vadd.f32 %v3613_v12, %v3607_v5  ;;  %v3527_v47 = vadd.f32 %v3526_v45, %v11286_v53  ;;  %v8950_v42 = vpop.f32.mrb[91].mxu0 }
 0x3fa   :  { %v3404_v11 = vadd.f32 %v8948_v35, %v11158_v2  ;;  %v8951_v57 = vadd.f32 %v8950_v42, %v8949_v28 }
 0x3fb   :  { %v3615_v18 = vadd.f32 %v3614_v63, %v3608_v7 }
 0x3fc   :  { %v11296_v25 = vadd.f32 %v11205_v38, %v3404_v11  ;;  %v3407_v36 = vadd.f32 %v8951_v57, %v11163_v33 }
 0x3fe   :  { %v3528_v29 = vadd.f32 %v3527_v47, %v11296_v25  ;;  %v3609_v43 = vmul.f32 %v11296_v25, %v11296_v25  ;;  %v11303_v3 = vadd.f32 %v11207_v54, %v3407_v36  ;;  %v8952_v39 = vpop.f32.mrb[92].mxu0 }
 0x3ff   :  { %v8953_v56 = vpop.f32.mrb[93].mxu0 }
 0x400   :  { %v3616_v12 = vadd.f32 %v3615_v18, %v3609_v43  ;;  %v3529_v2 = vadd.f32 %v3528_v29, %v11303_v3  ;;  %v3610_v46 = vmul.f32 %v11303_v3, %v11303_v3  ;;  %v8954_v38 = vadd.f32 %v8953_v56, %v8952_v39  ;;  %v8955_v41 = vpop.f32.mrb[94].mxu0 }
 0x401   :  { %v8956_v6 = vpop.f32.mrb[95].mxu0 }
 0x402   :  { %v3617_v33 = vadd.f32 %v3616_v12, %v3610_v46  ;;  %v3412_v60 = vadd.f32 %v8954_v38, %v11171_v8  ;;  %v8957_v4 = vadd.f32 %v8956_v6, %v8955_v41 }
 0x404   :  { %v11310_v45 = vadd.f32 %v11221_v22, %v3412_v60  ;;  %v3415_v54 = vadd.f32 %v8957_v4, %v11173_v62  ;;  %v3640_v60 = vlaneseq }
 0x406   :  { %v3530_v5 = vadd.f32 %v3529_v2, %v11310_v45  ;;  %v3611_v61 = vmul.f32 %v11310_v45, %v11310_v45  ;;  %v3480_v7 = vadd.f32 %v11223_v0, %v3415_v54  ;;  %v3641_v4 = vshrl.u32 %v3640_v60, 7  ;;  %v3632_v54 = vld [vmem:[#allocation12] sm:$0x1] }
 0x408   :  { %v3618_v35 = vadd.f32 %v3617_v33, %v3611_v61  ;;  %v3531_v28 = vadd.f32 %v3530_v5, %v3480_v7  ;;  %v3612_v63 = vmul.f32 %v3480_v7, %v3480_v7  ;;  %v11317_v5 = vsub.s32 0, %v3641_v4 }
 0x40a   :  { %v3532_v47 = vrot.slane %v3531_v28, 4  ;;  %v3619_v42 = vadd.f32 %v3618_v35, %v3612_v63  ;;  %13362 = vst [vmem:[#allocation66_spill] sm:$0xff] %v11317_v5 }
 0x40c   :  { %v3533_v11 = vadd.f32 %v3532_v47, %v3531_v28  ;;  %v3620_v8 = vrot.slane %v3619_v42, 4  ;;  %v3636_v28 = vld [vmem:[#allocation13] sm:$0x1] }
 0x40e   :  { %v3534_v57 = vrot.slane %v3533_v11, 2  ;;  %v3621_v18 = vadd.f32 %v3620_v8, %v3619_v42 }
 0x410   :  { %v3535_v22 = vadd.f32 %v3534_v57, %v3533_v11  ;;  %v3622_v36 = vrot.slane %v3621_v18, 2 }
 0x412   :  { %v3536_v29 = vrot.slane %v3535_v22, 1  ;;  %v3623_v62 = vadd.f32 %v3622_v36, %v3621_v18 }
 0x414   :  { %v3537_v43 = vadd.f32 %v3536_v29, %v3535_v22  ;;  %v3624_v39 = vrot.slane %v3623_v62, 1 }
 0x416   :  { %v3538_v56 = vadd.f32 %v3537_v43, %v3524_v27  ;;  %v3625_v12 = vadd.f32 %v3624_v39, %v3623_v62 }
 0x418   :  { %v3626_v2 = vadd.f32 %v3625_v12, %v3604_v40  ;;  %v3627_v46 = vmul.f32 0.00390625, %v3538_v56 }
 0x41a   :  { %v3628_v0 = vmul.f32 0.00390625, %v3626_v2  ;;  %v3629_v38 = vmul.f32 %v3627_v46, %v3627_v46 }
 0x41c   :  { %v3630_v41 = vsub.f32 %v3628_v0, %v3629_v38 }
 0x41e   :  { %v3631_v6 = vmax.f32 %v3630_v41, 0.0 }
 0x420   :  { %v3633_v33 = vadd.f32 1e-05, %v3631_v6 }
 0x422   :  { %9578 = vrsqrt.f32 %v3633_v33 }
 0x42c   :  { %v9579_v61 = vpop.eup %9578 }
 0x42d   :  { %v3635_v35 = vmul.f32 %v9579_v61, %v3632_v54 }
 0x42f   :  { %v3637_v63 = vmul.f32 %v3635_v35, %v3627_v46  ;;  %v3643_v27 = vrot.slane %v3635_v35, %v11317_v5 }
 0x431   :  { %v3638_v47 = vsub.f32 %v3636_v28, %v3637_v63  ;;  %v3778_v40 = vmul.f32 %v3643_v27, %v3480_v7  ;;  %v3645_v42 = vmul.f32 %v3643_v27, %v11041_v32  ;;  %v3646_v11 = vmul.f32 %v3643_v27, %v11043_v9 }
 0x432   :  { %v3647_v8 = vmul.f32 %v3643_v27, %v11051_v1  ;;  %v3648_v57 = vmul.f32 %v3643_v27, %v11055_v52  ;;  %v3649_v18 = vmul.f32 %v3643_v27, %v11059_v50  ;;  %v3650_v36 = vmul.f32 %v3643_v27, %v11063_v14 }
 0x433   :  { %v3657_v22 = vrot.slane %v3638_v47, %v11317_v5  ;;  %v3651_v29 = vmul.f32 %v3643_v27, %v11067_v13  ;;  %v3691_v62 = vmul.f32 %v3643_v27, %v11082_v58  ;;  %v3692_v7 = vmul.f32 %v3643_v27, %v11090_v19 }
 0x434   :  { %v3693_v32 = vmul.f32 %v3643_v27, %v11110_v20  ;;  %v3694_v9 = vmul.f32 %v3643_v27, %v11113_v48  ;;  %v3695_v1 = vmul.f32 %v3643_v27, %v11131_v49  ;;  %v3696_v52 = vmul.f32 %v3643_v27, %v11138_v10 }
 0x435   :  { %v11333_v43 = vadd.f32 %v3778_v40, %v3657_v22  ;;  %v3697_v50 = vmul.f32 %v3643_v27, %v11149_v55  ;;  %v3698_v14 = vmul.f32 %v3643_v27, %v11156_v21  ;;  %v3731_v13 = vmul.f32 %v3643_v27, %v11210_v37  ;;  %v11408_v40 = vld [vmem:[#allocation3] sm:$0x80] }
 0x436   :  { %v3732_v58 = vmul.f32 %v3643_v27, %v11213_v30  ;;  %v3733_v19 = vmul.f32 %v3643_v27, %v11226_v17  ;;  %v3734_v20 = vmul.f32 %v3643_v27, %v11232_v34  ;;  %v3652_v48 = vmul.f32 %v3643_v27, %v11071_v59 }
 0x437   :  { %v3735_v49 = vmul.f32 %v3643_v27, %v11240_v26  ;;  %v3736_v39 = vmul.f32 %v3643_v27, %v11247_v44  ;;  %v3737_v10 = vmul.f32 %v3643_v27, %v11253_v24  ;;  %v3738_v55 = vmul.f32 %v3643_v27, %v11259_v51 }
 0x438   :  { %v3771_v21 = vmul.f32 %v3643_v27, %v11266_v16  ;;  %v3772_v37 = vmul.f32 %v3643_v27, %v11270_v15  ;;  %v3773_v30 = vmul.f32 %v3643_v27, %v11282_v31  ;;  %v3774_v17 = vmul.f32 %v3643_v27, %v11286_v53 }
 0x439   :  { %v3775_v34 = vmul.f32 %v3643_v27, %v11296_v25  ;;  %v3776_v59 = vmul.f32 %v3643_v27, %v11303_v3  ;;  %v3777_v26 = vmul.f32 %v3643_v27, %v11310_v45  ;;  %v3659_v56 = vadd.f32 %v3657_v22, %v3645_v42 }
 0x43a   :  { %v11354_v44 = vadd.f32 %v3657_v22, %v3646_v11  ;;  %v11356_v24 = vadd.f32 %v3657_v22, %v3647_v8  ;;  %v11358_v51 = vadd.f32 %v3657_v22, %v3648_v57  ;;  %v11360_v16 = vadd.f32 %v3657_v22, %v3649_v18 }
 0x43b   :  { %v11362_v15 = vadd.f32 %v3657_v22, %v3650_v36  ;;  %v11364_v31 = vadd.f32 %v3657_v22, %v3651_v29  ;;  %v11366_v53 = vadd.f32 %v3657_v22, %v3652_v48  ;;  %v11368_v25 = vadd.f32 %v3691_v62, %v3657_v22 }
 0x43c   :  { %v11370_v3 = vadd.f32 %v3692_v7, %v3657_v22  ;;  %v11372_v45 = vadd.f32 %v3693_v32, %v3657_v22  ;;  %v11374_v12 = vadd.f32 %v3694_v9, %v3657_v22  ;;  %v11376_v2 = vadd.f32 %v3695_v1, %v3657_v22 }
 0x43d   :  { %v11378_v46 = vadd.f32 %v3696_v52, %v3657_v22  ;;  %v11380_v0 = vadd.f32 %v3697_v50, %v3657_v22  ;;  %v11382_v38 = vadd.f32 %v3698_v14, %v3657_v22  ;;  %v11384_v41 = vadd.f32 %v3731_v13, %v3657_v22 }
 0x43e   :  { %v11386_v6 = vadd.f32 %v3732_v58, %v3657_v22  ;;  %v11388_v33 = vadd.f32 %v3733_v19, %v3657_v22  ;;  %v11390_v60 = vadd.f32 %v3734_v20, %v3657_v22  ;;  %v11392_v4 = vadd.f32 %v3735_v49, %v3657_v22 }
 0x43f   :  { %v11394_v54 = vadd.f32 %v3736_v39, %v3657_v22  ;;  %v11396_v61 = vadd.f32 %v3737_v10, %v3657_v22  ;;  %v11398_v35 = vadd.f32 %v3738_v55, %v3657_v22  ;;  %v11400_v28 = vadd.f32 %v3771_v21, %v3657_v22 }
 0x440   :  { %v11402_v63 = vadd.f32 %v3772_v37, %v3657_v22  ;;  %v11404_v27 = vadd.f32 %v3773_v30, %v3657_v22  ;;  %v11406_v47 = vadd.f32 %v3774_v17, %v3657_v22  ;;  %v11410_v42 = vadd.f32 %v3775_v34, %v3657_v22 }
 0x441   :  { %v11412_v11 = vadd.f32 %v3776_v59, %v3657_v22  ;;  %v11414_v8 = vadd.f32 %v3777_v26, %v3657_v22  ;;  %v11417_v57 = vmul.f32 0.01, %v11333_v43  ;;  %v3675_v18 = vmul.f32 0.01, %v3659_v56 }
 0x442   :  { %vm3667_vm5 = vcmp.ge.f32.partialorder %v3659_v56, 0.0  ;;  %vm3668_vm6 = vcmp.ge.f32.partialorder %v11354_v44, 0.0  ;;  %vm3669_vm7 = vcmp.ge.f32.partialorder %v11356_v24, 0.0  ;;  %vm3670_vm2 = vcmp.ge.f32.partialorder %v11358_v51, 0.0 }
 0x443   :  { %vm3671_vm1 = vcmp.ge.f32.partialorder %v11360_v16, 0.0  ;;  %v3676_v22 = vmul.f32 0.01, %v11354_v44  ;;  %v3677_v29 = vmul.f32 0.01, %v11356_v24  ;;  %v11436_v52 = vsel %vm3667_vm5, %v3659_v56, %v3675_v18 }
 0x444   :  { %v3678_v62 = vmul.f32 0.01, %v11358_v51  ;;  %v3679_v7 = vmul.f32 0.01, %v11360_v16  ;;  %v3680_v32 = vmul.f32 0.01, %v11362_v15 }
 0x445   :  { %v3681_v9 = vmul.f32 0.01, %v11364_v31  ;;  %v3682_v1 = vmul.f32 0.01, %v11366_v53  ;;  %vm3708_vm12 = vcmp.ge.f32.partialorder %v11370_v3, 0.0  ;;  %vm3709_vm10 = vcmp.ge.f32.partialorder %v11372_v45, 0.0 }
 0x446   :  { %vm3710_vm8 = vcmp.ge.f32.partialorder %v11374_v12, 0.0  ;;  %vm3711_vm15 = vcmp.ge.f32.partialorder %v11376_v2, 0.0  ;;  %vm3712_vm14 = vcmp.ge.f32.partialorder %v11378_v46, 0.0  ;;  %vm3713_vm11 = vcmp.ge.f32.partialorder %v11380_v0, 0.0 }
 0x447   :  { %v3715_v50 = vmul.f32 0.01, %v11368_v25  ;;  %v3716_v14 = vmul.f32 0.01, %v11370_v3  ;;  %v3717_v13 = vmul.f32 0.01, %v11372_v45  ;;  %v11456_v49 = vsel %vm3668_vm6, %v11354_v44, %v3676_v22 }
 0x448   :  { %v3718_v58 = vmul.f32 0.01, %v11374_v12  ;;  %v3719_v19 = vmul.f32 0.01, %v11376_v2  ;;  %v3720_v20 = vmul.f32 0.01, %v11378_v46  ;;  %v11464_v55 = vsel %vm3669_vm7, %v11356_v24, %v3677_v29 }
 0x449   :  { %v3721_v48 = vmul.f32 0.01, %v11380_v0  ;;  %v3722_v39 = vmul.f32 0.01, %v11382_v38  ;;  %v3755_v10 = vmul.f32 0.01, %v11384_v41  ;;  %v11476_v17 = vsel %vm3670_vm2, %v11358_v51, %v3678_v62 }
 0x44a   :  { %v3756_v21 = vmul.f32 0.01, %v11386_v6  ;;  %v11468_v37 = vmul.f32 0.01, %v11388_v33  ;;  %v11471_v30 = vmul.f32 0.01, %v11390_v60  ;;  %v11490_v56 = vsel %vm3671_vm1, %v11360_v16, %v3679_v7 }
 0x44b   :  { %v11479_v34 = vmul.f32 0.01, %v11392_v4  ;;  %v11482_v59 = vmul.f32 0.01, %v11394_v54  ;;  %v11485_v26 = vmul.f32 0.01, %v11396_v61 }
 0x44c   :  { %v11495_v44 = vmul.f32 0.01, %v11398_v35  ;;  %vm3789_vm2 = vcmp.ge.f32.partialorder %v11404_v27, 0.0  ;;  %vm3790_vm9 = vcmp.ge.f32.partialorder %v11406_v47, 0.0  ;;  %v3795_v24 = vmul.f32 0.01, %v11400_v28 }
 0x44d   :  { %v3796_v51 = vmul.f32 0.01, %v11402_v63  ;;  %v3797_v16 = vmul.f32 0.01, %v11404_v27  ;;  %v3798_v18 = vmul.f32 0.01, %v11406_v47 }
 0x44e   :  { %13363 = vst [vmem:[#allocation67_spill] sm:$0xff] %v11495_v44  ;;  %vm13364_vm1 = vcmp.ge.f32.partialorder %v11362_v15, 0.0  ;;  %vm3752_vm7 = vcmp.ge.f32.partialorder %v11394_v54, 0.0  ;;  %v3799_v29 = vmul.f32 0.01, %v11410_v42  ;;  %vm13365_vm5 = vcmp.ge.f32.partialorder %v11364_v31, 0.0 }
 0x44f   :  { %v11507_v22 = vsel %vm13364_vm1, %v11362_v15, %v3680_v32  ;;  %v3800_v62 = vmul.f32 0.01, %v11412_v11  ;;  %v3801_v7 = vmul.f32 0.01, %v11414_v8  ;;  %v11516_v36 = vsel %vm13365_vm5, %v11364_v31, %v3681_v9 }
 0x450   :  { %vm13366_vm6 = vcmp.ge.f32.partialorder %v11366_v53, 0.0  ;;  %vm13367_vm1 = vcmp.ge.f32.partialorder %v11368_v25, 0.0  ;;  %v3724_v32 = vsel %vm3708_vm12, %v11370_v3, %v3716_v14  ;;  %v3725_v44 = vsel %vm3709_vm10, %v11372_v45, %v3717_v13  ;;  %v9507_v13 = vld [vmem:[#allocation15 + $0x90] sm:$0xff]  }
 0x451   :  { %v11521_v5 = vsel %vm13366_vm6, %v11366_v53, %v3682_v1  ;;  %v3723_v15 = vsel %vm13367_vm1, %v11368_v25, %v3715_v50  ;;  %v3726_v31 = vsel %vm3710_vm8, %v11374_v12, %v3718_v58  ;;  %v3727_v53 = vsel %vm3711_vm15, %v11376_v2, %v3719_v19  ;;  %4253 = vst [vmem:[#allocation2 + $0x30] sm:$0xff] %v3724_v32 }
 0x452   :  { %v3728_v25 = vsel %vm3712_vm14, %v11378_v46, %v3720_v20  ;;  %v3729_v3 = vsel %vm3713_vm11, %v11380_v0, %v3721_v48  ;;  %4252 = vst [vmem:[#allocation2] sm:$0xff] %v3723_v15  ;;  %4254 = vst [vmem:[#allocation2 + $0x60] sm:$0xff] %v3725_v44  ;;  %vm3753_vm10 = vcmp.ge.f32.partialorder %v11396_v61, 0.0  ;;  %vm3754_vm12 = vcmp.ge.f32.partialorder %v11398_v35, 0.0 }
 0x453   :  { %vm13368_vm8 = vcmp.ge.f32.partialorder %v11382_v38, 0.0  ;;  %v11552_v12 = vsel %vm3789_vm2, %v11404_v27, %v3797_v16  ;;  %v11557_v2 = vsel %vm3790_vm9, %v11406_v47, %v3798_v18  ;;  %vm13369_vm11 = vcmp.ge.f32.partialorder %v11384_v41, 0.0  ;;  %4255 = vst [vmem:[#allocation2 + $0x90] sm:$0xff] %v3726_v31  ;;  %4256 = vst [vmem:[#allocation2 + $0xc0] sm:$0xff] %v3727_v53 }
 0x454   :  { %v3730_v45 = vsel %vm13368_vm8, %v11382_v38, %v3722_v39  ;;  %v11562_v46 = vsel %vm13369_vm11, %v11384_v41, %v3755_v10  ;;  %4257 = vst [vmem:[#allocation2 + $0xf0] sm:$0xff] %v3728_v25  ;;  %4258 = vst [vmem:[#allocation2 + $0x120] sm:$0xff] %v3729_v3  ;;  %vm13370_vm14 = vcmp.ge.f32.partialorder %v11386_v6, 0.0  ;;  %v3919_v38 = vpack.c.bf16 %v11456_v49, %v11436_v52  ;;  %v9509_v39 = vld [vmem:[#allocation15] sm:$0xff]  }
 0x455   :  { %3813 = vst [vmem:[#allocation3 + $0x30] sm:$0xff] %v11552_v12  ;;  %3814 = vst [vmem:[#allocation3 + $0x40] sm:$0xff] %v11557_v2  ;;  %v11569_v0 = vsel %vm13370_vm14, %v11386_v6, %v3756_v21  ;;  %vm3787_vm9 = vcmp.ge.f32.partialorder %v11400_v28, 0.0  ;;  %vm3788_vm15 = vcmp.ge.f32.partialorder %v11402_v63, 0.0  ;;  %v11585_v27 = vpack.c.bf16 %v3724_v32, %v3723_v15 }
 0x456   :  { %4260 = vst [vmem:[#allocation2 + $0x8] sm:$0xff] %v11562_v46  ;;  %4270 = vst [vmem:[#allocation2 + $0x70] sm:$0xff] %v11552_v12  ;;  %v11580_v41 = vsel %vm3787_vm9, %v11400_v28, %v3795_v24  ;;  %v11583_v6 = vsel %vm3788_vm15, %v11402_v63, %v3796_v51  ;;  %v11587_v47 = vpack.c.bf16 %v3726_v31, %v3725_v44  ;;  %4154 = vmatprep.mubr.bf16.mxu0 %v3919_v38  ;;  %v9504_v63 = vld [vmem:[#allocation15 + $0x88] sm:$0xff]   ;;  %vm13374_vm14 = vcmask 1040384   ;;  %v9519_v38 = vld [vmem:[#allocation15 + $0xb0] sm:$0xff]  }
 0x457   :  { %4271 = vst [vmem:[#allocation2 + $0xa0] sm:$0xff] %v11557_v2  ;;  %4259 = vst [vmem:[#allocation2 + $0x150] sm:$0xff] %v3730_v45  ;;  %vm3791_vm5 = vcmp.ge.f32.partialorder %v11410_v42, 0.0  ;;  %vm3792_vm6 = vcmp.ge.f32.partialorder %v11412_v11, 0.0  ;;  %v11595_v28 = vpack.c.bf16 %v3728_v25, %v3727_v53  ;;  %vm3793_vm2 = vcmp.ge.f32.partialorder %v11414_v8, 0.0  ;;  %9147 = vmatprep.mubr.bf16.mxu1 %v11585_v27  ;;  %v9511_v44 = vld [vmem:[#allocation15 + $0x48] sm:$0xff]  }
 0x458   :  { %4261 = vst [vmem:[#allocation2 + $0x38] sm:$0xff] %v11569_v0  ;;  %3811 = vst [vmem:[#allocation3 + $0x10] sm:$0xff] %v11580_v41  ;;  %v11600_v9 = vsel %vm3791_vm5, %v11410_v42, %v3799_v29  ;;  %v11603_v1 = vsel %vm3792_vm6, %v11412_v11, %v3800_v62  ;;  %vm3794_vm1 = vcmp.ge.f32.partialorder %v11333_v43, 0.0  ;;  %v11607_v52 = vsel %vm3793_vm2, %v11414_v8, %v3801_v7  ;;  %v9513_v7 = vld [vmem:[#allocation15 + $0xa0] sm:$0xff]   ;;  %v9515_v25 = vld [vmem:[#allocation15 + $0x10] sm:$0xff]  }
 0x459   :  { %3812 = vst [vmem:[#allocation3 + $0x20] sm:$0xff] %v11583_v6  ;;  %4268 = vst [vmem:[#allocation2 + $0x10] sm:$0xff] %v11580_v41  ;;  %9148 = vmatmul.mubr.bf16.vlgmr.msra.gmra.mrb[96].mxu1 %v11587_v47  ;;  %v11614_v50 = vsel %vm3794_vm1, %v11333_v43, %v11417_v57  ;;  %v11617_v42 = vpack.c.bf16 %v3730_v45, %v3729_v3  ;;  %v4302_v11 = vpack.c.bf16 %v11583_v6, %v11580_v41  ;;  %v9517_v3 = vld [vmem:[#allocation15 + $0x58] sm:$0xff]   ;;  %v9516_v45 = vld [vmem:[#allocation15 + $0xa8] sm:$0xff]  }
 0x45a   :  { %4269 = vst [vmem:[#allocation2 + $0x40] sm:$0xff] %v11583_v6  ;;  %3815 = vst [vmem:[#allocation3 + $0x50] sm:$0xff] %v11600_v9  ;;  %v3838_v8 = vrot.slane %v11580_v41, 7  ;;  %9156 = vmatpush3.bf16.msra.mxu1 %v11237_v23  ;;  %9151 = vmatprep.mubr.bf16.mxu1 %v11595_v28  ;;  %v3840_v14 = vrot.slane %v11583_v6, 7  ;;  %vm13371_vm8 = vcmp.ge.f32.partialorder %v11388_v33, 0.0  ;;  %vm13372_vm11 = vcmp.ge.f32.partialorder %v11390_v60, 0.0 }
 0x45b   :  { %3816 = vst [vmem:[#allocation3 + $0x60] sm:$0xff] %v11603_v1  ;;  %3817 = vst [vmem:[#allocation3 + $0x70] sm:$0xff] %v11607_v52  ;;  %v11630_v43 = vsel %vm13371_vm8, %v11388_v33, %v11468_v37  ;;  %v11636_v57 = vsel %vm13372_vm11, %v11390_v60, %v11471_v30  ;;  %v3922_v23 = vpack.c.bf16 %v11476_v17, %v11464_v55  ;;  %9157 = vmatprep.subr.bf16.mxu1 %v9504_v63  ;;  %v13380_v17 = vld [vmem:[#allocation67_spill] sm:$0xff] }
 0x45c   :  { %3818 = vst [vmem:[#allocation3 + $0x80] sm:$0xff] %v11614_v50  ;;  %v13373_v58 = vrot.slane %v11408_v40, 7  ;;  %4262 = vst [vmem:[#allocation2 + $0x68] sm:$0xff] %v11630_v43  ;;  %v3842_v33 = vrot.slane %v11552_v12, 7  ;;  %v3844_v20 = vrot.slane %v11557_v2, 7  ;;  %vm13375_vm9 = vcmp.ge.f32.partialorder %v11392_v4, 0.0 }
 0x45d   :  { %4263 = vst [vmem:[#allocation2 + $0x98] sm:$0xff] %v11636_v57  ;;  %v11651_v60 = vsel %vm13375_vm9, %v11392_v4, %v11479_v34  ;;  %vm13376_vm15 = vmmov %vm13374_vm14  ;;  %v11658_v40 = vsel %vm3752_vm7, %v11394_v54, %v11482_v59  ;;  %v3925_v49 = vpack.c.bf16 %v11507_v22, %v11490_v56  ;;  %v3846_v4 = vrot.slane %v11600_v9, 7  ;;  %v9510_v54 = vld [vmem:[#allocation15 + $0x98] sm:$0xff]   ;;  %v9521_v41 = vld [vmem:[#allocation15 + $0x20] sm:$0xff]  }
 0x45e   :  { %v3839_v19 = vsel %vm13374_vm14, %v13373_v58, %v3838_v8  ;;  %v3841_v48 = vsel %vm13376_vm15, %v3838_v8, %v3840_v14  ;;  %4264 = vst [vmem:[#allocation2 + $0xc8] sm:$0xff] %v11651_v60  ;;  %vm13377_vm5 = vmmov %vm13374_vm14  ;;  %9158 = vmatpush3.bf16.msra.mxu1 %v9504_v63  ;;  %v3848_v21 = vrot.slane %v11603_v1, 7  ;;  %v11673_v30 = vsel %vm3753_vm10, %v11396_v61, %v11485_v26  ;;  %v9523_v6 = vld [vmem:[#allocation15 + $0x68] sm:$0xff]   ;;  %v9522_v63 = vld [vmem:[#allocation15 + $0xb8] sm:$0xff]  }
 0x45f   :  { %v3843_v10 = vsel %vm13377_vm5, %v3840_v14, %v3842_v33  ;;  %vm13378_vm6 = vmmov %vm13377_vm5  ;;  %4265 = vst [vmem:[#allocation2 + $0xf8] sm:$0xff] %v11658_v40  ;;  %9159 = vmatprep.subr.bf16.mxu1 %v9507_v13  ;;  %v11679_v34 = vsel %vm3754_vm12, %v11398_v35, %v13380_v17  ;;  %v9631_v59 = vpack.c.bf16 %v3841_v48, %v3839_v19  ;;  %v9512_v35 = vld [vmem:[#allocation15 + $0x8] sm:$0xff]   ;;  %v3850_v18 = vrot.slane %v11607_v52, 7  ;;  %v9527_v8 = vld [vmem:[#allocation15 + $0x78] sm:$0xff]  }
 0x460   :  { %v3845_v55 = vsel %vm13378_vm6, %v3842_v33, %v3844_v20  ;;  %vm13379_vm7 = vmmov %vm13377_vm5  ;;  %v3928_v51 = vpack.c.bf16 %v11521_v5, %v11516_v36  ;;  %4266 = vst [vmem:[#allocation2 + $0x128] sm:$0xff] %v11673_v30  ;;  %v4305_v61 = vpack.c.bf16 %v11557_v2, %v11552_v12  ;;  %v4308_v26 = vpack.c.bf16 %v11603_v1, %v11600_v9  ;;  %v9514_v36 = vld [vmem:[#allocation15 + $0x50] sm:$0xff]  }
 0x461   :  { %v3847_v37 = vsel %vm13379_vm7, %v3844_v20, %v3846_v4  ;;  %9632 = vmatmul.mubr.msk.bf16.vlgmr.msra.gmra.mrb[96].mxu0 %vm10805_vm13, %v9631_v59  ;;  %vm13382_vm2 = vmmov %vm13377_vm5  ;;  %4267 = vst [vmem:[#allocation2 + $0x158] sm:$0xff] %v11679_v34  ;;  %9152 = vmatmul.mubr.bf16.gmra.mrb[100].mxu1 %v11617_v42  ;;  %v4301_v5 = vpack.c.bf16 %v11569_v0, %v11562_v46  ;;  %v9518_v46 = vld [vmem:[#allocation15 + $0x18] sm:$0xff]   ;;  %v9520_v0 = vld [vmem:[#allocation15 + $0x60] sm:$0xff]  }
 0x462   :  { %v3849_v24 = vsel %vm13382_vm2, %v3846_v4, %v3848_v21  ;;  %9051 = vmatpush3.bf16.msra.mxu0 %v9509_v39  ;;  %9160 = vmatpush3.bf16.msra.mxu1 %v9507_v13  ;;  %v4311_v29 = vpack.c.bf16 %v11614_v50, %v11607_v52  ;;  %v4304_v62 = vpack.c.bf16 %v11636_v57, %v11630_v43  ;;  %vm13383_vm13 = vmmov %vm13382_vm2  ;;  %v9524_v52 = vld [vmem:[#allocation15 + $0x28] sm:$0xff]   ;;  %v9525_v50 = vld [vmem:[#allocation15 + $0x70] sm:$0xff]  }
 0x463   :  { %v3827_v16 = vld [vmem:[#allocation3 + $0x80] sm:$0x7f]  ;;  %9171 = vmatprep.mubr.bf16.mxu1 %v4302_v11  ;;  %9161 = vmatprep.subr.bf16.mxu1 %v9510_v54  ;;  %v3851_v15 = vsel %vm13383_vm13, %v3848_v21, %v3850_v18  ;;  %v4307_v32 = vpack.c.bf16 %v11658_v40, %v11651_v60  ;;  %v4310_v31 = vpack.c.bf16 %v11679_v34, %v11673_v30  ;;  %vm13384_vm10 = vmmov %vm13382_vm2  ;;  %v9528_v57 = vld [vmem:[#allocation15 + $0x38] sm:$0xff]  }
 0x464   :  { %v3852_v22 = vrot.slane %v3827_v16, 7  ;;  %4162 = vmatprep.mubr.bf16.mxu0 %v3922_v23  ;;  %9052 = vmatprep.subr.bf16.mxu0 %v9511_v44  ;;  %v9634_v12 = vpack.c.bf16 %v3845_v55, %v3843_v10  ;;  %v9637_v9 = vpack.c.bf16 %v3849_v24, %v3847_v37  ;;  %v9526_v11 = vld [vmem:[#allocation15 + $0x30] sm:$0xff]   ;;  %v13388_v23 = vmov 0   ;;  %v9529_v10 = vld [vmem:[#allocation19] sm:$0xff]  }
 0x465   :  { %v9531_v44 = vld [vmem:[#allocation19 + $0x10] sm:$0xff]  }
 0x466   :  { %v3853_v53 = vsel %vm13384_vm10, %v3850_v18, %v3852_v22  ;;  %9053 = vmatpush3.bf16.msra.mxu0 %v9512_v35  ;;  %9162 = vmatpush3.bf16.msra.mxu1 %v9510_v54 }
 0x467   :  { %9054 = vmatprep.subr.bf16.mxu0 %v9514_v36  ;;  %9163 = vmatprep.subr.bf16.mxu1 %v9513_v7  ;;  %v9640_v14 = vpack.c.bf16 %v3853_v53, %v3851_v15  ;;  %v9532_v36 = vld [vmem:[#allocation19 + $0x18] sm:$0xff]  }
 0x469   :  { %9635 = vmatmul.mubr.msk.bf16.gmra.mrb[100].mxu0 %vm10829_vm0, %v9634_v12  ;;  %vm13304_vm0 = vcmask 523264   ;;  %v9533_v12 = vld [vmem:[#allocation19 + $0x20] sm:$0xff]  }
 0x46a   :  { %9055 = vmatpush3.bf16.msra.mxu0 %v9515_v25  ;;  %4170 = vmatprep.mubr.bf16.mxu0 %v3925_v49 }
 0x46b   :  { %9164 = vmatpush3.bf16.msra.mxu1 %v9513_v7  ;;  %9056 = vmatprep.subr.bf16.mxu0 %v9517_v3 }
 0x46c   :  { %9165 = vmatprep.subr.bf16.mxu1 %v9516_v45 }
 0x46e   :  { %9057 = vmatpush3.bf16.msra.mxu0 %v9518_v46 }
 0x46f   :  { %9166 = vmatpush3.bf16.msra.mxu1 %v9516_v45  ;;  %9058 = vmatprep.subr.bf16.mxu0 %v9520_v0 }
 0x470   :  { %9167 = vmatprep.subr.bf16.mxu1 %v9519_v38 }
 0x471   :  { %9638 = vmatmul.mubr.msk.bf16.gmra.mrb[104].mxu0 %vm10865_vm3, %v9637_v9  ;;  %v9534_v9 = vld [vmem:[#allocation19 + $0x28] sm:$0xff]  }
 0x472   :  { %9059 = vmatpush3.bf16.msra.mxu0 %v9521_v41  ;;  %4178 = vmatprep.mubr.bf16.mxu0 %v3928_v51 }
 0x473   :  { %9168 = vmatpush3.bf16.msra.mxu1 %v9519_v38  ;;  %9060 = vmatprep.subr.bf16.mxu0 %v9523_v6 }
 0x474   :  { %9169 = vmatprep.subr.bf16.mxu1 %v9522_v63 }
 0x476   :  { %9061 = vmatpush3.bf16.msra.mxu0 %v9524_v52 }
 0x477   :  { %9170 = vmatpush3.bf16.msra.mxu1 %v9522_v63  ;;  %9062 = vmatprep.subr.bf16.mxu0 %v9525_v50 }
 0x479   :  { %9641 = vmatmul.mubr.msk.bf16.gmra.mrb[108].mxu0 %vm10885_vm4, %v9640_v14 }
 0x47a   :  { %9172 = vmatmul.mubr.bf16.vlgmr.msra.gmra.mrb[104].mxu1 %v4305_v61  ;;  %9063 = vmatpush3.bf16.msra.mxu0 %v9526_v11 }
 0x47b   :  { %9175 = vmatprep.mubr.bf16.mxu1 %v4308_v26  ;;  %4536 = vmatprep.mubr.bf16.mxu0 %v4301_v5 }
 0x47c   :  { %9064 = vmatprep.subr.bf16.mxu0 %v9527_v8 }
 0x47e   :  { %9065 = vmatpush3.bf16.msra.mxu0 %v9528_v57 }
 0x47f   :  { %5091 = vmatprep.subr.bf16.mxu0 %v13388_v23 }
 0x481   :  { %4537 = vmatmul.mubr.bf16.vlgmr.msra.gmra.mrb[112].mxu0 %v11585_v27 }
 0x482   :  { %9176 = vmatmul.mubr.bf16.gmra.mrb[108].mxu1 %v4311_v29  ;;  %4544 = vmatprep.mubr.bf16.mxu0 %v4304_v62 }
 0x483   :  { %5092 = vmatpush1.bf16.msra.mxu0 %v9529_v10 }
 0x484   :  { %5093 = vmatprep.subr.bf16.mxu0 %v13388_v23 }
 0x489   :  { %4545 = vmatmul.mubr.bf16.gmra.mrb[116].mxu0 %v11587_v47 }
 0x48a   :  { %4552 = vmatprep.mubr.bf16.mxu0 %v4307_v32 }
 0x491   :  { %4553 = vmatmul.mubr.bf16.gmra.mrb[120].mxu0 %v11595_v28 }
 0x492   :  { %4560 = vmatprep.mubr.bf16.mxu0 %v4310_v31 }
 0x499   :  { %4561 = vmatmul.mubr.bf16.gmra.mrb[124].mxu0 %v11617_v42  ;;  %v9530_v42 = vld [vmem:[#allocation19 + $0x8] sm:$0xff]  }
 0x49a   :  { %5094 = vmatpush1.bf16.msra.mxu0 %v9530_v42 }
 0x49b   :  { %5095 = vmatprep.subr.bf16.mxu0 %v13388_v23 }
 0x49e   :  { %5096 = vmatpush1.bf16.msra.mxu0 %v9531_v44 }
 0x49f   :  { %5097 = vmatprep.subr.bf16.mxu0 %v13388_v23 }
 0x4a2   :  { %5098 = vmatpush1.bf16.msra.mxu0 %v9532_v36 }
 0x4a3   :  { %5099 = vmatprep.subr.bf16.mxu0 %v13388_v23 }
 0x4a6   :  { %5100 = vmatpush1.bf16.msra.mxu0 %v9533_v12 }
 0x4a7   :  { %5101 = vmatprep.subr.bf16.mxu0 %v13388_v23 }
 0x4aa   :  { %5102 = vmatpush1.bf16.msra.mxu0 %v9534_v9 }
 0x4ab   :  { %5103 = vmatprep.subr.bf16.mxu0 %v13388_v23 }
 0x52c   :  { %v9149_v13 = vpop.f32.mrb[96].mxu1 }
 0x52d   :  { %v4221_v58 = vpop.f32.mrb[97].mxu1 }
 0x52e   :  { %v9150_v19 = vpop.f32.mrb[98].mxu1 }
 0x52f   :  { %v4224_v33 = vpop.f32.mrb[99].mxu1 }
 0x534   :  { %v9014_v20 = vpop.f32.mrb[96].mxu0  ;;  %v11717_v60 = vpop.f32.mrb[100].mxu1 }
 0x535   :  { %v9015_v48 = vpop.f32.mrb[97].mxu0  ;;  %v4237_v40 = vpop.f32.mrb[101].mxu1 }
 0x536   :  { %v9016_v27 = vadd.f32 %v9015_v48, %v9014_v20  ;;  %v9017_v49 = vpop.f32.mrb[98].mxu0  ;;  %v11719_v39 = vpop.f32.mrb[102].mxu1  ;;  %v9535_v20 = vld [vmem:[#allocation19 + $0x30] sm:$0xff]  }
 0x537   :  { %v9018_v47 = vpop.f32.mrb[99].mxu0  ;;  %v4240_v55 = vpop.f32.mrb[103].mxu1  ;;  %5104 = vmatpush1.bf16.msra.mxu0 %v9535_v20 }
 0x538   :  { %v11721_v28 = vadd.f32 %v9016_v27, %v4221_v58  ;;  %v9019_v4 = vadd.f32 %v9018_v47, %v9017_v49  ;;  %5105 = vmatprep.subr.bf16.mxu0 %v13388_v23 }
 0x53a   :  { %v4679_v21 = vmul.f32 %v11721_v28, %v11721_v28  ;;  %v11725_v54 = vadd.f32 %v9019_v4, %v4224_v33  ;;  %v4635_v37 = vsel %vm13304_vm0, %v11721_v28, 0.0 }
 0x53c   :  { %v4636_v30 = vsel %vm13304_vm0, %v11725_v54, 0.0  ;;  %v4680_v17 = vmul.f32 %v11725_v54, %v11725_v54  ;;  %v9020_v34 = vpop.f32.mrb[100].mxu0  ;;  %v4687_v24 = vsel %vm13304_vm0, %v4679_v21, 0.0 }
 0x53d   :  { %v4637_v59 = vadd.f32 %v4636_v30, %v4635_v37  ;;  %v9021_v56 = vpop.f32.mrb[101].mxu0  ;;  %v9536_v37 = vld [vmem:[#allocation19 + $0x38] sm:$0xff]  }
 0x53e   :  { %v4688_v51 = vsel %vm13304_vm0, %v4680_v17, 0.0  ;;  %v9022_v61 = vadd.f32 %v9021_v56, %v9020_v34  ;;  %v9023_v35 = vpop.f32.mrb[102].mxu0  ;;  %5106 = vmatpush1.bf16.msra.mxu0 %v9536_v37 }
 0x53f   :  { %v4689_v26 = vadd.f32 %v4688_v51, %v4687_v24  ;;  %v9024_v16 = vpop.f32.mrb[103].mxu0  ;;  %5107 = vmatprep.subr.bf16.mxu0 %v13388_v23 }
 0x540   :  { %v11737_v18 = vadd.f32 %v9149_v13, %v9022_v61  ;;  %v9025_v5 = vadd.f32 %v9024_v16, %v9023_v35 }
 0x542   :  { %v4638_v22 = vsel %vm13304_vm0, %v11737_v18, 0.0  ;;  %v4681_v29 = vmul.f32 %v11737_v18, %v11737_v18  ;;  %v11743_v62 = vadd.f32 %v9150_v19, %v9025_v5 }
 0x543   :  { %v4639_v7 = vadd.f32 %v4638_v22, %v4637_v59 }
 0x544   :  { %v4690_v15 = vsel %vm13304_vm0, %v4681_v29, 0.0  ;;  %v4640_v32 = vsel %vm13304_vm0, %v11743_v62, 0.0  ;;  %v4682_v31 = vmul.f32 %v11743_v62, %v11743_v62  ;;  %v9026_v53 = vpop.f32.mrb[104].mxu0 }
 0x545   :  { %v4691_v25 = vadd.f32 %v4690_v15, %v4689_v26  ;;  %v4641_v3 = vadd.f32 %v4640_v32, %v4639_v7  ;;  %v9027_v45 = vpop.f32.mrb[105].mxu0 }
 0x546   :  { %v4692_v2 = vsel %vm13304_vm0, %v4682_v31, 0.0  ;;  %v9028_v46 = vadd.f32 %v9027_v45, %v9026_v53  ;;  %v9029_v0 = vpop.f32.mrb[106].mxu0 }
 0x547   :  { %v4693_v38 = vadd.f32 %v4692_v2, %v4691_v25  ;;  %v9030_v41 = vpop.f32.mrb[107].mxu0  ;;  %v9538_v25 = vld [vmem:[#allocation19 + $0x48] sm:$0xff]  }
 0x548   :  { %v11753_v6 = vadd.f32 %v9028_v46, %v4237_v40  ;;  %v9031_v63 = vadd.f32 %v9030_v41, %v9029_v0 }
 0x54a   :  { %v4642_v1 = vsel %vm13304_vm0, %v11753_v6, 0.0  ;;  %v4683_v52 = vmul.f32 %v11753_v6, %v11753_v6  ;;  %v11759_v50 = vadd.f32 %v9031_v63, %v4240_v55 }
 0x54b   :  { %v4643_v11 = vadd.f32 %v4642_v1, %v4641_v3 }
 0x54c   :  { %v4694_v8 = vsel %vm13304_vm0, %v4683_v52, 0.0  ;;  %v4644_v14 = vsel %vm13304_vm0, %v11759_v50, 0.0  ;;  %v4684_v43 = vmul.f32 %v11759_v50, %v11759_v50  ;;  %v9032_v57 = vpop.f32.mrb[108].mxu0 }
 0x54d   :  { %v4695_v13 = vadd.f32 %v4694_v8, %v4693_v38  ;;  %v4645_v58 = vadd.f32 %v4644_v14, %v4643_v11  ;;  %v9173_v19 = vpop.f32.mrb[104].mxu1  ;;  %v9033_v33 = vpop.f32.mrb[109].mxu0 }
 0x54e   :  { %v4696_v48 = vsel %vm13304_vm0, %v4684_v43, 0.0  ;;  %v4603_v40 = vpop.f32.mrb[105].mxu1  ;;  %v9034_v27 = vadd.f32 %v9033_v33, %v9032_v57  ;;  %v9035_v49 = vpop.f32.mrb[110].mxu0 }
 0x54f   :  { %v4697_v47 = vadd.f32 %v4696_v48, %v4695_v13  ;;  %v9174_v10 = vpop.f32.mrb[106].mxu1  ;;  %v9036_v55 = vpop.f32.mrb[111].mxu0 }
 0x550   :  { %v4606_v4 = vpop.f32.mrb[107].mxu1  ;;  %v11770_v42 = vadd.f32 %v11717_v60, %v9034_v27  ;;  %v9037_v21 = vadd.f32 %v9036_v55, %v9035_v49 }
 0x552   :  { %v4646_v30 = vsel %vm13304_vm0, %v11770_v42, 0.0  ;;  %v4685_v17 = vmul.f32 %v11770_v42, %v11770_v42  ;;  %v11777_v34 = vadd.f32 %v11719_v39, %v9037_v21  ;;  %v9537_v39 = vld [vmem:[#allocation19 + $0x40] sm:$0xff]  }
 0x553   :  { %v4647_v59 = vadd.f32 %v4646_v30, %v4645_v58  ;;  %5108 = vmatpush1.bf16.msra.mxu0 %v9537_v39 }
 0x554   :  { %v4698_v56 = vsel %vm13304_vm0, %v4685_v17, 0.0  ;;  %v4648_v60 = vsel %vm13304_vm0, %v11777_v34, 0.0  ;;  %v4686_v44 = vmul.f32 %v11777_v34, %v11777_v34  ;;  %v9066_v24 = vpop.f32.mrb[112].mxu0  ;;  %5109 = vmatprep.subr.bf16.mxu0 %v13388_v23 }
 0x555   :  { %v4699_v51 = vadd.f32 %v4698_v56, %v4697_v47  ;;  %v11785_v61 = vadd.f32 %v4648_v60, %v4647_v59  ;;  %v11787_v35 = vpop.f32.mrb[108].mxu1  ;;  %v9067_v26 = vpop.f32.mrb[113].mxu0 }
 0x556   :  { %v4700_v16 = vsel %vm13304_vm0, %v4686_v44, 0.0  ;;  %v4619_v5 = vpop.f32.mrb[109].mxu1  ;;  %v9068_v36 = vadd.f32 %v9067_v26, %v9066_v24  ;;  %v9069_v22 = vpop.f32.mrb[114].mxu0 }
 0x557   :  { %v11791_v29 = vadd.f32 %v4700_v16, %v4699_v51  ;;  %v11793_v7 = vpop.f32.mrb[110].mxu1  ;;  %v9070_v15 = vpop.f32.mrb[115].mxu0  ;;  %5110 = vmatpush1.bf16.msra.mxu0 %v9538_v25  ;;  %v4650_v16 = vrot.slane %v11785_v61, 4 }
 0x558   :  { %v4622_v32 = vpop.f32.mrb[111].mxu1  ;;  %v11795_v31 = vadd.f32 %v9068_v36, %v4603_v40  ;;  %v9071_v53 = vadd.f32 %v9070_v15, %v9069_v22  ;;  %5111 = vmatprep.subr.bf16.mxu0 %v13388_v23 }
 0x559   :  { %v4702_v25 = vrot.slane %v11791_v29, 4 }
 0x55a   :  { %v4709_v3 = vmul.f32 %v11795_v31, %v11795_v31  ;;  %v11799_v45 = vadd.f32 %v9071_v53, %v4606_v4  ;;  %v4657_v12 = vsel %vm13304_vm0, %v11795_v31, 0.0 }
 0x55c   :  { %v4658_v2 = vsel %vm13304_vm0, %v11799_v45, 0.0  ;;  %v4710_v46 = vmul.f32 %v11799_v45, %v11799_v45  ;;  %v9072_v0 = vpop.f32.mrb[116].mxu0  ;;  %v4717_v63 = vsel %vm13304_vm0, %v4709_v3, 0.0 }
 0x55d   :  { %v4659_v38 = vadd.f32 %v4658_v2, %v4657_v12  ;;  %v9073_v41 = vpop.f32.mrb[117].mxu0 }
 0x55e   :  { %v4718_v9 = vsel %vm13304_vm0, %v4710_v46, 0.0  ;;  %v9074_v1 = vadd.f32 %v9073_v41, %v9072_v0  ;;  %v9075_v52 = vpop.f32.mrb[118].mxu0  ;;  %v4651_v0 = vadd.f32 %v4650_v16, %v11785_v61 }
 0x55f   :  { %v4719_v11 = vadd.f32 %v4718_v9, %v4717_v63  ;;  %v9076_v8 = vpop.f32.mrb[119].mxu0  ;;  %v4703_v9 = vadd.f32 %v4702_v25, %v11791_v29  ;;  %v4748_v25 = vld [vmem:[#allocation18] sm:$0x1] }
 0x560   :  { %v11811_v14 = vadd.f32 %v9173_v19, %v9074_v1  ;;  %v9077_v43 = vadd.f32 %v9076_v8, %v9075_v52  ;;  %v4652_v8 = vrot.slane %v4651_v0, 2 }
 0x562   :  { %v4660_v57 = vsel %vm13304_vm0, %v11811_v14, 0.0  ;;  %v4711_v13 = vmul.f32 %v11811_v14, %v11811_v14  ;;  %v11817_v58 = vadd.f32 %v9174_v10, %v9077_v43 }
 0x563   :  { %v4661_v33 = vadd.f32 %v4660_v57, %v4659_v38 }
 0x564   :  { %v4720_v20 = vsel %vm13304_vm0, %v4711_v13, 0.0  ;;  %v4662_v48 = vsel %vm13304_vm0, %v11817_v58, 0.0  ;;  %v4712_v40 = vmul.f32 %v11817_v58, %v11817_v58  ;;  %v9078_v19 = vpop.f32.mrb[120].mxu0  ;;  %v4704_v13 = vrot.slane %v4703_v9, 2 }
 0x565   :  { %v4721_v27 = vadd.f32 %v4720_v20, %v4719_v11  ;;  %v4663_v49 = vadd.f32 %v4662_v48, %v4661_v33  ;;  %v9079_v47 = vpop.f32.mrb[121].mxu0  ;;  %v4653_v48 = vadd.f32 %v4652_v8, %v4651_v0  ;;  %v9540_v8 = vld [vmem:[#allocation19 + $0x58] sm:$0xff]  }
 0x566   :  { %v4722_v55 = vsel %vm13304_vm0, %v4712_v40, 0.0  ;;  %v9080_v4 = vadd.f32 %v9079_v47, %v9078_v19  ;;  %v9081_v21 = vpop.f32.mrb[122].mxu0 }
 0x567   :  { %v4723_v37 = vadd.f32 %v4722_v55, %v4721_v27  ;;  %v9082_v10 = vpop.f32.mrb[123].mxu0 }
 0x568   :  { %v11825_v30 = vadd.f32 %v9080_v4, %v4619_v5  ;;  %v9083_v17 = vadd.f32 %v9082_v10, %v9081_v21 }
 0x56a   :  { %v4664_v59 = vsel %vm13304_vm0, %v11825_v30, 0.0  ;;  %v4713_v56 = vmul.f32 %v11825_v30, %v11825_v30  ;;  %v11831_v60 = vadd.f32 %v9083_v17, %v4622_v32 }
 0x56b   :  { %v4665_v44 = vadd.f32 %v4664_v59, %v4663_v49  ;;  %v4654_v49 = vrot.slane %v4653_v48, 1 }
 0x56c   :  { %v4724_v24 = vsel %vm13304_vm0, %v4713_v56, 0.0  ;;  %v4666_v51 = vsel %vm13304_vm0, %v11831_v60, 0.0  ;;  %v4714_v26 = vmul.f32 %v11831_v60, %v11831_v60  ;;  %v9084_v39 = vpop.f32.mrb[124].mxu0 }
 0x56d   :  { %v4725_v5 = vadd.f32 %v4724_v24, %v4723_v37  ;;  %v4667_v36 = vadd.f32 %v4666_v51, %v4665_v44  ;;  %v9085_v22 = vpop.f32.mrb[125].mxu0  ;;  %v4655_v10 = vadd.f32 %v4654_v49, %v4653_v48 }
 0x56e   :  { %v4726_v15 = vsel %vm13304_vm0, %v4714_v26, 0.0  ;;  %v9086_v53 = vadd.f32 %v9085_v22, %v9084_v39  ;;  %v9087_v32 = vpop.f32.mrb[126].mxu0 }
 0x56f   :  { %v4727_v3 = vadd.f32 %v4726_v15, %v4725_v5  ;;  %v9088_v12 = vpop.f32.mrb[127].mxu0  ;;  %v4744_v15 = vld [vmem:[#allocation16] sm:$0x1] }
 0x570   :  { %v11842_v2 = vadd.f32 %v11787_v35, %v9086_v53  ;;  %v9089_v46 = vadd.f32 %v9088_v12, %v9087_v32 }
 0x572   :  { %v4668_v38 = vsel %vm13304_vm0, %v11842_v2, 0.0  ;;  %v4715_v41 = vmul.f32 %v11842_v2, %v11842_v2  ;;  %v4631_v63 = vadd.f32 %v11793_v7, %v9089_v46  ;;  %v4705_v7 = vadd.f32 %v4704_v13, %v4703_v9  ;;  %v13389_v46 = vld [vmem:[#allocation66_spill] sm:$0xff] }
 0x573   :  { %v4669_v1 = vadd.f32 %v4668_v38, %v4667_v36 }
 0x574   :  { %v4728_v52 = vsel %vm13304_vm0, %v4715_v41, 0.0  ;;  %v4670_v11 = vsel %vm13304_vm0, %v4631_v63, 0.0  ;;  %v4716_v35 = vmul.f32 %v4631_v63, %v4631_v63  ;;  %v4706_v4 = vrot.slane %v4705_v7, 1 }
 0x575   :  { %v4729_v43 = vadd.f32 %v4728_v52, %v4727_v3  ;;  %v4671_v57 = vadd.f32 %v4670_v11, %v4669_v1  ;;  %v9539_v3 = vld [vmem:[#allocation19 + $0x50] sm:$0xff]  }
 0x576   :  { %v4730_v61 = vsel %vm13304_vm0, %v4716_v35, 0.0  ;;  %v4707_v56 = vadd.f32 %v4706_v4, %v4705_v7  ;;  %5112 = vmatpush1.bf16.msra.mxu0 %v9539_v3 }
 0x577   :  { %v4672_v33 = vrot.slane %v4671_v57, 4  ;;  %v4731_v20 = vadd.f32 %v4730_v61, %v4729_v43  ;;  %5113 = vmatprep.subr.bf16.mxu0 %v13388_v23 }
 0x579   :  { %v4673_v40 = vadd.f32 %v4672_v33, %v4671_v57  ;;  %v4732_v19 = vrot.slane %v4731_v20, 4 }
 0x57a   :  { %5114 = vmatpush1.bf16.msra.mxu0 %v9540_v8 }
 0x57b   :  { %v4674_v27 = vrot.slane %v4673_v40, 2  ;;  %v4733_v29 = vadd.f32 %v4732_v19, %v4731_v20 }
 0x57d   :  { %v4675_v47 = vadd.f32 %v4674_v27, %v4673_v40  ;;  %v4734_v55 = vrot.slane %v4733_v29, 2 }
 0x57f   :  { %v4676_v21 = vrot.slane %v4675_v47, 1  ;;  %v4735_v37 = vadd.f32 %v4734_v55, %v4733_v29 }
 0x581   :  { %v4677_v17 = vadd.f32 %v4676_v21, %v4675_v47  ;;  %v4736_v59 = vrot.slane %v4735_v37, 1 }
 0x583   :  { %v4678_v44 = vadd.f32 %v4677_v17, %v4655_v10  ;;  %v4737_v24 = vadd.f32 %v4736_v59, %v4735_v37 }
 0x585   :  { %v4738_v51 = vadd.f32 %v4737_v24, %v4707_v56  ;;  %v4739_v26 = vmul.f32 0.0078125, %v4678_v44 }
 0x587   :  { %v4740_v39 = vmul.f32 0.0078125, %v4738_v51  ;;  %v4741_v16 = vmul.f32 %v4739_v26, %v4739_v26 }
 0x589   :  { %v4742_v5 = vsub.f32 %v4740_v39, %v4741_v16 }
 0x58b   :  { %v4743_v36 = vmax.f32 %v4742_v5, 0.0 }
 0x58d   :  { %v4745_v22 = vadd.f32 1e-05, %v4743_v36 }
 0x58f   :  { %9580 = vrsqrt.f32 %v4745_v22 }
 0x599   :  { %v9581_v53 = vpop.eup %9580 }
 0x59a   :  { %v4747_v32 = vmul.f32 %v9581_v53, %v4744_v15  ;;  %v4851_v53 = vld [vmem:[#allocation3] sm:$0x80] }
 0x59c   :  { %v4749_v12 = vmul.f32 %v4747_v32, %v4739_v26  ;;  %v11855_v0 = vrot.slane %v4747_v32, %v13389_v46 }
 0x59e   :  { %v4750_v38 = vsub.f32 %v4748_v25, %v4749_v12  ;;  %v4810_v41 = vmul.f32 %v11855_v0, %v4631_v63  ;;  %v4758_v9 = vmul.f32 %v11855_v0, %v11725_v54  ;;  %v4757_v1 = vmul.f32 %v11855_v0, %v11721_v28 }
 0x59f   :  { %v4760_v52 = vmul.f32 %v11855_v0, %v11743_v62  ;;  %v4759_v11 = vmul.f32 %v11855_v0, %v11737_v18  ;;  %v4762_v35 = vmul.f32 %v11855_v0, %v11759_v50  ;;  %v4761_v63 = vmul.f32 %v11855_v0, %v11753_v6 }
 0x5a0   :  { %v11872_v54 = vrot.slane %v4750_v38, %v13389_v46  ;;  %v4803_v28 = vmul.f32 %v11855_v0, %v11795_v31  ;;  %v4804_v43 = vmul.f32 %v11855_v0, %v11799_v45  ;;  %v4764_v62 = vmul.f32 %v11855_v0, %v11777_v34 }
 0x5a1   :  { %v4763_v18 = vmul.f32 %v11855_v0, %v11770_v42  ;;  %v4805_v50 = vmul.f32 %v11855_v0, %v11811_v14  ;;  %v4806_v6 = vmul.f32 %v11855_v0, %v11817_v58  ;;  %v4807_v57 = vmul.f32 %v11855_v0, %v11825_v30 }
 0x5a2   :  { %v4818_v31 = vadd.f32 %v4810_v41, %v11872_v54  ;;  %v4772_v45 = vadd.f32 %v11872_v54, %v4758_v9  ;;  %v4771_v61 = vadd.f32 %v11872_v54, %v4757_v1  ;;  %v4774_v34 = vadd.f32 %v11872_v54, %v4760_v52 }
 0x5a3   :  { %v4773_v42 = vadd.f32 %v11872_v54, %v4759_v11  ;;  %v4776_v13 = vadd.f32 %v11872_v54, %v4762_v35  ;;  %v4775_v14 = vadd.f32 %v11872_v54, %v4761_v63  ;;  %v4811_v58 = vadd.f32 %v4803_v28, %v11872_v54 }
 0x5a4   :  { %vm4826_vm3 = vcmp.ge.f32.partialorder %v4818_v31, 0.0  ;;  %v4834_v33 = vmul.f32 0.01, %v4818_v31  ;;  %vm4780_vm4 = vcmp.ge.f32.partialorder %v4772_v45, 0.0  ;;  %v4788_v30 = vmul.f32 0.01, %v4772_v45 }
 0x5a5   :  { %vm4779_vm12 = vcmp.ge.f32.partialorder %v4771_v61, 0.0  ;;  %v4787_v20 = vmul.f32 0.01, %v4771_v61  ;;  %v4790_v19 = vmul.f32 0.01, %v4774_v34  ;;  %vm4782_vm1 = vcmp.ge.f32.partialorder %v4774_v34, 0.0 }
 0x5a6   :  { %v4842_v48 = vsel %vm4826_vm3, %v4818_v31, %v4834_v33  ;;  %v4796_v40 = vsel %vm4780_vm4, %v4772_v45, %v4788_v30  ;;  %vm4781_vm8 = vcmp.ge.f32.partialorder %v4773_v42, 0.0  ;;  %v4789_v27 = vmul.f32 0.01, %v4773_v42 }
 0x5a7   :  { %4850 = vst.msk [vmem:[#allocation3 + $0x80] sm:$0xff] %vm13304_vm0, %v4842_v48  ;;  %4958 = vst.msk [vmem:[#allocation2 + $0x158] sm:$0xff] %vm13304_vm0, %v4842_v48  ;;  %4920 = vrot.lane.b32.xlu1 %v4796_v40, %s10200_s30  ;;  %v4795_v7 = vsel %vm4779_vm12, %v4771_v61, %v4787_v20  ;;  %vm4784_vm11 = vcmp.ge.f32.partialorder %v4776_v13, 0.0  ;;  %v4792_v29 = vmul.f32 0.01, %v4776_v13  ;;  %v4812_v47 = vadd.f32 %v4804_v43, %v11872_v54  ;;  %v13394_v61 = vld [vmem:[#allocation57_spill] sm:$0xff] }
 0x5a8   :  { %4918 = vrot.lane.b32.xlu0 %v4795_v7, %s10200_s30  ;;  %v4791_v49 = vmul.f32 0.01, %v4775_v14  ;;  %vm4783_vm14 = vcmp.ge.f32.partialorder %v4775_v14, 0.0  ;;  %vm4819_vm9 = vcmp.ge.f32.partialorder %v4811_v58, 0.0  ;;  %v4827_v55 = vmul.f32 0.01, %v4811_v58 }
 0x5a9   :  { %v4778_v4 = vadd.f32 %v11872_v54, %v4764_v62  ;;  %v4798_v21 = vsel %vm4782_vm1, %v4774_v34, %v4790_v19  ;;  %vm4820_vm15 = vcmp.ge.f32.partialorder %v4812_v47, 0.0  ;;  %v4828_v37 = vmul.f32 0.01, %v4812_v47  ;;  %v13398_v48 = vld [vmem:[#allocation54_spill] sm:$0xff] }
 0x5aa   :  { %v4777_v10 = vadd.f32 %v11872_v54, %v4763_v18  ;;  %v4797_v17 = vsel %vm4781_vm8, %v4773_v42, %v4789_v27  ;;  %v4835_v59 = vsel %vm4819_vm9, %v4811_v58, %v4827_v55  ;;  %v4813_v56 = vadd.f32 %v4805_v50, %v11872_v54  ;;  %v13400_v27 = vld [vmem:[#allocation56_spill] sm:$0xff] }
 0x5ab   :  { %4924 = vrot.lane.b32.xlu1 %v4798_v21, %s10200_s30  ;;  %v4800_v44 = vsel %vm4784_vm11, %v4776_v13, %v4792_v29  ;;  %v4799_v24 = vsel %vm4783_vm14, %v4775_v14, %v4791_v49  ;;  %v4836_v51 = vsel %vm4820_vm15, %v4812_v47, %v4828_v37  ;;  %4951 = vst.msk [vmem:[#allocation2 + $0x8] sm:$0xff] %vm13304_vm0, %v4835_v59  ;;  %4843 = vst.msk [vmem:[#allocation3 + $0x10] sm:$0xff] %vm13304_vm0, %v4835_v59  ;;  %vm13390_vm4 = vcmask 1040384   ;;  %v13404_v37 = vld [vmem:[#allocation59_spill] sm:$0xff]  ;;  %v13406_v59 = vld [vmem:[#allocation58_spill] sm:$0xff] }
 0x5ac   :  { %4922 = vrot.lane.b32.xlu0 %v4797_v17, %s10200_s30  ;;  %v4814_v26 = vadd.f32 %v4806_v6, %v11872_v54  ;;  %4952 = vst.msk [vmem:[#allocation2 + $0x38] sm:$0xff] %vm13304_vm0, %v4836_v51  ;;  %4844 = vst.msk [vmem:[#allocation3 + $0x20] sm:$0xff] %vm13304_vm0, %v4836_v51  ;;  %vm4786_vm5 = vcmp.ge.f32.partialorder %v4778_v4, 0.0  ;;  %vm4821_vm6 = vcmp.ge.f32.partialorder %v4813_v56, 0.0  ;;  %v4829_v39 = vmul.f32 0.01, %v4813_v56 }
 0x5ad   :  { %v4808_v16 = vmul.f32 %v11855_v0, %v11831_v60  ;;  %v4794_v5 = vmul.f32 0.01, %v4778_v4  ;;  %v4815_v22 = vadd.f32 %v4807_v57, %v11872_v54  ;;  %v4793_v15 = vmul.f32 0.01, %v4777_v10  ;;  %vm13391_vm12 = vmmov %vm13390_vm4  ;;  %v13392_v57 = vld [vmem:[#allocation55_spill] sm:$0xff]  ;;  %v13410_v51 = vld [vmem:[#allocation62_spill] sm:$0xff] }
 0x5ae   :  { %vm4822_vm7 = vcmp.ge.f32.partialorder %v4814_v26, 0.0  ;;  %v4830_v36 = vmul.f32 0.01, %v4814_v26  ;;  %v4837_v32 = vsel %vm4821_vm6, %v4813_v56, %v4829_v39  ;;  %v4809_v3 = vmul.f32 %v11855_v0, %v11842_v2  ;;  %v4859_v58 = vld [vmem:[#allocation3 + $0x80] sm:$0x7f]  ;;  %vm13396_vm11 = vmmov %vm13390_vm4 }
 0x5af   :  { %4928 = vrot.lane.b32.xlu1 %v4800_v44, %s10200_s30  ;;  %v4816_v25 = vadd.f32 %v4808_v16, %v11872_v54  ;;  %vm4785_vm2 = vcmp.ge.f32.partialorder %v4777_v10, 0.0  ;;  %4845 = vst.msk [vmem:[#allocation3 + $0x30] sm:$0xff] %vm13304_vm0, %v4837_v32  ;;  %4953 = vst.msk [vmem:[#allocation2 + $0x68] sm:$0xff] %vm13304_vm0, %v4837_v32  ;;  %vm4823_vm13 = vcmp.ge.f32.partialorder %v4815_v22, 0.0  ;;  %v4831_v60 = vmul.f32 0.01, %v4815_v22 }
 0x5b0   :  { %4926 = vrot.lane.b32.xlu0 %v4799_v24, %s10200_s30  ;;  %v4838_v12 = vsel %vm4822_vm7, %v4814_v26, %v4830_v36  ;;  %v4817_v41 = vadd.f32 %v4809_v3, %v11872_v54  ;;  %v4802_v2 = vsel %vm4786_vm5, %v4778_v4, %v4794_v5  ;;  %v4869_v0 = vrot.slane %v4851_v53, 7  ;;  %vm13397_vm14 = vmmov %vm13390_vm4  ;;  %v13412_v39 = vld [vmem:[#allocation63_spill] sm:$0xff] }
 0x5b1   :  { %4846 = vst.msk [vmem:[#allocation3 + $0x40] sm:$0xff] %vm13304_vm0, %v4838_v12  ;;  %4954 = vst.msk [vmem:[#allocation2 + $0x98] sm:$0xff] %vm13304_vm0, %v4838_v12  ;;  %vm4824_vm10 = vcmp.ge.f32.partialorder %v4816_v25, 0.0  ;;  %v4832_v38 = vmul.f32 0.01, %v4816_v25  ;;  %v4839_v9 = vsel %vm4823_vm13, %v4815_v22, %v4831_v60  ;;  %v4801_v52 = vsel %vm4785_vm2, %v4777_v10, %v4793_v15 }
 0x5b2   :  { %v4960_v1 = vld [vmem:[#allocation2 + $0x8] sm:$0xff]  ;;  %v4852_v11 = vld [vmem:[#allocation3 + $0x10] sm:$0xff]  ;;  %4847 = vst.msk [vmem:[#allocation3 + $0x50] sm:$0xff] %vm13304_vm0, %v4839_v9  ;;  %4955 = vst.msk [vmem:[#allocation2 + $0xc8] sm:$0xff] %vm13304_vm0, %v4839_v9  ;;  %vm4825_vm3 = vcmp.ge.f32.partialorder %v4817_v41, 0.0  ;;  %vm13393_vm1 = vcmp.eq.s32.totalorder %v13392_v57, 1 }
 0x5b3   :  { %4932 = vrot.lane.b32.xlu1 %v4802_v2, %s10200_s30  ;;  %v4840_v35 = vsel %vm4824_vm10, %v4816_v25, %v4832_v38  ;;  %v4833_v63 = vmul.f32 0.01, %v4817_v41  ;;  %v4962_v8 = vld [vmem:[#allocation2 + $0x38] sm:$0xff]  ;;  %v4853_v54 = vld [vmem:[#allocation3 + $0x20] sm:$0xff]  ;;  %v4870_v28 = vrot.slane %v4852_v11, 7  ;;  %vm13395_vm8 = vcmp.eq.s32.totalorder %v13394_v61, 1  ;;  %vm13402_vm5 = vmmov %vm13390_vm4 }
 0x5b4   :  { %4930 = vrot.lane.b32.xlu0 %v4801_v52, %s10200_s30  ;;  %4848 = vst.msk [vmem:[#allocation3 + $0x60] sm:$0xff] %vm13304_vm0, %v4840_v35  ;;  %4956 = vst.msk [vmem:[#allocation2 + $0xf8] sm:$0xff] %vm13304_vm0, %v4840_v35  ;;  %v4976_v43 = vpack.c.bf16 %v4962_v8, %v4960_v1  ;;  %v4872_v62 = vrot.slane %v4853_v54, 7  ;;  %vm13399_vm9 = vcmp.eq.s32.totalorder %v13398_v48, 1  ;;  %vm13401_vm15 = vcmp.eq.s32.totalorder %v13400_v27, 1 }
 0x5b5   :  { %v4841_v18 = vsel %vm4825_vm3, %v4817_v41, %v4833_v63  ;;  %v4871_v50 = vsel %vm13390_vm4, %v4869_v0, %v4870_v28  ;;  %v4884_v47 = vrot.slane %v4859_v58, 7  ;;  %vm13403_vm6 = vmmov %vm13390_vm4  ;;  %vm13405_vm7 = vcmp.eq.s32.totalorder %v13404_v37, 1 }
 0x5b6   :  { %4849 = vst.msk [vmem:[#allocation3 + $0x70] sm:$0xff] %vm13304_vm0, %v4841_v18  ;;  %4957 = vst.msk [vmem:[#allocation2 + $0x128] sm:$0xff] %vm13304_vm0, %v4841_v18  ;;  %8420 = vmatprep.mubr.msk.bf16.mxu0 %vm13304_vm0, %v4976_v43  ;;  %v4873_v6 = vsel %vm13391_vm12, %v4870_v28, %v4872_v62  ;;  %v4894_v31 = vsel %vm13393_vm1, %v4871_v50, 0.0  ;;  %v4854_v45 = vld [vmem:[#allocation3 + $0x30] sm:$0xff]  ;;  %vm13407_vm2 = vcmp.eq.s32.totalorder %v13406_v59, 1  ;;  %vm13411_vm3 = vcmp.eq.s32.totalorder %v13410_v51, 1 }
 0x5b7   :  { %v4895_v34 = vsel %vm13395_vm8, %v4873_v6, 0.0  ;;  %4902 = vst.msk [vmem:[#allocation2] sm:$0xff] %vm13304_vm0, %v4894_v31  ;;  %v4874_v13 = vrot.slane %v4854_v45, 7  ;;  %vm13408_vm13 = vmmov %vm13390_vm4  ;;  %vm13303_vm12 = vcmask 1048064   ;;  %v4964_v25 = vld [vmem:[#allocation2 + $0x68] sm:$0xff]  ;;  %v4974_v43 = vld [vmem:[#allocation2 + $0x158] sm:$0xff] }
 0x5b8   :  { %v4855_v42 = vld [vmem:[#allocation3 + $0x40] sm:$0xff]  ;;  %4903 = vst.msk [vmem:[#allocation2 + $0x30] sm:$0xff] %vm13304_vm0, %v4895_v34  ;;  %vm13409_vm10 = vmmov %vm13390_vm4  ;;  %vm13413_vm4 = vcmp.eq.s32.totalorder %v13412_v39, 1  ;;  %v4966_v3 = vld [vmem:[#allocation2 + $0x98] sm:$0xff]  ;;  %vm13305_vm1 = vcmask 261120  }
 0x5b9   :  { %v4876_v14 = vrot.slane %v4855_v42, 7  ;;  %v4875_v33 = vsel %vm13396_vm11, %v4872_v62, %v4874_v13  ;;  %v4856_v30 = vld [vmem:[#allocation3 + $0x50] sm:$0xff]  ;;  %v4978_v41 = vpack.c.bf16 %v4966_v3, %v4964_v25  ;;  %v4968_v52 = vld [vmem:[#allocation2 + $0xc8] sm:$0xff] }
 0x5ba   :  { %v4896_v40 = vsel %vm13399_vm9, %v4875_v33, 0.0  ;;  %v4878_v7 = vrot.slane %v4856_v30, 7 }
 0x5bb   :  { %v4877_v20 = vsel %vm13397_vm14, %v4874_v13, %v4876_v14  ;;  %v4857_v19 = vld [vmem:[#allocation3 + $0x60] sm:$0xff]  ;;  %4904 = vst.msk [vmem:[#allocation2 + $0x60] sm:$0xff] %vm13304_vm0, %v4896_v40  ;;  %v4970_v11 = vld [vmem:[#allocation2 + $0xf8] sm:$0xff] }
 0x5bc   :  { %v4897_v29 = vsel %vm13401_vm15, %v4877_v20, 0.0  ;;  %v4880_v49 = vrot.slane %v4857_v19, 7  ;;  %v4879_v55 = vsel %vm13402_vm5, %v4876_v14, %v4878_v7  ;;  %v4980_v63 = vpack.c.bf16 %v4970_v11, %v4968_v52 }
 0x5bd   :  { %4905 = vst.msk [vmem:[#allocation2 + $0x90] sm:$0xff] %vm13304_vm0, %v4897_v29  ;;  %v4858_v4 = vld [vmem:[#allocation3 + $0x70] sm:$0xff]  ;;  %v4898_v10 = vsel %vm13405_vm7, %v4879_v55, 0.0  ;;  %v4972_v28 = vld [vmem:[#allocation2 + $0x128] sm:$0xff] }
 0x5be   :  { %v4881_v21 = vsel %vm13403_vm6, %v4878_v7, %v4880_v49  ;;  %v4882_v17 = vrot.slane %v4858_v4, 7  ;;  %4906 = vst.msk [vmem:[#allocation2 + $0xc0] sm:$0xff] %vm13304_vm0, %v4898_v10  ;;  %v4982_v18 = vpack.c.bf16 %v4974_v43, %v4972_v28 }
 0x5bf   :  { %v4899_v56 = vsel %vm13407_vm2, %v4881_v21, 0.0 }
 0x5c0   :  { %4907 = vst.msk [vmem:[#allocation2 + $0xf0] sm:$0xff] %vm13304_vm0, %v4899_v56  ;;  %v4885_v44 = vsel %vm13408_vm13, %v4882_v17, %v4884_v47  ;;  %v4883_v24 = vsel %vm13409_vm10, %v4880_v49, %v4882_v17 }
 0x5c1   :  { %v4901_v26 = vsel %vm13411_vm3, %v4885_v44, 0.0  ;;  %v4900_v16 = vsel %vm13413_vm4, %v4883_v24, 0.0 }
 0x5c2   :  { %4909 = vst.msk [vmem:[#allocation2 + $0x150] sm:$0xff] %vm13304_vm0, %v4901_v26  ;;  %4908 = vst.msk [vmem:[#allocation2 + $0x120] sm:$0xff] %vm13304_vm0, %v4900_v16 }
 0x619   :  { %v4921_v5 = vpop.permute.xlu1 %4920 }
 0x61a   :  { %4944 = vst.msk [vmem:[#allocation2 + $0x30] sm:$0xff] %vm13303_vm12, %v4921_v5  ;;  %v4919_v36 = vpop.permute.xlu0 %4918 }
 0x61b   :  { %4943 = vst.msk [vmem:[#allocation2] sm:$0xff] %vm13303_vm12, %v4919_v36 }
 0x61d   :  { %v4925_v22 = vpop.permute.xlu1 %4924 }
 0x61e   :  { %4946 = vst.msk [vmem:[#allocation2 + $0x90] sm:$0xff] %vm13303_vm12, %v4925_v22  ;;  %v4923_v15 = vpop.permute.xlu0 %4922 }
 0x61f   :  { %4945 = vst.msk [vmem:[#allocation2 + $0x60] sm:$0xff] %vm13303_vm12, %v4923_v15 }
 0x621   :  { %v4929_v53 = vpop.permute.xlu1 %4928  ;;  %v4961_v32 = vld [vmem:[#allocation2 + $0x30] sm:$0xff] }
 0x622   :  { %4948 = vst.msk [vmem:[#allocation2 + $0xf0] sm:$0xff] %vm13303_vm12, %v4929_v53  ;;  %v4927_v12 = vpop.permute.xlu0 %4926  ;;  %v4959_v60 = vld [vmem:[#allocation2] sm:$0xff] }
 0x623   :  { %4947 = vst.msk [vmem:[#allocation2 + $0xc0] sm:$0xff] %vm13303_vm12, %v4927_v12  ;;  %v4975_v38 = vpack.c.bf16 %v4961_v32, %v4959_v60 }
 0x625   :  { %5124 = vmatmul.mubr.bf16.vlgmr.msra.gmra.mrb[128].mxu0 %v4975_v38  ;;  %v4933_v2 = vpop.permute.xlu1 %4932  ;;  %v4965_v1 = vld [vmem:[#allocation2 + $0x90] sm:$0xff] }
 0x626   :  { %4950 = vst.msk [vmem:[#allocation2 + $0x150] sm:$0xff] %vm13303_vm12, %v4933_v2  ;;  %8421 = vmatprep.mubr.msk.bf16.mxu0 %vm13304_vm0, %v4978_v41  ;;  %v4931_v0 = vpop.permute.xlu0 %4930  ;;  %v4963_v9 = vld [vmem:[#allocation2 + $0x60] sm:$0xff] }
 0x627   :  { %4949 = vst.msk [vmem:[#allocation2 + $0x120] sm:$0xff] %vm13303_vm12, %v4931_v0  ;;  %v4977_v35 = vpack.c.bf16 %v4965_v1, %v4963_v9 }
 0x629   :  { %v4969_v54 = vld [vmem:[#allocation2 + $0xf0] sm:$0xff] }
 0x62a   :  { %v4967_v8 = vld [vmem:[#allocation2 + $0xc0] sm:$0xff] }
 0x62b   :  { %v4979_v62 = vpack.c.bf16 %v4969_v54, %v4967_v8 }
 0x62d   :  { %5132 = vmatmul.mubr.bf16.gmra.mrb[132].mxu0 %v4977_v35  ;;  %v4973_v6 = vld [vmem:[#allocation2 + $0x150] sm:$0xff] }
 0x62e   :  { %8422 = vmatprep.mubr.msk.bf16.mxu0 %vm13304_vm0, %v4980_v63  ;;  %v4971_v50 = vld [vmem:[#allocation2 + $0x120] sm:$0xff] }
 0x62f   :  { %v4981_v31 = vpack.c.bf16 %v4973_v6, %v4971_v50 }
 0x635   :  { %5140 = vmatmul.mubr.bf16.gmra.mrb[136].mxu0 %v4979_v62 }
 0x636   :  { %8423 = vmatprep.mubr.msk.bf16.mxu0 %vm13304_vm0, %v4982_v18 }
 0x63d   :  { %5148 = vmatmul.mubr.bf16.gmra.mrb[140].mxu0 %v4981_v31 }
 0x63e   :  { %7179 = vmatprep.mubr.bf16.mxu0 %v13388_v23 }
 0x6f8   :  { %v11981_v45 = vpop.f32.mrb[128].mxu0 }
 0x6f9   :  { %v5179_v34 = vmul.f32 %v11981_v45, %v11981_v45  ;;  %v5127_v42 = vpop.f32.mrb[129].mxu0  ;;  %v5157_v14 = vsel %vm13305_vm1, %v11981_v45, 0.0 }
 0x6fa   :  { %v11985_v13 = vpop.f32.mrb[130].mxu0 }
 0x6fb   :  { %v5158_v58 = vsel %vm13305_vm1, %v11985_v13, 0.0  ;;  %v5180_v33 = vmul.f32 %v11985_v13, %v11985_v13  ;;  %v5130_v30 = vpop.f32.mrb[131].mxu0  ;;  %v5187_v40 = vsel %vm13305_vm1, %v5179_v34, 0.0 }
 0x6fc   :  { %v5159_v20 = vadd.f32 %v5158_v58, %v5157_v14 }
 0x6fd   :  { %v5188_v19 = vsel %vm13305_vm1, %v5180_v33, 0.0 }
 0x6fe   :  { %v5189_v7 = vadd.f32 %v5188_v19, %v5187_v40 }
 0x700   :  { %v11995_v29 = vpop.f32.mrb[132].mxu0 }
 0x701   :  { %v5160_v49 = vsel %vm13305_vm1, %v11995_v29, 0.0  ;;  %v5181_v47 = vmul.f32 %v11995_v29, %v11995_v29  ;;  %v5135_v55 = vpop.f32.mrb[133].mxu0 }
 0x702   :  { %v5161_v4 = vadd.f32 %v5160_v49, %v5159_v20  ;;  %v12001_v21 = vpop.f32.mrb[134].mxu0 }
 0x703   :  { %v5190_v10 = vsel %vm13305_vm1, %v5181_v47, 0.0  ;;  %v5162_v17 = vsel %vm13305_vm1, %v12001_v21, 0.0  ;;  %v5182_v56 = vmul.f32 %v12001_v21, %v12001_v21  ;;  %v5138_v44 = vpop.f32.mrb[135].mxu0 }
 0x704   :  { %v5191_v24 = vadd.f32 %v5190_v10, %v5189_v7  ;;  %v5163_v26 = vadd.f32 %v5162_v17, %v5161_v4 }
 0x705   :  { %v5192_v16 = vsel %vm13305_vm1, %v5182_v56, 0.0 }
 0x706   :  { %v5193_v5 = vadd.f32 %v5192_v16, %v5191_v24  ;;  %v5214_v24 = vld [vmem:[#allocation21] sm:$0x1] }
 0x708   :  { %v5141_v36 = vpop.f32.mrb[136].mxu0 }
 0x709   :  { %v5164_v22 = vsel %vm13305_vm1, %v5141_v36, 0.0  ;;  %v5183_v15 = vmul.f32 %v5141_v36, %v5141_v36  ;;  %v5143_v53 = vpop.f32.mrb[137].mxu0 }
 0x70a   :  { %v5165_v32 = vadd.f32 %v5164_v22, %v5163_v26  ;;  %v5144_v25 = vpop.f32.mrb[138].mxu0 }
 0x70b   :  { %v5194_v3 = vsel %vm13305_vm1, %v5183_v15, 0.0  ;;  %v5166_v12 = vsel %vm13305_vm1, %v5144_v25, 0.0  ;;  %v5184_v60 = vmul.f32 %v5144_v25, %v5144_v25  ;;  %v5146_v38 = vpop.f32.mrb[139].mxu0 }
 0x70c   :  { %v5195_v41 = vadd.f32 %v5194_v3, %v5193_v5  ;;  %v5167_v2 = vadd.f32 %v5166_v12, %v5165_v32  ;;  %v5218_v5 = vld [vmem:[#allocation22] sm:$0x1] }
 0x70d   :  { %v5196_v0 = vsel %vm13305_vm1, %v5184_v60, 0.0 }
 0x70e   :  { %v5197_v9 = vadd.f32 %v5196_v0, %v5195_v41 }
 0x710   :  { %v5149_v1 = vpop.f32.mrb[140].mxu0 }
 0x711   :  { %v5168_v52 = vsel %vm13305_vm1, %v5149_v1, 0.0  ;;  %v5185_v11 = vmul.f32 %v5149_v1, %v5149_v1  ;;  %v5151_v35 = vpop.f32.mrb[141].mxu0 }
 0x712   :  { %v5169_v63 = vadd.f32 %v5168_v52, %v5167_v2  ;;  %v5152_v8 = vpop.f32.mrb[142].mxu0 }
 0x713   :  { %v5198_v54 = vsel %vm13305_vm1, %v5185_v11, 0.0  ;;  %v5170_v28 = vsel %vm13305_vm1, %v5152_v8, 0.0  ;;  %v5186_v43 = vmul.f32 %v5152_v8, %v5152_v8  ;;  %v5154_v62 = vpop.f32.mrb[143].mxu0 }
 0x714   :  { %v5199_v18 = vadd.f32 %v5198_v54, %v5197_v9  ;;  %v5171_v50 = vadd.f32 %v5170_v28, %v5169_v63  ;;  %v377_v62 = vld [vmem:[#allocation9] sm:$0xff] }
 0x715   :  { %v5200_v6 = vsel %vm13305_vm1, %v5186_v43, 0.0  ;;  %vm385_vm15 = vcmp.gt.f32.partialorder %v377_v62, 0.5 }
 0x716   :  { %v5172_v31 = vrot.slane %v5171_v50, 4  ;;  %v5201_v34 = vadd.f32 %v5200_v6, %v5199_v18  ;;  %v5398_v6 = vsel %vm385_vm15, 1, %v13388_v23  ;;  %vm13414_vm15 = vcmask 1040384  }
 0x718   :  { %v5173_v42 = vadd.f32 %v5172_v31, %v5171_v50  ;;  %v5202_v14 = vrot.slane %v5201_v34, 4 }
 0x71a   :  { %v5174_v58 = vrot.slane %v5173_v42, 2  ;;  %v5203_v33 = vadd.f32 %v5202_v14, %v5201_v34  ;;  %v379_v14 = vld [vmem:[#allocation9 + $0x10] sm:$0xff] }
 0x71b   :  { %vm387_vm2 = vcmp.gt.f32.partialorder %v379_v14, 0.5 }
 0x71c   :  { %v5175_v30 = vadd.f32 %v5174_v58, %v5173_v42  ;;  %v5204_v20 = vrot.slane %v5203_v33, 2  ;;  %v378_v58 = vld [vmem:[#allocation9 + $0x8] sm:$0xff] }
 0x71d   :  { %vm386_vm13 = vcmp.gt.f32.partialorder %v378_v58, 0.5 }
 0x71e   :  { %v5176_v40 = vrot.slane %v5175_v30, 1  ;;  %v5205_v19 = vadd.f32 %v5204_v20, %v5203_v33  ;;  %v380_v20 = vld [vmem:[#allocation9 + $0x18] sm:$0xff] }
 0x71f   :  { %vm388_vm10 = vcmp.gt.f32.partialorder %v380_v20, 0.5 }
 0x720   :  { %v5177_v7 = vadd.f32 %v5176_v40, %v5175_v30  ;;  %v5206_v49 = vrot.slane %v5205_v19, 1  ;;  %v5400_v40 = vsel %vm387_vm2, 1, %v13388_v23 }
 0x722   :  { %v5207_v47 = vadd.f32 %v5206_v49, %v5205_v19  ;;  %v5209_v55 = vmul.f32 0.015625, %v5177_v7  ;;  %v5399_v19 = vsel %vm386_vm13, 1, %v13388_v23  ;;  %v382_v49 = vld [vmem:[#allocation9 + $0x28] sm:$0xff] }
 0x723   :  { %vm390_vm4 = vcmp.gt.f32.partialorder %v382_v49, 0.5 }
 0x724   :  { %v5210_v4 = vmul.f32 0.015625, %v5207_v47  ;;  %v5211_v10 = vmul.f32 %v5209_v55, %v5209_v55  ;;  %v381_v47 = vld [vmem:[#allocation9 + $0x20] sm:$0xff] }
 0x726   :  { %v5212_v17 = vsub.f32 %v5210_v4, %v5211_v10  ;;  %v384_v10 = vld [vmem:[#allocation9 + $0x38] sm:$0xff] }
 0x728   :  { %v5213_v56 = vmax.f32 %v5212_v17, 0.0  ;;  %v383_v17 = vld [vmem:[#allocation9 + $0x30] sm:$0xff] }
 0x72a   :  { %v5215_v44 = vadd.f32 1e-05, %v5213_v56  ;;  %v5403_v56 = vsel %vm390_vm4, 1, %v13388_v23  ;;  %vm13421_vm4 = vcmp.eq.s32.totalorder %v13398_v48, 1 }
 0x72c   :  { %9582 = vrsqrt.f32 %v5215_v44 }
 0x736   :  { %v9583_v26 = vpop.eup %9582 }
 0x737   :  { %v5217_v16 = vmul.f32 %v9583_v26, %v5214_v24 }
 0x739   :  { %v5219_v22 = vmul.f32 %v5217_v16, %v5209_v55  ;;  %v5225_v15 = vrot.slane %v5217_v16, %v13389_v46  ;;  %v5401_v55 = vsel %vm388_vm10, 1, %v13388_v23  ;;  %vm5447_vm10 = vcmask 1046528  }
 0x73b   :  { %v5220_v53 = vsub.f32 %v5218_v5, %v5219_v22  ;;  %v5234_v32 = vmul.f32 %v5225_v15, %v5152_v8  ;;  %v5228_v3 = vmul.f32 %v5225_v15, %v11985_v13  ;;  %v5227_v12 = vmul.f32 %v5225_v15, %v11981_v45 }
 0x73c   :  { %v5230_v60 = vmul.f32 %v5225_v15, %v12001_v21  ;;  %v5229_v38 = vmul.f32 %v5225_v15, %v11995_v29  ;;  %v5231_v41 = vmul.f32 %v5225_v15, %v5141_v36  ;;  %v5232_v2 = vmul.f32 %v5225_v15, %v5144_v25 }
 0x73d   :  { %v5239_v0 = vrot.slane %v5220_v53, %v13389_v46  ;;  %v5233_v9 = vmul.f32 %v5225_v15, %v5149_v1  ;;  %v5330_v53 = vld [vmem:[#allocation3] sm:$0x80] }
 0x73f   :  { %v5248_v52 = vadd.f32 %v5239_v0, %v5234_v32  ;;  %v5242_v11 = vadd.f32 %v5239_v0, %v5228_v3  ;;  %v5241_v35 = vadd.f32 %v5239_v0, %v5227_v12  ;;  %v5244_v63 = vadd.f32 %v5239_v0, %v5230_v60 }
 0x740   :  { %v5243_v54 = vadd.f32 %v5239_v0, %v5229_v38  ;;  %v5245_v28 = vadd.f32 %v5239_v0, %v5231_v41  ;;  %v5246_v8 = vadd.f32 %v5239_v0, %v5232_v2  ;;  %v5247_v43 = vadd.f32 %v5239_v0, %v5233_v9 }
 0x741   :  { %vm5250_vm8 = vcmp.ge.f32.partialorder %v5242_v11, 0.0  ;;  %v5258_v13 = vmul.f32 0.01, %v5242_v11  ;;  %vm5249_vm11 = vcmp.ge.f32.partialorder %v5241_v35, 0.0  ;;  %v5257_v45 = vmul.f32 0.01, %v5241_v35 }
 0x742   :  { %v5260_v36 = vmul.f32 0.01, %v5244_v63  ;;  %v5259_v25 = vmul.f32 0.01, %v5243_v54  ;;  %vm5252_vm14 = vcmp.ge.f32.partialorder %v5244_v63, 0.0  ;;  %vm5251_vm9 = vcmp.ge.f32.partialorder %v5243_v54, 0.0 }
 0x743   :  { %v12023_v21 = vsel %vm5250_vm8, %v5242_v11, %v5258_v13  ;;  %v12025_v29 = vsel %vm5249_vm11, %v5241_v35, %v5257_v45  ;;  %v5261_v50 = vmul.f32 0.01, %v5245_v28  ;;  %vm5253_vm5 = vcmp.ge.f32.partialorder %v5245_v28, 0.0 }
 0x744   :  { %5283 = vrot.lane.b32.xlu1 %v12023_v21, %s10226_s17  ;;  %5281 = vrot.lane.b32.xlu0 %v12025_v29, %s10226_s17  ;;  %v12031_v1 = vsel %vm5252_vm14, %v5244_v63, %v5260_v36  ;;  %v12033_v18 = vsel %vm5251_vm9, %v5243_v54, %v5259_v25  ;;  %v5262_v34 = vmul.f32 0.01, %v5246_v8  ;;  %v5263_v42 = vmul.f32 0.01, %v5247_v43 }
 0x745   :  { %v12040_v31 = vsel %vm5253_vm5, %v5245_v28, %v5261_v50  ;;  %vm5254_vm6 = vcmp.ge.f32.partialorder %v5246_v8, 0.0  ;;  %vm5255_vm7 = vcmp.ge.f32.partialorder %v5247_v43, 0.0  ;;  %v5264_v7 = vmul.f32 0.01, %v5248_v52  ;;  %vm13415_vm5 = vmmov %vm13414_vm15 }
 0x746   :  { %v12044_v33 = vsel %vm5254_vm6, %v5246_v8, %v5262_v34  ;;  %v12046_v30 = vsel %vm5255_vm7, %v5247_v43, %v5263_v42  ;;  %vm5256_vm3 = vcmp.ge.f32.partialorder %v5248_v52, 0.0  ;;  %vm389_vm8 = vcmp.gt.f32.partialorder %v381_v47, 0.5  ;;  %vm13418_vm2 = vmmov %vm13415_vm5 }
 0x747   :  { %v12055_v4 = vsel %vm5256_vm3, %v5248_v52, %v5264_v7  ;;  %v5402_v44 = vsel %vm389_vm8, 1, %v13388_v23  ;;  %vm392_vm11 = vcmp.gt.f32.partialorder %v384_v10, 0.5  ;;  %vm391_vm14 = vcmp.gt.f32.partialorder %v383_v17, 0.5  ;;  %vm13419_vm13 = vmmov %vm13418_vm2  ;;  %v9541_v10 = vld [vmem:[#allocation24] sm:$0xff]  }
 0x748   :  { %5287 = vrot.lane.b32.xlu1 %v12031_v1, %s10226_s17  ;;  %5285 = vrot.lane.b32.xlu0 %v12033_v18, %s10226_s17  ;;  %v5405_v24 = vsel %vm392_vm11, 1, %v13388_v23  ;;  %v5404_v26 = vsel %vm391_vm14, 1, %v13388_v23  ;;  %vm5321_vm9 = vcmask 130048   ;;  %v5348_v35 = vrot.slane %v5330_v53, 7  ;;  %vm13422_vm11 = vmmov %vm13418_vm2 }
 0x749   :  { %vm13416_vm6 = vcmp.eq.s32.totalorder %v13394_v61, 1  ;;  %vm13417_vm7 = vcmp.eq.s32.totalorder %v13392_v57, 1  ;;  %vm13420_vm3 = vcmp.eq.s32.totalorder %v13400_v27, 1  ;;  %vm13423_vm14 = vcmp.eq.s32.totalorder %v13404_v37, 1  ;;  %9179 = vmatprep.subr.bf16.mxu1 %v9541_v10 }
 0x74a   :  { %9180 = vmatpush3.bf16.msra.mxu1 %v9541_v10 }
 0x74c   :  { %5407 = vperm.xlu1 %9288, %v5398_v6   ;;  %5289 = vrot.lane.b32.xlu0 %v12040_v31, %s10226_s17 }
 0x750   :  { %5291 = vrot.lane.b32.xlu1 %v12044_v33, %s10226_s17  ;;  %5293 = vrot.lane.b32.xlu0 %v12046_v30, %s10226_s17 }
 0x754   :  { %5413 = vperm.xlu1 %9288, %v5400_v40   ;;  %5410 = vperm.xlu0 %9287, %v5399_v19  }
 0x758   :  { %5295 = vrot.lane.b32.xlu1 %v12055_v4, %s10226_s17  ;;  %5416 = vperm.xlu0 %9287, %v5401_v55  }
 0x75c   :  { %5422 = vperm.xlu1 %9288, %v5403_v56   ;;  %5419 = vperm.xlu0 %9287, %v5402_v44  }
 0x760   :  { %5428 = vperm.xlu1 %9288, %v5405_v24   ;;  %5425 = vperm.xlu0 %9287, %v5404_v26  }
 0x7b6   :  { %v5284_v16 = vpop.permute.xlu1 %5283  ;;  %v5282_v5 = vpop.permute.xlu0 %5281 }
 0x7b7   :  { %v5306_v22 = vadd.f32 %v5284_v16, %v12023_v21  ;;  %v5305_v15 = vadd.f32 %v5282_v5, %v12025_v29  ;;  %v9542_v16 = vld [vmem:[#allocation24 + $0x8] sm:$0xff]  }
 0x7b8   :  { %9181 = vmatprep.subr.bf16.mxu1 %v9542_v16 }
 0x7b9   :  { %v5314_v32 = vmul.f32 0.5, %v5306_v22  ;;  %v5313_v3 = vmul.f32 0.5, %v5305_v15  ;;  %9182 = vmatpush3.bf16.msra.mxu1 %v9542_v16 }
 0x7ba   :  { %v5288_v12 = vpop.permute.xlu1 %5287  ;;  %v5286_v60 = vpop.permute.xlu0 %5285 }
 0x7bb   :  { %5323 = vst.msk [vmem:[#allocation3 + $0x20] sm:$0xff] %vm5321_vm9, %v5314_v32  ;;  %5322 = vst.msk [vmem:[#allocation3 + $0x10] sm:$0xff] %vm5321_vm9, %v5313_v3  ;;  %v5308_v38 = vadd.f32 %v5288_v12, %v12031_v1  ;;  %v5307_v41 = vadd.f32 %v5286_v60, %v12033_v18  ;;  %5499 = vrot.lane.b32.xlu1 %v5314_v32, %s10213_s29  ;;  %5497 = vrot.lane.b32.xlu0 %v5313_v3, %s10213_s29 }
 0x7bc   :  { %5381 = vst.msk [vmem:[#allocation3] sm:$0xff] %vm5321_vm9, %v5313_v3 }
 0x7bd   :  { %v5316_v2 = vmul.f32 0.5, %v5308_v38  ;;  %v5315_v0 = vmul.f32 0.5, %v5307_v41 }
 0x7be   :  { %v5290_v9 = vpop.permute.xlu0 %5289 }
 0x7bf   :  { %5325 = vst.msk [vmem:[#allocation3 + $0x40] sm:$0xff] %vm5321_vm9, %v5316_v2  ;;  %5324 = vst.msk [vmem:[#allocation3 + $0x30] sm:$0xff] %vm5321_vm9, %v5315_v0  ;;  %v5309_v52 = vadd.f32 %v5290_v9, %v12040_v31  ;;  %5503 = vrot.lane.b32.xlu1 %v5316_v2, %s10213_s29  ;;  %5501 = vrot.lane.b32.xlu0 %v5315_v0, %s10213_s29 }
 0x7c1   :  { %v5317_v11 = vmul.f32 0.5, %v5309_v52 }
 0x7c2   :  { %v5331_v63 = vld [vmem:[#allocation3 + $0x10] sm:$0xff]  ;;  %v5332_v54 = vld [vmem:[#allocation3 + $0x20] sm:$0xff]  ;;  %v5294_v28 = vpop.permute.xlu0 %5293 }
 0x7c3   :  { %5382 = vst.msk [vmem:[#allocation3 + $0x10] sm:$0xff] %vm5321_vm9, %v5314_v32  ;;  %5383 = vst.msk [vmem:[#allocation3 + $0x20] sm:$0xff] %vm5321_vm9, %v5315_v0  ;;  %v5311_v8 = vadd.f32 %v5294_v28, %v12046_v30  ;;  %5505 = vrot.lane.b32.xlu0 %v5317_v11, %s10213_s29  ;;  %v5351_v43 = vrot.slane %v5332_v54, 7  ;;  %v5349_v13 = vrot.slane %v5331_v63, 7  ;;  %v5389_v50 = vld [vmem:[#allocation3] sm:$0xfe] }
 0x7c4   :  { %5326 = vst.msk [vmem:[#allocation3 + $0x50] sm:$0xff] %vm5321_vm9, %v5317_v11  ;;  %v5448_v30 = vrot.slane %v5389_v50, 1  ;;  %v9543_v0 = vld [vmem:[#allocation24 + $0x10] sm:$0xff]  }
 0x7c5   :  { %v12082_v45 = vmul.f32 0.5, %v5311_v8  ;;  %v5352_v21 = vsel %vm13414_vm15, %v5349_v13, %v5351_v43  ;;  %v5350_v29 = vsel %vm13415_vm5, %v5348_v35, %v5349_v13  ;;  %9183 = vmatprep.subr.bf16.mxu1 %v9543_v0 }
 0x7c6   :  { %v5333_v36 = vld [vmem:[#allocation3 + $0x30] sm:$0xff]  ;;  %v5334_v25 = vld [vmem:[#allocation3 + $0x40] sm:$0xff]  ;;  %v5374_v62 = vsel %vm13416_vm6, %v5352_v21, 0.0  ;;  %v5373_v1 = vsel %vm13417_vm7, %v5350_v29, 0.0  ;;  %vm13424_vm7 = vmmov %vm13418_vm2  ;;  %9184 = vmatpush3.bf16.msra.mxu1 %v9543_v0 }
 0x7c7   :  { %5384 = vst.msk [vmem:[#allocation3 + $0x30] sm:$0xff] %vm5321_vm9, %v5316_v2  ;;  %5385 = vst.msk [vmem:[#allocation3 + $0x40] sm:$0xff] %vm5321_vm9, %v5317_v11  ;;  %5509 = vrot.lane.b32.xlu0 %v12082_v45, %s10213_s29  ;;  %v5355_v18 = vrot.slane %v5334_v25, 7  ;;  %v5353_v61 = vrot.slane %v5333_v36, 7 }
 0x7c8   :  { %5328 = vst.msk [vmem:[#allocation3 + $0x70] sm:$0xff] %vm5321_vm9, %v12082_v45  ;;  %5482 = vst.msk [vmem:[#allocation2 + $0x30] sm:$0xff] %vm5321_vm9, %v5374_v62 }
 0x7c9   :  { %5481 = vst.msk [vmem:[#allocation2] sm:$0xff] %vm5321_vm9, %v5373_v1  ;;  %v5356_v57 = vsel %vm13418_vm2, %v5353_v61, %v5355_v18  ;;  %v5354_v6 = vsel %vm13419_vm13, %v5351_v43, %v5353_v61  ;;  %vm13425_vm13 = vcmp.eq.s32.totalorder %v13412_v39, 1 }
 0x7ca   :  { %v5390_v34 = vld [vmem:[#allocation3 + $0x10] sm:$0xff]  ;;  %v5376_v42 = vsel %vm13420_vm3, %v5356_v57, 0.0  ;;  %v5375_v14 = vsel %vm13421_vm4, %v5354_v6, 0.0  ;;  %v5391_v55 = vld [vmem:[#allocation3 + $0x20] sm:$0xff]  ;;  %vm13426_vm3 = vcmp.eq.s32.totalorder %v13406_v59, 1 }
 0x7cb   :  { %v12100_v31 = vld [vmem:[#allocation3 + $0x50] sm:$0xff]  ;;  %v12106_v58 = vpop.permute.xlu1 %5407  ;;  %v5449_v20 = vrot.slane %v5390_v34, 1  ;;  %5484 = vst.msk [vmem:[#allocation2 + $0x90] sm:$0xff] %vm5321_vm9, %v5376_v42  ;;  %5483 = vst.msk [vmem:[#allocation2 + $0x60] sm:$0xff] %vm5321_vm9, %v5375_v14  ;;  %v5451_v24 = vrot.slane %v5391_v55, 1 }
 0x7cc   :  { %v5357_v40 = vrot.slane %v12100_v31, 7  ;;  %vm5430_vm8 = vcmp.eq.s32.totalorder %v12106_v58, 1 }
 0x7cd   :  { %v5450_v19 = vsel %vm5447_vm10, %v5448_v30, %v5449_v20  ;;  %v5452_v11 = vsel %vm5447_vm10, %v5449_v20, %v5451_v24 }
 0x7ce   :  { %v5358_v27 = vsel %vm13422_vm11, %v5355_v18, %v5357_v40  ;;  %v5473_v48 = vsel %vm5430_vm8, %v5450_v19, 0.0  ;;  %v12116_v7 = vld [vmem:[#allocation3 + $0x30] sm:$0xff]  ;;  %v5393_v32 = vld [vmem:[#allocation3 + $0x40] sm:$0xff] }
 0x7cf   :  { %v5377_v49 = vsel %vm13423_vm14, %v5358_v27, 0.0  ;;  %v5292_v47 = vpop.permute.xlu1 %5291  ;;  %5538 = vrot.lane.b32.xlu0 %v5473_v48, %s10227_s9  ;;  %v5453_v56 = vrot.slane %v12116_v7, 1  ;;  %v5337_v3 = vld [vmem:[#allocation3 + $0x70] sm:$0xff]  ;;  %v5455_v2 = vrot.slane %v5393_v32, 1 }
 0x7d0   :  { %5485 = vst.msk [vmem:[#allocation2 + $0xc0] sm:$0xff] %vm5321_vm9, %v5377_v49  ;;  %v5310_v17 = vadd.f32 %v5292_v47, %v12044_v33  ;;  %v5361_v52 = vrot.slane %v5337_v3, 7 }
 0x7d1   :  { %v5454_v33 = vsel %vm5447_vm10, %v5451_v24, %v5453_v56  ;;  %v5456_v21 = vsel %vm5447_vm10, %v5453_v56, %v5455_v2 }
 0x7d2   :  { %v5318_v44 = vmul.f32 0.5, %v5310_v17 }
 0x7d3   :  { %v12124_v26 = vpop.permute.xlu1 %5413  ;;  %v12126_v37 = vpop.permute.xlu0 %5410 }
 0x7d4   :  { %5327 = vst.msk [vmem:[#allocation3 + $0x60] sm:$0xff] %vm5321_vm9, %v5318_v44  ;;  %5386 = vst.msk [vmem:[#allocation3 + $0x50] sm:$0xff] %vm5321_vm9, %v5318_v44  ;;  %vm13312_vm15 = vcmp.eq.s32.totalorder %v12124_v26, 1  ;;  %5507 = vrot.lane.b32.xlu1 %v5318_v44, %s10213_s29  ;;  %vm5431_vm5 = vcmp.eq.s32.totalorder %v12126_v37, 1 }
 0x7d5   :  { %v5475_v5 = vsel %vm13312_vm15, %v5454_v33, 0.0  ;;  %v5474_v28 = vsel %vm5431_vm5, %v5452_v11, 0.0  ;;  %v9544_v11 = vld [vmem:[#allocation28] sm:$0xff]  }
 0x7d6   :  { %5542 = vrot.lane.b32.xlu0 %v5475_v5, %s10227_s9  ;;  %9193 = vmatprep.subr.bf16.mxu1 %v9544_v11 }
 0x7d7   :  { %v5296_v22 = vpop.permute.xlu1 %5295  ;;  %v12136_v15 = vpop.permute.xlu0 %5416 }
 0x7d8   :  { %v5312_v53 = vadd.f32 %v5296_v22, %v12055_v4  ;;  %vm13313_vm4 = vcmp.eq.s32.totalorder %v12136_v15, 1 }
 0x7d9   :  { %v5476_v59 = vsel %vm13313_vm4, %v5456_v21, 0.0 }
 0x7da   :  { %v5320_v12 = vmul.f32 0.5, %v5312_v53 }
 0x7db   :  { %v5336_v60 = vld [vmem:[#allocation3 + $0x60] sm:$0xff]  ;;  %v12139_v38 = vpop.permute.xlu0 %5419  ;;  %v5394_v41 = vld [vmem:[#allocation3 + $0x50] sm:$0xff] }
 0x7dc   :  { %5387 = vst.msk [vmem:[#allocation3 + $0x60] sm:$0xff] %vm5321_vm9, %v12082_v45  ;;  %5329 = vst.msk [vmem:[#allocation3 + $0x80] sm:$0xff] %vm5321_vm9, %v5320_v12  ;;  %5511 = vrot.lane.b32.xlu1 %v5320_v12, %s10213_s29  ;;  %v5457_v4 = vrot.slane %v5394_v41, 1  ;;  %v5359_v9 = vrot.slane %v5336_v60, 7  ;;  %vm13310_vm6 = vcmp.eq.s32.totalorder %v12139_v38, 1  ;;  %v12165_v45 = vpop.permute.xlu1 %5422 }
 0x7dd   :  { %5388 = vst.msk [vmem:[#allocation3 + $0x70] sm:$0xff] %vm5321_vm9, %v5320_v12  ;;  %vm13311_vm11 = vcmp.eq.s32.totalorder %v12165_v45, 1 }
 0x7de   :  { %v5458_v35 = vsel %vm5447_vm10, %v5455_v2, %v5457_v4  ;;  %v5362_v63 = vsel %vm13424_vm7, %v5359_v9, %v5361_v52  ;;  %v5360_v54 = vsel %vm13418_vm2, %v5357_v40, %v5359_v9  ;;  %vm13429_vm7 = vmmov %vm13418_vm2  ;;  %vm13430_vm2 = vcmp.eq.s32.totalorder %v13410_v51, 1 }
 0x7df   :  { %v5477_v8 = vsel %vm13310_vm6, %v5458_v35, 0.0  ;;  %v5379_v43 = vsel %vm13425_vm13, %v5362_v63, 0.0  ;;  %v5378_v13 = vsel %vm13426_vm3, %v5360_v54, 0.0  ;;  %v12168_v29 = vpop.permute.xlu0 %5425  ;;  %vm13306_vm3 = vcmask 261248  }
 0x7e0   :  { %5540 = vrot.lane.b32.xlu1 %v5474_v28, %s10227_s9  ;;  %5546 = vrot.lane.b32.xlu0 %v5477_v8, %s10227_s9  ;;  %5487 = vst.msk [vmem:[#allocation2 + $0x120] sm:$0xff] %vm5321_vm9, %v5379_v43  ;;  %5486 = vst.msk [vmem:[#allocation2 + $0xf0] sm:$0xff] %vm5321_vm9, %v5378_v13  ;;  %vm13307_vm14 = vcmp.eq.s32.totalorder %v12168_v29, 1  ;;  %v12177_v31 = vpop.permute.xlu1 %5428 }
 0x7e1   :  { %13427 = vst [vmem:[#allocation67_spill] sm:$0xff] %v12168_v29  ;;  %13428 = vst [vmem:[#allocation60_spill] sm:$0xff] %v12177_v31  ;;  %vm13308_vm13 = vcmp.eq.s32.totalorder %v12177_v31, 1 }
 0x7e3   :  { %v5395_v39 = vld [vmem:[#allocation3 + $0x60] sm:$0xff] }
 0x7e4   :  { %v5396_v36 = vld [vmem:[#allocation3 + $0x70] sm:$0xff]  ;;  %v5397_v25 = vld [vmem:[#allocation3 + $0x80] sm:$0x1]  ;;  %5544 = vrot.lane.b32.xlu1 %v5476_v59, %s10227_s9  ;;  %v5459_v62 = vrot.slane %v5395_v39, 1 }
 0x7e5   :  { %v5461_v1 = vrot.slane %v5396_v36, 1  ;;  %v5463_v18 = vrot.slane %v5397_v25, 1  ;;  %v5338_v61 = vld [vmem:[#allocation3 + $0x80] sm:$0x7f] }
 0x7e6   :  { %v5363_v50 = vrot.slane %v5338_v61, 7  ;;  %v5460_v57 = vsel %vm5447_vm10, %v5457_v4, %v5459_v62 }
 0x7e7   :  { %v5462_v6 = vsel %vm5447_vm10, %v5459_v62, %v5461_v1  ;;  %v5478_v34 = vsel %vm13311_vm11, %v5460_v57, 0.0  ;;  %v5464_v30 = vsel %vm5447_vm10, %v5461_v1, %v5463_v18 }
 0x7e8   :  { %v5479_v42 = vsel %vm13307_vm14, %v5462_v6, 0.0  ;;  %v5364_v14 = vsel %vm13429_vm7, %v5361_v52, %v5363_v50  ;;  %5548 = vrot.lane.b32.xlu1 %v5478_v34, %s10227_s9  ;;  %v5480_v40 = vsel %vm13308_vm13, %v5464_v30, 0.0  ;;  %vm5562_vm7 = vcmask 392448  }
 0x7e9   :  { %5550 = vrot.lane.b32.xlu0 %v5479_v42, %s10227_s9  ;;  %v5380_v20 = vsel %vm13430_vm2, %v5364_v14, 0.0  ;;  %vm5607_vm2 = vcmask 392192  }
 0x7ea   :  { %5488 = vst.msk [vmem:[#allocation2 + $0x150] sm:$0xff] %vm5321_vm9, %v5380_v20 }
 0x7ec   :  { %5552 = vrot.lane.b32.xlu1 %v5480_v40, %s10227_s9 }
 0x82d   :  { %v5500_v19 = vpop.permute.xlu1 %5499  ;;  %v5498_v27 = vpop.permute.xlu0 %5497 }
 0x82e   :  { %5523 = vst.msk [vmem:[#allocation2 + $0x30] sm:$0xff] %vm13306_vm3, %v5500_v19  ;;  %5522 = vst.msk [vmem:[#allocation2] sm:$0xff] %vm13306_vm3, %v5498_v27 }
 0x831   :  { %v5504_v48 = vpop.permute.xlu1 %5503  ;;  %v5502_v7 = vpop.permute.xlu0 %5501 }
 0x832   :  { %5525 = vst.msk [vmem:[#allocation2 + $0x90] sm:$0xff] %vm13306_vm3, %v5504_v48  ;;  %5524 = vst.msk [vmem:[#allocation2 + $0x60] sm:$0xff] %vm13306_vm3, %v5502_v7 }
 0x835   :  { %v5506_v51 = vpop.permute.xlu0 %5505 }
 0x836   :  { %5526 = vst.msk [vmem:[#allocation2 + $0xc0] sm:$0xff] %vm13306_vm3, %v5506_v51 }
 0x839   :  { %v5510_v49 = vpop.permute.xlu0 %5509 }
 0x83a   :  { %5528 = vst.msk [vmem:[#allocation2 + $0x120] sm:$0xff] %vm13306_vm3, %v5510_v49 }
 0x841   :  { %v5539_v47 = vpop.permute.xlu0 %5538 }
 0x842   :  { %5563 = vst.msk [vmem:[#allocation2] sm:$0xff] %vm5562_vm7, %v5539_v47 }
 0x846   :  { %v5508_v55 = vpop.permute.xlu1 %5507 }
 0x847   :  { %5527 = vst.msk [vmem:[#allocation2 + $0xf0] sm:$0xff] %vm13306_vm3, %v5508_v55 }
 0x848   :  { %v5543_v10 = vpop.permute.xlu0 %5542 }
 0x849   :  { %5565 = vst.msk [vmem:[#allocation2 + $0x60] sm:$0xff] %vm5562_vm7, %v5543_v10  ;;  %v5571_v5 = vld [vmem:[#allocation2] sm:$0xff] }
 0x84e   :  { %v5512_v17 = vpop.permute.xlu1 %5511 }
 0x84f   :  { %5529 = vst.msk [vmem:[#allocation2 + $0x150] sm:$0xff] %vm13306_vm3, %v5512_v17 }
 0x850   :  { %v5573_v3 = vld [vmem:[#allocation2 + $0x60] sm:$0xff] }
 0x852   :  { %v5541_v56 = vpop.permute.xlu1 %5540  ;;  %v5547_v44 = vpop.permute.xlu0 %5546 }
 0x853   :  { %5564 = vst.msk [vmem:[#allocation2 + $0x30] sm:$0xff] %vm5562_vm7, %v5541_v56  ;;  %5567 = vst.msk [vmem:[#allocation2 + $0xc0] sm:$0xff] %vm5562_vm7, %v5547_v44 }
 0x856   :  { %v5545_v24 = vpop.permute.xlu1 %5544 }
 0x857   :  { %5566 = vst.msk [vmem:[#allocation2 + $0x90] sm:$0xff] %vm5562_vm7, %v5545_v24 }
 0x85a   :  { %v5549_v16 = vpop.permute.xlu1 %5548  ;;  %v5572_v22 = vld [vmem:[#allocation2 + $0x30] sm:$0xff]  ;;  %v5575_v41 = vld [vmem:[#allocation2 + $0xc0] sm:$0xff] }
 0x85b   :  { %v5551_v33 = vpop.permute.xlu0 %5550  ;;  %5568 = vst.msk [vmem:[#allocation2 + $0xf0] sm:$0xff] %vm5562_vm7, %v5549_v16  ;;  %v5579_v53 = vpack.c.bf16 %v5572_v22, %v5571_v5 }
 0x85c   :  { %5569 = vst.msk [vmem:[#allocation2 + $0x120] sm:$0xff] %vm5562_vm7, %v5551_v33 }
 0x85d   :  { %9185 = vmatprep.mubr.msk.bf16.mxu1 %vm5607_vm2, %v5579_v53 }
 0x85e   :  { %v5553_v32 = vpop.permute.xlu1 %5552  ;;  %v5574_v12 = vld [vmem:[#allocation2 + $0x90] sm:$0xff] }
 0x85f   :  { %5570 = vst.msk [vmem:[#allocation2 + $0x150] sm:$0xff] %vm5562_vm7, %v5553_v32  ;;  %v5580_v60 = vpack.c.bf16 %v5574_v12, %v5573_v3 }
 0x861   :  { %9186 = vmatmul.mubr.msk.bf16.vlgmr.msra.gmra.mrb[112].mxu1 %vm5607_vm2, %v5580_v60 }
 0x862   :  { %v5576_v2 = vld [vmem:[#allocation2 + $0xf0] sm:$0xff]  ;;  %9194 = vmatpush3.bf16.msra.mxu1 %v9544_v11 }
 0x863   :  { %v5581_v0 = vpack.c.bf16 %v5576_v2, %v5575_v41  ;;  %v5577_v4 = vld [vmem:[#allocation2 + $0x120] sm:$0xff] }
 0x865   :  { %9189 = vmatprep.mubr.msk.bf16.mxu1 %vm5607_vm2, %v5581_v0 }
 0x866   :  { %v5578_v9 = vld [vmem:[#allocation2 + $0x150] sm:$0xff] }
 0x867   :  { %v5582_v52 = vpack.c.bf16 %v5578_v9, %v5577_v4 }
 0x869   :  { %9190 = vmatmul.mubr.msk.bf16.gmra.mrb[116].mxu1 %vm5607_vm2, %v5582_v52 }
 0x934   :  { %v12214_v35 = vpop.f32.mrb[112].mxu1 }
 0x935   :  { %v12216_v63 = vpop.f32.mrb[113].mxu1  ;;  %v5709_v43 = vmul.f32 %v12214_v35, %v12214_v35  ;;  %v5688_v36 = vsel %vm5321_vm9, %v12214_v35, 0.0 }
 0x936   :  { %v5707_v54 = vmul.f32 %v12216_v63, %v12216_v63  ;;  %v12220_v28 = vpop.f32.mrb[114].mxu1  ;;  %v5685_v13 = vsel %vm5321_vm9, %v12216_v63, 0.0 }
 0x937   :  { %v12222_v8 = vpop.f32.mrb[115].mxu1  ;;  %v5710_v62 = vmul.f32 %v12220_v28, %v12220_v28  ;;  %v5718_v50 = vsel %vm5321_vm9, %v5709_v43, 0.0  ;;  %v5690_v57 = vsel %vm5321_vm9, %v12220_v28, 0.0 }
 0x938   :  { %v5686_v21 = vsel %vm5321_vm9, %v12222_v8, 0.0  ;;  %v5708_v59 = vmul.f32 %v12222_v8, %v12222_v8  ;;  %v5715_v25 = vsel %vm5321_vm9, %v5707_v54, 0.0 }
 0x939   :  { %v5687_v39 = vadd.f32 %v5686_v21, %v5685_v13  ;;  %v5720_v30 = vsel %vm5321_vm9, %v5710_v62, 0.0 }
 0x93a   :  { %v5716_v1 = vsel %vm5321_vm9, %v5708_v59, 0.0 }
 0x93b   :  { %v5689_v18 = vadd.f32 %v5688_v36, %v5687_v39  ;;  %v5717_v61 = vadd.f32 %v5716_v1, %v5715_v25 }
 0x93c   :  { %v9191_v6 = vpop.f32.mrb[116].mxu1 }
 0x93d   :  { %v5719_v34 = vadd.f32 %v5718_v50, %v5717_v61  ;;  %v5670_v42 = vpop.f32.mrb[117].mxu1  ;;  %v5691_v14 = vadd.f32 %v5690_v57, %v5689_v18  ;;  %v5713_v51 = vmul.f32 %v9191_v6, %v9191_v6  ;;  %v5696_v56 = vsel %vm5321_vm9, %v9191_v6, 0.0  ;;  %v5742_v18 = vld [vmem:[#allocation25] sm:$0x1]  ;;  %v5746_v57 = vld [vmem:[#allocation27] sm:$0x1] }
 0x93e   :  { %v5692_v20 = vsel %vm5321_vm9, %v5670_v42, 0.0  ;;  %v5711_v40 = vmul.f32 %v5670_v42, %v5670_v42  ;;  %v9192_v19 = vpop.f32.mrb[118].mxu1 }
 0x93f   :  { %v5693_v27 = vadd.f32 %v5692_v20, %v5691_v14  ;;  %v5721_v48 = vadd.f32 %v5720_v30, %v5719_v34  ;;  %v5673_v7 = vpop.f32.mrb[119].mxu1  ;;  %v5714_v44 = vmul.f32 %v9192_v19, %v9192_v19  ;;  %v5726_v5 = vsel %vm5321_vm9, %v5713_v51, 0.0 }
 0x940   :  { %v5722_v49 = vsel %vm5321_vm9, %v5711_v40, 0.0  ;;  %v5694_v47 = vsel %vm5321_vm9, %v5673_v7, 0.0  ;;  %v5712_v55 = vmul.f32 %v5673_v7, %v5673_v7  ;;  %v5698_v22 = vsel %vm5321_vm9, %v9192_v19, 0.0 }
 0x941   :  { %v5723_v10 = vadd.f32 %v5722_v49, %v5721_v48  ;;  %v5695_v17 = vadd.f32 %v5694_v47, %v5693_v27  ;;  %v5728_v3 = vsel %vm5321_vm9, %v5714_v44, 0.0 }
 0x942   :  { %v5724_v24 = vsel %vm5321_vm9, %v5712_v55, 0.0 }
 0x943   :  { %v5697_v16 = vadd.f32 %v5696_v56, %v5695_v17  ;;  %v5725_v33 = vadd.f32 %v5724_v24, %v5723_v10 }
 0x945   :  { %v5699_v53 = vadd.f32 %v5698_v22, %v5697_v16  ;;  %v5727_v32 = vadd.f32 %v5726_v5, %v5725_v33 }
 0x947   :  { %v5700_v12 = vrot.slane %v5699_v53, 4  ;;  %v5729_v60 = vadd.f32 %v5728_v3, %v5727_v32 }
 0x949   :  { %v5701_v41 = vadd.f32 %v5700_v12, %v5699_v53  ;;  %v5730_v2 = vrot.slane %v5729_v60, 4 }
 0x94b   :  { %v5702_v0 = vrot.slane %v5701_v41, 2  ;;  %v5731_v4 = vadd.f32 %v5730_v2, %v5729_v60 }
 0x94d   :  { %v5703_v9 = vadd.f32 %v5702_v0, %v5701_v41  ;;  %v5732_v52 = vrot.slane %v5731_v4, 2 }
 0x94f   :  { %v5704_v11 = vrot.slane %v5703_v9, 1  ;;  %v5733_v54 = vadd.f32 %v5732_v52, %v5731_v4  ;;  %v9545_v4 = vld [vmem:[#allocation28 + $0x8] sm:$0xff]  }
 0x950   :  { %9195 = vmatprep.subr.bf16.mxu1 %v9545_v4 }
 0x951   :  { %v5705_v43 = vadd.f32 %v5704_v11, %v5703_v9  ;;  %v5734_v13 = vrot.slane %v5733_v54, 1  ;;  %9196 = vmatpush3.bf16.msra.mxu1 %v9545_v4 }
 0x953   :  { %v5735_v21 = vadd.f32 %v5734_v13, %v5733_v54  ;;  %v5737_v59 = vmul.f32 0.015625, %v5705_v43 }
 0x955   :  { %v5738_v39 = vmul.f32 0.015625, %v5735_v21  ;;  %v5739_v36 = vmul.f32 %v5737_v59, %v5737_v59 }
 0x957   :  { %v5740_v25 = vsub.f32 %v5738_v39, %v5739_v36 }
 0x959   :  { %v5741_v62 = vmax.f32 %v5740_v25, 0.0 }
 0x95b   :  { %v5743_v1 = vadd.f32 1e-05, %v5741_v62 }
 0x95d   :  { %9584 = vrsqrt.f32 %v5743_v1 }
 0x967   :  { %v9585_v61 = vpop.eup %9584 }
 0x968   :  { %v5745_v50 = vmul.f32 %v9585_v61, %v5742_v18 }
 0x96a   :  { %v5747_v34 = vmul.f32 %v5745_v50, %v5737_v59  ;;  %v5753_v14 = vrot.slane %v5745_v50, %v13389_v46 }
 0x96c   :  { %v5748_v30 = vsub.f32 %v5746_v57, %v5747_v34  ;;  %v5755_v20 = vmul.f32 %v5753_v14, %v12216_v63  ;;  %v5760_v40 = vmul.f32 %v5753_v14, %v5673_v7  ;;  %v5756_v27 = vmul.f32 %v5753_v14, %v12222_v8 }
 0x96d   :  { %v5757_v48 = vmul.f32 %v12214_v35, %v5753_v14  ;;  %v5758_v51 = vmul.f32 %v12220_v28, %v5753_v14  ;;  %v5759_v49 = vmul.f32 %v5753_v14, %v5670_v42  ;;  %v5761_v47 = vmul.f32 %v9191_v6, %v5753_v14 }
 0x96e   :  { %v5767_v55 = vrot.slane %v5748_v30, %v13389_v46  ;;  %v5762_v10 = vmul.f32 %v9192_v19, %v5753_v14 }
 0x970   :  { %v5769_v17 = vadd.f32 %v5767_v55, %v5755_v20  ;;  %v5774_v56 = vadd.f32 %v5767_v55, %v5760_v40  ;;  %v5770_v44 = vadd.f32 %v5767_v55, %v5756_v27  ;;  %v5771_v24 = vadd.f32 %v5767_v55, %v5757_v48  ;;  %v5817_v48 = vld [vmem:[#allocation3 + $0x80] sm:$0x1] }
 0x971   :  { %v5772_v16 = vadd.f32 %v5767_v55, %v5758_v51  ;;  %v5773_v33 = vadd.f32 %v5767_v55, %v5759_v49  ;;  %v5775_v5 = vadd.f32 %v5767_v55, %v5761_v47  ;;  %v5776_v63 = vadd.f32 %v5767_v55, %v5762_v10 }
 0x972   :  { %vm5777_vm7 = vcmp.ge.f32.partialorder %v5769_v17, 0.0  ;;  %vm5782_vm2 = vcmp.ge.f32.partialorder %v5774_v56, 0.0  ;;  %v5785_v8 = vmul.f32 0.01, %v5769_v17  ;;  %v5790_v7 = vmul.f32 0.01, %v5774_v56 }
 0x973   :  { %vm5778_vm12 = vcmp.ge.f32.partialorder %v5770_v44, 0.0  ;;  %vm5779_vm0 = vcmp.ge.f32.partialorder %v5771_v24, 0.0  ;;  %v5786_v35 = vmul.f32 0.01, %v5770_v44  ;;  %v5787_v28 = vmul.f32 0.01, %v5771_v24 }
 0x974   :  { %v5793_v6 = vsel %vm5777_vm7, %v5769_v17, %v5785_v8  ;;  %v5798_v42 = vsel %vm5782_vm2, %v5774_v56, %v5790_v7  ;;  %vm5780_vm1 = vcmp.ge.f32.partialorder %v5772_v16, 0.0  ;;  %vm5781_vm3 = vcmp.ge.f32.partialorder %v5773_v33, 0.0 }
 0x975   :  { %5806 = vst.msk [vmem:[#allocation3 + $0x50] sm:$0xff] %vm5321_vm9, %v5798_v42  ;;  %5801 = vst.msk [vmem:[#allocation3] sm:$0xff] %vm5321_vm9, %v5793_v6  ;;  %v5794_v19 = vsel %vm5778_vm12, %v5770_v44, %v5786_v35  ;;  %v5795_v22 = vsel %vm5779_vm0, %v5771_v24, %v5787_v28  ;;  %v5788_v53 = vmul.f32 0.01, %v5772_v16  ;;  %v5789_v32 = vmul.f32 0.01, %v5773_v33 }
 0x976   :  { %5860 = vst.msk [vmem:[#allocation2] sm:$0xff] %vm5321_vm9, %v5793_v6  ;;  %5865 = vst.msk [vmem:[#allocation2 + $0xf0] sm:$0xff] %vm5321_vm9, %v5798_v42  ;;  %vm5783_vm7 = vcmp.ge.f32.partialorder %v5775_v5, 0.0  ;;  %v5791_v3 = vmul.f32 0.01, %v5775_v5  ;;  %vm5784_vm2 = vcmp.ge.f32.partialorder %v5776_v63, 0.0 }
 0x977   :  { %5802 = vst.msk [vmem:[#allocation3 + $0x10] sm:$0xff] %vm5321_vm9, %v5794_v19  ;;  %5803 = vst.msk [vmem:[#allocation3 + $0x20] sm:$0xff] %vm5321_vm9, %v5795_v22  ;;  %v5792_v12 = vmul.f32 0.01, %v5776_v63  ;;  %v5796_v60 = vsel %vm5780_vm1, %v5772_v16, %v5788_v53  ;;  %v5797_v41 = vsel %vm5781_vm3, %v5773_v33, %v5789_v32  ;;  %v5842_v55 = vrot.slane %v5817_v48, 1 }
 0x978   :  { %5861 = vst.msk [vmem:[#allocation2 + $0x30] sm:$0xff] %vm5321_vm9, %v5794_v19  ;;  %5862 = vst.msk [vmem:[#allocation2 + $0x60] sm:$0xff] %vm5321_vm9, %v5795_v22  ;;  %v5799_v2 = vsel %vm5783_vm7, %v5775_v5, %v5791_v3  ;;  %vm13431_vm0 = vcmask 261248  }
 0x979   :  { %5804 = vst.msk [vmem:[#allocation3 + $0x30] sm:$0xff] %vm5321_vm9, %v5796_v60  ;;  %5805 = vst.msk [vmem:[#allocation3 + $0x40] sm:$0xff] %vm5321_vm9, %v5797_v41  ;;  %v5800_v0 = vsel %vm5784_vm2, %v5776_v63, %v5792_v12  ;;  %vm13437_vm2 = vcmask 261120  }
 0x97a   :  { %5863 = vst.msk [vmem:[#allocation2 + $0x90] sm:$0xff] %vm5321_vm9, %v5796_v60  ;;  %5864 = vst.msk [vmem:[#allocation2 + $0xc0] sm:$0xff] %vm5321_vm9, %v5797_v41 }
 0x97b   :  { %5807 = vst.msk [vmem:[#allocation3 + $0x60] sm:$0xff] %vm5321_vm9, %v5799_v2  ;;  %5866 = vst.msk [vmem:[#allocation2 + $0x120] sm:$0xff] %vm5321_vm9, %v5799_v2 }
 0x97c   :  { %5808 = vst.msk [vmem:[#allocation3 + $0x70] sm:$0xff] %vm5321_vm9, %v5800_v0  ;;  %5867 = vst.msk [vmem:[#allocation2 + $0x150] sm:$0xff] %vm5321_vm9, %v5800_v0  ;;  %v5809_v9 = vld [vmem:[#allocation3] sm:$0xfe]  ;;  %v5814_v39 = vld [vmem:[#allocation3 + $0x50] sm:$0xff] }
 0x97d   :  { %v5827_v54 = vrot.slane %v5809_v9, 1  ;;  %v5836_v14 = vrot.slane %v5814_v39, 1  ;;  %vm13432_vm12 = vmmov %vm13431_vm0 }
 0x97e   :  { %v5810_v52 = vld [vmem:[#allocation3 + $0x10] sm:$0xff]  ;;  %v5811_v11 = vld [vmem:[#allocation3 + $0x20] sm:$0xff]  ;;  %vm13433_vm1 = vmmov %vm13431_vm0 }
 0x97f   :  { %v5828_v43 = vrot.slane %v5810_v52, 1  ;;  %v5830_v13 = vrot.slane %v5811_v11, 1  ;;  %vm13434_vm9 = vmmov %vm13431_vm0 }
 0x980   :  { %v5812_v21 = vld [vmem:[#allocation3 + $0x30] sm:$0xff]  ;;  %v5813_v59 = vld [vmem:[#allocation3 + $0x40] sm:$0xff]  ;;  %vm13435_vm3 = vmmov %vm13431_vm0 }
 0x981   :  { %v5831_v36 = vsel %vm5447_vm10, %v5828_v43, %v5830_v13  ;;  %v5829_v25 = vsel %vm5447_vm10, %v5827_v54, %v5828_v43  ;;  %v5832_v62 = vrot.slane %v5812_v21, 1  ;;  %v5834_v1 = vrot.slane %v5813_v59, 1  ;;  %vm13436_vm7 = vmmov %vm13431_vm0 }
 0x982   :  { %v5815_v18 = vld [vmem:[#allocation3 + $0x60] sm:$0xff]  ;;  %v5853_v61 = vsel %vm5431_vm5, %v5831_v36, 0.0  ;;  %v5852_v50 = vsel %vm5430_vm8, %v5829_v25, 0.0 }
 0x983   :  { %5878 = vrot.lane.b32.xlu1 %v5853_v61, %s10213_s29  ;;  %5876 = vrot.lane.b32.xlu0 %v5852_v50, %s10213_s29  ;;  %v5835_v57 = vsel %vm5447_vm10, %v5832_v62, %v5834_v1  ;;  %v5833_v34 = vsel %vm5447_vm10, %v5830_v13, %v5832_v62  ;;  %v5838_v30 = vrot.slane %v5815_v18, 1  ;;  %v5816_v20 = vld [vmem:[#allocation3 + $0x70] sm:$0xff]  ;;  %v5837_v49 = vsel %vm5447_vm10, %v5834_v1, %v5836_v14 }
 0x984   :  { %v5855_v40 = vsel %vm13313_vm4, %v5835_v57, 0.0  ;;  %v5854_v27 = vsel %vm13312_vm15, %v5833_v34, 0.0  ;;  %v5840_v47 = vrot.slane %v5816_v20, 1  ;;  %v5856_v17 = vsel %vm13310_vm6, %v5837_v49, 0.0 }
 0x985   :  { %v5839_v51 = vsel %vm5447_vm10, %v5836_v14, %v5838_v30 }
 0x986   :  { %v5857_v10 = vsel %vm13311_vm11, %v5839_v51, 0.0  ;;  %v5843_v56 = vsel %vm5447_vm10, %v5840_v47, %v5842_v55  ;;  %v5841_v44 = vsel %vm5447_vm10, %v5838_v30, %v5840_v47 }
 0x987   :  { %5882 = vrot.lane.b32.xlu1 %v5855_v40, %s10213_s29  ;;  %5880 = vrot.lane.b32.xlu0 %v5854_v27, %s10213_s29  ;;  %v5859_v24 = vsel %vm13308_vm13, %v5843_v56, 0.0  ;;  %v5858_v16 = vsel %vm13307_vm14, %v5841_v44, 0.0  ;;  %vm13456_vm14 = vcmask 261120  }
 0x988   :  { %vm13457_vm13 = vmmov %vm13456_vm14 }
 0x989   :  { %vm13458_vm6 = vmmov %vm13457_vm13 }
 0x98a   :  { %vm13459_vm11 = vmmov %vm13458_vm6 }
 0x98b   :  { %5886 = vrot.lane.b32.xlu1 %v5857_v10, %s10213_s29  ;;  %5884 = vrot.lane.b32.xlu0 %v5856_v17, %s10213_s29  ;;  %vm13460_vm15 = vmmov %vm13458_vm6 }
 0x98c   :  { %vm13461_vm4 = vmmov %vm13458_vm6 }
 0x98f   :  { %5890 = vrot.lane.b32.xlu1 %v5859_v24, %s10213_s29  ;;  %5888 = vrot.lane.b32.xlu0 %v5858_v16, %s10213_s29  ;;  %s10228_s29 = smov 96  }
 0x9f5   :  { %v5879_v33 = vpop.permute.xlu1 %5878  ;;  %v5877_v5 = vpop.permute.xlu0 %5876 }
 0x9f6   :  { %5901 = vst.msk [vmem:[#allocation2 + $0x30] sm:$0xff] %vm13431_vm0, %v5879_v33 }
 0x9f7   :  { %5900 = vst.msk [vmem:[#allocation2] sm:$0xff] %vm13432_vm12, %v5877_v5  ;;  %vm13438_vm12 = vmmov %vm13431_vm0 }
 0x9f9   :  { %v5883_v63 = vpop.permute.xlu1 %5882  ;;  %v5881_v8 = vpop.permute.xlu0 %5880 }
 0x9fa   :  { %5903 = vst.msk [vmem:[#allocation2 + $0x90] sm:$0xff] %vm13433_vm1, %v5883_v63  ;;  %vm13439_vm1 = vmmov %vm13437_vm2 }
 0x9fb   :  { %5902 = vst.msk [vmem:[#allocation2 + $0x60] sm:$0xff] %vm13434_vm9, %v5881_v8  ;;  %vm13440_vm9 = vmmov %vm13439_vm1 }
 0x9fd   :  { %v5887_v7 = vpop.permute.xlu1 %5886  ;;  %v5885_v35 = vpop.permute.xlu0 %5884  ;;  %v5909_v6 = vld [vmem:[#allocation2 + $0x30] sm:$0xff] }
 0x9fe   :  { %v5908_v28 = vld [vmem:[#allocation2] sm:$0xff]  ;;  %5905 = vst.msk [vmem:[#allocation2 + $0xf0] sm:$0xff] %vm13435_vm3, %v5887_v7  ;;  %vm13441_vm3 = vmmov %vm13439_vm1 }
 0x9ff   :  { %5904 = vst.msk [vmem:[#allocation2 + $0xc0] sm:$0xff] %vm13436_vm7, %v5885_v35  ;;  %v5916_v42 = vpack.c.bf16 %v5909_v6, %v5908_v28  ;;  %vm13309_vm7 = vcmask 523520  }
 0xa01   :  { %9197 = vmatprep.mubr.msk.bf16.mxu1 %vm13437_vm2, %v5916_v42  ;;  %v5891_v19 = vpop.permute.xlu1 %5890  ;;  %v5889_v22 = vpop.permute.xlu0 %5888  ;;  %v5911_v32 = vld [vmem:[#allocation2 + $0x90] sm:$0xff]  ;;  %vm13442_vm2 = vmmov %vm13439_vm1 }
 0xa02   :  { %v5910_v53 = vld [vmem:[#allocation2 + $0x60] sm:$0xff]  ;;  %5907 = vst.msk [vmem:[#allocation2 + $0x150] sm:$0xff] %vm13431_vm0, %v5891_v19  ;;  %vm13443_vm0 = vmmov %vm13439_vm1 }
 0xa03   :  { %5906 = vst.msk [vmem:[#allocation2 + $0x120] sm:$0xff] %vm13438_vm12, %v5889_v22  ;;  %v5917_v3 = vpack.c.bf16 %v5911_v32, %v5910_v53  ;;  %vm13444_vm12 = vmmov %vm13443_vm0 }
 0xa05   :  { %9198 = vmatmul.mubr.msk.bf16.vlgmr.msra.gmra.mrb[120].mxu1 %vm13439_vm1, %v5917_v3  ;;  %v5913_v60 = vld [vmem:[#allocation2 + $0xf0] sm:$0xff]  ;;  %vm13445_vm1 = vmmov %vm13443_vm0 }
 0xa06   :  { %v5912_v12 = vld [vmem:[#allocation2 + $0xc0] sm:$0xff] }
 0xa07   :  { %v5918_v41 = vpack.c.bf16 %v5913_v60, %v5912_v12 }
 0xa09   :  { %9201 = vmatprep.mubr.msk.bf16.mxu1 %vm13440_vm9, %v5918_v41  ;;  %v5915_v0 = vld [vmem:[#allocation2 + $0x150] sm:$0xff]  ;;  %vm13446_vm9 = vmmov %vm13443_vm0 }
 0xa0a   :  { %v5914_v2 = vld [vmem:[#allocation2 + $0x120] sm:$0xff] }
 0xa0b   :  { %v5919_v4 = vpack.c.bf16 %v5915_v0, %v5914_v2 }
 0xa0d   :  { %9202 = vmatmul.mubr.msk.bf16.gmra.mrb[124].mxu1 %vm13441_vm3, %v5919_v4  ;;  %vm13447_vm3 = vmmov %vm13443_vm0 }
 0xad8   :  { %v12318_v9 = vpop.f32.mrb[120].mxu1 }
 0xad9   :  { %v12320_v52 = vpop.f32.mrb[121].mxu1  ;;  %v6016_v13 = vsel %vm13442_vm2, %v12318_v9, 0.0  ;;  %v6064_v21 = vmul.f32 %v12318_v9, %v12318_v9  ;;  %v6039_v18 = vsel %vm13309_vm7, %v12318_v9, 0.0  ;;  %vm13448_vm2 = vmmov %vm13443_vm0 }
 0xada   :  { %v6062_v11 = vmul.f32 %v12320_v52, %v12320_v52  ;;  %v12324_v54 = vpop.f32.mrb[122].mxu1  ;;  %v6013_v59 = vsel %vm13443_vm0, %v12320_v52, 0.0  ;;  %v6036_v36 = vsel %vm13309_vm7, %v12320_v52, 0.0 }
 0xadb   :  { %v12326_v43 = vpop.f32.mrb[123].mxu1  ;;  %v6065_v34 = vmul.f32 %v12324_v54, %v12324_v54  ;;  %v6018_v40 = vsel %vm13447_vm3, %v12324_v54, 0.0  ;;  %v6073_v47 = vsel %vm13448_vm2, %v6064_v21, 0.0  ;;  %v6095_v55 = vsel %vm13309_vm7, %v6064_v21, 0.0  ;;  %vm13452_vm3 = vmmov %vm13443_vm0 }
 0xadc   :  { %v6014_v39 = vsel %vm13444_vm12, %v12326_v43, 0.0  ;;  %v6037_v62 = vsel %vm13309_vm7, %v12326_v43, 0.0  ;;  %v6063_v1 = vmul.f32 %v12326_v43, %v12326_v43  ;;  %v6070_v61 = vsel %vm13445_vm1, %v6062_v11, 0.0  ;;  %vm13449_vm12 = vmmov %vm13443_vm0 }
 0xadd   :  { %v6015_v25 = vadd.f32 %v6014_v39, %v6013_v59  ;;  %v6092_v50 = vsel %vm13309_vm7, %v6062_v11, 0.0  ;;  %v6038_v57 = vadd.f32 %v6037_v62, %v6036_v36  ;;  %v6041_v10 = vsel %vm13309_vm7, %v12324_v54, 0.0  ;;  %vm13450_vm1 = vmmov %vm13443_vm0 }
 0xade   :  { %v6071_v30 = vsel %vm13446_vm9, %v6063_v1, 0.0  ;;  %v6093_v20 = vsel %vm13309_vm7, %v6063_v1, 0.0  ;;  %v6075_v63 = vsel %vm13449_vm12, %v6065_v34, 0.0  ;;  %v6097_v8 = vsel %vm13309_vm7, %v6065_v34, 0.0  ;;  %vm13451_vm9 = vmmov %vm13443_vm0 }
 0xadf   :  { %v6017_v14 = vadd.f32 %v6016_v13, %v6015_v25  ;;  %v6040_v27 = vadd.f32 %v6039_v18, %v6038_v57  ;;  %v6072_v48 = vadd.f32 %v6071_v30, %v6070_v61  ;;  %v6094_v51 = vadd.f32 %v6093_v20, %v6092_v50  ;;  %vm13453_vm2 = vmmov %vm13443_vm0 }
 0xae0   :  { %v12352_v49 = vpop.f32.mrb[124].mxu1  ;;  %vm13454_vm12 = vmmov %vm13443_vm0 }
 0xae1   :  { %v12358_v17 = vpop.f32.mrb[125].mxu1  ;;  %v6019_v56 = vadd.f32 %v6018_v40, %v6017_v14  ;;  %v6074_v44 = vadd.f32 %v6073_v47, %v6072_v48  ;;  %v6096_v24 = vadd.f32 %v6095_v55, %v6094_v51  ;;  %v6042_v33 = vadd.f32 %v6041_v10, %v6040_v27 }
 0xae2   :  { %v6020_v16 = vsel %vm13443_vm0, %v12358_v17, 0.0  ;;  %v12362_v5 = vpop.f32.mrb[126].mxu1  ;;  %v6043_v35 = vsel %vm13309_vm7, %v12358_v17, 0.0  ;;  %v6066_v42 = vmul.f32 %v12358_v17, %v12358_v17  ;;  %v6024_v41 = vsel %vm13452_vm3, %v12352_v49, 0.0 }
 0xae3   :  { %v6021_v7 = vadd.f32 %v6020_v16, %v6019_v56  ;;  %v12368_v28 = vpop.f32.mrb[127].mxu1  ;;  %v6044_v6 = vadd.f32 %v6043_v35, %v6042_v33  ;;  %v6076_v19 = vadd.f32 %v6075_v63, %v6074_v44  ;;  %v6098_v22 = vadd.f32 %v6097_v8, %v6096_v24 }
 0xae4   :  { %v6022_v53 = vsel %vm13450_vm1, %v12368_v28, 0.0  ;;  %v6077_v32 = vsel %vm13451_vm9, %v6066_v42, 0.0  ;;  %v6099_v3 = vsel %vm13309_vm7, %v6066_v42, 0.0  ;;  %v6045_v60 = vsel %vm13309_vm7, %v12368_v28, 0.0  ;;  %vm13455_vm1 = vmmov %vm13443_vm0 }
 0xae5   :  { %v6023_v12 = vadd.f32 %v6022_v53, %v6021_v7  ;;  %v6078_v2 = vadd.f32 %v6077_v32, %v6076_v19  ;;  %v6100_v0 = vadd.f32 %v6099_v3, %v6098_v22  ;;  %v6046_v4 = vadd.f32 %v6045_v60, %v6044_v6 }
 0xae6   :  { %v6047_v11 = vsel %vm13309_vm7, %v12352_v49, 0.0  ;;  %v6068_v13 = vmul.f32 %v12352_v49, %v12352_v49  ;;  %v6067_v21 = vmul.f32 %v12368_v28, %v12368_v28  ;;  %v6026_v39 = vsel %vm13453_vm2, %v12362_v5, 0.0 }
 0xae7   :  { %v6025_v59 = vadd.f32 %v6024_v41, %v6023_v12  ;;  %v6049_v36 = vsel %vm13309_vm7, %v12362_v5, 0.0  ;;  %v6048_v25 = vadd.f32 %v6047_v11, %v6046_v4  ;;  %v6069_v62 = vmul.f32 %v12362_v5, %v12362_v5 }
 0xae8   :  { %v6079_v1 = vsel %vm13443_vm0, %v6067_v21, 0.0  ;;  %v6101_v18 = vsel %vm13309_vm7, %v6067_v21, 0.0  ;;  %v6081_v14 = vsel %vm13454_vm12, %v6068_v13, 0.0  ;;  %v6103_v30 = vsel %vm13309_vm7, %v6068_v13, 0.0 }
 0xae9   :  { %v6027_v61 = vadd.f32 %v6026_v39, %v6025_v59  ;;  %v6080_v50 = vadd.f32 %v6079_v1, %v6078_v2  ;;  %v6102_v57 = vadd.f32 %v6101_v18, %v6100_v0  ;;  %v6050_v34 = vadd.f32 %v6049_v36, %v6048_v25 }
 0xaea   :  { %v6105_v48 = vsel %vm13309_vm7, %v6069_v62, 0.0  ;;  %v6083_v51 = vsel %vm13455_vm1, %v6069_v62, 0.0 }
 0xaeb   :  { %v6051_v20 = vrot.slane %v6050_v34, 4  ;;  %v6104_v40 = vadd.f32 %v6103_v30, %v6102_v57  ;;  %v6082_v27 = vadd.f32 %v6081_v14, %v6080_v50  ;;  %v6028_v42 = vrot.slane %v6027_v61, 4  ;;  %v9547_v50 = vld [vmem:[#allocation33 + $0x8] sm:$0xff]   ;;  %v6123_v57 = vld [vmem:[#allocation30] sm:$0x1]  ;;  %v9548_v30 = vld [vmem:[#allocation33 + $0x10] sm:$0xff]  }
 0xaed   :  { %v6052_v47 = vadd.f32 %v6051_v20, %v6050_v34  ;;  %v6106_v55 = vadd.f32 %v6105_v48, %v6104_v40  ;;  %v6084_v10 = vadd.f32 %v6083_v51, %v6082_v27  ;;  %v6029_v19 = vadd.f32 %v6028_v42, %v6027_v61  ;;  %v9546_v61 = vld [vmem:[#allocation33] sm:$0xff]   ;;  %v6127_v20 = vld [vmem:[#allocation31] sm:$0x1] }
 0xaee   :  { %9205 = vmatprep.subr.bf16.mxu1 %v9546_v61 }
 0xaef   :  { %v6053_v56 = vrot.slane %v6052_v47, 2  ;;  %v6107_v44 = vrot.slane %v6106_v55, 4  ;;  %v6085_v22 = vrot.slane %v6084_v10, 4  ;;  %v6030_v53 = vrot.slane %v6029_v19, 2  ;;  %9206 = vmatpush3.bf16.msra.mxu1 %v9546_v61 }
 0xaf0   :  { %9207 = vmatprep.subr.bf16.mxu1 %v9547_v50 }
 0xaf1   :  { %v6054_v24 = vadd.f32 %v6053_v56, %v6052_v47  ;;  %v6108_v16 = vadd.f32 %v6107_v44, %v6106_v55  ;;  %v6086_v32 = vadd.f32 %v6085_v22, %v6084_v10  ;;  %v6031_v3 = vadd.f32 %v6030_v53, %v6029_v19  ;;  %v9549_v10 = vld [vmem:[#allocation33 + $0x18] sm:$0xff]  }
 0xaf3   :  { %v6055_v33 = vrot.slane %v6054_v24, 1  ;;  %v6109_v63 = vrot.slane %v6108_v16, 2  ;;  %v6087_v12 = vrot.slane %v6086_v32, 2  ;;  %v6032_v60 = vrot.slane %v6031_v3, 1  ;;  %9208 = vmatpush3.bf16.msra.mxu1 %v9547_v50 }
 0xaf4   :  { %9209 = vmatprep.subr.bf16.mxu1 %v9548_v30 }
 0xaf5   :  { %v6056_v8 = vadd.f32 %v6055_v33, %v6054_v24  ;;  %v6110_v7 = vadd.f32 %v6109_v63, %v6108_v16  ;;  %v6088_v41 = vadd.f32 %v6087_v12, %v6086_v32  ;;  %v6033_v2 = vadd.f32 %v6032_v60, %v6031_v3 }
 0xaf7   :  { %6058 = vrot.lane.b32.xlu0 %v6056_v8, %s10228_s29  ;;  %v6111_v35 = vrot.slane %v6110_v7, 1  ;;  %v6089_v0 = vrot.slane %v6088_v41, 1  ;;  %9210 = vmatpush3.bf16.msra.mxu1 %v9548_v30 }
 0xaf8   :  { %9211 = vmatprep.subr.bf16.mxu1 %v9549_v10 }
 0xaf9   :  { %v6112_v6 = vadd.f32 %v6111_v35, %v6110_v7  ;;  %v6090_v21 = vadd.f32 %v6089_v0, %v6088_v41 }
 0xafb   :  { %6114 = vrot.lane.b32.xlu1 %v6112_v6, %s10228_s29  ;;  %9212 = vmatpush3.bf16.msra.mxu1 %v9549_v10 }
 0xb69   :  { %v6059_v4 = vpop.permute.xlu0 %6058 }
 0xb6a   :  { %v6061_v11 = vadd.f32 %v6059_v4, %v6033_v2 }
 0xb6c   :  { %v6118_v13 = vmul.f32 0.0078125, %v6061_v11 }
 0xb6d   :  { %v6115_v59 = vpop.permute.xlu1 %6114 }
 0xb6e   :  { %v6120_v39 = vmul.f32 %v6118_v13, %v6118_v13  ;;  %v6117_v36 = vadd.f32 %v6115_v59, %v6090_v21 }
 0xb70   :  { %v6119_v25 = vmul.f32 0.0078125, %v6117_v36 }
 0xb72   :  { %v6121_v62 = vsub.f32 %v6119_v25, %v6120_v39 }
 0xb74   :  { %v6122_v1 = vmax.f32 %v6121_v62, 0.0 }
 0xb76   :  { %v6124_v18 = vadd.f32 1e-05, %v6122_v1 }
 0xb78   :  { %9586 = vrsqrt.f32 %v6124_v18  ;;  %v12432_v18 = vld [vmem:[#allocation33] sm:$0xff]  }
 0xb79   :  { %9221 = vmatprep.subr.bf16.mxu1 %v12432_v18 }
 0xb82   :  { %v9587_v34 = vpop.eup %9586 }
 0xb83   :  { %v6126_v14 = vmul.f32 %v9587_v34, %v6123_v57 }
 0xb85   :  { %v6128_v40 = vmul.f32 %v6126_v14, %v6118_v13  ;;  %v6134_v27 = vrot.slane %v6126_v14, %v13389_v46 }
 0xb87   :  { %v6129_v48 = vsub.f32 %v6127_v20, %v6128_v40  ;;  %v6136_v51 = vmul.f32 %v6134_v27, %v12320_v52  ;;  %6182 = vrot.lane.b32.xlu0 %v6134_v27, %s10227_s9  ;;  %v6137_v47 = vmul.f32 %v6134_v27, %v12326_v43  ;;  %v6138_v55 = vmul.f32 %v12318_v9, %v6134_v27 }
 0xb88   :  { %v6139_v56 = vmul.f32 %v12324_v54, %v6134_v27  ;;  %v6140_v44 = vmul.f32 %v6134_v27, %v12358_v17  ;;  %v6141_v24 = vmul.f32 %v6134_v27, %v12368_v28  ;;  %v6142_v16 = vmul.f32 %v12352_v49, %v6134_v27 }
 0xb89   :  { %v6148_v33 = vrot.slane %v6129_v48, %v13389_v46  ;;  %v6143_v63 = vmul.f32 %v12362_v5, %v6134_v27 }
 0xb8b   :  { %v6150_v8 = vadd.f32 %v6148_v33, %v6136_v51  ;;  %6193 = vrot.lane.b32.xlu1 %v6148_v33, %s10227_s9  ;;  %v6151_v7 = vadd.f32 %v6148_v33, %v6137_v47  ;;  %v6152_v35 = vadd.f32 %v6148_v33, %v6138_v55  ;;  %v6153_v6 = vadd.f32 %v6148_v33, %v6139_v56 }
 0xb8c   :  { %v6154_v42 = vadd.f32 %v6148_v33, %v6140_v44  ;;  %v6155_v19 = vadd.f32 %v6148_v33, %v6141_v24  ;;  %v6156_v22 = vadd.f32 %v6148_v33, %v6142_v16  ;;  %v6157_v53 = vadd.f32 %v6148_v33, %v6143_v63 }
 0xb8d   :  { %vm6158_vm9 = vcmp.ge.f32.partialorder %v6150_v8, 0.0  ;;  %v6166_v32 = vmul.f32 0.01, %v6150_v8  ;;  %vm6159_vm3 = vcmp.ge.f32.partialorder %v6151_v7, 0.0  ;;  %vm6160_vm2 = vcmp.ge.f32.partialorder %v6152_v35, 0.0 }
 0xb8e   :  { %v6167_v3 = vmul.f32 0.01, %v6151_v7  ;;  %v6168_v12 = vmul.f32 0.01, %v6152_v35  ;;  %vm6161_vm0 = vcmp.ge.f32.partialorder %v6153_v6, 0.0  ;;  %vm6162_vm12 = vcmp.ge.f32.partialorder %v6154_v42, 0.0 }
 0xb8f   :  { %v6174_v60 = vsel %vm6158_vm9, %v6150_v8, %v6166_v32  ;;  %v6169_v41 = vmul.f32 0.01, %v6153_v6  ;;  %v6170_v2 = vmul.f32 0.01, %v6154_v42  ;;  %vm6163_vm1 = vcmp.ge.f32.partialorder %v6155_v19, 0.0  ;;  %vm13462_vm9 = vmmov %vm13461_vm4 }
 0xb90   :  { %6228 = vst.msk [vmem:[#allocation2] sm:$0xff] %vm13456_vm14, %v6174_v60  ;;  %v6175_v0 = vsel %vm6159_vm3, %v6151_v7, %v6167_v3  ;;  %v6176_v4 = vsel %vm6160_vm2, %v6152_v35, %v6168_v12  ;;  %vm6164_vm7 = vcmp.ge.f32.partialorder %v6156_v22, 0.0  ;;  %v6171_v11 = vmul.f32 0.01, %v6155_v19  ;;  %vm13464_vm3 = vmmov %vm13461_vm4 }
 0xb91   :  { %6365 = vst.msk [vmem:[#allocation3] sm:$0xff] %vm13457_vm13, %v6174_v60  ;;  %v6177_v13 = vsel %vm6161_vm0, %v6153_v6, %v6169_v41  ;;  %v6178_v21 = vsel %vm6162_vm12, %v6154_v42, %v6170_v2  ;;  %v6172_v59 = vmul.f32 0.01, %v6156_v22  ;;  %vm6165_vm14 = vcmp.ge.f32.partialorder %v6157_v53, 0.0  ;;  %vm13463_vm13 = vmmov %vm13461_vm4 }
 0xb92   :  { %6366 = vst.msk [vmem:[#allocation3 + $0x10] sm:$0xff] %vm13458_vm6, %v6175_v0  ;;  %vm13465_vm2 = vmmov %vm13464_vm3  ;;  %v6179_v39 = vsel %vm6163_vm1, %v6155_v19, %v6171_v11  ;;  %v6173_v36 = vmul.f32 0.01, %v6157_v53  ;;  %vm13473_vm1 = vcmp.eq.s32.totalorder %v12124_v26, 1 }
 0xb93   :  { %6367 = vst.msk [vmem:[#allocation3 + $0x20] sm:$0xff] %vm13459_vm11, %v6176_v4  ;;  %v6180_v25 = vsel %vm6164_vm7, %v6156_v22, %v6172_v59  ;;  %vm13467_vm6 = vmmov %vm13465_vm2  ;;  %vm13472_vm7 = vcmp.eq.s32.totalorder %v12136_v15, 1 }
 0xb94   :  { %6229 = vst.msk [vmem:[#allocation2 + $0x30] sm:$0xff] %vm13460_vm15, %v6175_v0  ;;  %vm13466_vm15 = vmmov %vm13465_vm2  ;;  %v6181_v62 = vsel %vm6165_vm14, %v6157_v53, %v6173_v36  ;;  %vm13474_vm14 = vcmp.eq.s32.totalorder %v12165_v45, 1 }
 0xb95   :  { %6230 = vst.msk [vmem:[#allocation2 + $0x60] sm:$0xff] %vm13461_vm4, %v6176_v4  ;;  %vm13468_vm4 = vmmov %vm13465_vm2 }
 0xb96   :  { %6368 = vst.msk [vmem:[#allocation3 + $0x30] sm:$0xff] %vm13462_vm9, %v6177_v13  ;;  %vm13469_vm11 = vmmov %vm13465_vm2  ;;  %vm13475_vm9 = vcmp.eq.s32.totalorder %v12139_v38, 1 }
 0xb97   :  { %6369 = vst.msk [vmem:[#allocation3 + $0x40] sm:$0xff] %vm13463_vm13, %v6178_v21  ;;  %vm13470_vm0 = vmmov %vm13465_vm2 }
 0xb98   :  { %6231 = vst.msk [vmem:[#allocation2 + $0x90] sm:$0xff] %vm13464_vm3, %v6177_v13  ;;  %vm13471_vm12 = vmmov %vm13470_vm0  ;;  %v6373_v1 = vld [vmem:[#allocation3] sm:$0xfe] }
 0xb99   :  { %6232 = vst.msk [vmem:[#allocation2 + $0xc0] sm:$0xff] %vm13465_vm2, %v6178_v21  ;;  %v6374_v61 = vld [vmem:[#allocation3 + $0x10] sm:$0xff]  ;;  %v6391_v57 = vrot.slane %v6373_v1, 1 }
 0xb9a   :  { %6370 = vst.msk [vmem:[#allocation3 + $0x50] sm:$0xff] %vm13466_vm15, %v6179_v39  ;;  %v6375_v50 = vld [vmem:[#allocation3 + $0x20] sm:$0xff]  ;;  %v6392_v34 = vrot.slane %v6374_v61, 1 }
 0xb9b   :  { %6233 = vst.msk [vmem:[#allocation2 + $0xf0] sm:$0xff] %vm13467_vm6, %v6179_v39  ;;  %v6394_v14 = vrot.slane %v6375_v50, 1 }
 0xb9c   :  { %6371 = vst.msk [vmem:[#allocation3 + $0x60] sm:$0xff] %vm13468_vm4, %v6180_v25  ;;  %v6393_v47 = vsel %vm5447_vm10, %v6391_v57, %v6392_v34  ;;  %vm13476_vm4 = vcmask 523520  }
 0xb9d   :  { %6234 = vst.msk [vmem:[#allocation2 + $0x120] sm:$0xff] %vm13469_vm11, %v6180_v25  ;;  %v6376_v30 = vld [vmem:[#allocation3 + $0x30] sm:$0xff]  ;;  %v6395_v51 = vsel %vm5447_vm10, %v6392_v34, %v6394_v14  ;;  %v6416_v56 = vsel %vm5430_vm8, %v6393_v47, 0.0  ;;  %vm13477_vm11 = vmmov %vm13476_vm4 }
 0xb9e   :  { %6235 = vst.msk [vmem:[#allocation2 + $0x150] sm:$0xff] %vm13470_vm0, %v6181_v62  ;;  %v6377_v20 = vld [vmem:[#allocation3 + $0x40] sm:$0xff]  ;;  %v6396_v40 = vrot.slane %v6376_v30, 1  ;;  %v6417_v10 = vsel %vm5431_vm5, %v6395_v51, 0.0  ;;  %6472 = vrot.lane.b32.xlu0 %v6416_v56, %s10227_s9 }
 0xb9f   :  { %6372 = vst.msk [vmem:[#allocation3 + $0x70] sm:$0xff] %vm13471_vm12, %v6181_v62  ;;  %v6398_v27 = vrot.slane %v6377_v20, 1  ;;  %6474 = vrot.lane.b32.xlu1 %v6417_v10, %s10227_s9  ;;  %vm13478_vm12 = vmmov %vm13476_vm4 }
 0xba0   :  { %v6397_v24 = vsel %vm5447_vm10, %v6394_v14, %v6396_v40 }
 0xba1   :  { %v6378_v48 = vld [vmem:[#allocation3 + $0x50] sm:$0xff]  ;;  %v6399_v44 = vsel %vm5447_vm10, %v6396_v40, %v6398_v27  ;;  %v6418_v8 = vsel %vm13473_vm1, %v6397_v24, 0.0 }
 0xba2   :  { %v6400_v16 = vrot.slane %v6378_v48, 1  ;;  %v6419_v63 = vsel %vm13472_vm7, %v6399_v44, 0.0  ;;  %6476 = vrot.lane.b32.xlu0 %v6418_v8, %s10227_s9  ;;  %vm13479_vm7 = vmmov %vm13476_vm4  ;;  %v6381_v48 = vld [vmem:[#allocation3 + $0x80] sm:$0x1]  ;;  %v9551_v8 = vld [vmem:[#allocation33 + $0x8] sm:$0xff]  }
 0xba3   :  { %v12437_v55 = vld [vmem:[#allocation3 + $0x60] sm:$0xff]  ;;  %6478 = vrot.lane.b32.xlu1 %v6419_v63, %s10227_s9  ;;  %v6406_v63 = vrot.slane %v6381_v48, 1 }
 0xba4   :  { %v6402_v33 = vrot.slane %v12437_v55, 1  ;;  %v6401_v35 = vsel %vm5447_vm10, %v6398_v27, %v6400_v16 }
 0xba5   :  { %v6420_v42 = vsel %vm13475_vm9, %v6401_v35, 0.0  ;;  %vm13480_vm9 = vmmov %vm13476_vm4 }
 0xba6   :  { %v6403_v7 = vsel %vm5447_vm10, %v6400_v16, %v6402_v33  ;;  %6480 = vrot.lane.b32.xlu0 %v6420_v42, %s10227_s9  ;;  %v6380_v20 = vld [vmem:[#allocation3 + $0x70] sm:$0xff] }
 0xba7   :  { %v6421_v6 = vsel %vm13474_vm14, %v6403_v7, 0.0  ;;  %v6404_v56 = vrot.slane %v6380_v20, 1 }
 0xba8   :  { %6482 = vrot.lane.b32.xlu1 %v6421_v6, %s10227_s9 }
 0xba9   :  { %v6407_v35 = vsel %vm5447_vm10, %v6404_v56, %v6406_v63  ;;  %v6405_v6 = vsel %vm5447_vm10, %v6402_v33, %v6404_v56  ;;  %v9553_v33 = vld [vmem:[#allocation33 + $0x18] sm:$0xff]  }
 0xbf9   :  { %v6183_v19 = vpop.permute.xlu0 %6182 }
 0xbfa   :  { %v6186_v22 = vmul.f32 %v6183_v19, %v12326_v43  ;;  %v6185_v53 = vmul.f32 %v6183_v19, %v12320_v52  ;;  %v6188_v32 = vmul.f32 %v12324_v54, %v6183_v19  ;;  %v6187_v3 = vmul.f32 %v12318_v9, %v6183_v19 }
 0xbfb   :  { %v6190_v60 = vmul.f32 %v6183_v19, %v12368_v28  ;;  %v6189_v41 = vmul.f32 %v6183_v19, %v12358_v17  ;;  %v6192_v2 = vmul.f32 %v12362_v5, %v6183_v19  ;;  %v6191_v0 = vmul.f32 %v12352_v49, %v6183_v19 }
 0xbfd   :  { %v6194_v12 = vpop.permute.xlu1 %6193 }
 0xbfe   :  { %v6197_v4 = vadd.f32 %v6194_v12, %v6186_v22  ;;  %v6196_v11 = vadd.f32 %v6194_v12, %v6185_v53  ;;  %v6199_v13 = vadd.f32 %v6194_v12, %v6188_v32  ;;  %v6198_v21 = vadd.f32 %v6194_v12, %v6187_v3  ;;  %v9552_v22 = vld [vmem:[#allocation33 + $0x10] sm:$0xff]  }
 0xbff   :  { %v6201_v43 = vadd.f32 %v6194_v12, %v6190_v60  ;;  %v6200_v59 = vadd.f32 %v6194_v12, %v6189_v41  ;;  %v6203_v52 = vadd.f32 %v6194_v12, %v6192_v2  ;;  %v6202_v39 = vadd.f32 %v6194_v12, %v6191_v0 }
 0xc00   :  { %vm6205_vm13 = vcmp.ge.f32.partialorder %v6197_v4, 0.0  ;;  %v6213_v54 = vmul.f32 0.01, %v6197_v4  ;;  %vm6204_vm3 = vcmp.ge.f32.partialorder %v6196_v11, 0.0  ;;  %v6212_v9 = vmul.f32 0.01, %v6196_v11 }
 0xc01   :  { %vm6207_vm2 = vcmp.ge.f32.partialorder %v6199_v13, 0.0  ;;  %v6215_v28 = vmul.f32 0.01, %v6199_v13  ;;  %vm6206_vm15 = vcmp.ge.f32.partialorder %v6198_v21, 0.0  ;;  %v6214_v17 = vmul.f32 0.01, %v6198_v21 }
 0xc02   :  { %v6221_v36 = vsel %vm6205_vm13, %v6197_v4, %v6213_v54  ;;  %v6220_v5 = vsel %vm6204_vm3, %v6196_v11, %v6212_v9  ;;  %vm6209_vm6 = vcmp.ge.f32.partialorder %v6201_v43, 0.0  ;;  %v6217_v49 = vmul.f32 0.01, %v6201_v43  ;;  %vm13481_vm13 = vmmov %vm13476_vm4 }
 0xc03   :  { %6434 = vrot.lane.b32.xlu1 %v6221_v36, %s10228_s29  ;;  %6237 = vst.msk [vmem:[#allocation2 + $0x30] sm:$0xff] %vm13476_vm4, %v6221_v36  ;;  %6432 = vrot.lane.b32.xlu0 %v6220_v5, %s10228_s29  ;;  %v6223_v25 = vsel %vm6207_vm2, %v6199_v13, %v6215_v28  ;;  %v6222_v62 = vsel %vm6206_vm15, %v6198_v21, %v6214_v17  ;;  %vm6208_vm0 = vcmp.ge.f32.partialorder %v6200_v59, 0.0  ;;  %v6216_v1 = vmul.f32 0.01, %v6200_v59  ;;  %vm13482_vm3 = vmmov %vm13476_vm4 }
 0xc04   :  { %6236 = vst.msk [vmem:[#allocation2] sm:$0xff] %vm13477_vm11, %v6220_v5  ;;  %v6225_v61 = vsel %vm6209_vm6, %v6201_v43, %v6217_v49  ;;  %vm6211_vm1 = vcmp.ge.f32.partialorder %v6203_v52, 0.0  ;;  %v6219_v50 = vmul.f32 0.01, %v6203_v52  ;;  %vm6210_vm14 = vcmp.ge.f32.partialorder %v6202_v39, 0.0  ;;  %vm13483_vm2 = vmmov %vm13482_vm3 }
 0xc05   :  { %6239 = vst.msk [vmem:[#allocation2 + $0x90] sm:$0xff] %vm13478_vm12, %v6223_v25  ;;  %v6224_v57 = vsel %vm6208_vm0, %v6200_v59, %v6216_v1  ;;  %v6218_v34 = vmul.f32 0.01, %v6202_v39  ;;  %vm13484_vm15 = vcmask 523264   ;;  %vm13487_vm11 = vcmp.eq.s32.totalorder %v12177_v31, 1 }
 0xc06   :  { %6238 = vst.msk [vmem:[#allocation2 + $0x60] sm:$0xff] %vm13479_vm7, %v6222_v62  ;;  %v6227_v14 = vsel %vm6211_vm1, %v6203_v52, %v6219_v50  ;;  %vm13485_vm6 = vmmov %vm13484_vm15  ;;  %v6423_v53 = vsel %vm13487_vm11, %v6407_v35, 0.0  ;;  %vm13488_vm0 = vcmp.eq.s32.totalorder %v12168_v29, 1  ;;  %vm13490_vm7 = vcmask 261120  }
 0xc07   :  { %6241 = vst.msk [vmem:[#allocation2 + $0xf0] sm:$0xff] %vm13480_vm9, %v6225_v61  ;;  %6438 = vrot.lane.b32.xlu1 %v6223_v25, %s10228_s29  ;;  %6436 = vrot.lane.b32.xlu0 %v6222_v62, %s10228_s29  ;;  %v6226_v30 = vsel %vm6210_vm14, %v6202_v39, %v6218_v34  ;;  %vm13486_vm4 = vmmov %vm13485_vm6  ;;  %v6422_v32 = vsel %vm13488_vm0, %v6405_v6, 0.0 }
 0xc08   :  { %6240 = vst.msk [vmem:[#allocation2 + $0xc0] sm:$0xff] %vm13481_vm13, %v6224_v57  ;;  %vm13489_vm12 = vmmov %vm13486_vm4 }
 0xc09   :  { %6243 = vst.msk [vmem:[#allocation2 + $0x150] sm:$0xff] %vm13482_vm3, %v6227_v14  ;;  %vm13491_vm1 = vmmov %vm13490_vm7 }
 0xc0a   :  { %6242 = vst.msk [vmem:[#allocation2 + $0x120] sm:$0xff] %vm13483_vm2, %v6226_v30  ;;  %v6245_v27 = vld [vmem:[#allocation2 + $0x30] sm:$0xff]  ;;  %vm13492_vm14 = vmmov %vm13483_vm2 }
 0xc0b   :  { %v6244_v40 = vld [vmem:[#allocation2] sm:$0xff]  ;;  %6442 = vrot.lane.b32.xlu1 %v6225_v61, %s10228_s29  ;;  %6440 = vrot.lane.b32.xlu0 %v6224_v57, %s10228_s29  ;;  %vm13493_vm9 = vmmov %vm13483_vm2 }
 0xc0c   :  { %v6252_v51 = vpack.c.bf16 %v6245_v27, %v6244_v40  ;;  %v6247_v10 = vld [vmem:[#allocation2 + $0x90] sm:$0xff]  ;;  %vm13494_vm13 = vmmov %vm13491_vm1 }
 0xc0d   :  { %v6246_v47 = vld [vmem:[#allocation2 + $0x60] sm:$0xff]  ;;  %vm13495_vm3 = vmmov %vm13491_vm1 }
 0xc0e   :  { %v6253_v44 = vpack.c.bf16 %v6247_v10, %v6246_v47  ;;  %v6249_v24 = vld [vmem:[#allocation2 + $0xf0] sm:$0xff]  ;;  %9213 = vmatprep.mubr.msk.bf16.mxu1 %vm13484_vm15, %v6252_v51  ;;  %vm13496_vm15 = vmmov %vm13483_vm2 }
 0xc0f   :  { %v6248_v16 = vld [vmem:[#allocation2 + $0xc0] sm:$0xff]  ;;  %6446 = vrot.lane.b32.xlu1 %v6227_v14, %s10228_s29  ;;  %6444 = vrot.lane.b32.xlu0 %v6226_v30, %s10228_s29  ;;  %vm13499_vm11 = vmmov %vm13483_vm2 }
 0xc10   :  { %9214 = vmatmul.mubr.msk.bf16.vlgmr.msra.gmra.mrb[128].mxu1 %vm13485_vm6, %v6253_v44  ;;  %v6254_v7 = vpack.c.bf16 %v6249_v24, %v6248_v16  ;;  %v6251_v19 = vld [vmem:[#allocation2 + $0x150] sm:$0xff]  ;;  %v6473_v3 = vpop.permute.xlu0 %6472  ;;  %vm13497_vm6 = vmmov %vm13491_vm1 }
 0xc11   :  { %9222 = vmatpush3.bf16.msra.mxu1 %v12432_v18  ;;  %v6250_v42 = vld [vmem:[#allocation2 + $0x120] sm:$0xff]  ;;  %v6475_v18 = vpop.permute.xlu1 %6474  ;;  %vm13500_vm0 = vmmov %vm13483_vm2 }
 0xc12   :  { %9217 = vmatprep.mubr.msk.bf16.mxu1 %vm13486_vm4, %v6254_v7  ;;  %9223 = vmatprep.subr.bf16.mxu1 %v9551_v8  ;;  %v6255_v55 = vpack.c.bf16 %v6251_v19, %v6250_v42  ;;  %vm13498_vm4 = vmmov %vm13491_vm1 }
 0xc13   :  { %6486 = vrot.lane.b32.xlu1 %v6423_v53, %s10227_s9  ;;  %6484 = vrot.lane.b32.xlu0 %v6422_v32, %s10227_s9 }
 0xc14   :  { %v6477_v60 = vpop.permute.xlu0 %6476 }
 0xc15   :  { %9224 = vmatpush3.bf16.msra.mxu1 %v9551_v8  ;;  %v6479_v12 = vpop.permute.xlu1 %6478 }
 0xc16   :  { %9225 = vmatprep.subr.bf16.mxu1 %v9552_v22 }
 0xc18   :  { %9218 = vmatmul.mubr.msk.bf16.gmra.mrb[132].mxu1 %vm13489_vm12, %v6255_v55  ;;  %v6481_v2 = vpop.permute.xlu0 %6480 }
 0xc19   :  { %9226 = vmatpush3.bf16.msra.mxu1 %v9552_v22 }
 0xc1a   :  { %9227 = vmatprep.subr.bf16.mxu1 %v9553_v33  ;;  %v6483_v41 = vpop.permute.xlu1 %6482 }
 0xc1d   :  { %9228 = vmatpush3.bf16.msra.mxu1 %v9553_v33 }
 0xc75   :  { %v6435_v0 = vpop.permute.xlu1 %6434  ;;  %v6433_v4 = vpop.permute.xlu0 %6432 }
 0xc76   :  { %6457 = vst.msk [vmem:[#allocation2 + $0x30] sm:$0xff] %vm13490_vm7, %v6435_v0  ;;  %vm13501_vm7 = vmmov %vm13491_vm1 }
 0xc77   :  { %6456 = vst.msk [vmem:[#allocation2] sm:$0xff] %vm13491_vm1, %v6433_v4 }
 0xc78   :  { %6497 = vst.msk [vmem:[#allocation2 + $0x30] sm:$0xff] %vm13492_vm14, %v6475_v18  ;;  %vm13502_vm14 = vmmov %vm13489_vm12 }
 0xc79   :  { %6496 = vst.msk [vmem:[#allocation2] sm:$0xff] %vm13493_vm9, %v6473_v3  ;;  %v6439_v11 = vpop.permute.xlu1 %6438  ;;  %v6437_v13 = vpop.permute.xlu0 %6436  ;;  %vm13503_vm9 = vmmov %vm13500_vm0 }
 0xc7a   :  { %6459 = vst.msk [vmem:[#allocation2 + $0x90] sm:$0xff] %vm13494_vm13, %v6439_v11  ;;  %vm13504_vm13 = vmmov %vm13500_vm0 }
 0xc7b   :  { %6458 = vst.msk [vmem:[#allocation2 + $0x60] sm:$0xff] %vm13495_vm3, %v6437_v13  ;;  %vm13505_vm3 = vmmov %vm13489_vm12 }
 0xc7c   :  { %6499 = vst.msk [vmem:[#allocation2 + $0x90] sm:$0xff] %vm13483_vm2, %v6479_v12  ;;  %vm13506_vm2 = vmmov %vm13505_vm3 }
 0xc7d   :  { %6498 = vst.msk [vmem:[#allocation2 + $0x60] sm:$0xff] %vm13496_vm15, %v6477_v60  ;;  %v6443_v21 = vpop.permute.xlu1 %6442  ;;  %v6441_v43 = vpop.permute.xlu0 %6440  ;;  %vm13507_vm15 = vmmov %vm13506_vm2 }
 0xc7e   :  { %6461 = vst.msk [vmem:[#allocation2 + $0xf0] sm:$0xff] %vm13497_vm6, %v6443_v21  ;;  %vm13508_vm6 = vmmov %vm13506_vm2 }
 0xc7f   :  { %6460 = vst.msk [vmem:[#allocation2 + $0xc0] sm:$0xff] %vm13498_vm4, %v6441_v43  ;;  %v6505_v52 = vld [vmem:[#allocation2 + $0x30] sm:$0xff]  ;;  %vm13509_vm4 = vcmask 1048064  }
 0xc80   :  { %v6504_v59 = vld [vmem:[#allocation2] sm:$0xff]  ;;  %6501 = vst.msk [vmem:[#allocation2 + $0xf0] sm:$0xff] %vm13499_vm11, %v6483_v41  ;;  %vm13510_vm11 = vmmov %vm13506_vm2 }
 0xc81   :  { %6500 = vst.msk [vmem:[#allocation2 + $0xc0] sm:$0xff] %vm13500_vm0, %v6481_v2  ;;  %v6512_v39 = vpack.c.bf16 %v6505_v52, %v6504_v59  ;;  %v6447_v54 = vpop.permute.xlu1 %6446  ;;  %v6445_v9 = vpop.permute.xlu0 %6444  ;;  %vm13511_vm0 = vmmov %vm13509_vm4 }
 0xc82   :  { %6463 = vst.msk [vmem:[#allocation2 + $0x150] sm:$0xff] %vm13501_vm7, %v6447_v54  ;;  %vm13513_vm7 = vmmov %vm13506_vm2 }
 0xc83   :  { %9229 = vmatprep.mubr.msk.bf16.mxu1 %vm13489_vm12, %v6512_v39  ;;  %6462 = vst.msk [vmem:[#allocation2 + $0x120] sm:$0xff] %vm13491_vm1, %v6445_v9  ;;  %v6507_v17 = vld [vmem:[#allocation2 + $0x90] sm:$0xff]  ;;  %vm13512_vm12 = vmmov %vm13511_vm0 }
 0xc84   :  { %v6506_v28 = vld [vmem:[#allocation2 + $0x60] sm:$0xff]  ;;  %vm13514_vm1 = vmmov %vm13506_vm2 }
 0xc85   :  { %v6513_v36 = vpack.c.bf16 %v6507_v17, %v6506_v28  ;;  %v6487_v5 = vpop.permute.xlu1 %6486  ;;  %v6485_v49 = vpop.permute.xlu0 %6484 }
 0xc86   :  { %6503 = vst.msk [vmem:[#allocation2 + $0x150] sm:$0xff] %vm13503_vm9, %v6487_v5  ;;  %vm13516_vm9 = vmmov %vm13514_vm1 }
 0xc87   :  { %9230 = vmatmul.mubr.msk.bf16.vlgmr.msra.gmra.mrb[136].mxu1 %vm13502_vm14, %v6513_v36  ;;  %6502 = vst.msk [vmem:[#allocation2 + $0x120] sm:$0xff] %vm13504_vm13, %v6485_v49  ;;  %v6509_v62 = vld [vmem:[#allocation2 + $0xf0] sm:$0xff]  ;;  %vm13515_vm14 = vmmov %vm13511_vm0 }
 0xc88   :  { %v6508_v25 = vld [vmem:[#allocation2 + $0xc0] sm:$0xff]  ;;  %vm13517_vm13 = vmmov %vm13511_vm0 }
 0xc89   :  { %v6514_v1 = vpack.c.bf16 %v6509_v62, %v6508_v25 }
 0xc8b   :  { %9233 = vmatprep.mubr.msk.bf16.mxu1 %vm13505_vm3, %v6514_v1  ;;  %vm13518_vm3 = vmmov %vm13514_vm1 }
 0xc8d   :  { %v6511_v50 = vld [vmem:[#allocation2 + $0x150] sm:$0xff] }
 0xc8e   :  { %v6510_v61 = vld [vmem:[#allocation2 + $0x120] sm:$0xff] }
 0xc8f   :  { %v6515_v57 = vpack.c.bf16 %v6511_v50, %v6510_v61 }
 0xc91   :  { %9234 = vmatmul.mubr.msk.bf16.gmra.mrb[140].mxu1 %vm13506_vm2, %v6515_v57  ;;  %vm13519_vm2 = vmmov %vm13511_vm0 }
 0xc92   :  { %7440 = vmatprep.mubr.bf16.mxu1 %v13388_v23 }
 0xce3   :  { %v12524_v34 = vpop.f32.mrb[128].mxu1 }
 0xce4   :  { %v12526_v14 = vpop.f32.mrb[129].mxu1  ;;  %v6723_v30 = vmul.f32 %v12524_v34, %v12524_v34  ;;  %v6628_v48 = vsel %vm13507_vm15, %v12524_v34, 0.0  ;;  %v6650_v63 = vsel %vm13512_vm12, %v12524_v34, 0.0  ;;  %vm13520_vm15 = vmmov %vm13511_vm0 }
 0xce5   :  { %v6721_v20 = vmul.f32 %v12526_v14, %v12526_v14  ;;  %v12532_v40 = vpop.f32.mrb[130].mxu1  ;;  %v6625_v51 = vsel %vm13508_vm6, %v12526_v14, 0.0  ;;  %v6647_v47 = vsel %vm13509_vm4, %v12526_v14, 0.0  ;;  %vm13521_vm6 = vmmov %vm13514_vm1 }
 0xce6   :  { %v12534_v27 = vpop.f32.mrb[131].mxu1  ;;  %v6724_v56 = vmul.f32 %v12532_v40, %v12532_v40  ;;  %v6732_v8 = vsel %vm13513_vm7, %v6723_v30, 0.0  ;;  %v6630_v53 = vsel %vm13518_vm3, %v12532_v40, 0.0  ;;  %v6754_v3 = vsel %vm13519_vm2, %v6723_v30, 0.0  ;;  %vm13522_vm4 = vmmov %vm13514_vm1 }
 0xce7   :  { %v6626_v10 = vsel %vm13510_vm11, %v12534_v27, 0.0  ;;  %v6648_v24 = vsel %vm13511_vm0, %v12534_v27, 0.0  ;;  %v6722_v16 = vmul.f32 %v12534_v27, %v12534_v27  ;;  %v6729_v7 = vsel %vm13514_vm1, %v6721_v20, 0.0  ;;  %vm13523_vm11 = vmmov %vm13511_vm0 }
 0xce8   :  { %v6627_v44 = vadd.f32 %v6626_v10, %v6625_v51  ;;  %v6649_v35 = vadd.f32 %v6648_v24, %v6647_v47  ;;  %v6751_v6 = vsel %vm13515_vm14, %v6721_v20, 0.0  ;;  %v6652_v12 = vsel %vm13520_vm15, %v12532_v40, 0.0  ;;  %vm13524_vm12 = vmmov %vm13514_vm1 }
 0xce9   :  { %v6730_v19 = vsel %vm13516_vm9, %v6722_v16, 0.0  ;;  %v6752_v22 = vsel %vm13517_vm13, %v6722_v16, 0.0  ;;  %v6734_v60 = vsel %vm13521_vm6, %v6724_v56, 0.0  ;;  %v6756_v43 = vsel %vm13523_vm11, %v6724_v56, 0.0  ;;  %vm13525_vm7 = vmmov %vm13511_vm0 }
 0xcea   :  { %v6629_v42 = vadd.f32 %v6628_v48, %v6627_v44  ;;  %v6651_v32 = vadd.f32 %v6650_v63, %v6649_v35  ;;  %v6731_v55 = vadd.f32 %v6730_v19, %v6729_v7  ;;  %v6753_v33 = vadd.f32 %v6752_v22, %v6751_v6  ;;  %vm13526_vm14 = vmmov %vm13511_vm0 }
 0xceb   :  { %v12559_v18 = vpop.f32.mrb[132].mxu1  ;;  %vm13527_vm9 = vmmov %vm13514_vm1 }
 0xcec   :  { %v12565_v41 = vpop.f32.mrb[133].mxu1  ;;  %v6631_v2 = vadd.f32 %v6630_v53, %v6629_v42  ;;  %v6733_v0 = vadd.f32 %v6732_v8, %v6731_v55  ;;  %v6755_v4 = vadd.f32 %v6754_v3, %v6753_v33  ;;  %v6653_v13 = vadd.f32 %v6652_v12, %v6651_v32  ;;  %vm13528_vm13 = vmmov %vm13511_vm0 }
 0xced   :  { %v6632_v11 = vsel %vm13522_vm4, %v12565_v41, 0.0  ;;  %v12569_v21 = vpop.f32.mrb[134].mxu1  ;;  %v6654_v52 = vsel %vm13511_vm0, %v12565_v41, 0.0  ;;  %v6725_v39 = vmul.f32 %v12565_v41, %v12565_v41  ;;  %v6636_v50 = vsel %vm13527_vm9, %v12559_v18, 0.0  ;;  %vm13529_vm3 = vmmov %vm13514_vm1 }
 0xcee   :  { %v6633_v59 = vadd.f32 %v6632_v11, %v6631_v2  ;;  %v12576_v54 = vpop.f32.mrb[135].mxu1  ;;  %v6655_v9 = vadd.f32 %v6654_v52, %v6653_v13  ;;  %v6735_v28 = vadd.f32 %v6734_v60, %v6733_v0  ;;  %v6757_v17 = vadd.f32 %v6756_v43, %v6755_v4  ;;  %vm13530_vm2 = vmmov %vm13514_vm1 }
 0xcef   :  { %v6736_v36 = vsel %vm13524_vm12, %v6725_v39, 0.0  ;;  %v6758_v5 = vsel %vm13525_vm7, %v6725_v39, 0.0  ;;  %v6634_v49 = vsel %vm13514_vm1, %v12576_v54, 0.0  ;;  %v6656_v61 = vsel %vm13526_vm14, %v12576_v54, 0.0  ;;  %vm13531_vm15 = vmmov %vm13511_vm0 }
 0xcf0   :  { %v6737_v25 = vadd.f32 %v6736_v36, %v6735_v28  ;;  %v6759_v62 = vadd.f32 %v6758_v5, %v6757_v17  ;;  %v6635_v1 = vadd.f32 %v6634_v49, %v6633_v59  ;;  %v6727_v57 = vmul.f32 %v12559_v18, %v12559_v18  ;;  %vm13532_vm6 = vmmov %vm13511_vm0 }
 0xcf1   :  { %v6657_v30 = vadd.f32 %v6656_v61, %v6655_v9  ;;  %v6726_v20 = vmul.f32 %v12576_v54, %v12576_v54  ;;  %v6658_v48 = vsel %vm13528_vm13, %v12559_v18, 0.0  ;;  %v6638_v51 = vsel %vm13529_vm3, %v12569_v21, 0.0  ;;  %vm13533_vm4 = vmmov %vm13514_vm1 }
 0xcf2   :  { %v6637_v47 = vadd.f32 %v6636_v50, %v6635_v1  ;;  %v6728_v10 = vmul.f32 %v12569_v21, %v12569_v21  ;;  %v6660_v63 = vsel %vm13532_vm6, %v12569_v21, 0.0  ;;  %v6740_v35 = vsel %vm13533_vm4, %v6727_v57, 0.0  ;;  %vm13534_vm11 = vmmov %vm13511_vm0 }
 0xcf3   :  { %v6738_v56 = vsel %vm13530_vm2, %v6726_v20, 0.0  ;;  %v6760_v44 = vsel %vm13531_vm15, %v6726_v20, 0.0  ;;  %v6659_v24 = vadd.f32 %v6658_v48, %v6657_v30  ;;  %v6762_v42 = vsel %vm13534_vm11, %v6727_v57, 0.0  ;;  %vm13535_vm12 = vmmov %vm13514_vm1 }
 0xcf4   :  { %v6739_v16 = vadd.f32 %v6738_v56, %v6737_v25  ;;  %v6761_v8 = vadd.f32 %v6760_v44, %v6759_v62  ;;  %v6639_v7 = vadd.f32 %v6638_v51, %v6637_v47  ;;  %v6764_v32 = vsel %vm13511_vm0, %v6728_v10, 0.0  ;;  %vm13536_vm7 = vmmov %vm13514_vm1 }
 0xcf5   :  { %v6661_v6 = vadd.f32 %v6660_v63, %v6659_v24  ;;  %v6742_v55 = vsel %vm13535_vm12, %v6728_v10, 0.0  ;;  %vm13537_vm14 = vmmov %vm13514_vm1 }
 0xcf6   :  { %v6763_v19 = vadd.f32 %v6762_v42, %v6761_v8  ;;  %v6741_v22 = vadd.f32 %v6740_v35, %v6739_v16  ;;  %v6640_v49 = vrot.slane %v6639_v7, 4  ;;  %vm13538_vm9 = vmmov %vm13511_vm0 }
 0xcf7   :  { %v6662_v53 = vrot.slane %v6661_v6, 4  ;;  %vm13539_vm13 = vmmov %vm13511_vm0 }
 0xcf8   :  { %v6765_v33 = vadd.f32 %v6764_v32, %v6763_v19  ;;  %v12604_v3 = vadd.f32 %v6742_v55, %v6741_v22  ;;  %vm13540_vm3 = vmmov %vm13511_vm0 }
 0xcf9   :  { %v6663_v12 = vadd.f32 %v6662_v53, %v6661_v6  ;;  %vm13541_vm2 = vmmov %vm13514_vm1 }
 0xcfa   :  { %v6766_v60 = vrot.slane %v6765_v33, 4  ;;  %vm13542_vm15 = vmmov %vm13511_vm0 }
 0xcfb   :  { %v6664_v2 = vrot.slane %v6663_v12, 2  ;;  %vm13543_vm6 = vmmov %vm13514_vm1 }
 0xcfc   :  { %v6767_v0 = vadd.f32 %v6766_v60, %v6765_v33  ;;  %vm13544_vm4 = vmmov %vm13511_vm0 }
 0xcfd   :  { %v6665_v4 = vadd.f32 %v6664_v2, %v6663_v12  ;;  %vm13545_vm11 = vmmov %vm13514_vm1  ;;  %v6641_v2 = vadd.f32 %v6640_v49, %v6639_v7  ;;  %v6744_v49 = vrot.slane %v12604_v3, 4 }
 0xcfe   :  { %v6768_v11 = vrot.slane %v6767_v0, 2  ;;  %vm13546_vm0 = vmmov %vm13514_vm1 }
 0xcff   :  { %v6666_v13 = vrot.slane %v6665_v4, 1  ;;  %vm13547_vm12 = vmmov %vm13540_vm3 }
 0xd00   :  { %v6769_v43 = vadd.f32 %v6768_v11, %v6767_v0 }
 0xd01   :  { %v6667_v59 = vadd.f32 %v6666_v13, %v6665_v4 }
 0xd02   :  { %v6770_v52 = vrot.slane %v6769_v43, 1 }
 0xd03   :  { %6669 = vrot.lane.b32.xlu0 %v6667_v59, %s10200_s30 }
 0xd04   :  { %v6771_v39 = vadd.f32 %v6770_v52, %v6769_v43 }
 0xd06   :  { %6773 = vrot.lane.b32.xlu1 %v6771_v39, %s10200_s30 }
 0xd5a   :  { %v12608_v9 = vpop.f32.mrb[136].mxu1 }
 0xd5b   :  { %v12610_v28 = vpop.f32.mrb[137].mxu1  ;;  %v6676_v25 = vsel %vm13536_vm7, %v12608_v9, 0.0  ;;  %v6779_v62 = vmul.f32 %v12608_v9, %v12608_v9  ;;  %v6698_v48 = vsel %vm13540_vm3, %v12608_v9, 0.0  ;;  %vm13548_vm7 = vmmov %vm13540_vm3 }
 0xd5c   :  { %v6777_v17 = vmul.f32 %v12610_v28, %v12610_v28  ;;  %v12614_v36 = vpop.f32.mrb[138].mxu1  ;;  %v6673_v1 = vsel %vm13514_vm1, %v12610_v28, 0.0  ;;  %v6695_v50 = vsel %vm13538_vm9, %v12610_v28, 0.0  ;;  %vm13549_vm1 = vmmov %vm13546_vm0 }
 0xd5d   :  { %v12616_v5 = vpop.f32.mrb[139].mxu1  ;;  %v6780_v56 = vmul.f32 %v12614_v36, %v12614_v36  ;;  %v6678_v63 = vsel %vm13545_vm11, %v12614_v36, 0.0  ;;  %v6788_v42 = vsel %vm13546_vm0, %v6779_v62, 0.0  ;;  %v6810_v19 = vsel %vm13547_vm12, %v6779_v62, 0.0  ;;  %vm13551_vm9 = vmmov %vm13546_vm0 }
 0xd5e   :  { %v6674_v61 = vsel %vm13537_vm14, %v12616_v5, 0.0  ;;  %v6696_v30 = vsel %vm13539_vm13, %v12616_v5, 0.0  ;;  %v6778_v20 = vmul.f32 %v12616_v5, %v12616_v5  ;;  %v6785_v51 = vsel %vm13541_vm2, %v6777_v17, 0.0  ;;  %vm13550_vm14 = vmmov %vm13540_vm3 }
 0xd5f   :  { %v6675_v57 = vadd.f32 %v6674_v61, %v6673_v1  ;;  %v6807_v47 = vsel %vm13542_vm15, %v6777_v17, 0.0  ;;  %v6697_v10 = vadd.f32 %v6696_v30, %v6695_v50  ;;  %v6700_v22 = vsel %vm13548_vm7, %v12614_v36, 0.0  ;;  %vm13552_vm13 = vmmov %vm13540_vm3 }
 0xd60   :  { %v6786_v24 = vsel %vm13543_vm6, %v6778_v20, 0.0  ;;  %v6808_v16 = vsel %vm13544_vm4, %v6778_v20, 0.0  ;;  %v6790_v12 = vsel %vm13549_vm1, %v6780_v56, 0.0  ;;  %v6812_v0 = vsel %vm13550_vm14, %v6780_v56, 0.0  ;;  %vm13553_vm3 = vmmov %vm13546_vm0 }
 0xd61   :  { %v6677_v44 = vadd.f32 %v6676_v25, %v6675_v57  ;;  %v6699_v8 = vadd.f32 %v6698_v48, %v6697_v10  ;;  %v6787_v35 = vadd.f32 %v6786_v24, %v6785_v51  ;;  %v6809_v6 = vadd.f32 %v6808_v16, %v6807_v47  ;;  %vm13554_vm2 = vmmov %vm13544_vm4 }
 0xd62   :  { %vm13555_vm15 = vmmov %vm13546_vm0  ;;  %v6642_v50 = vrot.slane %v6641_v2, 2 }
 0xd63   :  { %v6679_v53 = vadd.f32 %v6678_v63, %v6677_v44  ;;  %v6789_v32 = vadd.f32 %v6788_v42, %v6787_v35  ;;  %v6811_v55 = vadd.f32 %v6810_v19, %v6809_v6  ;;  %v6701_v33 = vadd.f32 %v6700_v22, %v6699_v8  ;;  %vm13556_vm6 = vmmov %vm13554_vm2 }
 0xd64   :  { %v12647_v60 = vpop.f32.mrb[140].mxu1  ;;  %vm13557_vm4 = vmmov %vm13546_vm0  ;;  %v6745_v63 = vadd.f32 %v6744_v49, %v12604_v3  ;;  %v6643_v3 = vadd.f32 %v6642_v50, %v6641_v2 }
 0xd65   :  { %v12650_v4 = vpop.f32.mrb[141].mxu1  ;;  %v6791_v11 = vadd.f32 %v6790_v12, %v6789_v32  ;;  %v6813_v52 = vadd.f32 %v6812_v0, %v6811_v55  ;;  %v6684_v51 = vsel %vm13557_vm4, %v12647_v60, 0.0  ;;  %v6783_v47 = vmul.f32 %v12647_v60, %v12647_v60  ;;  %vm13558_vm11 = vmmov %vm13554_vm2 }
 0xd66   :  { %v6680_v13 = vsel %vm13551_vm9, %v12650_v4, 0.0  ;;  %v6702_v43 = vsel %vm13552_vm13, %v12650_v4, 0.0  ;;  %v6781_v59 = vmul.f32 %v12650_v4, %v12650_v4  ;;  %v12658_v39 = vpop.f32.mrb[142].mxu1  ;;  %v6706_v44 = vsel %vm13558_vm11, %v12647_v60, 0.0  ;;  %vm13559_vm12 = vmmov %vm13546_vm0 }
 0xd67   :  { %v6681_v17 = vadd.f32 %v6680_v13, %v6679_v53  ;;  %v6703_v25 = vadd.f32 %v6702_v43, %v6701_v33  ;;  %v12660_v7 = vpop.f32.mrb[143].mxu1  ;;  %v6686_v24 = vsel %vm13546_vm0, %v12658_v39, 0.0  ;;  %v6784_v8 = vmul.f32 %v12658_v39, %v12658_v39  ;;  %vm13560_vm7 = vmmov %vm13554_vm2 }
 0xd68   :  { %v6792_v62 = vsel %vm13553_vm3, %v6781_v59, 0.0  ;;  %v6814_v1 = vsel %vm13554_vm2, %v6781_v59, 0.0  ;;  %v6682_v61 = vsel %vm13555_vm15, %v12660_v7, 0.0  ;;  %v6704_v48 = vsel %vm13556_vm6, %v12660_v7, 0.0  ;;  %vm13561_vm1 = vmmov %vm13554_vm2 }
 0xd69   :  { %v6793_v57 = vadd.f32 %v6792_v62, %v6791_v11  ;;  %v6815_v30 = vadd.f32 %v6814_v1, %v6813_v52  ;;  %v6683_v20 = vadd.f32 %v6682_v61, %v6681_v17  ;;  %v6705_v10 = vadd.f32 %v6704_v48, %v6703_v25  ;;  %vm13562_vm14 = vmmov %vm13546_vm0 }
 0xd6a   :  { %v6782_v56 = vmul.f32 %v12660_v7, %v12660_v7  ;;  %v6708_v22 = vsel %vm13561_vm1, %v12658_v39, 0.0  ;;  %v6796_v55 = vsel %vm13562_vm14, %v6783_v47, 0.0  ;;  %vm13563_vm9 = vmmov %vm13561_vm1  ;;  %v6746_v59 = vrot.slane %v6745_v63, 2 }
 0xd6b   :  { %v6685_v16 = vadd.f32 %v6684_v51, %v6683_v20  ;;  %v6707_v42 = vadd.f32 %v6706_v44, %v6705_v10  ;;  %v6818_v12 = vsel %vm13563_vm9, %v6783_v47, 0.0  ;;  %vm13564_vm13 = vmmov %vm13546_vm0  ;;  %v6644_v61 = vrot.slane %v6643_v3, 1 }
 0xd6c   :  { %v6794_v35 = vsel %vm13559_vm12, %v6782_v56, 0.0  ;;  %v6816_v6 = vsel %vm13560_vm7, %v6782_v56, 0.0  ;;  %v6798_v43 = vsel %vm13564_vm13, %v6784_v8, 0.0  ;;  %vm13565_vm3 = vmmov %vm13561_vm1  ;;  %v6747_v20 = vadd.f32 %v6746_v59, %v6745_v63  ;;  %v12692_v59 = vld [vmem:[#allocation37] ss:$8 sps:$4 sm:$0xff]  }
 0xd6d   :  { %v6795_v19 = vadd.f32 %v6794_v35, %v6793_v57  ;;  %v6817_v53 = vadd.f32 %v6816_v6, %v6815_v30  ;;  %v6687_v32 = vadd.f32 %v6686_v24, %v6685_v16  ;;  %v6709_v33 = vadd.f32 %v6708_v22, %v6707_v42  ;;  %vm13568_vm7 = vmmov %vm13559_vm12 }
 0xd6e   :  { %v6820_v17 = vsel %vm13565_vm3, %v6784_v8, 0.0  ;;  %v6645_v44 = vadd.f32 %v6644_v61, %v6643_v3  ;;  %v6748_v35 = vrot.slane %v6747_v20, 1  ;;  %v12717_v61 = vld [vmem:[#allocation37 + $0x30] ss:$8 sps:$4 sm:$0xff]   ;;  %vm13569_vm1 = vmmov %vm13568_vm7 }
 0xd6f   :  { %v6819_v0 = vadd.f32 %v6818_v12, %v6817_v53  ;;  %v6688_v11 = vrot.slane %v6687_v32, 4  ;;  %v6797_v13 = vadd.f32 %v6796_v55, %v6795_v19  ;;  %v6710_v52 = vrot.slane %v6709_v33, 4  ;;  %vm13570_vm14 = vmmov %vm13569_vm1 }
 0xd70   :  { %v6749_v12 = vadd.f32 %v6748_v35, %v6747_v20  ;;  %v12734_v35 = vld [vmem:[#allocation37 + $0x54] ss:$8 sps:$4 sm:$0xff]  }
 0xd71   :  { %v6821_v25 = vadd.f32 %v6820_v17, %v6819_v0  ;;  %v6689_v49 = vadd.f32 %v6688_v11, %v6687_v32  ;;  %v6799_v62 = vadd.f32 %v6798_v43, %v6797_v13  ;;  %v6711_v1 = vadd.f32 %v6710_v52, %v6709_v33  ;;  %v12694_v52 = vld [vmem:[#allocation37 + $0x4] ss:$8 sps:$4 sm:$0xff]   ;;  %v12696_v17 = vld [vmem:[#allocation37 + $0x14] ss:$8 sps:$4 sm:$0xff]  }
 0xd72   :  { %7147 = vmatprep.subr.bf16.mxu0 %v12694_v52  ;;  %7408 = vmatprep.subr.bf16.mxu1 %v12694_v52 }
 0xd73   :  { %v6822_v57 = vrot.slane %v6821_v25, 4  ;;  %v6690_v30 = vrot.slane %v6689_v49, 2  ;;  %v6712_v48 = vrot.slane %v6711_v1, 2  ;;  %v6800_v51 = vrot.slane %v6799_v62, 4  ;;  %7148 = vmatpush1.bf16.msra.mxu0 %v12692_v59  ;;  %7409 = vmatpush1.bf16.msra.mxu1 %v12692_v59 }
 0xd74   :  { %7149 = vmatprep.subr.bf16.mxu0 %v12696_v17  ;;  %7410 = vmatprep.subr.bf16.mxu1 %v12696_v17 }
 0xd75   :  { %v6823_v2 = vadd.f32 %v6822_v57, %v6821_v25  ;;  %v6691_v50 = vadd.f32 %v6690_v30, %v6689_v49  ;;  %v6670_v47 = vpop.permute.xlu0 %6669  ;;  %v6713_v10 = vadd.f32 %v6712_v48, %v6711_v1  ;;  %v6801_v56 = vadd.f32 %v6800_v51, %v6799_v62  ;;  %v12701_v25 = vld [vmem:[#allocation37 + $0x10] ss:$8 sps:$4 sm:$0xff]   ;;  %v12705_v49 = vld [vmem:[#allocation37 + $0x24] ss:$8 sps:$4 sm:$0xff]   ;;  %v12709_v62 = vld [vmem:[#allocation37 + $0x20] ss:$8 sps:$4 sm:$0xff]  }
 0xd76   :  { %v6672_v42 = vadd.f32 %v6670_v47, %v6645_v44  ;;  %v12713_v1 = vld [vmem:[#allocation37 + $0x34] ss:$8 sps:$4 sm:$0xff]   ;;  %v12724_v44 = vld [vmem:[#allocation37 + $0x40] ss:$8 sps:$4 sm:$0xff]  }
 0xd77   :  { %v6824_v24 = vrot.slane %v6823_v2, 2  ;;  %v6692_v16 = vrot.slane %v6691_v50, 1  ;;  %v6714_v8 = vrot.slane %v6713_v10, 1  ;;  %v6802_v6 = vrot.slane %v6801_v56, 2  ;;  %7150 = vmatpush1.bf16.msra.mxu0 %v12701_v25  ;;  %7411 = vmatpush1.bf16.msra.mxu1 %v12701_v25 }
 0xd78   :  { %v6774_v55 = vpop.permute.xlu1 %6773  ;;  %7151 = vmatprep.subr.bf16.mxu0 %v12705_v49  ;;  %7412 = vmatprep.subr.bf16.mxu1 %v12705_v49 }
 0xd79   :  { %v6825_v19 = vadd.f32 %v6824_v24, %v6823_v2  ;;  %v6693_v22 = vadd.f32 %v6692_v16, %v6691_v50  ;;  %v6715_v53 = vadd.f32 %v6714_v8, %v6713_v10  ;;  %v6803_v32 = vadd.f32 %v6802_v6, %v6801_v56  ;;  %v12726_v24 = vld [vmem:[#allocation37 + $0x44] ss:$8 sps:$4 sm:$0xff]   ;;  %v12732_v16 = vld [vmem:[#allocation37 + $0x50] ss:$8 sps:$4 sm:$0xff]   ;;  %v6838_v8 = vld [vmem:[#allocation34] sm:$0x1] }
 0xd7a   :  { %v6776_v13 = vadd.f32 %v6774_v55, %v6749_v12 }
 0xd7b   :  { %v6826_v63 = vrot.slane %v6825_v19, 1  ;;  %v6694_v33 = vadd.f32 %v6693_v22, %v6672_v42  ;;  %6717 = vrot.lane.b32.xlu0 %v6715_v53, %s10200_s30  ;;  %v6804_v0 = vrot.slane %v6803_v32, 1  ;;  %7152 = vmatpush1.bf16.msra.mxu0 %v12709_v62  ;;  %v12742_v22 = vld [vmem:[#allocation37 + $0x64] ss:$8 sps:$4 sm:$0xff]   ;;  %v6842_v53 = vld [vmem:[#allocation36] sm:$0x1] }
 0xd7c   :  { %7413 = vmatpush1.bf16.msra.mxu1 %v12709_v62  ;;  %7153 = vmatprep.subr.bf16.mxu0 %v12713_v1 }
 0xd7d   :  { %v6827_v11 = vadd.f32 %v6826_v63, %v6825_v19  ;;  %v6805_v3 = vadd.f32 %v6804_v0, %v6803_v32  ;;  %7414 = vmatprep.subr.bf16.mxu1 %v12713_v1  ;;  %v12740_v19 = vld [vmem:[#allocation37 + $0x60] ss:$8 sps:$4 sm:$0xff]  }
 0xd7f   :  { %6829 = vrot.lane.b32.xlu1 %v6827_v11, %s10200_s30  ;;  %v6806_v43 = vadd.f32 %v6805_v3, %v6776_v13  ;;  %7154 = vmatpush1.bf16.msra.mxu0 %v12717_v61  ;;  %v12759_v11 = vld [vmem:[#allocation37 + $0x70] ss:$8 sps:$4 sm:$0xff]   ;;  %v12761_v13 = vld [vmem:[#allocation37 + $0x74] ss:$8 sps:$4 sm:$0xff]  }
 0xd80   :  { %7415 = vmatpush1.bf16.msra.mxu1 %v12717_v61  ;;  %7155 = vmatprep.subr.bf16.mxu0 %v12726_v24  ;;  %13566 = vst [vmem:[#allocation61_spill] sm:$0xff] %v12761_v13 }
 0xd81   :  { %7416 = vmatprep.subr.bf16.mxu1 %v12726_v24 }
 0xd83   :  { %7156 = vmatpush1.bf16.msra.mxu0 %v12724_v44 }
 0xd84   :  { %7417 = vmatpush1.bf16.msra.mxu1 %v12724_v44  ;;  %7157 = vmatprep.subr.bf16.mxu0 %v12734_v35 }
 0xd85   :  { %7418 = vmatprep.subr.bf16.mxu1 %v12734_v35 }
 0xd87   :  { %7158 = vmatpush1.bf16.msra.mxu0 %v12732_v16 }
 0xd88   :  { %7419 = vmatpush1.bf16.msra.mxu1 %v12732_v16  ;;  %7159 = vmatprep.subr.bf16.mxu0 %v12742_v22 }
 0xd89   :  { %7420 = vmatprep.subr.bf16.mxu1 %v12742_v22 }
 0xd8b   :  { %7160 = vmatpush1.bf16.msra.mxu0 %v12740_v19 }
 0xd8c   :  { %7421 = vmatpush1.bf16.msra.mxu1 %v12740_v19  ;;  %7161 = vmatprep.subr.bf16.mxu0 %v12761_v13 }
 0xd8d   :  { %7422 = vmatprep.subr.bf16.mxu1 %v12761_v13 }
 0xd8f   :  { %7162 = vmatpush1.bf16.msra.mxu0 %v12759_v11 }
 0xd90   :  { %7605 = vmatprep.subr.bf16.mxu0 %v12694_v52  ;;  %7423 = vmatpush1.bf16.msra.mxu1 %v12759_v11 }
 0xd91   :  { %9237 = vmatprep.subr.bf16.mxu1 %v12694_v52 }
 0xded   :  { %v6718_v57 = vpop.permute.xlu0 %6717 }
 0xdee   :  { %v6720_v30 = vadd.f32 %v6718_v57, %v6694_v33 }
 0xdf0   :  { %v6833_v20 = vmul.f32 0.00390625, %v6720_v30 }
 0xdf1   :  { %v6830_v48 = vpop.permute.xlu1 %6829 }
 0xdf2   :  { %v6832_v51 = vadd.f32 %v6830_v48, %v6806_v43  ;;  %v6835_v2 = vmul.f32 %v6833_v20, %v6833_v20 }
 0xdf4   :  { %v6834_v50 = vmul.f32 0.00390625, %v6832_v51 }
 0xdf6   :  { %v6836_v47 = vsub.f32 %v6834_v50, %v6835_v2 }
 0xdf8   :  { %v6837_v10 = vmax.f32 %v6836_v47, 0.0 }
 0xdfa   :  { %v6839_v56 = vadd.f32 1e-05, %v6837_v10 }
 0xdfc   :  { %9588 = vrsqrt.f32 %v6839_v56 }
 0xe06   :  { %v9589_v6 = vpop.eup %9588 }
 0xe07   :  { %v6841_v42 = vmul.f32 %v9589_v6, %v6838_v8 }
 0xe09   :  { %v6843_v32 = vmul.f32 %v6841_v42, %v6833_v20  ;;  %v12745_v55 = vrot.slane %v6841_v42, %v13389_v46 }
 0xe0b   :  { %v6844_v63 = vsub.f32 %v6842_v53, %v6843_v32  ;;  %6897 = vrot.lane.b32.xlu0 %v12745_v55, %s10200_s30  ;;  %v6944_v33 = vmul.f32 %v12745_v55, %v12616_v5  ;;  %v6943_v12 = vmul.f32 %v12745_v55, %v12610_v28  ;;  %v6946_v0 = vmul.f32 %v12614_v36, %v12745_v55 }
 0xe0c   :  { %v6945_v3 = vmul.f32 %v12608_v9, %v12745_v55  ;;  %v6852_v43 = vmul.f32 %v12745_v55, %v12534_v27  ;;  %v6851_v57 = vmul.f32 %v12745_v55, %v12526_v14  ;;  %v6948_v30 = vmul.f32 %v12745_v55, %v12660_v7 }
 0xe0d   :  { %v12772_v20 = vrot.slane %v6844_v63, %v13389_v46  ;;  %v6947_v48 = vmul.f32 %v12745_v55, %v12650_v4  ;;  %v6854_v51 = vmul.f32 %v12532_v40, %v12745_v55  ;;  %v6853_v2 = vmul.f32 %v12524_v34, %v12745_v55 }
 0xe0e   :  { %v6950_v50 = vmul.f32 %v12658_v39, %v12745_v55  ;;  %v6949_v46 = vmul.f32 %v12647_v60, %v12745_v55  ;;  %v6856_v47 = vmul.f32 %v12745_v55, %v12576_v54  ;;  %v6855_v10 = vmul.f32 %v12745_v55, %v12565_v41 }
 0xe0f   :  { %6908 = vrot.lane.b32.xlu1 %v12772_v20, %s10200_s30  ;;  %v6952_v56 = vadd.f32 %v6944_v33, %v12772_v20  ;;  %v6951_v8 = vadd.f32 %v6943_v12, %v12772_v20  ;;  %v6954_v6 = vadd.f32 %v6946_v0, %v12772_v20  ;;  %v6953_v42 = vadd.f32 %v6945_v3, %v12772_v20 }
 0xe10   :  { %v6866_v53 = vadd.f32 %v12772_v20, %v6852_v43  ;;  %v6865_v32 = vadd.f32 %v12772_v20, %v6851_v57  ;;  %v12799_v63 = vadd.f32 %v6948_v30, %v12772_v20  ;;  %v12802_v29 = vadd.f32 %v6947_v48, %v12772_v20 }
 0xe11   :  { %vm6960_vm2 = vcmp.ge.f32.partialorder %v6952_v56, 0.0  ;;  %v6968_v33 = vmul.f32 0.01, %v6952_v56  ;;  %vm6959_vm15 = vcmp.ge.f32.partialorder %v6951_v8, 0.0  ;;  %v6967_v12 = vmul.f32 0.01, %v6951_v8 }
 0xe12   :  { %vm6962_vm6 = vcmp.ge.f32.partialorder %v6954_v6, 0.0  ;;  %v6970_v0 = vmul.f32 0.01, %v6954_v6  ;;  %v6969_v3 = vmul.f32 0.01, %v6953_v42  ;;  %vm6874_vm4 = vcmp.ge.f32.partialorder %v6866_v53, 0.0 }
 0xe13   :  { %v12807_v43 = vsel %vm6960_vm2, %v6952_v56, %v6968_v33  ;;  %v12809_v57 = vsel %vm6959_vm15, %v6951_v8, %v6967_v12  ;;  %v6882_v30 = vmul.f32 0.01, %v6866_v53  ;;  %vm6961_vm11 = vcmp.ge.f32.partialorder %v6953_v42, 0.0  ;;  %vm13571_vm2 = vmmov %vm13569_vm1 }
 0xe14   :  { %13567 = vst [vmem:[#allocation64_spill] sm:$0xff] %v12807_v43  ;;  %7270 = vrot.lane.b32.xlu1 %v12807_v43, %s10200_s30  ;;  %7268 = vrot.lane.b32.xlu0 %v12809_v57, %s10200_s30  ;;  %vm6873_vm0 = vcmp.ge.f32.partialorder %v6865_v32, 0.0  ;;  %v6881_v48 = vmul.f32 0.01, %v6865_v32  ;;  %v12816_v13 = vsel %vm6962_vm6, %v6954_v6, %v6970_v0  ;;  %v6868_v8 = vadd.f32 %v12772_v20, %v6854_v51  ;;  %vm13572_vm15 = vmmov %vm13569_vm1 }
 0xe15   :  { %v6890_v31 = vsel %vm6874_vm4, %v6866_v53, %v6882_v30  ;;  %v6867_v33 = vadd.f32 %v12772_v20, %v6853_v2  ;;  %v12822_v12 = vsel %vm6961_vm11, %v6953_v42, %v6969_v3  ;;  %v12827_v43 = vadd.f32 %v6950_v50, %v12772_v20  ;;  %vm13573_vm6 = vmmov %vm13569_vm1 }
 0xe16   :  { %7024 = vst.msk [vmem:[#allocation2 + $0x30] sm:$0xff] %vm13559_vm12, %v6890_v31  ;;  %v6889_v56 = vsel %vm6873_vm0, %v6865_v32, %v6881_v48  ;;  %v12830_v6 = vadd.f32 %v6949_v46, %v12772_v20  ;;  %v6870_v53 = vadd.f32 %v12772_v20, %v6856_v47  ;;  %vm6876_vm9 = vcmp.ge.f32.partialorder %v6868_v8, 0.0  ;;  %vm13574_vm4 = vmmov %vm13569_vm1 }
 0xe17   :  { %7679 = vst.msk [vmem:[#allocation3 + $0x10] sm:$0xff] %vm13568_vm7, %v6890_v31  ;;  %v6884_v31 = vmul.f32 0.01, %v6868_v8  ;;  %vm6875_vm13 = vcmp.ge.f32.partialorder %v6867_v33, 0.0  ;;  %v6883_v51 = vmul.f32 0.01, %v6867_v33  ;;  %v6869_v46 = vadd.f32 %v12772_v20, %v6855_v10  ;;  %vm13575_vm11 = vmmov %vm13569_vm1 }
 0xe18   :  { %7023 = vst.msk [vmem:[#allocation2] sm:$0xff] %vm13569_vm1, %v6889_v56  ;;  %7274 = vrot.lane.b32.xlu1 %v12816_v13, %s10200_s30  ;;  %7272 = vrot.lane.b32.xlu0 %v12822_v12, %s10200_s30  ;;  %vm6878_vm3 = vcmp.ge.f32.partialorder %v6870_v53, 0.0  ;;  %v6886_v42 = vmul.f32 0.01, %v6870_v53  ;;  %v6858_v47 = vmul.f32 %v12569_v21, %v12745_v55  ;;  %v6857_v0 = vmul.f32 %v12559_v18, %v12745_v55  ;;  %vm13576_vm0 = vmmov %vm13569_vm1 }
 0xe19   :  { %7678 = vst.msk [vmem:[#allocation3] sm:$0xff] %vm13570_vm14, %v6889_v56  ;;  %v6892_v2 = vsel %vm6876_vm9, %v6868_v8, %v6884_v31  ;;  %v6891_v50 = vsel %vm6875_vm13, %v6867_v33, %v6883_v51  ;;  %vm6877_vm12 = vcmp.ge.f32.partialorder %v6869_v46, 0.0  ;;  %v6885_v3 = vmul.f32 0.01, %v6869_v46  ;;  %vm13577_vm1 = vmmov %vm13576_vm0 }
 0xe1a   :  { %7026 = vst.msk [vmem:[#allocation2 + $0x90] sm:$0xff] %vm13571_vm2, %v6892_v2  ;;  %v6894_v32 = vsel %vm6878_vm3, %v6870_v53, %v6886_v42  ;;  %v6872_v30 = vadd.f32 %v12772_v20, %v6858_v47  ;;  %v6871_v10 = vadd.f32 %v12772_v20, %v6857_v0  ;;  %vm13578_vm14 = vmmov %vm13576_vm0  ;;  %v6972_v53 = vmul.f32 0.01, %v12799_v63 }
 0xe1b   :  { %7681 = vst.msk [vmem:[#allocation3 + $0x30] sm:$0xff] %vm13572_vm15, %v6892_v2  ;;  %v6893_v48 = vsel %vm6877_vm12, %v6869_v46, %v6885_v3  ;;  %vm13579_vm13 = vmmov %vm13576_vm0  ;;  %v6971_v31 = vmul.f32 0.01, %v12802_v29 }
 0xe1c   :  { %7025 = vst.msk [vmem:[#allocation2 + $0x60] sm:$0xff] %vm13573_vm6, %v6891_v50  ;;  %vm6880_vm7 = vcmp.ge.f32.partialorder %v6872_v30, 0.0  ;;  %v6888_v56 = vmul.f32 0.01, %v6872_v30  ;;  %vm6879_vm9 = vcmp.ge.f32.partialorder %v6871_v10, 0.0  ;;  %vm13580_vm3 = vmmov %vm13576_vm0  ;;  %vm6964_vm6 = vcmp.ge.f32.partialorder %v12799_v63, 0.0 }
 0xe1d   :  { %7680 = vst.msk [vmem:[#allocation3 + $0x20] sm:$0xff] %vm13574_vm4, %v6891_v50  ;;  %v6887_v8 = vmul.f32 0.01, %v6871_v10  ;;  %vm13581_vm2 = vmmov %vm13576_vm0  ;;  %vm6963_vm4 = vcmp.ge.f32.partialorder %v12802_v29, 0.0 }
 0xe1e   :  { %7028 = vst.msk [vmem:[#allocation2 + $0xf0] sm:$0xff] %vm13575_vm11, %v6894_v32  ;;  %v6896_v55 = vsel %vm6880_vm7, %v6872_v30, %v6888_v56  ;;  %vm13582_vm15 = vmmov %vm13576_vm0 }
 0xe1f   :  { %7683 = vst.msk [vmem:[#allocation3 + $0x50] sm:$0xff] %vm13576_vm0, %v6894_v32  ;;  %v6895_v33 = vsel %vm6879_vm9, %v6871_v10, %v6887_v8 }
 0xe20   :  { %7027 = vst.msk [vmem:[#allocation2 + $0xc0] sm:$0xff] %vm13577_vm1, %v6893_v48 }
 0xe21   :  { %7682 = vst.msk [vmem:[#allocation3 + $0x40] sm:$0xff] %vm13578_vm14, %v6893_v48  ;;  %vm13583_vm14 = vcmask 1048064  }
 0xe22   :  { %7030 = vst.msk [vmem:[#allocation2 + $0x150] sm:$0xff] %vm13579_vm13, %v6896_v55  ;;  %vm13584_vm9 = vmmov %vm13583_vm14 }
 0xe23   :  { %7685 = vst.msk [vmem:[#allocation3 + $0x70] sm:$0xff] %vm13580_vm3, %v6896_v55  ;;  %vm13585_vm3 = vmmov %vm13584_vm9 }
 0xe24   :  { %7029 = vst.msk [vmem:[#allocation2 + $0x120] sm:$0xff] %vm13581_vm2, %v6895_v33  ;;  %vm13586_vm2 = vmmov %vm13585_vm3 }
 0xe25   :  { %7684 = vst.msk [vmem:[#allocation3 + $0x60] sm:$0xff] %vm13582_vm15, %v6895_v33 }
 0xe7d   :  { %v12856_v20 = vpop.permute.xlu0 %6897 }
 0xe7e   :  { %v6901_v51 = vmul.f32 %v12856_v20, %v12534_v27  ;;  %v6900_v2 = vmul.f32 %v12856_v20, %v12526_v14  ;;  %v6903_v42 = vmul.f32 %v12532_v40, %v12856_v20  ;;  %v6902_v50 = vmul.f32 %v12524_v34, %v12856_v20 }
 0xe7f   :  { %v6905_v47 = vmul.f32 %v12856_v20, %v12576_v54  ;;  %v6904_v32 = vmul.f32 %v12856_v20, %v12565_v41  ;;  %v6907_v27 = vmul.f32 %v12569_v21, %v12856_v20  ;;  %v6906_v14 = vmul.f32 %v12559_v18, %v12856_v20 }
 0xe80   :  { %v6990_v58 = vmul.f32 %v12658_v39, %v12856_v20  ;;  %v6989_v37 = vmul.f32 %v12647_v60, %v12856_v20  ;;  %v7693_v60 = vld [vmem:[#allocation3 + $0x70] sm:$0xff] }
 0xe81   :  { %v12870_v46 = vpop.permute.xlu1 %6908 }
 0xe82   :  { %v6912_v0 = vadd.f32 %v12870_v46, %v6901_v51  ;;  %v6911_v40 = vadd.f32 %v12870_v46, %v6900_v2  ;;  %v6914_v34 = vadd.f32 %v12870_v46, %v6903_v42  ;;  %v6913_v3 = vadd.f32 %v12870_v46, %v6902_v50 }
 0xe83   :  { %v6916_v30 = vadd.f32 %v12870_v46, %v6905_v47  ;;  %v6915_v54 = vadd.f32 %v12870_v46, %v6904_v32  ;;  %v6918_v41 = vadd.f32 %v12870_v46, %v6907_v27  ;;  %v6917_v10 = vadd.f32 %v12870_v46, %v6906_v14 }
 0xe84   :  { %vm6920_vm11 = vcmp.ge.f32.partialorder %v6912_v0, 0.0  ;;  %v6928_v21 = vmul.f32 0.01, %v6912_v0  ;;  %vm6919_vm0 = vcmp.ge.f32.partialorder %v6911_v40, 0.0  ;;  %v6927_v18 = vmul.f32 0.01, %v6911_v40 }
 0xe85   :  { %vm6922_vm12 = vcmp.ge.f32.partialorder %v6914_v34, 0.0  ;;  %v6930_v48 = vmul.f32 0.01, %v6914_v34  ;;  %vm6921_vm7 = vcmp.ge.f32.partialorder %v6913_v3, 0.0  ;;  %v6929_v56 = vmul.f32 0.01, %v6913_v3 }
 0xe86   :  { %v6936_v8 = vsel %vm6920_vm11, %v6912_v0, %v6928_v21  ;;  %v6935_v55 = vsel %vm6919_vm0, %v6911_v40, %v6927_v18  ;;  %vm6924_vm1 = vcmp.ge.f32.partialorder %v6916_v30, 0.0  ;;  %v6932_v33 = vmul.f32 0.01, %v6916_v30  ;;  %vm13587_vm0 = vmmov %vm13586_vm2 }
 0xe87   :  { %7230 = vrot.lane.b32.xlu1 %v6936_v8, %s10200_s30  ;;  %7032 = vst.msk [vmem:[#allocation2 + $0x30] sm:$0xff] %vm13583_vm14, %v6936_v8  ;;  %7228 = vrot.lane.b32.xlu0 %v6935_v55, %s10200_s30  ;;  %v6938_v51 = vsel %vm6922_vm12, %v6914_v34, %v6930_v48  ;;  %v6937_v2 = vsel %vm6921_vm7, %v6913_v3, %v6929_v56  ;;  %vm6923_vm13 = vcmp.ge.f32.partialorder %v6915_v54, 0.0  ;;  %v6931_v42 = vmul.f32 0.01, %v6915_v54  ;;  %vm13588_vm12 = vmmov %vm13587_vm0 }
 0xe88   :  { %7031 = vst.msk [vmem:[#allocation2] sm:$0xff] %vm13584_vm9, %v6935_v55  ;;  %v6940_v50 = vsel %vm6924_vm1, %v6916_v30, %v6932_v33  ;;  %vm6926_vm15 = vcmp.ge.f32.partialorder %v6918_v41, 0.0  ;;  %v6934_v47 = vmul.f32 0.01, %v6918_v41  ;;  %vm6925_vm11 = vcmp.ge.f32.partialorder %v6917_v10, 0.0  ;;  %vm13589_vm7 = vmmov %vm13587_vm0  ;;  %v7689_v30 = vld [vmem:[#allocation3 + $0x30] sm:$0xff] }
 0xe89   :  { %7034 = vst.msk [vmem:[#allocation2 + $0x90] sm:$0xff] %vm13585_vm3, %v6938_v51  ;;  %v6939_v32 = vsel %vm6923_vm13, %v6915_v54, %v6931_v42  ;;  %v6933_v27 = vmul.f32 0.01, %v6917_v10  ;;  %v12898_v14 = vsel %vm6964_vm6, %v12799_v63, %v6972_v53  ;;  %v12903_v0 = vsel %vm6963_vm4, %v12802_v29, %v6971_v31  ;;  %vm13590_vm1 = vmmov %vm13587_vm0  ;;  %v7690_v54 = vld [vmem:[#allocation3 + $0x40] sm:$0xff] }
 0xe8a   :  { %7033 = vst.msk [vmem:[#allocation2 + $0x60] sm:$0xff] %vm13586_vm2, %v6937_v2  ;;  %v6942_v40 = vsel %vm6926_vm15, %v6918_v41, %v6934_v47  ;;  %v6974_v3 = vmul.f32 0.01, %v12827_v43  ;;  %v6973_v29 = vmul.f32 0.01, %v12830_v6  ;;  %vm6966_vm6 = vcmp.ge.f32.partialorder %v12827_v43, 0.0 }
 0xe8b   :  { %7036 = vst.msk [vmem:[#allocation2 + $0xf0] sm:$0xff] %vm13587_vm0, %v6940_v50  ;;  %7278 = vrot.lane.b32.xlu1 %v12898_v14, %s10200_s30  ;;  %7276 = vrot.lane.b32.xlu0 %v12903_v0, %s10200_s30  ;;  %v6941_v34 = vsel %vm6925_vm11, %v6917_v10, %v6933_v27  ;;  %vm6965_vm4 = vcmp.ge.f32.partialorder %v12830_v6, 0.0  ;;  %v12918_v41 = vld [vmem:[#allocation3 + $0x20] sm:$0xff]  ;;  %v7709_v18 = vrot.slane %v7689_v30, 1  ;;  %v7711_v48 = vrot.slane %v7690_v54, 1 }
 0xe8c   :  { %7035 = vst.msk [vmem:[#allocation2 + $0xc0] sm:$0xff] %vm13588_vm12, %v6939_v32  ;;  %v12921_v10 = vsel %vm6966_vm6, %v12827_v43, %v6974_v3  ;;  %v12924_v21 = vsel %vm6965_vm4, %v12830_v6, %v6973_v29  ;;  %v7707_v56 = vrot.slane %v12918_v41, 1  ;;  %vm13591_vm14 = vcmp.eq.s32.totalorder %v12136_v15, 1  ;;  %v7687_v29 = vld [vmem:[#allocation3 + $0x10] sm:$0xff] }
 0xe8d   :  { %7038 = vst.msk [vmem:[#allocation2 + $0x150] sm:$0xff] %vm13589_vm7, %v6942_v40  ;;  %v7712_v55 = vsel %vm5447_vm10, %v7709_v18, %v7711_v48  ;;  %vm13592_vm9 = vcmp.eq.s32.totalorder %v12124_v26, 1  ;;  %v6986_v15 = vmul.f32 %v12614_v36, %v12856_v20  ;;  %v6985_v26 = vmul.f32 %v12608_v9, %v12856_v20 }
 0xe8e   :  { %7037 = vst.msk [vmem:[#allocation2 + $0x120] sm:$0xff] %vm13590_vm1, %v6941_v34  ;;  %v7040_v53 = vld [vmem:[#allocation2 + $0x30] sm:$0xff]  ;;  %v7710_v33 = vsel %vm5447_vm10, %v7707_v56, %v7709_v18  ;;  %v7732_v42 = vsel %vm13591_vm14, %v7712_v55, 0.0  ;;  %v7705_v54 = vrot.slane %v7687_v29, 1  ;;  %vm13593_vm13 = vcmp.eq.s32.totalorder %v12165_v45, 1 }
 0xe8f   :  { %v7039_v63 = vld [vmem:[#allocation2] sm:$0xff]  ;;  %7234 = vrot.lane.b32.xlu1 %v6938_v51, %s10200_s30  ;;  %7232 = vrot.lane.b32.xlu0 %v6937_v2, %s10200_s30  ;;  %v12941_v2 = vld [vmem:[#allocation3 + $0x60] sm:$0xff]  ;;  %v6993_v3 = vadd.f32 %v6985_v26, %v12870_v46  ;;  %vm13594_vm3 = vcmp.eq.s32.totalorder %v12139_v38, 1  ;;  %v6987_v38 = vmul.f32 %v12856_v20, %v12650_v4  ;;  %vm13600_vm4 = vcmask 523264  }
 0xe90   :  { %v7047_v31 = vpack.c.bf16 %v7040_v53, %v7039_v63  ;;  %v7042_v43 = vld [vmem:[#allocation2 + $0x90] sm:$0xff]  ;;  %v7691_v51 = vld [vmem:[#allocation3 + $0x50] sm:$0xff]  ;;  %v6994_v53 = vadd.f32 %v6986_v15, %v12870_v46  ;;  %vm13601_vm14 = vmmov %vm13600_vm4 }
 0xe91   :  { %v7041_v8 = vld [vmem:[#allocation2 + $0x60] sm:$0xff]  ;;  %v7713_v47 = vrot.slane %v7691_v51, 1  ;;  %vm7001_vm15 = vcmp.ge.f32.partialorder %v6993_v3, 0.0 }
 0xe92   :  { %7180 = vmatmul.mubr.bf16.vlgmr.msra.gmra.mrb[144].mxu0 %v7047_v31  ;;  %v7048_v6 = vpack.c.bf16 %v7042_v43, %v7041_v8  ;;  %v7044_v63 = vld [vmem:[#allocation2 + $0xf0] sm:$0xff]  ;;  %v7010_v43 = vmul.f32 0.01, %v6994_v53  ;;  %vm7002_vm2 = vcmp.ge.f32.partialorder %v6994_v53, 0.0 }
 0xe93   :  { %7189 = vmatprep.mubr.bf16.mxu0 %v13388_v23  ;;  %7606 = vmatpush1.bf16.msra.mxu0 %v12692_v59  ;;  %v7043_v27 = vld [vmem:[#allocation2 + $0xc0] sm:$0xff]  ;;  %v7686_v31 = vld [vmem:[#allocation3] sm:$0xfe]  ;;  %v7714_v9 = vsel %vm5447_vm10, %v7711_v48, %v7713_v47  ;;  %v6988_v48 = vmul.f32 %v12856_v20, %v12660_v7  ;;  %v7708_v7 = vsel %vm5447_vm10, %v7705_v54, %v7707_v56 }
 0xe94   :  { %7282 = vrot.lane.b32.xlu1 %v12921_v10, %s10200_s30  ;;  %7280 = vrot.lane.b32.xlu0 %v12924_v21, %s10200_s30  ;;  %v7049_v30 = vpack.c.bf16 %v7044_v63, %v7043_v27  ;;  %v7704_v18 = vrot.slane %v7686_v31, 1  ;;  %v6983_v27 = vmul.f32 %v12856_v20, %v12610_v28  ;;  %v7730_v41 = vsel %vm5431_vm5, %v7708_v7, 0.0  ;;  %v13595_v28 = vld [vmem:[#allocation61_spill] sm:$0xff] }
 0xe95   :  { %7607 = vmatprep.subr.bf16.mxu0 %v12696_v17  ;;  %v7045_v45 = vld [vmem:[#allocation2 + $0x120] sm:$0xff]  ;;  %v6996_v55 = vadd.f32 %v6988_v48, %v12870_v46  ;;  %v13596_v48 = vld [vmem:[#allocation60_spill] sm:$0xff] }
 0xe96   :  { %vm13597_vm1 = vcmp.eq.s32.totalorder %v13596_v48, 1 }
 0xe97   :  { %7608 = vmatpush1.bf16.msra.mxu0 %v12701_v25  ;;  %v7012_v15 = vmul.f32 0.01, %v6996_v55  ;;  %vm7004_vm11 = vcmp.ge.f32.partialorder %v6996_v55, 0.0 }
 0xe98   :  { %7238 = vrot.lane.b32.xlu1 %v6940_v50, %s10200_s30  ;;  %7236 = vrot.lane.b32.xlu0 %v6939_v32, %s10200_s30  ;;  %v7731_v50 = vsel %vm13592_vm9, %v7710_v33, 0.0  ;;  %v7715_v32 = vrot.slane %v12941_v2, 1  ;;  %v12982_v33 = vsel %vm7002_vm2, %v6994_v53, %v7010_v43  ;;  %v6991_v53 = vadd.f32 %v6983_v27, %v12870_v46 }
 0xe99   :  { %7609 = vmatprep.subr.bf16.mxu0 %v12705_v49 }
 0xe9a   :  { %7190 = vmatmul.mubr.bf16.gmra.mrb[148].mxu0 %v7048_v6  ;;  %v7716_v36 = vsel %vm5447_vm10, %v7713_v47, %v7715_v32  ;;  %v7046_v6 = vld [vmem:[#allocation2 + $0x150] sm:$0xff]  ;;  %v6984_v47 = vmul.f32 %v12856_v20, %v12616_v5  ;;  %v13016_v5 = vsel %vm7004_vm11, %v6996_v55, %v7012_v15  ;;  %v7007_v31 = vmul.f32 0.01, %v6991_v53  ;;  %v7271_v55 = vpop.permute.xlu1 %7270 }
 0xe9b   :  { %7199 = vmatprep.mubr.bf16.mxu0 %v13388_v23  ;;  %7610 = vmatpush1.bf16.msra.mxu0 %v12709_v62  ;;  %v7734_v8 = vsel %vm13593_vm13, %v7716_v36, 0.0  ;;  %v7050_v4 = vpack.c.bf16 %v7046_v6, %v7045_v45  ;;  %v6997_v36 = vadd.f32 %v6989_v37, %v12870_v46  ;;  %vm6999_vm5 = vcmp.ge.f32.partialorder %v6991_v53, 0.0  ;;  %v13598_v6 = vld [vmem:[#allocation67_spill] sm:$0xff]  ;;  %vm13604_vm13 = vmmov %vm13600_vm4 }
 0xe9c   :  { %7791 = vrot.lane.b32.xlu1 %v7732_v42, %s10200_s30  ;;  %7789 = vrot.lane.b32.xlu0 %v7731_v50, %s10200_s30  ;;  %v7706_v42 = vsel %vm5447_vm10, %v7704_v18, %v7705_v54  ;;  %v6995_v50 = vadd.f32 %v6987_v38, %v12870_v46  ;;  %v6992_v26 = vadd.f32 %v6984_v47, %v12870_v46  ;;  %v7694_v18 = vld [vmem:[#allocation3 + $0x80] sm:$0x1]  ;;  %vm13599_vm6 = vcmp.eq.s32.totalorder %v13598_v6, 1 }
 0xe9d   :  { %7611 = vmatprep.subr.bf16.mxu0 %v12713_v1  ;;  %v7729_v63 = vsel %vm5430_vm8, %v7706_v42, 0.0  ;;  %v7015_v20 = vsel %vm6999_vm5, %v6991_v53, %v7007_v31  ;;  %v7013_v54 = vmul.f32 0.01, %v6997_v36  ;;  %vm7005_vm7 = vcmp.ge.f32.partialorder %v6997_v36, 0.0  ;;  %v7269_v42 = vpop.permute.xlu0 %7268 }
 0xe9e   :  { %v7011_v56 = vmul.f32 0.01, %v6995_v50  ;;  %vm7003_vm0 = vcmp.ge.f32.partialorder %v6995_v50, 0.0  ;;  %vm7000_vm8 = vcmp.ge.f32.partialorder %v6992_v26, 0.0 }
 0xe9f   :  { %7612 = vmatpush1.bf16.msra.mxu0 %v12717_v61  ;;  %v13032_v43 = vsel %vm7005_vm7, %v6997_v36, %v7013_v54 }
 0xea0   :  { %7242 = vrot.lane.b32.xlu1 %v6942_v40, %s10200_s30  ;;  %7240 = vrot.lane.b32.xlu0 %v6941_v34, %s10200_s30  ;;  %v7733_v40 = vsel %vm13594_vm3, %v7714_v9, 0.0  ;;  %v7009_v34 = vmul.f32 0.01, %v6993_v3  ;;  %v13018_v29 = vsel %vm7003_vm0, %v6995_v50, %v7011_v56  ;;  %v7275_v50 = vpop.permute.xlu1 %7274  ;;  %vm13605_vm3 = vmmov %vm13600_vm4  ;;  %v13609_v56 = vld [vmem:[#allocation64_spill] sm:$0xff] }
 0xea1   :  { %7613 = vmatprep.subr.bf16.mxu0 %v12726_v24  ;;  %vm13608_vm11 = vmmov %vm13605_vm3 }
 0xea2   :  { %7200 = vmatmul.mubr.bf16.gmra.mrb[152].mxu0 %v7049_v30  ;;  %v12984_v51 = vsel %vm7001_vm15, %v6993_v3, %v7009_v34  ;;  %v7008_v3 = vmul.f32 0.01, %v6992_v26  ;;  %v6998_v30 = vadd.f32 %v6990_v58, %v12870_v46  ;;  %v7717_v46 = vrot.slane %v7693_v60, 1  ;;  %vm13610_vm0 = vmmov %vm13605_vm3 }
 0xea3   :  { %7209 = vmatprep.mubr.bf16.mxu0 %v13388_v23  ;;  %7614 = vmatpush1.bf16.msra.mxu0 %v12724_v44  ;;  %vm13614_vm7 = vmmov %vm13610_vm0 }
 0xea4   :  { %7795 = vrot.lane.b32.xlu1 %v7734_v8, %s10200_s30  ;;  %7793 = vrot.lane.b32.xlu0 %v7733_v40, %s10200_s30  ;;  %v7016_v39 = vsel %vm7000_vm8, %v6992_v26, %v7008_v3  ;;  %v7014_v9 = vmul.f32 0.01, %v6998_v30  ;;  %vm7006_vm12 = vcmp.ge.f32.partialorder %v6998_v30, 0.0  ;;  %v7719_v8 = vrot.slane %v7694_v18, 1 }
 0xea5   :  { %7615 = vmatprep.subr.bf16.mxu0 %v12734_v35  ;;  %v7718_v34 = vsel %vm5447_vm10, %v7715_v32, %v7717_v46 }
 0xea6   :  { %v13030_v40 = vsel %vm7006_vm12, %v6998_v30, %v7014_v9  ;;  %v7735_v38 = vsel %vm13599_vm6, %v7718_v34, 0.0  ;;  %vm13613_vm12 = vmmov %vm13610_vm0 }
 0xea7   :  { %7616 = vmatpush1.bf16.msra.mxu0 %v12732_v16 }
 0xea8   :  { %7751 = vrot.lane.b32.xlu1 %v12982_v33, %s10200_s30  ;;  %7749 = vrot.lane.b32.xlu0 %v12984_v51, %s10200_s30 }
 0xea9   :  { %7617 = vmatprep.subr.bf16.mxu0 %v12742_v22 }
 0xeaa   :  { %7210 = vmatmul.mubr.bf16.gmra.mrb[156].mxu0 %v7050_v4  ;;  %v7273_v4 = vpop.permute.xlu0 %7272 }
 0xeab   :  { %7618 = vmatpush1.bf16.msra.mxu0 %v12740_v19  ;;  %7637 = vmatprep.mubr.bf16.mxu0 %v13388_v23 }
 0xeac   :  { %7787 = vrot.lane.b32.xlu1 %v7730_v41, %s10200_s30  ;;  %7785 = vrot.lane.b32.xlu0 %v7729_v63, %s10200_s30 }
 0xead   :  { %7619 = vmatprep.subr.bf16.mxu0 %v13595_v28 }
 0xeaf   :  { %7620 = vmatpush1.bf16.msra.mxu0 %v12759_v11 }
 0xeb0   :  { %7755 = vrot.lane.b32.xlu1 %v13016_v5, %s10200_s30  ;;  %7753 = vrot.lane.b32.xlu0 %v13018_v29, %s10200_s30 }
 0xeb1   :  { %7925 = vmatprep.subr.bf16.mxu0 %v12694_v52  ;;  %v7720_v52 = vsel %vm5447_vm10, %v7717_v46, %v7719_v8  ;;  %vm13602_vm10 = vcmask 1048064  }
 0xeb2   :  { %v7736_v45 = vsel %vm13597_vm1, %v7720_v52, 0.0  ;;  %vm13603_vm9 = vmmov %vm13602_vm10 }
 0xeb3   :  { %vm13606_vm2 = vmmov %vm13603_vm9 }
 0xeb4   :  { %7747 = vrot.lane.b32.xlu1 %v7016_v39, %s10200_s30  ;;  %7745 = vrot.lane.b32.xlu0 %v7015_v20, %s10200_s30  ;;  %vm13607_vm15 = vmmov %vm13606_vm2 }
 0xeb5   :  { %vm13611_vm8 = vmmov %vm13606_vm2 }
 0xeb6   :  { %vm13612_vm5 = vmmov %vm13606_vm2 }
 0xeb7   :  { %vm13615_vm1 = vmmov %vm13606_vm2 }
 0xeb8   :  { %7759 = vrot.lane.b32.xlu1 %v13030_v40, %s10200_s30  ;;  %7757 = vrot.lane.b32.xlu0 %v13032_v43, %s10200_s30  ;;  %vm13616_vm6 = vmmov %vm13615_vm1 }
 0xebc   :  { %7799 = vrot.lane.b32.xlu1 %v7736_v45, %s10200_s30  ;;  %7797 = vrot.lane.b32.xlu0 %v7735_v38, %s10200_s30  ;;  %s10229_s30 = smov [#allocation40]  }
 0xebd   :  { %s8145_s11 = sshll.u32 %s10229_s30, 4  ;;  %s8146_s11 = int_to_ptr.vmem [resolvable:$true] %s8145_s11 }
 0xebe   :  { %s10148_s28 = scalar_lea.vmem %s8146_s11, 8192  ;;  %p10153_p3 = scmp.lt.s32.totalorder %s8146_s11, %s8146_s11 }
 0xebf   :  { %p10149_p2 = scmp.ne.s32.totalorder %s8146_s11, %s10148_s28  ;;  %p10154_p4 = scmp.lt.s32.totalorder %s10148_s28, %s10148_s28 }
 0xec1   :  { %p10155_p5 = por %p10154_p4, %p10153_p3 }
 0xec3   :  { %p10156_p6 = pnand %p10155_p5, %p10149_p2 }
 0xef9   :  { %v7231_v7 = vpop.permute.xlu1 %7230  ;;  %v7229_v47 = vpop.permute.xlu0 %7228 }
 0xefa   :  { %7253 = vst.msk [vmem:[#allocation2 + $0x30] sm:$0xff] %vm13600_vm4, %v7231_v7  ;;  %vm13617_vm4 = vmmov %vm13610_vm0 }
 0xefb   :  { %7252 = vst.msk [vmem:[#allocation2] sm:$0xff] %vm13601_vm14, %v7229_v47  ;;  %vm13618_vm14 = vmmov %vm13610_vm0 }
 0xefc   :  { %7293 = vst.msk [vmem:[#allocation2 + $0x30] sm:$0xff] %vm13602_vm10, %v7271_v55  ;;  %vm13619_vm10 = vmmov %vm13615_vm1 }
 0xefd   :  { %7292 = vst.msk [vmem:[#allocation2] sm:$0xff] %vm13603_vm9, %v7269_v42  ;;  %v7279_v2 = vpop.permute.xlu1 %7278  ;;  %v7277_v32 = vpop.permute.xlu0 %7276  ;;  %vm13620_vm9 = vmmov %vm13615_vm1 }
 0xf01   :  { %v7235_v27 = vpop.permute.xlu1 %7234  ;;  %v7233_v63 = vpop.permute.xlu0 %7232 }
 0xf02   :  { %7255 = vst.msk [vmem:[#allocation2 + $0x90] sm:$0xff] %vm13604_vm13, %v7235_v27  ;;  %vm13621_vm13 = vmmov %vm13610_vm0 }
 0xf03   :  { %7254 = vst.msk [vmem:[#allocation2 + $0x60] sm:$0xff] %vm13605_vm3, %v7233_v63  ;;  %v7301_v26 = vld [vmem:[#allocation2 + $0x30] sm:$0xff]  ;;  %vm13622_vm3 = vmmov %vm13610_vm0 }
 0xf04   :  { %v7300_v15 = vld [vmem:[#allocation2] sm:$0xff]  ;;  %7295 = vst.msk [vmem:[#allocation2 + $0x90] sm:$0xff] %vm13606_vm2, %v7275_v50  ;;  %vm13623_vm2 = vmmov %vm13615_vm1 }
 0xf05   :  { %7294 = vst.msk [vmem:[#allocation2 + $0x60] sm:$0xff] %vm13607_vm15, %v7273_v4  ;;  %v7308_v41 = vpack.c.bf16 %v7301_v26, %v7300_v15  ;;  %vm13624_vm15 = vmmov %vm13615_vm1 }
 0xf06   :  { %7481 = vst.msk [vmem:[#allocation2] sm:$0xff] %vm13608_vm11, %v12809_v57  ;;  %v7283_v53 = vpop.permute.xlu1 %7282  ;;  %v7281_v58 = vpop.permute.xlu0 %7280  ;;  %vm13625_vm11 = vmmov %vm13610_vm0 }
 0xf07   :  { %7482 = vst.msk [vmem:[#allocation2 + $0x30] sm:$0xff] %vm13610_vm0, %v13609_v56  ;;  %7441 = vmatmul.mubr.bf16.vlgmr.msra.gmra.mrb[144].mxu1 %v7308_v41 }
 0xf08   :  { %7489 = vst.msk [vmem:[#allocation2] sm:$0xff] %vm13611_vm8, %v7015_v20  ;;  %9245 = vmatpush1.bf16.msra.mxu1 %v12692_v59  ;;  %7450 = vmatprep.mubr.bf16.mxu1 %v13388_v23  ;;  %vm13626_vm8 = vmmov %vm13615_vm1 }
 0xf09   :  { %7490 = vst.msk [vmem:[#allocation2 + $0x30] sm:$0xff] %vm13612_vm5, %v7016_v39  ;;  %9238 = vmatprep.subr.bf16.mxu1 %v12696_v17  ;;  %vm13627_vm5 = vmmov %vm13615_vm1 }
 0xf0a   :  { %v7239_v37 = vpop.permute.xlu1 %7238  ;;  %v7237_v3 = vpop.permute.xlu0 %7236 }
 0xf0b   :  { %7257 = vst.msk [vmem:[#allocation2 + $0xf0] sm:$0xff] %vm13613_vm12, %v7239_v37  ;;  %v7303_v31 = vld [vmem:[#allocation2 + $0x90] sm:$0xff]  ;;  %vm13628_vm12 = vmmov %vm13610_vm0 }
 0xf0c   :  { %7256 = vst.msk [vmem:[#allocation2 + $0xc0] sm:$0xff] %vm13614_vm7, %v7237_v3  ;;  %9246 = vmatpush1.bf16.msra.mxu1 %v12701_v25  ;;  %v7302_v57 = vld [vmem:[#allocation2 + $0x60] sm:$0xff]  ;;  %vm13629_vm7 = vmmov %vm13610_vm0 }
 0xf0d   :  { %7297 = vst.msk [vmem:[#allocation2 + $0xf0] sm:$0xff] %vm13615_vm1, %v7279_v2  ;;  %v7309_v30 = vpack.c.bf16 %v7303_v31, %v7302_v57  ;;  %9239 = vmatprep.subr.bf16.mxu1 %v12705_v49 }
 0xf0e   :  { %7296 = vst.msk [vmem:[#allocation2 + $0xc0] sm:$0xff] %vm13616_vm6, %v7277_v32  ;;  %v7792_v20 = vpop.permute.xlu1 %7791  ;;  %v7790_v9 = vpop.permute.xlu0 %7789  ;;  %vm13630_vm6 = vmmov %vm13615_vm1  ;;  %v13150_v32 = vld [vmem:[#allocation39] ss:$0 sm:$0xff] }
 0xf0f   :  { %7483 = vst.msk [vmem:[#allocation2 + $0x60] sm:$0xff] %vm13617_vm4, %v12822_v12  ;;  %v7497_v36 = vld [vmem:[#allocation2] sm:$0xff]  ;;  %7451 = vmatmul.mubr.bf16.gmra.mrb[148].mxu1 %v7309_v30  ;;  %vm13631_vm4 = vmmov %vm13610_vm0 }
 0xf10   :  { %7484 = vst.msk [vmem:[#allocation2 + $0x90] sm:$0xff] %vm13618_vm14, %v12816_v13  ;;  %v7498_v60 = vld [vmem:[#allocation2 + $0x30] sm:$0xff]  ;;  %9247 = vmatpush1.bf16.msra.mxu1 %v12709_v62  ;;  %7460 = vmatprep.mubr.bf16.mxu1 %v13388_v23  ;;  %vm13632_vm14 = vmmov %vm13610_vm0 }
 0xf11   :  { %7491 = vst.msk [vmem:[#allocation2 + $0x60] sm:$0xff] %vm13619_vm10, %v12984_v51  ;;  %v7505_v39 = vpack.c.bf16 %v7498_v60, %v7497_v36  ;;  %9240 = vmatprep.subr.bf16.mxu1 %v12713_v1  ;;  %vm13633_vm10 = vmmov %vm13615_vm1 }
 0xf12   :  { %7492 = vst.msk [vmem:[#allocation2 + $0x90] sm:$0xff] %vm13620_vm9, %v12982_v33  ;;  %v7243_v13 = vpop.permute.xlu1 %7242  ;;  %v7241_v12 = vpop.permute.xlu0 %7240  ;;  %vm13634_vm9 = vmmov %vm13615_vm1 }
 0xf13   :  { %7638 = vmatmul.mubr.bf16.vlgmr.msra.gmra.mrb[160].mxu0 %v7505_v39  ;;  %7259 = vst.msk [vmem:[#allocation2 + $0x150] sm:$0xff] %vm13621_vm13, %v7243_v13  ;;  %vm13635_vm13 = vmmov %vm13610_vm0 }
 0xf14   :  { %7926 = vmatpush1.bf16.msra.mxu0 %v12692_v59  ;;  %7647 = vmatprep.mubr.bf16.mxu0 %v13388_v23  ;;  %7258 = vst.msk [vmem:[#allocation2 + $0x120] sm:$0xff] %vm13622_vm3, %v7241_v12  ;;  %v7305_v51 = vld [vmem:[#allocation2 + $0xf0] sm:$0xff]  ;;  %vm13636_vm3 = vmmov %vm13610_vm0 }
 0xf15   :  { %7927 = vmatprep.subr.bf16.mxu0 %v12696_v17  ;;  %9248 = vmatpush1.bf16.msra.mxu1 %v12717_v61  ;;  %v7304_v33 = vld [vmem:[#allocation2 + $0xc0] sm:$0xff]  ;;  %7299 = vst.msk [vmem:[#allocation2 + $0x150] sm:$0xff] %vm13623_vm2, %v7283_v53  ;;  %vm13637_vm2 = vmmov %vm13615_vm1 }
 0xf16   :  { %7298 = vst.msk [vmem:[#allocation2 + $0x120] sm:$0xff] %vm13624_vm15, %v7281_v58  ;;  %v7310_v59 = vpack.c.bf16 %v7305_v51, %v7304_v33  ;;  %9241 = vmatprep.subr.bf16.mxu1 %v12726_v24  ;;  %v7796_v46 = vpop.permute.xlu1 %7795  ;;  %vm13638_vm15 = vmmov %vm13615_vm1 }
 0xf17   :  { %7485 = vst.msk [vmem:[#allocation2 + $0xc0] sm:$0xff] %vm13625_vm11, %v12903_v0  ;;  %v7794_v0 = vpop.permute.xlu0 %7793  ;;  %vm13639_vm11 = vmmov %vm13610_vm0 }
 0xf18   :  { %7486 = vst.msk [vmem:[#allocation2 + $0xf0] sm:$0xff] %vm13610_vm0, %v12898_v14  ;;  %v7499_v17 = vld [vmem:[#allocation2 + $0x60] sm:$0xff]  ;;  %7928 = vmatpush1.bf16.msra.mxu0 %v12701_v25  ;;  %7461 = vmatmul.mubr.bf16.gmra.mrb[152].mxu1 %v7310_v59 }
 0xf19   :  { %v7500_v54 = vld [vmem:[#allocation2 + $0x90] sm:$0xff]  ;;  %7493 = vst.msk [vmem:[#allocation2 + $0xc0] sm:$0xff] %vm13626_vm8, %v13018_v29  ;;  %7929 = vmatprep.subr.bf16.mxu0 %v12705_v49  ;;  %9249 = vmatpush1.bf16.msra.mxu1 %v12724_v44  ;;  %vm13640_vm8 = vmmov %vm13615_vm1 }
 0xf1a   :  { %7494 = vst.msk [vmem:[#allocation2 + $0xf0] sm:$0xff] %vm13627_vm5, %v13016_v5  ;;  %v7506_v18 = vpack.c.bf16 %v7500_v54, %v7499_v17  ;;  %9242 = vmatprep.subr.bf16.mxu1 %v12734_v35  ;;  %7470 = vmatprep.mubr.bf16.mxu1 %v13388_v23  ;;  %v7752_v25 = vpop.permute.xlu1 %7751  ;;  %vm13641_vm5 = vmmov %vm13615_vm1 }
 0xf1b   :  { %v7750_v14 = vpop.permute.xlu0 %7749  ;;  %7772 = vst.msk [vmem:[#allocation2 + $0x90] sm:$0xff] %vm13628_vm12, %v7752_v25  ;;  %vm13642_vm12 = vmmov %vm13610_vm0 }
 0xf1c   :  { %7648 = vmatmul.mubr.bf16.gmra.mrb[164].mxu0 %v7506_v18  ;;  %7771 = vst.msk [vmem:[#allocation2 + $0x60] sm:$0xff] %vm13629_vm7, %v7750_v14  ;;  %v7307_v5 = vld [vmem:[#allocation2 + $0x150] sm:$0xff]  ;;  %vm13643_vm7 = vmmov %vm13610_vm0 }
 0xf1d   :  { %7930 = vmatpush1.bf16.msra.mxu0 %v12709_v62  ;;  %7657 = vmatprep.mubr.bf16.mxu0 %v13388_v23  ;;  %v7306_v49 = vld [vmem:[#allocation2 + $0x120] sm:$0xff]  ;;  %7812 = vst.msk [vmem:[#allocation2 + $0x90] sm:$0xff] %vm13615_vm1, %v7792_v20 }
 0xf1e   :  { %7931 = vmatprep.subr.bf16.mxu0 %v12713_v1  ;;  %9250 = vmatpush1.bf16.msra.mxu1 %v12732_v16  ;;  %7811 = vst.msk [vmem:[#allocation2 + $0x60] sm:$0xff] %vm13630_vm6, %v7790_v9  ;;  %v7311_v62 = vpack.c.bf16 %v7307_v5, %v7306_v49  ;;  %v7788_v52 = vpop.permute.xlu1 %7787  ;;  %vm13644_vm6 = vmmov %vm13615_vm1 }
 0xf1f   :  { %7487 = vst.msk [vmem:[#allocation2 + $0x120] sm:$0xff] %vm13631_vm4, %v12924_v21  ;;  %9243 = vmatprep.subr.bf16.mxu1 %v12742_v22  ;;  %v7786_v21 = vpop.permute.xlu0 %7785 }
 0xf20   :  { %7488 = vst.msk [vmem:[#allocation2 + $0x150] sm:$0xff] %vm13632_vm14, %v12921_v10  ;;  %v7501_v1 = vld [vmem:[#allocation2 + $0xc0] sm:$0xff]  ;;  %7471 = vmatmul.mubr.bf16.gmra.mrb[156].mxu1 %v7311_v62 }
 0xf21   :  { %v7502_v29 = vld [vmem:[#allocation2 + $0xf0] sm:$0xff]  ;;  %7932 = vmatpush1.bf16.msra.mxu0 %v12717_v61  ;;  %7495 = vst.msk [vmem:[#allocation2 + $0x120] sm:$0xff] %vm13633_vm10, %v13032_v43  ;;  %7967 = vmatprep.mubr.bf16.mxu1 %v13388_v23 }
 0xf22   :  { %7496 = vst.msk [vmem:[#allocation2 + $0x150] sm:$0xff] %vm13634_vm9, %v13030_v40  ;;  %v7507_v8 = vpack.c.bf16 %v7502_v29, %v7501_v1  ;;  %7933 = vmatprep.subr.bf16.mxu0 %v12726_v24  ;;  %9251 = vmatpush1.bf16.msra.mxu1 %v12740_v19  ;;  %v7756_v61 = vpop.permute.xlu1 %7755 }
 0xf23   :  { %9244 = vmatprep.subr.bf16.mxu1 %v13595_v28  ;;  %v7754_v10 = vpop.permute.xlu0 %7753  ;;  %7774 = vst.msk [vmem:[#allocation2 + $0xf0] sm:$0xff] %vm13635_vm13, %v7756_v61 }
 0xf24   :  { %7658 = vmatmul.mubr.bf16.gmra.mrb[168].mxu0 %v7507_v8  ;;  %7773 = vst.msk [vmem:[#allocation2 + $0xc0] sm:$0xff] %vm13636_vm3, %v7754_v10  ;;  %v7820_v40 = vld [vmem:[#allocation2 + $0x90] sm:$0xff] }
 0xf25   :  { %7934 = vmatpush1.bf16.msra.mxu0 %v12724_v44  ;;  %7667 = vmatprep.mubr.bf16.mxu0 %v13388_v23  ;;  %v7819_v24 = vld [vmem:[#allocation2 + $0x60] sm:$0xff]  ;;  %7814 = vst.msk [vmem:[#allocation2 + $0xf0] sm:$0xff] %vm13637_vm2, %v7796_v46 }
 0xf26   :  { %7935 = vmatprep.subr.bf16.mxu0 %v12734_v35  ;;  %9252 = vmatpush1.bf16.msra.mxu1 %v12759_v11  ;;  %7813 = vst.msk [vmem:[#allocation2 + $0xc0] sm:$0xff] %vm13638_vm15, %v7794_v0  ;;  %v7826_v44 = vpack.c.bf16 %v7820_v40, %v7819_v24  ;;  %v7748_v35 = vpop.permute.xlu1 %7747 }
 0xf27   :  { %v7746_v45 = vpop.permute.xlu0 %7745  ;;  %7770 = vst.msk [vmem:[#allocation2 + $0x30] sm:$0xff] %vm13639_vm11, %v7748_v35 }
 0xf28   :  { %v7503_v43 = vld [vmem:[#allocation2 + $0x120] sm:$0xff]  ;;  %7769 = vst.msk [vmem:[#allocation2] sm:$0xff] %vm13610_vm0, %v7746_v45 }
 0xf29   :  { %v7504_v34 = vld [vmem:[#allocation2 + $0x150] sm:$0xff]  ;;  %7936 = vmatpush1.bf16.msra.mxu0 %v12732_v16  ;;  %7968 = vmatmul.mubr.bf16.vlgmr.msra.gmra.mrb[160].mxu1 %v7826_v44  ;;  %7810 = vst.msk [vmem:[#allocation2 + $0x30] sm:$0xff] %vm13640_vm8, %v7788_v52 }
 0xf2a   :  { %v7508_v48 = vpack.c.bf16 %v7504_v34, %v7503_v43  ;;  %7937 = vmatprep.subr.bf16.mxu0 %v12742_v22  ;;  %7977 = vmatprep.mubr.bf16.mxu1 %v13388_v23  ;;  %7809 = vst.msk [vmem:[#allocation2] sm:$0xff] %vm13641_vm5, %v7786_v21  ;;  %v7760_v16 = vpop.permute.xlu1 %7759 }
 0xf2b   :  { %v7758_v22 = vpop.permute.xlu0 %7757  ;;  %7776 = vst.msk [vmem:[#allocation2 + $0x150] sm:$0xff] %vm13642_vm12, %v7760_v16 }
 0xf2c   :  { %7668 = vmatmul.mubr.bf16.gmra.mrb[172].mxu0 %v7508_v48  ;;  %7775 = vst.msk [vmem:[#allocation2 + $0x120] sm:$0xff] %vm13643_vm7, %v7758_v22  ;;  %v7822_v38 = vld [vmem:[#allocation2 + $0xf0] sm:$0xff] }
 0xf2d   :  { %7938 = vmatpush1.bf16.msra.mxu0 %v12740_v19  ;;  %7957 = vmatprep.mubr.bf16.mxu0 %v13388_v23  ;;  %v7821_v6 = vld [vmem:[#allocation2 + $0xc0] sm:$0xff] }
 0xf2e   :  { %7939 = vmatprep.subr.bf16.mxu0 %v13595_v28  ;;  %v7827_v55 = vpack.c.bf16 %v7822_v38, %v7821_v6  ;;  %v7800_v42 = vpop.permute.xlu1 %7799 }
 0xf2f   :  { %v7798_v50 = vpop.permute.xlu0 %7797  ;;  %7816 = vst.msk [vmem:[#allocation2 + $0x150] sm:$0xff] %vm13615_vm1, %v7800_v42 }
 0xf30   :  { %7815 = vst.msk [vmem:[#allocation2 + $0x120] sm:$0xff] %vm13644_vm6, %v7798_v50  ;;  %v7818_v28 = vld [vmem:[#allocation2 + $0x30] sm:$0xff] }
 0xf31   :  { %7940 = vmatpush1.bf16.msra.mxu0 %v12759_v11  ;;  %7978 = vmatmul.mubr.bf16.gmra.mrb[164].mxu1 %v7827_v55  ;;  %v7817_v19 = vld [vmem:[#allocation2] sm:$0xff] }
 0xf32   :  { %7987 = vmatprep.mubr.bf16.mxu1 %v13388_v23  ;;  %v7825_v4 = vpack.c.bf16 %v7818_v28, %v7817_v19 }
 0xf34   :  { %7958 = vmatmul.mubr.bf16.vlgmr.msra.gmra.mrb[176].mxu0 %v7825_v4 }
 0xf36   :  { %v7824_v47 = vld [vmem:[#allocation2 + $0x150] sm:$0xff] }
 0xf37   :  { %v7823_v7 = vld [vmem:[#allocation2 + $0x120] sm:$0xff] }
 0xf38   :  { %v7828_v2 = vpack.c.bf16 %v7824_v47, %v7823_v7 }
 0xf3a   :  { %7988 = vmatmul.mubr.bf16.gmra.mrb[168].mxu1 %v7828_v2 }
 0xf65   :  { %v7181_v11 = vpop.f32.mrb[144].mxu0 }
 0xf66   :  { %v8005_v27 = vadd.f32 %v13150_v32, %v7181_v11  ;;  %v7183_v63 = vpop.f32.mrb[145].mxu0 }
 0xf67   :  { %v8021_v15 = vadd.f32 %v13150_v32, %v7183_v63  ;;  %v7185_v26 = vpop.f32.mrb[146].mxu0 }
 0xf68   :  { %8013 = vst [vmem:[#allocation40] sm:$0xff] %v8005_v27  ;;  %v8006_v41 = vadd.f32 %v13150_v32, %v7185_v26  ;;  %v7187_v56 = vpop.f32.mrb[147].mxu0 }
 0xf69   :  { %8030 = vst [vmem:[#allocation40 + $0x40] sm:$0xff] %v8021_v15  ;;  %v8022_v23 = vadd.f32 %v13150_v32, %v7187_v56 }
 0xf6a   :  { %8014 = vst [vmem:[#allocation40 + $0x8] sm:$0xff] %v8006_v41 }
 0xf6b   :  { %8031 = vst [vmem:[#allocation40 + $0x48] sm:$0xff] %v8022_v23 }
 0xf6d   :  { %v7191_v53 = vpop.f32.mrb[148].mxu0 }
 0xf6e   :  { %v8007_v58 = vadd.f32 %v13150_v32, %v7191_v53  ;;  %v7193_v37 = vpop.f32.mrb[149].mxu0 }
 0xf6f   :  { %v8023_v3 = vadd.f32 %v13150_v32, %v7193_v37  ;;  %v7195_v57 = vpop.f32.mrb[150].mxu0 }
 0xf70   :  { %8015 = vst [vmem:[#allocation40 + $0x10] sm:$0xff] %v8007_v58  ;;  %v8008_v31 = vadd.f32 %v13150_v32, %v7195_v57  ;;  %v7197_v30 = vpop.f32.mrb[151].mxu0 }
 0xf71   :  { %8032 = vst [vmem:[#allocation40 + $0x50] sm:$0xff] %v8023_v3  ;;  %v8024_v36 = vadd.f32 %v13150_v32, %v7197_v30 }
 0xf72   :  { %8016 = vst [vmem:[#allocation40 + $0x18] sm:$0xff] %v8008_v31 }
 0xf73   :  { %8033 = vst [vmem:[#allocation40 + $0x58] sm:$0xff] %v8024_v36 }
 0xf75   :  { %v7201_v60 = vpop.f32.mrb[152].mxu0 }
 0xf76   :  { %v8009_v39 = vadd.f32 %v13150_v32, %v7201_v60  ;;  %v7203_v20 = vpop.f32.mrb[153].mxu0 }
 0xf77   :  { %v8025_v9 = vadd.f32 %v13150_v32, %v7203_v20  ;;  %v7205_v13 = vpop.f32.mrb[154].mxu0 }
 0xf78   :  { %8017 = vst [vmem:[#allocation40 + $0x20] sm:$0xff] %v8009_v39  ;;  %v8010_v12 = vadd.f32 %v13150_v32, %v7205_v13  ;;  %v7207_v33 = vpop.f32.mrb[155].mxu0 }
 0xf79   :  { %8034 = vst [vmem:[#allocation40 + $0x60] sm:$0xff] %v8025_v9  ;;  %v8026_v51 = vadd.f32 %v13150_v32, %v7207_v33 }
 0xf7a   :  { %8018 = vst [vmem:[#allocation40 + $0x28] sm:$0xff] %v8010_v12 }
 0xf7b   :  { %8035 = vst [vmem:[#allocation40 + $0x68] sm:$0xff] %v8026_v51 }
 0xf7d   :  { %v7211_v59 = vpop.f32.mrb[156].mxu0 }
 0xf7e   :  { %v8011_v17 = vadd.f32 %v13150_v32, %v7211_v59  ;;  %v7213_v54 = vpop.f32.mrb[157].mxu0 }
 0xf7f   :  { %v8027_v18 = vadd.f32 %v13150_v32, %v7213_v54  ;;  %v7215_v46 = vpop.f32.mrb[158].mxu0 }
 0xf80   :  { %8019 = vst [vmem:[#allocation40 + $0x30] sm:$0xff] %v8011_v17  ;;  %v8012_v0 = vadd.f32 %v13150_v32, %v7215_v46  ;;  %v7217_v25 = vpop.f32.mrb[159].mxu0 }
 0xf81   :  { %8036 = vst [vmem:[#allocation40 + $0x70] sm:$0xff] %v8027_v18  ;;  %v8028_v14 = vadd.f32 %v13150_v32, %v7217_v25 }
 0xf82   :  { %8020 = vst [vmem:[#allocation40 + $0x38] sm:$0xff] %v8012_v0 }
 0xf83   :  { %8037 = vst [vmem:[#allocation40 + $0x78] sm:$0xff] %v8028_v14 }
 0xfda   :  { %v7442_v49 = vpop.f32.mrb[144].mxu1 }
 0xfdb   :  { %v8038_v5 = vadd.f32 %v13150_v32, %v7442_v49  ;;  %v7444_v62 = vpop.f32.mrb[145].mxu1 }
 0xfdc   :  { %v8055_v1 = vadd.f32 %v13150_v32, %v7444_v62  ;;  %v7446_v29 = vpop.f32.mrb[146].mxu1 }
 0xfdd   :  { %8047 = vst [vmem:[#allocation40 + $0x80] sm:$0xff] %v8038_v5  ;;  %v8039_v8 = vadd.f32 %v13150_v32, %v7446_v29  ;;  %v7448_v52 = vpop.f32.mrb[147].mxu1 }
 0xfde   :  { %8064 = vst [vmem:[#allocation40 + $0xc0] sm:$0xff] %v8055_v1  ;;  %v8056_v21 = vadd.f32 %v13150_v32, %v7448_v52 }
 0xfdf   :  { %8048 = vst [vmem:[#allocation40 + $0x88] sm:$0xff] %v8039_v8 }
 0xfe0   :  { %8065 = vst [vmem:[#allocation40 + $0xc8] sm:$0xff] %v8056_v21 }
 0xfe2   :  { %v7452_v61 = vpop.f32.mrb[148].mxu1 }
 0xfe3   :  { %v8040_v10 = vadd.f32 %v13150_v32, %v7452_v61  ;;  %v7454_v24 = vpop.f32.mrb[149].mxu1 }
 0xfe4   :  { %v8057_v44 = vadd.f32 %v13150_v32, %v7454_v24  ;;  %v7456_v34 = vpop.f32.mrb[150].mxu1 }
 0xfe5   :  { %8049 = vst [vmem:[#allocation40 + $0x90] sm:$0xff] %v8040_v10  ;;  %v8041_v35 = vadd.f32 %v13150_v32, %v7456_v34  ;;  %v7458_v16 = vpop.f32.mrb[151].mxu1 }
 0xfe6   :  { %v7639_v40 = vpop.f32.mrb[160].mxu0  ;;  %8066 = vst [vmem:[#allocation40 + $0xd0] sm:$0xff] %v8057_v44  ;;  %v8058_v6 = vadd.f32 %v13150_v32, %v7458_v16 }
 0xfe7   :  { %v8072_v43 = vadd.f32 %v13150_v32, %v7639_v40  ;;  %v7641_v48 = vpop.f32.mrb[161].mxu0  ;;  %8050 = vst [vmem:[#allocation40 + $0x98] sm:$0xff] %v8041_v35 }
 0xfe8   :  { %v8089_v45 = vadd.f32 %v13150_v32, %v7641_v48  ;;  %v7643_v22 = vpop.f32.mrb[162].mxu0  ;;  %8067 = vst [vmem:[#allocation40 + $0xd8] sm:$0xff] %v8058_v6 }
 0xfe9   :  { %8081 = vst [vmem:[#allocation40 + $0x100] sm:$0xff] %v8072_v43  ;;  %v8073_v38 = vadd.f32 %v13150_v32, %v7643_v22  ;;  %v7645_v55 = vpop.f32.mrb[163].mxu0 }
 0xfea   :  { %8098 = vst [vmem:[#allocation40 + $0x140] sm:$0xff] %v8089_v45  ;;  %v8090_v42 = vadd.f32 %v13150_v32, %v7645_v55 }
 0xfeb   :  { %8082 = vst [vmem:[#allocation40 + $0x108] sm:$0xff] %v8073_v38  ;;  %v7462_v50 = vpop.f32.mrb[152].mxu1 }
 0xfec   :  { %8099 = vst [vmem:[#allocation40 + $0x148] sm:$0xff] %v8090_v42  ;;  %v8042_v19 = vadd.f32 %v13150_v32, %v7462_v50  ;;  %v7464_v28 = vpop.f32.mrb[153].mxu1 }
 0xfed   :  { %v8059_v7 = vadd.f32 %v13150_v32, %v7464_v28  ;;  %v7466_v2 = vpop.f32.mrb[154].mxu1 }
 0xfee   :  { %8051 = vst [vmem:[#allocation40 + $0xa0] sm:$0xff] %v8042_v19  ;;  %v8043_v27 = vadd.f32 %v13150_v32, %v7466_v2  ;;  %v7468_v15 = vpop.f32.mrb[155].mxu1 }
 0xfef   :  { %v7649_v4 = vpop.f32.mrb[164].mxu0  ;;  %8068 = vst [vmem:[#allocation40 + $0xe0] sm:$0xff] %v8059_v7  ;;  %v8060_v41 = vadd.f32 %v13150_v32, %v7468_v15 }
 0xff0   :  { %v8074_v47 = vadd.f32 %v13150_v32, %v7649_v4  ;;  %v7651_v11 = vpop.f32.mrb[165].mxu0  ;;  %8052 = vst [vmem:[#allocation40 + $0xa8] sm:$0xff] %v8043_v27 }
 0xff1   :  { %v8091_v63 = vadd.f32 %v13150_v32, %v7651_v11  ;;  %v7653_v26 = vpop.f32.mrb[166].mxu0  ;;  %8069 = vst [vmem:[#allocation40 + $0xe8] sm:$0xff] %v8060_v41 }
 0xff2   :  { %8083 = vst [vmem:[#allocation40 + $0x110] sm:$0xff] %v8074_v47  ;;  %v8075_v56 = vadd.f32 %v13150_v32, %v7653_v26  ;;  %v7655_v23 = vpop.f32.mrb[167].mxu0 }
 0xff3   :  { %8100 = vst [vmem:[#allocation40 + $0x150] sm:$0xff] %v8091_v63  ;;  %v8092_v53 = vadd.f32 %v13150_v32, %v7655_v23  ;;  %v7472_v58 = vpop.f32.mrb[156].mxu1 }
 0xff4   :  { %8084 = vst [vmem:[#allocation40 + $0x118] sm:$0xff] %v8075_v56  ;;  %v8044_v37 = vadd.f32 %v13150_v32, %v7472_v58  ;;  %v7474_v3 = vpop.f32.mrb[157].mxu1 }
 0xff5   :  { %8101 = vst [vmem:[#allocation40 + $0x158] sm:$0xff] %v8092_v53  ;;  %v8061_v31 = vadd.f32 %v13150_v32, %v7474_v3  ;;  %v7476_v36 = vpop.f32.mrb[158].mxu1 }
 0xff6   :  { %8053 = vst [vmem:[#allocation40 + $0xb0] sm:$0xff] %v8044_v37  ;;  %v8045_v39 = vadd.f32 %v13150_v32, %v7476_v36  ;;  %v7478_v9 = vpop.f32.mrb[159].mxu1 }
 0xff7   :  { %v7659_v57 = vpop.f32.mrb[168].mxu0  ;;  %8070 = vst [vmem:[#allocation40 + $0xf0] sm:$0xff] %v8061_v31  ;;  %v8062_v12 = vadd.f32 %v13150_v32, %v7478_v9 }
 0xff8   :  { %v8076_v30 = vadd.f32 %v13150_v32, %v7659_v57  ;;  %v7661_v60 = vpop.f32.mrb[169].mxu0  ;;  %8054 = vst [vmem:[#allocation40 + $0xb8] sm:$0xff] %v8045_v39 }
 0xff9   :  { %v8093_v20 = vadd.f32 %v13150_v32, %v7661_v60  ;;  %v7663_v13 = vpop.f32.mrb[170].mxu0  ;;  %8071 = vst [vmem:[#allocation40 + $0xf8] sm:$0xff] %v8062_v12 }
 0xffa   :  { %8085 = vst [vmem:[#allocation40 + $0x120] sm:$0xff] %v8076_v30  ;;  %v8077_v33 = vadd.f32 %v13150_v32, %v7663_v13  ;;  %v7665_v51 = vpop.f32.mrb[171].mxu0 }
 0xffb   :  { %8102 = vst [vmem:[#allocation40 + $0x160] sm:$0xff] %v8093_v20  ;;  %v8094_v59 = vadd.f32 %v13150_v32, %v7665_v51 }
 0xffc   :  { %8086 = vst [vmem:[#allocation40 + $0x128] sm:$0xff] %v8077_v33  ;;  %v7969_v17 = vpop.f32.mrb[160].mxu1 }
 0xffd   :  { %8103 = vst [vmem:[#allocation40 + $0x168] sm:$0xff] %v8094_v59  ;;  %v8108_v54 = vadd.f32 %v13150_v32, %v7969_v17  ;;  %v7971_v46 = vpop.f32.mrb[161].mxu1 }
 0xffe   :  { %v8125_v25 = vadd.f32 %v13150_v32, %v7971_v46  ;;  %v7973_v49 = vpop.f32.mrb[162].mxu1 }
 0xfff   :  { %v7669_v18 = vpop.f32.mrb[172].mxu0  ;;  %8117 = vst [vmem:[#allocation40 + $0x190] sm:$0xff] %v8108_v54  ;;  %v8109_v62 = vadd.f32 %v13150_v32, %v7973_v49  ;;  %v7975_v29 = vpop.f32.mrb[163].mxu1 }
0x1000   :  { %v8078_v0 = vadd.f32 %v13150_v32, %v7669_v18  ;;  %v7671_v14 = vpop.f32.mrb[173].mxu0  ;;  %8134 = vst [vmem:[#allocation40 + $0x1d0] sm:$0xff] %v8125_v25  ;;  %v8126_v52 = vadd.f32 %v13150_v32, %v7975_v29 }
0x1001   :  { %v8095_v5 = vadd.f32 %v13150_v32, %v7671_v14  ;;  %v7673_v1 = vpop.f32.mrb[174].mxu0  ;;  %8118 = vst [vmem:[#allocation40 + $0x198] sm:$0xff] %v8109_v62 }
0x1002   :  { %8087 = vst [vmem:[#allocation40 + $0x130] sm:$0xff] %v8078_v0  ;;  %v8079_v8 = vadd.f32 %v13150_v32, %v7673_v1  ;;  %v7675_v21 = vpop.f32.mrb[175].mxu0  ;;  %8135 = vst [vmem:[#allocation40 + $0x1d8] sm:$0xff] %v8126_v52 }
0x1003   :  { %8104 = vst [vmem:[#allocation40 + $0x170] sm:$0xff] %v8095_v5  ;;  %v8096_v61 = vadd.f32 %v13150_v32, %v7675_v21 }
0x1004   :  { %8088 = vst [vmem:[#allocation40 + $0x138] sm:$0xff] %v8079_v8  ;;  %v7979_v10 = vpop.f32.mrb[164].mxu1 }
0x1005   :  { %8105 = vst [vmem:[#allocation40 + $0x178] sm:$0xff] %v8096_v61  ;;  %v8110_v24 = vadd.f32 %v13150_v32, %v7979_v10  ;;  %v7981_v40 = vpop.f32.mrb[165].mxu1 }
0x1006   :  { %v8127_v44 = vadd.f32 %v13150_v32, %v7981_v40  ;;  %v7983_v43 = vpop.f32.mrb[166].mxu1 }
0x1007   :  { %8119 = vst [vmem:[#allocation40 + $0x1a0] sm:$0xff] %v8110_v24  ;;  %v8111_v34 = vadd.f32 %v13150_v32, %v7983_v43  ;;  %v7985_v48 = vpop.f32.mrb[167].mxu1  ;;  %v7959_v45 = vpop.f32.mrb[176].mxu0 }
0x1008   :  { %8136 = vst [vmem:[#allocation40 + $0x1e0] sm:$0xff] %v8127_v44  ;;  %v8128_v35 = vadd.f32 %v13150_v32, %v7985_v48  ;;  %v8106_v16 = vadd.f32 %v13150_v32, %v7959_v45  ;;  %v7961_v22 = vpop.f32.mrb[177].mxu0 }
0x1009   :  { %8120 = vst [vmem:[#allocation40 + $0x1a8] sm:$0xff] %v8111_v34  ;;  %v8123_v6 = vadd.f32 %v13150_v32, %v7961_v22  ;;  %v7963_v38 = vpop.f32.mrb[178].mxu0 }
0x100a   :  { %8137 = vst [vmem:[#allocation40 + $0x1e8] sm:$0xff] %v8128_v35  ;;  %8115 = vst [vmem:[#allocation40 + $0x180] sm:$0xff] %v8106_v16  ;;  %v8107_v55 = vadd.f32 %v13150_v32, %v7963_v38  ;;  %v7965_v42 = vpop.f32.mrb[179].mxu0 }
0x100b   :  { %8132 = vst [vmem:[#allocation40 + $0x1c0] sm:$0xff] %v8123_v6  ;;  %v8124_v50 = vadd.f32 %v13150_v32, %v7965_v42 }
0x100c   :  { %8116 = vst [vmem:[#allocation40 + $0x188] sm:$0xff] %v8107_v55 }
0x100d   :  { %8133 = vst [vmem:[#allocation40 + $0x1c8] sm:$0xff] %v8124_v50  ;;  %v7989_v19 = vpop.f32.mrb[168].mxu1 }
0x100e   :  { %v8112_v28 = vadd.f32 %v13150_v32, %v7989_v19  ;;  %v7991_v4 = vpop.f32.mrb[169].mxu1 }
0x100f   :  { %v8129_v7 = vadd.f32 %v13150_v32, %v7991_v4  ;;  %v7993_v47 = vpop.f32.mrb[170].mxu1 }
0x1010   :  { %8121 = vst [vmem:[#allocation40 + $0x1b0] sm:$0xff] %v8112_v28  ;;  %v8113_v2 = vadd.f32 %v13150_v32, %v7993_v47  ;;  %v7995_v11 = vpop.f32.mrb[171].mxu1 }
0x1011   :  { %8138 = vst [vmem:[#allocation40 + $0x1f0] sm:$0xff] %v8129_v7  ;;  %v8130_v27 = vadd.f32 %v13150_v32, %v7995_v11 }
0x1012   :  { %8122 = vst [vmem:[#allocation40 + $0x1b8] sm:$0xff] %v8113_v2 }
0x1013   :  { %8139 = vst [vmem:[#allocation40 + $0x1f8] sm:$0xff] %v8130_v27 }
0x1014   :  { %10159 = shalt.err (!%p10156_p6)
}
0x1015   :  { %s13645_s15 = sld [smem:[#allocation78_spill]] }
0x101b   :  { %s10160_s10 = scalar_lea.hbm %s13645_s15, 8192 }
0x101c   :  { %p10161_p7 = scmp.ne.s32.totalorder %s13645_s15, %s10160_s10  ;;  %p10164_p8 = scmp.lt.u32.totalorder %s10160_s10, %s13645_s15 }
0x101e   :  { %p10166_p9 = pnand %p10164_p8, %p10161_p7 }
0x1020   :  { %10169 = shalt.err (!%p10166_p9)
}
0x1021   :  { %8151 = dma.vmem_to_hbm [thread:$0]  %s8146_s11, 8192, %s13645_s15, [#allocation6], %s13335_s6, %s13335_s6, %s13334_s2  }
0x1022   :  { %10194 = dma.done.wait [#allocation6], 8192  }
0x1023   :  { %10195 = vsyncadd [#allocation6], 4294959104 }
0x1024   :  { %8155 = vsyncpa [#allocation5], 1 }
0x1025   :  { %8156 = vsyncpa [#allocation8], 1 }
0x1026   :  { %8157 = vsyncpa [#allocation11], 1 }
0x1027   :  { %8158 = vsyncpa [#allocation14], 1 }
0x1028   :  { %8159 = vsyncpa [#allocation17], 1 }
0x1029   :  { %8160 = vsyncpa [#allocation20], 1 }
0x102a   :  { %8161 = vsyncpa [#allocation23], 1 }
0x102b   :  { %8162 = vsyncpa [#allocation26], 1 }
0x102c   :  { %8163 = vsyncpa [#allocation29], 1 }
0x102d   :  { %8164 = vsyncpa [#allocation32], 1 }
0x102e   :  { %8165 = vsyncpa [#allocation35], 1 }
0x102f   :  { %8166 = vsyncpa [#allocation38], 1 }
0x1030   :  { %8167 = vsyncpa [#allocation6], 1 }

</bundles_post_ra>
